<compile_context>
chip_gen: v7x
topology: tpu7x:2x2x1
jax: 0.10.0
libtpu: 0.0.40
codegen_flags: <defaults>
</compile_context>

<pallas_src>
import functools
import math

import jax
import jax.numpy as jnp
from jax.experimental import pallas as pl
from jax.experimental.pallas import tpu as pltpu

F32 = jnp.float32
BF16 = jnp.bfloat16
_VMEM = pl.BlockSpec(memory_space=pltpu.MemorySpace.VMEM)

TEMPERATURE = 2.0
GUMBEL_EPS = 1e-6
BN_EPS = 1e-5


def _round_up(v, m):
    return -(-v // m) * m


# ------------------------------------------------------------------ fused, tiled GEMM
def _gemm_fused_kernel(*refs, relu, has_post, has_add, has_mul):
    x_ref, w_ref, s_ref, b_ref = refs[:4]
    idx = 4
    if has_post:
        ps_ref, pb_ref = refs[idx], refs[idx + 1]
        idx += 2
    if has_add:
        add_ref = refs[idx]
        idx += 1
    if has_mul:
        mul_ref = refs[idx]
        idx += 1
    o_ref, acc_ref = refs[-2], refs[-1]

    @pl.when(pl.program_id(2) == 0)
    def _():
        acc_ref[...] = jnp.zeros_like(acc_ref)

    acc_ref[...] += jnp.dot(x_ref[...], w_ref[...],
                            preferred_element_type=jnp.float32)

    @pl.when(pl.program_id(2) == pl.num_programs(2) - 1)
    def _():
        y = acc_ref[...] * s_ref[...] + b_ref[...]
        if has_add:
            y = y + add_ref[...]
        if relu:
            y = jnp.maximum(y, 0.0)
        if has_post:
            y = y * ps_ref[...] + pb_ref[...]
        if has_mul:
            y = y * mul_ref[...]
        o_ref[...] = y


def gemm_fused(x, w, scale, bias, *, relu=False,
               post_scale=None, post_bias=None, add=None, mul=None):
    """y = epilogue(x @ w), epilogue fused on the accumulator tile:
         y = acc*scale + bias ; [+ add] ; [relu] ; [* post_scale + post_bias] ; [* mul].
    bf16 MXU operands, f32 accumulation/epilogue; zero-padded to lane-dense tiles."""
    M, K = x.shape
    K2, N = w.shape
    assert K == K2
    tm = min(256, _round_up(M, 8))
    tn = min(256, _round_up(N, 128))
    tk = min(512, _round_up(K, 128))
    Mp, Np, Kp = _round_up(M, tm), _round_up(N, tn), _round_up(K, tk)

    xp = jnp.pad(x.astype(BF16), ((0, Mp - M), (0, Kp - K)))
    wp = jnp.pad(w.astype(BF16), ((0, Kp - K), (0, Np - N)))

    def vec(v):
        return jnp.pad(v.astype(F32).reshape(1, N), ((0, 0), (0, Np - N)))

    has_post = post_scale is not None
    has_add = add is not None
    has_mul = mul is not None

    inputs = [xp, wp, vec(scale), vec(bias)]
    in_specs = [
        pl.BlockSpec((tm, tk), lambda i, j, k: (i, k)),
        pl.BlockSpec((tk, tn), lambda i, j, k: (k, j)),
        pl.BlockSpec((1, tn), lambda i, j, k: (0, j)),
        pl.BlockSpec((1, tn), lambda i, j, k: (0, j)),
    ]
    if has_post:
        inputs += [vec(post_scale), vec(post_bias)]
        in_specs += [pl.BlockSpec((1, tn), lambda i, j, k: (0, j)),
                     pl.BlockSpec((1, tn), lambda i, j, k: (0, j))]
    if has_add:
        inputs.append(jnp.pad(add.astype(F32), ((0, Mp - M), (0, Np - N))))
        in_specs.append(pl.BlockSpec((tm, tn), lambda i, j, k: (i, j)))
    if has_mul:
        inputs.append(jnp.pad(mul.astype(F32), ((0, Mp - M), (0, Np - N))))
        in_specs.append(pl.BlockSpec((tm, tn), lambda i, j, k: (i, j)))

    grid = (Mp // tm, Np // tn, Kp // tk)
    epi_bytes = 4 * Mp * Np * (1 + int(has_add) + int(has_mul))
    cost = pl.CostEstimate(flops=2 * Mp * Np * Kp, transcendentals=0,
                           bytes_accessed=2 * Mp * Kp + 2 * Kp * Np + epi_bytes)

    out = pl.pallas_call(
        functools.partial(_gemm_fused_kernel, relu=relu, has_post=has_post,
                          has_add=has_add, has_mul=has_mul),
        out_shape=jax.ShapeDtypeStruct((Mp, Np), F32),
        grid_spec=pltpu.PrefetchScalarGridSpec(
            num_scalar_prefetch=0,
            grid=grid,
            in_specs=in_specs,
            out_specs=pl.BlockSpec((tm, tn), lambda i, j, k: (i, j)),
            scratch_shapes=[pltpu.VMEM((tm, tn), jnp.float32)]),
        compiler_params=pltpu.CompilerParams(
            dimension_semantics=("parallel", "parallel", "arbitrary"),
            vmem_limit_bytes=32 * 1024 * 1024),
        cost_estimate=cost,
    )(*inputs)
    return out[:M, :N]


# ----------------------------------------------------------------------- other kernels
def _max_windows_kernel(*refs):
    o_ref = refs[-1]
    m = refs[0][...]
    for r in refs[1:-1]:
        m = jnp.maximum(m, r[...])
    o_ref[...] = m


def _row_softmax_kernel(z_ref, o_ref, *, temp):
    z = z_ref[...] * (1.0 / temp)
    z = z - jnp.max(z, axis=-1, keepdims=True)
    e = jnp.exp(z)
    o_ref[...] = e / jnp.sum(e, axis=-1, keepdims=True)


def _gumbel_softmax_kernel(z_ref, u_ref, o_ref, *, temp):
    # z_ref: (HW, 1) logits for one (n, t); u_ref: (HW, C) uniform(0,1) noise.
    noise = jnp.log(-jnp.log(u_ref[...] + GUMBEL_EPS) + GUMBEL_EPS)
    z = (z_ref[...] - noise) * (1.0 / temp)          # broadcast over the lane (C) axis
    z = z - jnp.max(z, axis=0, keepdims=True)        # softmax over H*W (sublane axis)
    e = jnp.exp(z)
    o_ref[...] = e / jnp.sum(e, axis=0, keepdims=True)


def _rowmean_kernel(x_ref, o_ref, *, inv_n):
    o_ref[...] = jnp.sum(x_ref[...], axis=0, keepdims=True) * inv_n


# ------------------------------------------------------------------------- conv / pool
def conv3d(x, w, scale, bias, stride, padding, relu,
           post_scale=None, post_bias=None, add=None, mul=None):
    """x: (N,T,H,W,Cin) channels-last; w: (kT,kH,kW,Cin,Cout); padding per-dim pairs."""
    N_, T, H, W, Cin = x.shape
    kT, kH, kW, _, Cout = w.shape
    st, sh, sw = stride
    xh = x.astype(BF16)
    if (kT, kH, kW) == (1, 1, 1) and all(p == (0, 0) for p in padding):
        xs = xh[:, ::st, ::sh, ::sw, :]               # no im2col for 1x1x1 convs
        To, Ho, Wo = xs.shape[1:4]
        patches = xs.reshape(N_ * To * Ho * Wo, Cin)
    else:
        # TODO(synk): a direct tap-accumulating conv kernel would avoid materializing the
        #             im2col patch matrix for k>1 convs; acceptable at these sizes (bf16).
        (pt0, pt1), (ph0, ph1), (pw0, pw1) = padding
        xp = jnp.pad(xh, ((0, 0), (pt0, pt1), (ph0, ph1), (pw0, pw1), (0, 0)))
        Tp, Hp, Wp = xp.shape[1:4]
        To = (Tp - kT) // st + 1
        Ho = (Hp - kH) // sh + 1
        Wo = (Wp - kW) // sw + 1
        cols = []
        for it in range(kT):
            for ih in range(kH):
                for iw in range(kW):
                    cols.append(xp[:, it:it + (To - 1) * st + 1:st,
                                   ih:ih + (Ho - 1) * sh + 1:sh,
                                   iw:iw + (Wo - 1) * sw + 1:sw, :])
        patches = jnp.concatenate(cols, axis=-1).reshape(
            N_ * To * Ho * Wo, kT * kH * kW * Cin)
    w2 = w.reshape(kT * kH * kW * Cin, Cout).astype(BF16)
    add2 = None if add is None else add.reshape(-1, Cout)
    mul2 = None if mul is None else mul.reshape(-1, Cout)
    y = gemm_fused(patches, w2, scale, bias, relu=relu,
                   post_scale=post_scale, post_bias=post_bias, add=add2, mul=mul2)
    return y.reshape(N_, To, Ho, Wo, Cout)


def _lane_dense(a2):
    """Reshape a contiguous 2-D slab to 128-lane-dense rows when possible."""
    size = a2.shape[0] * a2.shape[1]
    if size % 128 == 0:
        return a2.reshape(size // 128, 128)
    return a2


def maxpool3d(x, kernel, stride, padding):
    # TODO(synk): at real scale this should be gridded with the window max computed from
    #             the padded input inside the kernel; window slices are fine at toy size.
    N_, T, H, W, C = x.shape
    kT, kH, kW = kernel
    st, sh, sw = stride
    pt, ph, pw = padding
    xp = jnp.pad(x, ((0, 0), (pt, pt), (ph, ph), (pw, pw), (0, 0)),
                 constant_values=-jnp.inf)
    Tp, Hp, Wp = xp.shape[1:4]
    To = (Tp - kT) // st + 1
    Ho = (Hp - kH) // sh + 1
    Wo = (Wp - kW) // sw + 1
    wins = []
    for it in range(kT):
        for ih in range(kH):
            for iw in range(kW):
                wins.append(_lane_dense(
                    xp[:, it:it + (To - 1) * st + 1:st,
                       ih:ih + (Ho - 1) * sh + 1:sh,
                       iw:iw + (Wo - 1) * sw + 1:sw, :].reshape(-1, C)))
    out = pl.pallas_call(
        _max_windows_kernel,
        out_shape=jax.ShapeDtypeStruct(wins[0].shape, F32),
        in_specs=[_VMEM] * len(wins), out_specs=_VMEM,
    )(*wins)
    return out.reshape(N_, To, Ho, Wo, C)


# --------------------------------------------------------------------- softmax / gumbel
def atten_softmax(logits_cl, temperature):
    # softmax over H*W per (n, c=1, t); pure reshape, no relayout.
    N_, T, H, W, _ = logits_cl.shape
    rows = logits_cl.reshape(N_ * T, H * W)
    out = pl.pallas_call(
        functools.partial(_row_softmax_kernel, temp=temperature),
        out_shape=jax.ShapeDtypeStruct(rows.shape, F32),
        in_specs=[_VMEM], out_specs=_VMEM,
    )(rows)
    return out.reshape(N_, T, H, W, 1)


def gumbel_amap(logits_cl, C, key, temperature):
    # training-mode gumbel softmax over H*W per (n, c, t), in the native C-last layout.
    N_, T, H, W, _ = logits_cl.shape
    R, HW = N_ * T, H * W
    z3 = logits_cl.reshape(R, HW, 1)
    U = jax.random.uniform(key, (R, HW, C), F32)      # tiny; logits broadcast in-kernel
    out = pl.pallas_call(
        functools.partial(_gumbel_softmax_kernel, temp=temperature),
        out_shape=jax.ShapeDtypeStruct((R, HW, C), F32),
        grid=(R,),
        in_specs=[pl.BlockSpec((None, HW, 1), lambda r: (r, 0, 0)),
                  pl.BlockSpec((None, HW, C), lambda r: (r, 0, 0))],
        out_specs=pl.BlockSpec((None, HW, C), lambda r: (r, 0, 0)),
    )(z3, U)
    return out.reshape(N_, T, H, W, C)


# ---------------------------------------------------------------------------- params
class ParamGen:
    def __init__(self, seed=0):
        self._key = jax.random.PRNGKey(seed)

    def _next(self):
        self._key, sub = jax.random.split(self._key)
        return sub

    def conv(self, cin, cout, kt, kh, kw):
        fan_in = cin * kt * kh * kw
        return jax.random.normal(self._next(), (kt, kh, kw, cin, cout), F32) / math.sqrt(fan_in)

    def bn(self, c):
        return dict(
            gamma=1.0 + 0.1 * jax.random.normal(self._next(), (c,), F32),
            beta=0.1 * jax.random.normal(self._next(), (c,), F32),
            mean=0.05 * jax.random.normal(self._next(), (c,), F32),
            var=1.0 + 0.1 * jnp.abs(jax.random.normal(self._next(), (c,), F32)),
        )

    def linear(self, cin, cout):
        return dict(
            w=jax.random.normal(self._next(), (cin, cout), F32) / math.sqrt(cin),
            b=0.01 * jax.random.normal(self._next(), (cout,), F32),
        )


def bn_fold(bn):
    scale = bn['gamma'] / jnp.sqrt(bn['var'] + BN_EPS)
    bias = bn['beta'] - bn['mean'] * scale
    return scale, bias


# ------------------------------------------------------------------- module components
def same_pad(k, s):
    # conv_helper.Unit3Dpy 'SAME' convention: pad = max(k - s, 0), split (p//2, p-p//2)
    p = max(k - s, 0)
    return (p // 2, p - p // 2)


def make_unit3d(pg, cin, cout, k):
    return dict(w=pg.conv(cin, cout, *k), bn=pg.bn(cout), k=k)


def unit3d(p, x, stride, post_bn=None, mul=None):
    # Unit3Dpy = Conv3d(bias=False) + BN + ReLU; optional following BatchNorm3d and
    # attention multiply are fused into the same GEMM epilogue.
    k = p['k']
    scale, bias = bn_fold(p['bn'])
    pads = tuple(same_pad(ki, si) for ki, si in zip(k, stride))
    ps = pb = None
    if post_bn is not None:
        ps, pb = bn_fold(post_bn)
    return conv3d(x, p['w'], scale, bias, stride, pads, relu=True,
                  post_scale=ps, post_bias=pb, mul=mul)


def make_block(pg, dim_in, dim_out, dim_inner, temp_k, stride):
    p = dict(
        temp_k=temp_k, stride=stride,
        a_w=pg.conv(dim_in, dim_inner, temp_k, 1, 1), a_bn=pg.bn(dim_inner),
        b_w=pg.conv(dim_inner, dim_inner, 1, 3, 3), b_bn=pg.bn(dim_inner),
        c_w=pg.conv(dim_inner, dim_out, 1, 1, 1), c_bn=pg.bn(dim_out),
    )
    if dim_in != dim_out or stride != 1:
        p['ds_w'] = pg.conv(dim_in, dim_out, 1, 1, 1)
        p['ds_bn'] = pg.bn(dim_out)
    return p


def block_forward(p, x):
    tk, s = p['temp_k'], p['stride']
    sa, ba = bn_fold(p['a_bn'])
    h = conv3d(x, p['a_w'], sa, ba, (1, 1, 1),
               ((tk // 2, tk // 2), (0, 0), (0, 0)), relu=True)
    sb, bb = bn_fold(p['b_bn'])
    h = conv3d(h, p['b_w'], sb, bb, (1, s, s), ((0, 0), (1, 1), (1, 1)), relu=True)
    if 'ds_w' in p:
        sd, bd = bn_fold(p['ds_bn'])
        res = conv3d(x, p['ds_w'], sd, bd, (1, s, s),
                     ((0, 0), (0, 0), (0, 0)), relu=False)
    else:
        res = x
    sc, bc = bn_fold(p['c_bn'])
    # c-conv with BN, the residual add and the final ReLU fused into one GEMM epilogue.
    return conv3d(h, p['c_w'], sc, bc, (1, 1, 1), ((0, 0), (0, 0), (0, 0)),
                  relu=True, add=res)


def make_stage(pg, dim_in, dim_out, dim_inner, temp_k, stride, num_blocks):
    return [make_block(pg, dim_in if i == 0 else dim_out, dim_out, dim_inner,
                       temp_k, stride if i == 0 else 1) for i in range(num_blocks)]


def stage_forward(blocks, x):
    for p in blocks:
        x = block_forward(p, x)
    return x


def head_forward(p, x_cl):
    # ResNetBasicHead (training path): AvgPool3d -> Linear -> view(N, -1).
    # NOTE: pool_size is (T, CROP//32, CROP//32) = (T, 1, 1) here, so pooling the whole
    # (T, H, W) map is equivalent in this config (H = W = 1 at this stage).
    N_, T, H, W, C = x_cl.shape
    thw = T * H * W
    pooled = pl.pallas_call(
        functools.partial(_rowmean_kernel, inv_n=1.0 / thw),
        out_shape=jax.ShapeDtypeStruct((N_, 1, C), F32),
        grid=(N_,),
        in_specs=[pl.BlockSpec((None, thw, C), lambda n: (n, 0, 0))],
        out_specs=pl.BlockSpec((None, 1, C), lambda n: (n, 0, 0)),
    )(x_cl.reshape(N_, thw, C)).reshape(N_, C)
    nc = p['w'].shape[1]
    logits = gemm_fused(pooled, p['w'], jnp.ones((nc,), F32), p['b'], relu=False)
    return logits.reshape(N_, -1)


# ----------------------------------------------------------------------------- model
# cfg (scaled): ARCH='slow', DEPTH=50 -> (3,4,6,3), NUM_GROUPS=1, WIDTH_PER_GROUP=4,
# SPATIAL_STRIDES=[1,2,2,2], NUM_CLASSES=8, DATA.Resolution=2, NUM_FRAMES=4, CROP_SIZE=32,
# DROPOUT_RATE=0.0, DETECTION.ENABLE=False.
WPG = 4                      # width_per_group (64 in the original; all ratios preserved)
NUM_GROUPS = 1
DIM_INNER = NUM_GROUPS * WPG
NUM_CLASSES = 8              # affordance_channels
RESOLUTION = 2               # semantic_channels = Resolution^3
AFF_MID = WPG * 8            # == 512 when WPG = 64
AFF_OUT = WPG * 16           # == 1024 when WPG = 64
DEPTHS = (3, 4, 6, 3)        # ResNet-50
STEM_TEMP_K = 1              # _TEMPORAL_KERNEL_BASIS['slow'][0][0][0]
STAGE_TEMP_K = (1, 1, 3, 3)  # 'slow' stages s2..s5
STAGE_STRIDE = (1, 2, 2, 2)


def build_params(seed=0):
    pg = ParamGen(seed)
    params = {}
    params['s1'] = dict(w=pg.conv(3, WPG, STEM_TEMP_K, 7, 7), bn=pg.bn(WPG))
    params['s2'] = make_stage(pg, WPG, WPG * 4, DIM_INNER, STAGE_TEMP_K[0], STAGE_STRIDE[0], DEPTHS[0])
    params['s3'] = make_stage(pg, WPG * 4, WPG * 8, DIM_INNER * 2, STAGE_TEMP_K[1], STAGE_STRIDE[1], DEPTHS[1])
    params['s4'] = make_stage(pg, WPG * 8, WPG * 16, DIM_INNER * 4, STAGE_TEMP_K[2], STAGE_STRIDE[2], DEPTHS[2])
    params['s5'] = make_stage(pg, WPG * 16, WPG * 32, DIM_INNER * 8, STAGE_TEMP_K[3], STAGE_STRIDE[3], DEPTHS[3])

    params['aff_c1'] = make_unit3d(pg, NUM_CLASSES, AFF_MID, (3, 3, 3))
    params['aff_bn1'] = pg.bn(AFF_MID)
    params['aff_c2'] = make_unit3d(pg, AFF_MID, AFF_OUT, (1, 3, 3))
    params['aff_bn2'] = pg.bn(AFF_OUT)
    params['aff_c3'] = make_unit3d(pg, AFF_OUT, AFF_OUT, (1, 3, 3))
    params['aff_bn3'] = pg.bn(AFF_OUT)

    sem_ch = RESOLUTION ** 3
    params['sem_c1'] = make_unit3d(pg, sem_ch, AFF_MID, (3, 3, 3))
    params['sem_bn1'] = pg.bn(AFF_MID)
    params['sem_c2'] = make_unit3d(pg, AFF_MID, AFF_OUT, (1, 3, 3))
    params['sem_bn2'] = pg.bn(AFF_OUT)
    params['sem_c3'] = make_unit3d(pg, AFF_OUT, AFF_OUT, (1, 3, 3))
    params['sem_bn3'] = pg.bn(AFF_OUT)

    params['at_c1'] = make_unit3d(pg, 3 * AFF_MID, AFF_MID, (1, 3, 3))
    params['at_c2'] = make_unit3d(pg, AFF_MID, 1, (1, 3, 3))

    params['head'] = pg.linear(WPG * 32 + WPG * 32, NUM_CLASSES)
    return params


def model_forward(params, video, affordance_prior, semantic_prior, training, noise_key):
    # inputs are PyTorch layout (N, C, T, H, W); convert to channels-last.
    x = jnp.transpose(video, (0, 2, 3, 4, 1))

    # ---- s1 stem: Conv(1,7,7)/s(1,2,2) + BN + ReLU + MaxPool(1,3,3)/s(1,2,2)/p(0,1,1)
    s1 = params['s1']
    sc, bi = bn_fold(s1['bn'])
    x = conv3d(x, s1['w'], sc, bi, (1, 2, 2),
               ((STEM_TEMP_K // 2, STEM_TEMP_K // 2), (3, 3), (3, 3)), relu=True)
    x = maxpool3d(x, (1, 3, 3), (1, 2, 2), (0, 1, 1))

    x = stage_forward(params['s2'], x)
    # pathway0_pool for ARCH='slow': MaxPool3d(kernel=1, stride=1) == identity
    x = stage_forward(params['s3'], x)
    atten_feat = x
    x = stage_forward(params['s4'], x)
    x = stage_forward(params['s5'], x)

    # ---- prior branches: Unit3Dpy(conv+bn+relu) with the following BatchNorm3d fused
    # into the same GEMM epilogue (post affine).
    aff = jnp.transpose(affordance_prior, (0, 2, 3, 4, 1))
    sem = jnp.transpose(semantic_prior, (0, 2, 3, 4, 1))
    aff = unit3d(params['aff_c1'], aff, (2, 1, 1), post_bn=params['aff_bn1'])
    sem = unit3d(params['sem_c1'], sem, (2, 1, 1), post_bn=params['sem_bn1'])

    atten_in = jnp.concatenate([atten_feat, aff, sem], axis=-1)
    atten_in = unit3d(params['at_c1'], atten_in, (1, 2, 2))
    atten_logits = unit3d(params['at_c2'], atten_in, (1, 1, 1))

    atten_map = atten_softmax(atten_logits, TEMPERATURE)          # (N,T,H,W,1)

    k1, k2 = jax.random.split(noise_key)
    c_prior = params['aff_c2']['w'].shape[-1]                     # AFF_OUT
    if training:
        amap_aff = gumbel_amap(atten_logits, c_prior, k1, TEMPERATURE)
        amap_sem = gumbel_amap(atten_logits, c_prior, k2, TEMPERATURE)
    else:
        amap_aff = jnp.broadcast_to(atten_map, atten_map.shape[:-1] + (c_prior,))
        amap_sem = amap_aff

    aff = maxpool3d(aff, (1, 3, 3), (1, 2, 2), (0, 1, 1))
    sem = maxpool3d(sem, (1, 3, 3), (1, 2, 2), (0, 1, 1))
    # conv2 + BN(unit) + ReLU + BatchNorm3d(post) + attention multiply: one fused GEMM.
    aff = unit3d(params['aff_c2'], aff, (1, 1, 1), post_bn=params['aff_bn2'], mul=amap_aff)
    sem = unit3d(params['sem_c2'], sem, (1, 1, 1), post_bn=params['sem_bn2'], mul=amap_sem)
    aff = unit3d(params['aff_c3'], aff, (1, 2, 2), post_bn=params['aff_bn3'])
    sem = unit3d(params['sem_c3'], sem, (1, 2, 2), post_bn=params['sem_bn3'])

    x = jnp.concatenate([x, aff, sem], axis=-1)
    out = head_forward(params['head'], x)
    atten_map_out = jnp.transpose(atten_map, (0, 4, 1, 2, 3))     # back to (N, 1, T, H, W)
    return out, atten_map_out


# ------------------------------------------------------------------------------ main
if __name__ == "__main__":
    N, T, CROP = 2, 4, 32
    params = build_params(seed=0)

    key = jax.random.PRNGKey(0)
    kv, ka, ks, kn = jax.random.split(key, 4)
    # inputs_list[0]: video clip, NCTHW
    video = jax.random.normal(kv, (N, 3, T, CROP, CROP), F32)
    # inputs_list[1]/[2]: priors.  Their shapes must align (after the first stride-(2,1,1)
    # prior conv) with the s3 feature map: T_prior = 2*T, spatial = CROP // 8.
    aff_prior = jax.random.normal(ka, (N, NUM_CLASSES, 2 * T, CROP // 8, CROP // 8), F32)
    sem_prior = jax.random.normal(ks, (N, RESOLUTION ** 3, 2 * T, CROP // 8, CROP // 8), F32)

    fwd = jax.jit(lambda v, a, s, k: model_forward(params, v, a, s, True, k))
    out, atten_map = fwd(video, aff_prior, sem_prior, kn)
    (out, atten_map) = jax.block_until_ready((out, atten_map))

    assert out.shape == (N, NUM_CLASSES), out.shape
    assert atten_map.shape == (N, 1, T, CROP // 16, CROP // 16), atten_map.shape
    assert bool(jnp.all(jnp.isfinite(out))) and bool(jnp.all(jnp.isfinite(atten_map)))
    print("KERNEL_OK")
</pallas_src>

<mosaic_0001>
module attributes {stable_mosaic.version = 11 : i64} {
  func.func @_gemm_fused_kernel(%arg0: i32, %arg1: i32, %arg2: i32, %arg3: memref<256x256xbf16, #tpu.memory_space<vmem>>, %arg4: memref<256x128xbf16, #tpu.memory_space<vmem>>, %arg5: memref<1x128xf32, #tpu.memory_space<vmem>>, %arg6: memref<1x128xf32, #tpu.memory_space<vmem>>, %arg7: memref<256x128xf32, #tpu.memory_space<vmem>>, %arg8: memref<256x128xf32, #tpu.memory_space<vmem>>) attributes {dimension_semantics = [#tpu.dimension_semantics<parallel>, #tpu.dimension_semantics<parallel>, #tpu.dimension_semantics<arbitrary>], iteration_bounds = array<i64: 8, 1, 1>, scalar_prefetch = 0 : i64, scratch_operands = 1 : i64, tpu.core_type = #tpu.core_type<tc>, window_params = [{transform_indices = @transform_0, window_bounds = array<i64: 256, 256>}, {transform_indices = @transform_1, window_bounds = array<i64: 256, 128>}, {transform_indices = @transform_2, window_bounds = array<i64: 1, 128>}, {transform_indices = @transform_3, window_bounds = array<i64: 1, 128>}, {transform_indices = @transform_4, window_bounds = array<i64: 256, 128>}]} {
    %c0_i32 = arith.constant 0 : i32
    %0 = arith.cmpi eq, %arg2, %c0_i32 : i32
    %1 = arith.extui %0 : i1 to i32
    %c0_i32_0 = arith.constant 0 : i32
    %2 = arith.cmpi ne, %1, %c0_i32_0 : i32
    scf.if %2 {
      %cst_10 = arith.constant 0.000000e+00 : f32
      %12 = vector.broadcast %cst_10 : f32 to vector<256x128xf32>
      %c0_11 = arith.constant 0 : index
      %c0_12 = arith.constant 0 : index
      %13 = vector.load %arg8[%c0_11, %c0_12] : memref<256x128xf32, #tpu.memory_space<vmem>>, vector<256x128xf32>
      tpu.vector_store %arg8[%c0_11, %c0_12], %12 {strides = array<i32>} : memref<256x128xf32, #tpu.memory_space<vmem>>, vector<256x128xf32>,
    } else {
    }
    %c0 = arith.constant 0 : index
    %c0_1 = arith.constant 0 : index
    %3 = vector.load %arg8[%c0, %c0_1] : memref<256x128xf32, #tpu.memory_space<vmem>>, vector<256x128xf32>
    %c0_2 = arith.constant 0 : index
    %c0_3 = arith.constant 0 : index
    %4 = vector.load %arg3[%c0_2, %c0_3] : memref<256x256xbf16, #tpu.memory_space<vmem>>, vector<256x256xbf16>
    %c0_4 = arith.constant 0 : index
    %c0_5 = arith.constant 0 : index
    %5 = vector.load %arg4[%c0_4, %c0_5] : memref<256x128xbf16, #tpu.memory_space<vmem>>, vector<256x128xbf16>
    %cst = arith.constant dense<0.000000e+00> : vector<256x128xf32>
    %6 = tpu.matmul %4, %5, %cst {dimension_numbers = #tpu.dot_dimension_numbers<[1], [0], [0], [1], [0, 0, 1, 1], [], []>} : vector<256x256xbf16>, vector<256x128xbf16>, vector<256x128xf32> -> vector<256x128xf32>
    %7 = arith.addf %3, %6 : vector<256x128xf32>
    %c0_6 = arith.constant 0 : index
    %c0_7 = arith.constant 0 : index
    %8 = vector.load %arg8[%c0_6, %c0_7] : memref<256x128xf32, #tpu.memory_space<vmem>>, vector<256x128xf32>
    tpu.vector_store %arg8[%c0_6, %c0_7], %7 {strides = array<i32>} : memref<256x128xf32, #tpu.memory_space<vmem>>, vector<256x128xf32>,
    %c0_i32_8 = arith.constant 0 : i32
    %9 = arith.cmpi eq, %arg2, %c0_i32_8 : i32
    %10 = arith.extui %9 : i1 to i32
    %c0_i32_9 = arith.constant 0 : i32
    %11 = arith.cmpi ne, %10, %c0_i32_9 : i32
    scf.if %11 {
      %c0_10 = arith.constant 0 : index
      %c0_11 = arith.constant 0 : index
      %12 = vector.load %arg8[%c0_10, %c0_11] : memref<256x128xf32, #tpu.memory_space<vmem>>, vector<256x128xf32>
      %c0_12 = arith.constant 0 : index
      %c0_13 = arith.constant 0 : index
      %13 = vector.load %arg5[%c0_12, %c0_13] : memref<1x128xf32, #tpu.memory_space<vmem>>, vector<1x128xf32>
      %14 = vector.broadcast %13 : vector<1x128xf32> to vector<256x128xf32>
      %15 = arith.mulf %12, %14 : vector<256x128xf32>
      %c0_14 = arith.constant 0 : index
      %c0_15 = arith.constant 0 : index
      %16 = vector.load %arg6[%c0_14, %c0_15] : memref<1x128xf32, #tpu.memory_space<vmem>>, vector<1x128xf32>
      %17 = vector.broadcast %16 : vector<1x128xf32> to vector<256x128xf32>
      %18 = arith.addf %15, %17 : vector<256x128xf32>
      %cst_16 = arith.constant 0.000000e+00 : f32
      %19 = vector.broadcast %cst_16 : f32 to vector<256x128xf32>
      %20 = arith.maximumf %18, %19 : vector<256x128xf32>
      %c0_17 = arith.constant 0 : index
      %c0_18 = arith.constant 0 : index
      %21 = vector.load %arg7[%c0_17, %c0_18] : memref<256x128xf32, #tpu.memory_space<vmem>>, vector<256x128xf32>
      tpu.vector_store %arg7[%c0_17, %c0_18], %20 {strides = array<i32>} : memref<256x128xf32, #tpu.memory_space<vmem>>, vector<256x128xf32>,
    } else {
    }
    return
  }
  func.func @transform_0(%arg0: i32, %arg1: i32, %arg2: i32) -> (i32, i32) {
    %c0_i32 = arith.constant 0 : i32
    return %arg0, %arg2 : i32, i32
  }
  func.func @transform_1(%arg0: i32, %arg1: i32, %arg2: i32) -> (i32, i32) {
    %c0_i32 = arith.constant 0 : i32
    return %arg2, %arg1 : i32, i32
  }
  func.func @transform_2(%arg0: i32, %arg1: i32, %arg2: i32) -> (i32, i32) {
    %c0_i32 = arith.constant 0 : i32
    %c0_i32_0 = arith.constant 0 : i32
    return %c0_i32, %arg1 : i32, i32
  }
  func.func @transform_3(%arg0: i32, %arg1: i32, %arg2: i32) -> (i32, i32) {
    %c0_i32 = arith.constant 0 : i32
    %c0_i32_0 = arith.constant 0 : i32
    return %c0_i32, %arg1 : i32, i32
  }
  func.func @transform_4(%arg0: i32, %arg1: i32, %arg2: i32) -> (i32, i32) {
    %c0_i32 = arith.constant 0 : i32
    return %arg0, %arg1 : i32, i32
  }
}

module attributes {stable_mosaic.version = 11 : i64} {
  func.func @_max_windows_kernel(%arg0: memref<16x128xf32, #tpu.memory_space<vmem>>, %arg1: memref<16x128xf32, #tpu.memory_space<vmem>>, %arg2: memref<16x128xf32, #tpu.memory_space<vmem>>, %arg3: memref<16x128xf32, #tpu.memory_space<vmem>>, %arg4: memref<16x128xf32, #tpu.memory_space<vmem>>, %arg5: memref<16x128xf32, #tpu.memory_space<vmem>>, %arg6: memref<16x128xf32, #tpu.memory_space<vmem>>, %arg7: memref<16x128xf32, #tpu.memory_space<vmem>>, %arg8: memref<16x128xf32, #tpu.memory_space<vmem>>, %arg9: memref<16x128xf32, #tpu.memory_space<vmem>>) attributes {dimension_semantics = [], scalar_prefetch = 0 : i64, scratch_operands = 0 : i64, tpu.core_type = #tpu.core_type<tc>} {
    %c0 = arith.constant 0 : index
    %c0_0 = arith.constant 0 : index
    %0 = vector.load %arg0[%c0, %c0_0] : memref<16x128xf32, #tpu.memory_space<vmem>>, vector<16x128xf32>
    %c0_1 = arith.constant 0 : index
    %c0_2 = arith.constant 0 : index
    %1 = vector.load %arg1[%c0_1, %c0_2] : memref<16x128xf32, #tpu.memory_space<vmem>>, vector<16x128xf32>
    %2 = arith.maximumf %0, %1 : vector<16x128xf32>
    %c0_3 = arith.constant 0 : index
    %c0_4 = arith.constant 0 : index
    %3 = vector.load %arg2[%c0_3, %c0_4] : memref<16x128xf32, #tpu.memory_space<vmem>>, vector<16x128xf32>
    %4 = arith.maximumf %2, %3 : vector<16x128xf32>
    %c0_5 = arith.constant 0 : index
    %c0_6 = arith.constant 0 : index
    %5 = vector.load %arg3[%c0_5, %c0_6] : memref<16x128xf32, #tpu.memory_space<vmem>>, vector<16x128xf32>
    %6 = arith.maximumf %4, %5 : vector<16x128xf32>
    %c0_7 = arith.constant 0 : index
    %c0_8 = arith.constant 0 : index
    %7 = vector.load %arg4[%c0_7, %c0_8] : memref<16x128xf32, #tpu.memory_space<vmem>>, vector<16x128xf32>
    %8 = arith.maximumf %6, %7 : vector<16x128xf32>
    %c0_9 = arith.constant 0 : index
    %c0_10 = arith.constant 0 : index
    %9 = vector.load %arg5[%c0_9, %c0_10] : memref<16x128xf32, #tpu.memory_space<vmem>>, vector<16x128xf32>
    %10 = arith.maximumf %8, %9 : vector<16x128xf32>
    %c0_11 = arith.constant 0 : index
    %c0_12 = arith.constant 0 : index
    %11 = vector.load %arg6[%c0_11, %c0_12] : memref<16x128xf32, #tpu.memory_space<vmem>>, vector<16x128xf32>
    %12 = arith.maximumf %10, %11 : vector<16x128xf32>
    %c0_13 = arith.constant 0 : index
    %c0_14 = arith.constant 0 : index
    %13 = vector.load %arg7[%c0_13, %c0_14] : memref<16x128xf32, #tpu.memory_space<vmem>>, vector<16x128xf32>
    %14 = arith.maximumf %12, %13 : vector<16x128xf32>
    %c0_15 = arith.constant 0 : index
    %c0_16 = arith.constant 0 : index
    %15 = vector.load %arg8[%c0_15, %c0_16] : memref<16x128xf32, #tpu.memory_space<vmem>>, vector<16x128xf32>
    %16 = arith.maximumf %14, %15 : vector<16x128xf32>
    %c0_17 = arith.constant 0 : index
    %c0_18 = arith.constant 0 : index
    %17 = vector.load %arg9[%c0_17, %c0_18] : memref<16x128xf32, #tpu.memory_space<vmem>>, vector<16x128xf32>
    tpu.vector_store %arg9[%c0_17, %c0_18], %16 {strides = array<i32>} : memref<16x128xf32, #tpu.memory_space<vmem>>, vector<16x128xf32>,
    return
  }
}

module attributes {stable_mosaic.version = 11 : i64} {
  func.func @_gemm_fused_kernel(%arg0: i32, %arg1: i32, %arg2: i32, %arg3: memref<256x128xbf16, #tpu.memory_space<vmem>>, %arg4: memref<128x128xbf16, #tpu.memory_space<vmem>>, %arg5: memref<1x128xf32, #tpu.memory_space<vmem>>, %arg6: memref<1x128xf32, #tpu.memory_space<vmem>>, %arg7: memref<256x128xf32, #tpu.memory_space<vmem>>, %arg8: memref<256x128xf32, #tpu.memory_space<vmem>>) attributes {dimension_semantics = [#tpu.dimension_semantics<parallel>, #tpu.dimension_semantics<parallel>, #tpu.dimension_semantics<arbitrary>], iteration_bounds = array<i64: 2, 1, 1>, scalar_prefetch = 0 : i64, scratch_operands = 1 : i64, tpu.core_type = #tpu.core_type<tc>, window_params = [{transform_indices = @transform_0, window_bounds = array<i64: 256, 128>}, {transform_indices = @transform_1, window_bounds = array<i64: 128, 128>}, {transform_indices = @transform_2, window_bounds = array<i64: 1, 128>}, {transform_indices = @transform_3, window_bounds = array<i64: 1, 128>}, {transform_indices = @transform_4, window_bounds = array<i64: 256, 128>}]} {
    %c0_i32 = arith.constant 0 : i32
    %0 = arith.cmpi eq, %arg2, %c0_i32 : i32
    %1 = arith.extui %0 : i1 to i32
    %c0_i32_0 = arith.constant 0 : i32
    %2 = arith.cmpi ne, %1, %c0_i32_0 : i32
    scf.if %2 {
      %cst_10 = arith.constant 0.000000e+00 : f32
      %12 = vector.broadcast %cst_10 : f32 to vector<256x128xf32>
      %c0_11 = arith.constant 0 : index
      %c0_12 = arith.constant 0 : index
      %13 = vector.load %arg8[%c0_11, %c0_12] : memref<256x128xf32, #tpu.memory_space<vmem>>, vector<256x128xf32>
      tpu.vector_store %arg8[%c0_11, %c0_12], %12 {strides = array<i32>} : memref<256x128xf32, #tpu.memory_space<vmem>>, vector<256x128xf32>,
    } else {
    }
    %c0 = arith.constant 0 : index
    %c0_1 = arith.constant 0 : index
    %3 = vector.load %arg8[%c0, %c0_1] : memref<256x128xf32, #tpu.memory_space<vmem>>, vector<256x128xf32>
    %c0_2 = arith.constant 0 : index
    %c0_3 = arith.constant 0 : index
    %4 = vector.load %arg3[%c0_2, %c0_3] : memref<256x128xbf16, #tpu.memory_space<vmem>>, vector<256x128xbf16>
    %c0_4 = arith.constant 0 : index
    %c0_5 = arith.constant 0 : index
    %5 = vector.load %arg4[%c0_4, %c0_5] : memref<128x128xbf16, #tpu.memory_space<vmem>>, vector<128x128xbf16>
    %cst = arith.constant dense<0.000000e+00> : vector<256x128xf32>
    %6 = tpu.matmul %4, %5, %cst {dimension_numbers = #tpu.dot_dimension_numbers<[1], [0], [0], [1], [0, 0, 1, 1], [], []>} : vector<256x128xbf16>, vector<128x128xbf16>, vector<256x128xf32> -> vector<256x128xf32>
    %7 = arith.addf %3, %6 : vector<256x128xf32>
    %c0_6 = arith.constant 0 : index
    %c0_7 = arith.constant 0 : index
    %8 = vector.load %arg8[%c0_6, %c0_7] : memref<256x128xf32, #tpu.memory_space<vmem>>, vector<256x128xf32>
    tpu.vector_store %arg8[%c0_6, %c0_7], %7 {strides = array<i32>} : memref<256x128xf32, #tpu.memory_space<vmem>>, vector<256x128xf32>,
    %c0_i32_8 = arith.constant 0 : i32
    %9 = arith.cmpi eq, %arg2, %c0_i32_8 : i32
    %10 = arith.extui %9 : i1 to i32
    %c0_i32_9 = arith.constant 0 : i32
    %11 = arith.cmpi ne, %10, %c0_i32_9 : i32
    scf.if %11 {
      %c0_10 = arith.constant 0 : index
      %c0_11 = arith.constant 0 : index
      %12 = vector.load %arg8[%c0_10, %c0_11] : memref<256x128xf32, #tpu.memory_space<vmem>>, vector<256x128xf32>
      %c0_12 = arith.constant 0 : index
      %c0_13 = arith.constant 0 : index
      %13 = vector.load %arg5[%c0_12, %c0_13] : memref<1x128xf32, #tpu.memory_space<vmem>>, vector<1x128xf32>
      %14 = vector.broadcast %13 : vector<1x128xf32> to vector<256x128xf32>
      %15 = arith.mulf %12, %14 : vector<256x128xf32>
      %c0_14 = arith.constant 0 : index
      %c0_15 = arith.constant 0 : index
      %16 = vector.load %arg6[%c0_14, %c0_15] : memref<1x128xf32, #tpu.memory_space<vmem>>, vector<1x128xf32>
      %17 = vector.broadcast %16 : vector<1x128xf32> to vector<256x128xf32>
      %18 = arith.addf %15, %17 : vector<256x128xf32>
      %cst_16 = arith.constant 0.000000e+00 : f32
      %19 = vector.broadcast %cst_16 : f32 to vector<256x128xf32>
      %20 = arith.maximumf %18, %19 : vector<256x128xf32>
      %c0_17 = arith.constant 0 : index
      %c0_18 = arith.constant 0 : index
      %21 = vector.load %arg7[%c0_17, %c0_18] : memref<256x128xf32, #tpu.memory_space<vmem>>, vector<256x128xf32>
      tpu.vector_store %arg7[%c0_17, %c0_18], %20 {strides = array<i32>} : memref<256x128xf32, #tpu.memory_space<vmem>>, vector<256x128xf32>,
    } else {
    }
    return
  }
  func.func @transform_0(%arg0: i32, %arg1: i32, %arg2: i32) -> (i32, i32) {
    %c0_i32 = arith.constant 0 : i32
    return %arg0, %arg2 : i32, i32
  }
  func.func @transform_1(%arg0: i32, %arg1: i32, %arg2: i32) -> (i32, i32) {
    %c0_i32 = arith.constant 0 : i32
    return %arg2, %arg1 : i32, i32
  }
  func.func @transform_2(%arg0: i32, %arg1: i32, %arg2: i32) -> (i32, i32) {
    %c0_i32 = arith.constant 0 : i32
    %c0_i32_0 = arith.constant 0 : i32
    return %c0_i32, %arg1 : i32, i32
  }
  func.func @transform_3(%arg0: i32, %arg1: i32, %arg2: i32) -> (i32, i32) {
    %c0_i32 = arith.constant 0 : i32
    %c0_i32_0 = arith.constant 0 : i32
    return %c0_i32, %arg1 : i32, i32
  }
  func.func @transform_4(%arg0: i32, %arg1: i32, %arg2: i32) -> (i32, i32) {
    %c0_i32 = arith.constant 0 : i32
    return %arg0, %arg1 : i32, i32
  }
}

module attributes {stable_mosaic.version = 11 : i64} {
  func.func @_gemm_fused_kernel(%arg0: i32, %arg1: i32, %arg2: i32, %arg3: memref<256x128xbf16, #tpu.memory_space<vmem>>, %arg4: memref<128x128xbf16, #tpu.memory_space<vmem>>, %arg5: memref<1x128xf32, #tpu.memory_space<vmem>>, %arg6: memref<1x128xf32, #tpu.memory_space<vmem>>, %arg7: memref<256x128xf32, #tpu.memory_space<vmem>>, %arg8: memref<256x128xf32, #tpu.memory_space<vmem>>) attributes {dimension_semantics = [#tpu.dimension_semantics<parallel>, #tpu.dimension_semantics<parallel>, #tpu.dimension_semantics<arbitrary>], iteration_bounds = array<i64: 2, 1, 1>, scalar_prefetch = 0 : i64, scratch_operands = 1 : i64, tpu.core_type = #tpu.core_type<tc>, window_params = [{transform_indices = @transform_0, window_bounds = array<i64: 256, 128>}, {transform_indices = @transform_1, window_bounds = array<i64: 128, 128>}, {transform_indices = @transform_2, window_bounds = array<i64: 1, 128>}, {transform_indices = @transform_3, window_bounds = array<i64: 1, 128>}, {transform_indices = @transform_4, window_bounds = array<i64: 256, 128>}]} {
    %c0_i32 = arith.constant 0 : i32
    %0 = arith.cmpi eq, %arg2, %c0_i32 : i32
    %1 = arith.extui %0 : i1 to i32
    %c0_i32_0 = arith.constant 0 : i32
    %2 = arith.cmpi ne, %1, %c0_i32_0 : i32
    scf.if %2 {
      %cst_10 = arith.constant 0.000000e+00 : f32
      %12 = vector.broadcast %cst_10 : f32 to vector<256x128xf32>
      %c0_11 = arith.constant 0 : index
      %c0_12 = arith.constant 0 : index
      %13 = vector.load %arg8[%c0_11, %c0_12] : memref<256x128xf32, #tpu.memory_space<vmem>>, vector<256x128xf32>
      tpu.vector_store %arg8[%c0_11, %c0_12], %12 {strides = array<i32>} : memref<256x128xf32, #tpu.memory_space<vmem>>, vector<256x128xf32>,
    } else {
    }
    %c0 = arith.constant 0 : index
    %c0_1 = arith.constant 0 : index
    %3 = vector.load %arg8[%c0, %c0_1] : memref<256x128xf32, #tpu.memory_space<vmem>>, vector<256x128xf32>
    %c0_2 = arith.constant 0 : index
    %c0_3 = arith.constant 0 : index
    %4 = vector.load %arg3[%c0_2, %c0_3] : memref<256x128xbf16, #tpu.memory_space<vmem>>, vector<256x128xbf16>
    %c0_4 = arith.constant 0 : index
    %c0_5 = arith.constant 0 : index
    %5 = vector.load %arg4[%c0_4, %c0_5] : memref<128x128xbf16, #tpu.memory_space<vmem>>, vector<128x128xbf16>
    %cst = arith.constant dense<0.000000e+00> : vector<256x128xf32>
    %6 = tpu.matmul %4, %5, %cst {dimension_numbers = #tpu.dot_dimension_numbers<[1], [0], [0], [1], [0, 0, 1, 1], [], []>} : vector<256x128xbf16>, vector<128x128xbf16>, vector<256x128xf32> -> vector<256x128xf32>
    %7 = arith.addf %3, %6 : vector<256x128xf32>
    %c0_6 = arith.constant 0 : index
    %c0_7 = arith.constant 0 : index
    %8 = vector.load %arg8[%c0_6, %c0_7] : memref<256x128xf32, #tpu.memory_space<vmem>>, vector<256x128xf32>
    tpu.vector_store %arg8[%c0_6, %c0_7], %7 {strides = array<i32>} : memref<256x128xf32, #tpu.memory_space<vmem>>, vector<256x128xf32>,
    %c0_i32_8 = arith.constant 0 : i32
    %9 = arith.cmpi eq, %arg2, %c0_i32_8 : i32
    %10 = arith.extui %9 : i1 to i32
    %c0_i32_9 = arith.constant 0 : i32
    %11 = arith.cmpi ne, %10, %c0_i32_9 : i32
    scf.if %11 {
      %c0_10 = arith.constant 0 : index
      %c0_11 = arith.constant 0 : index
      %12 = vector.load %arg8[%c0_10, %c0_11] : memref<256x128xf32, #tpu.memory_space<vmem>>, vector<256x128xf32>
      %c0_12 = arith.constant 0 : index
      %c0_13 = arith.constant 0 : index
      %13 = vector.load %arg5[%c0_12, %c0_13] : memref<1x128xf32, #tpu.memory_space<vmem>>, vector<1x128xf32>
      %14 = vector.broadcast %13 : vector<1x128xf32> to vector<256x128xf32>
      %15 = arith.mulf %12, %14 : vector<256x128xf32>
      %c0_14 = arith.constant 0 : index
      %c0_15 = arith.constant 0 : index
      %16 = vector.load %arg6[%c0_14, %c0_15] : memref<1x128xf32, #tpu.memory_space<vmem>>, vector<1x128xf32>
      %17 = vector.broadcast %16 : vector<1x128xf32> to vector<256x128xf32>
      %18 = arith.addf %15, %17 : vector<256x128xf32>
      %c0_16 = arith.constant 0 : index
      %c0_17 = arith.constant 0 : index
      %19 = vector.load %arg7[%c0_16, %c0_17] : memref<256x128xf32, #tpu.memory_space<vmem>>, vector<256x128xf32>
      tpu.vector_store %arg7[%c0_16, %c0_17], %18 {strides = array<i32>} : memref<256x128xf32, #tpu.memory_space<vmem>>, vector<256x128xf32>,
    } else {
    }
    return
  }
  func.func @transform_0(%arg0: i32, %arg1: i32, %arg2: i32) -> (i32, i32) {
    %c0_i32 = arith.constant 0 : i32
    return %arg0, %arg2 : i32, i32
  }
  func.func @transform_1(%arg0: i32, %arg1: i32, %arg2: i32) -> (i32, i32) {
    %c0_i32 = arith.constant 0 : i32
    return %arg2, %arg1 : i32, i32
  }
  func.func @transform_2(%arg0: i32, %arg1: i32, %arg2: i32) -> (i32, i32) {
    %c0_i32 = arith.constant 0 : i32
    %c0_i32_0 = arith.constant 0 : i32
    return %c0_i32, %arg1 : i32, i32
  }
  func.func @transform_3(%arg0: i32, %arg1: i32, %arg2: i32) -> (i32, i32) {
    %c0_i32 = arith.constant 0 : i32
    %c0_i32_0 = arith.constant 0 : i32
    return %c0_i32, %arg1 : i32, i32
  }
  func.func @transform_4(%arg0: i32, %arg1: i32, %arg2: i32) -> (i32, i32) {
    %c0_i32 = arith.constant 0 : i32
    return %arg0, %arg1 : i32, i32
  }
}

module attributes {stable_mosaic.version = 11 : i64} {
  func.func @_gemm_fused_kernel(%arg0: i32, %arg1: i32, %arg2: i32, %arg3: memref<256x128xbf16, #tpu.memory_space<vmem>>, %arg4: memref<128x128xbf16, #tpu.memory_space<vmem>>, %arg5: memref<1x128xf32, #tpu.memory_space<vmem>>, %arg6: memref<1x128xf32, #tpu.memory_space<vmem>>, %arg7: memref<256x128xf32, #tpu.memory_space<vmem>>, %arg8: memref<256x128xf32, #tpu.memory_space<vmem>>, %arg9: memref<256x128xf32, #tpu.memory_space<vmem>>) attributes {dimension_semantics = [#tpu.dimension_semantics<parallel>, #tpu.dimension_semantics<parallel>, #tpu.dimension_semantics<arbitrary>], iteration_bounds = array<i64: 2, 1, 1>, scalar_prefetch = 0 : i64, scratch_operands = 1 : i64, tpu.core_type = #tpu.core_type<tc>, window_params = [{transform_indices = @transform_0, window_bounds = array<i64: 256, 128>}, {transform_indices = @transform_1, window_bounds = array<i64: 128, 128>}, {transform_indices = @transform_2, window_bounds = array<i64: 1, 128>}, {transform_indices = @transform_3, window_bounds = array<i64: 1, 128>}, {transform_indices = @transform_4, window_bounds = array<i64: 256, 128>}, {transform_indices = @transform_5, window_bounds = array<i64: 256, 128>}]} {
    %c0_i32 = arith.constant 0 : i32
    %0 = arith.cmpi eq, %arg2, %c0_i32 : i32
    %1 = arith.extui %0 : i1 to i32
    %c0_i32_0 = arith.constant 0 : i32
    %2 = arith.cmpi ne, %1, %c0_i32_0 : i32
    scf.if %2 {
      %cst_10 = arith.constant 0.000000e+00 : f32
      %12 = vector.broadcast %cst_10 : f32 to vector<256x128xf32>
      %c0_11 = arith.constant 0 : index
      %c0_12 = arith.constant 0 : index
      %13 = vector.load %arg9[%c0_11, %c0_12] : memref<256x128xf32, #tpu.memory_space<vmem>>, vector<256x128xf32>
      tpu.vector_store %arg9[%c0_11, %c0_12], %12 {strides = array<i32>} : memref<256x128xf32, #tpu.memory_space<vmem>>, vector<256x128xf32>,
    } else {
    }
    %c0 = arith.constant 0 : index
    %c0_1 = arith.constant 0 : index
    %3 = vector.load %arg9[%c0, %c0_1] : memref<256x128xf32, #tpu.memory_space<vmem>>, vector<256x128xf32>
    %c0_2 = arith.constant 0 : index
    %c0_3 = arith.constant 0 : index
    %4 = vector.load %arg3[%c0_2, %c0_3] : memref<256x128xbf16, #tpu.memory_space<vmem>>, vector<256x128xbf16>
    %c0_4 = arith.constant 0 : index
    %c0_5 = arith.constant 0 : index
    %5 = vector.load %arg4[%c0_4, %c0_5] : memref<128x128xbf16, #tpu.memory_space<vmem>>, vector<128x128xbf16>
    %cst = arith.constant dense<0.000000e+00> : vector<256x128xf32>
    %6 = tpu.matmul %4, %5, %cst {dimension_numbers = #tpu.dot_dimension_numbers<[1], [0], [0], [1], [0, 0, 1, 1], [], []>} : vector<256x128xbf16>, vector<128x128xbf16>, vector<256x128xf32> -> vector<256x128xf32>
    %7 = arith.addf %3, %6 : vector<256x128xf32>
    %c0_6 = arith.constant 0 : index
    %c0_7 = arith.constant 0 : index
    %8 = vector.load %arg9[%c0_6, %c0_7] : memref<256x128xf32, #tpu.memory_space<vmem>>, vector<256x128xf32>
    tpu.vector_store %arg9[%c0_6, %c0_7], %7 {strides = array<i32>} : memref<256x128xf32, #tpu.memory_space<vmem>>, vector<256x128xf32>,
    %c0_i32_8 = arith.constant 0 : i32
    %9 = arith.cmpi eq, %arg2, %c0_i32_8 : i32
    %10 = arith.extui %9 : i1 to i32
    %c0_i32_9 = arith.constant 0 : i32
    %11 = arith.cmpi ne, %10, %c0_i32_9 : i32
    scf.if %11 {
      %c0_10 = arith.constant 0 : index
      %c0_11 = arith.constant 0 : index
      %12 = vector.load %arg9[%c0_10, %c0_11] : memref<256x128xf32, #tpu.memory_space<vmem>>, vector<256x128xf32>
      %c0_12 = arith.constant 0 : index
      %c0_13 = arith.constant 0 : index
      %13 = vector.load %arg5[%c0_12, %c0_13] : memref<1x128xf32, #tpu.memory_space<vmem>>, vector<1x128xf32>
      %14 = vector.broadcast %13 : vector<1x128xf32> to vector<256x128xf32>
      %15 = arith.mulf %12, %14 : vector<256x128xf32>
      %c0_14 = arith.constant 0 : index
      %c0_15 = arith.constant 0 : index
      %16 = vector.load %arg6[%c0_14, %c0_15] : memref<1x128xf32, #tpu.memory_space<vmem>>, vector<1x128xf32>
      %17 = vector.broadcast %16 : vector<1x128xf32> to vector<256x128xf32>
      %18 = arith.addf %15, %17 : vector<256x128xf32>
      %c0_16 = arith.constant 0 : index
      %c0_17 = arith.constant 0 : index
      %19 = vector.load %arg7[%c0_16, %c0_17] : memref<256x128xf32, #tpu.memory_space<vmem>>, vector<256x128xf32>
      %20 = arith.addf %18, %19 : vector<256x128xf32>
      %cst_18 = arith.constant 0.000000e+00 : f32
      %21 = vector.broadcast %cst_18 : f32 to vector<256x128xf32>
      %22 = arith.maximumf %20, %21 : vector<256x128xf32>
      %c0_19 = arith.constant 0 : index
      %c0_20 = arith.constant 0 : index
      %23 = vector.load %arg8[%c0_19, %c0_20] : memref<256x128xf32, #tpu.memory_space<vmem>>, vector<256x128xf32>
      tpu.vector_store %arg8[%c0_19, %c0_20], %22 {strides = array<i32>} : memref<256x128xf32, #tpu.memory_space<vmem>>, vector<256x128xf32>,
    } else {
    }
    return
  }
  func.func @transform_0(%arg0: i32, %arg1: i32, %arg2: i32) -> (i32, i32) {
    %c0_i32 = arith.constant 0 : i32
    return %arg0, %arg2 : i32, i32
  }
  func.func @transform_1(%arg0: i32, %arg1: i32, %arg2: i32) -> (i32, i32) {
    %c0_i32 = arith.constant 0 : i32
    return %arg2, %arg1 : i32, i32
  }
  func.func @transform_2(%arg0: i32, %arg1: i32, %arg2: i32) -> (i32, i32) {
    %c0_i32 = arith.constant 0 : i32
    %c0_i32_0 = arith.constant 0 : i32
    return %c0_i32, %arg1 : i32, i32
  }
  func.func @transform_3(%arg0: i32, %arg1: i32, %arg2: i32) -> (i32, i32) {
    %c0_i32 = arith.constant 0 : i32
    %c0_i32_0 = arith.constant 0 : i32
    return %c0_i32, %arg1 : i32, i32
  }
  func.func @transform_4(%arg0: i32, %arg1: i32, %arg2: i32) -> (i32, i32) {
    %c0_i32 = arith.constant 0 : i32
    return %arg0, %arg1 : i32, i32
  }
  func.func @transform_5(%arg0: i32, %arg1: i32, %arg2: i32) -> (i32, i32) {
    %c0_i32 = arith.constant 0 : i32
    return %arg0, %arg1 : i32, i32
  }
}

module attributes {stable_mosaic.version = 11 : i64} {
  func.func @_gemm_fused_kernel(%arg0: i32, %arg1: i32, %arg2: i32, %arg3: memref<128x128xbf16, #tpu.memory_space<vmem>>, %arg4: memref<128x128xbf16, #tpu.memory_space<vmem>>, %arg5: memref<1x128xf32, #tpu.memory_space<vmem>>, %arg6: memref<1x128xf32, #tpu.memory_space<vmem>>, %arg7: memref<128x128xf32, #tpu.memory_space<vmem>>, %arg8: memref<128x128xf32, #tpu.memory_space<vmem>>) attributes {dimension_semantics = [#tpu.dimension_semantics<parallel>, #tpu.dimension_semantics<parallel>, #tpu.dimension_semantics<arbitrary>], iteration_bounds = array<i64: 1, 1, 1>, scalar_prefetch = 0 : i64, scratch_operands = 1 : i64, tpu.core_type = #tpu.core_type<tc>, window_params = [{transform_indices = @transform_0, window_bounds = array<i64: 128, 128>}, {transform_indices = @transform_1, window_bounds = array<i64: 128, 128>}, {transform_indices = @transform_2, window_bounds = array<i64: 1, 128>}, {transform_indices = @transform_3, window_bounds = array<i64: 1, 128>}, {transform_indices = @transform_4, window_bounds = array<i64: 128, 128>}]} {
    %c0_i32 = arith.constant 0 : i32
    %0 = arith.cmpi eq, %arg2, %c0_i32 : i32
    %1 = arith.extui %0 : i1 to i32
    %c0_i32_0 = arith.constant 0 : i32
    %2 = arith.cmpi ne, %1, %c0_i32_0 : i32
    scf.if %2 {
      %cst_10 = arith.constant 0.000000e+00 : f32
      %12 = vector.broadcast %cst_10 : f32 to vector<128x128xf32>
      %c0_11 = arith.constant 0 : index
      %c0_12 = arith.constant 0 : index
      %13 = vector.load %arg8[%c0_11, %c0_12] : memref<128x128xf32, #tpu.memory_space<vmem>>, vector<128x128xf32>
      tpu.vector_store %arg8[%c0_11, %c0_12], %12 {strides = array<i32>} : memref<128x128xf32, #tpu.memory_space<vmem>>, vector<128x128xf32>,
    } else {
    }
    %c0 = arith.constant 0 : index
    %c0_1 = arith.constant 0 : index
    %3 = vector.load %arg8[%c0, %c0_1] : memref<128x128xf32, #tpu.memory_space<vmem>>, vector<128x128xf32>
    %c0_2 = arith.constant 0 : index
    %c0_3 = arith.constant 0 : index
    %4 = vector.load %arg3[%c0_2, %c0_3] : memref<128x128xbf16, #tpu.memory_space<vmem>>, vector<128x128xbf16>
    %c0_4 = arith.constant 0 : index
    %c0_5 = arith.constant 0 : index
    %5 = vector.load %arg4[%c0_4, %c0_5] : memref<128x128xbf16, #tpu.memory_space<vmem>>, vector<128x128xbf16>
    %cst = arith.constant dense<0.000000e+00> : vector<128x128xf32>
    %6 = tpu.matmul %4, %5, %cst {dimension_numbers = #tpu.dot_dimension_numbers<[1], [0], [0], [1], [0, 0, 1, 1], [], []>} : vector<128x128xbf16>, vector<128x128xbf16>, vector<128x128xf32> -> vector<128x128xf32>
    %7 = arith.addf %3, %6 : vector<128x128xf32>
    %c0_6 = arith.constant 0 : index
    %c0_7 = arith.constant 0 : index
    %8 = vector.load %arg8[%c0_6, %c0_7] : memref<128x128xf32, #tpu.memory_space<vmem>>, vector<128x128xf32>
    tpu.vector_store %arg8[%c0_6, %c0_7], %7 {strides = array<i32>} : memref<128x128xf32, #tpu.memory_space<vmem>>, vector<128x128xf32>,
    %c0_i32_8 = arith.constant 0 : i32
    %9 = arith.cmpi eq, %arg2, %c0_i32_8 : i32
    %10 = arith.extui %9 : i1 to i32
    %c0_i32_9 = arith.constant 0 : i32
    %11 = arith.cmpi ne, %10, %c0_i32_9 : i32
    scf.if %11 {
      %c0_10 = arith.constant 0 : index
      %c0_11 = arith.constant 0 : index
      %12 = vector.load %arg8[%c0_10, %c0_11] : memref<128x128xf32, #tpu.memory_space<vmem>>, vector<128x128xf32>
      %c0_12 = arith.constant 0 : index
      %c0_13 = arith.constant 0 : index
      %13 = vector.load %arg5[%c0_12, %c0_13] : memref<1x128xf32, #tpu.memory_space<vmem>>, vector<1x128xf32>
      %14 = vector.broadcast %13 : vector<1x128xf32> to vector<128x128xf32>
      %15 = arith.mulf %12, %14 : vector<128x128xf32>
      %c0_14 = arith.constant 0 : index
      %c0_15 = arith.constant 0 : index
      %16 = vector.load %arg6[%c0_14, %c0_15] : memref<1x128xf32, #tpu.memory_space<vmem>>, vector<1x128xf32>
      %17 = vector.broadcast %16 : vector<1x128xf32> to vector<128x128xf32>
      %18 = arith.addf %15, %17 : vector<128x128xf32>
      %cst_16 = arith.constant 0.000000e+00 : f32
      %19 = vector.broadcast %cst_16 : f32 to vector<128x128xf32>
      %20 = arith.maximumf %18, %19 : vector<128x128xf32>
      %c0_17 = arith.constant 0 : index
      %c0_18 = arith.constant 0 : index
      %21 = vector.load %arg7[%c0_17, %c0_18] : memref<128x128xf32, #tpu.memory_space<vmem>>, vector<128x128xf32>
      tpu.vector_store %arg7[%c0_17, %c0_18], %20 {strides = array<i32>} : memref<128x128xf32, #tpu.memory_space<vmem>>, vector<128x128xf32>,
    } else {
    }
    return
  }
  func.func @transform_0(%arg0: i32, %arg1: i32, %arg2: i32) -> (i32, i32) {
    %c0_i32 = arith.constant 0 : i32
    return %arg0, %arg2 : i32, i32
  }
  func.func @transform_1(%arg0: i32, %arg1: i32, %arg2: i32) -> (i32, i32) {
    %c0_i32 = arith.constant 0 : i32
    return %arg2, %arg1 : i32, i32
  }
  func.func @transform_2(%arg0: i32, %arg1: i32, %arg2: i32) -> (i32, i32) {
    %c0_i32 = arith.constant 0 : i32
    %c0_i32_0 = arith.constant 0 : i32
    return %c0_i32, %arg1 : i32, i32
  }
  func.func @transform_3(%arg0: i32, %arg1: i32, %arg2: i32) -> (i32, i32) {
    %c0_i32 = arith.constant 0 : i32
    %c0_i32_0 = arith.constant 0 : i32
    return %c0_i32, %arg1 : i32, i32
  }
  func.func @transform_4(%arg0: i32, %arg1: i32, %arg2: i32) -> (i32, i32) {
    %c0_i32 = arith.constant 0 : i32
    return %arg0, %arg1 : i32, i32
  }
}

module attributes {stable_mosaic.version = 11 : i64} {
  func.func @_gemm_fused_kernel(%arg0: i32, %arg1: i32, %arg2: i32, %arg3: memref<128x128xbf16, #tpu.memory_space<vmem>>, %arg4: memref<128x128xbf16, #tpu.memory_space<vmem>>, %arg5: memref<1x128xf32, #tpu.memory_space<vmem>>, %arg6: memref<1x128xf32, #tpu.memory_space<vmem>>, %arg7: memref<128x128xf32, #tpu.memory_space<vmem>>, %arg8: memref<128x128xf32, #tpu.memory_space<vmem>>) attributes {dimension_semantics = [#tpu.dimension_semantics<parallel>, #tpu.dimension_semantics<parallel>, #tpu.dimension_semantics<arbitrary>], iteration_bounds = array<i64: 1, 1, 1>, scalar_prefetch = 0 : i64, scratch_operands = 1 : i64, tpu.core_type = #tpu.core_type<tc>, window_params = [{transform_indices = @transform_0, window_bounds = array<i64: 128, 128>}, {transform_indices = @transform_1, window_bounds = array<i64: 128, 128>}, {transform_indices = @transform_2, window_bounds = array<i64: 1, 128>}, {transform_indices = @transform_3, window_bounds = array<i64: 1, 128>}, {transform_indices = @transform_4, window_bounds = array<i64: 128, 128>}]} {
    %c0_i32 = arith.constant 0 : i32
    %0 = arith.cmpi eq, %arg2, %c0_i32 : i32
    %1 = arith.extui %0 : i1 to i32
    %c0_i32_0 = arith.constant 0 : i32
    %2 = arith.cmpi ne, %1, %c0_i32_0 : i32
    scf.if %2 {
      %cst_10 = arith.constant 0.000000e+00 : f32
      %12 = vector.broadcast %cst_10 : f32 to vector<128x128xf32>
      %c0_11 = arith.constant 0 : index
      %c0_12 = arith.constant 0 : index
      %13 = vector.load %arg8[%c0_11, %c0_12] : memref<128x128xf32, #tpu.memory_space<vmem>>, vector<128x128xf32>
      tpu.vector_store %arg8[%c0_11, %c0_12], %12 {strides = array<i32>} : memref<128x128xf32, #tpu.memory_space<vmem>>, vector<128x128xf32>,
    } else {
    }
    %c0 = arith.constant 0 : index
    %c0_1 = arith.constant 0 : index
    %3 = vector.load %arg8[%c0, %c0_1] : memref<128x128xf32, #tpu.memory_space<vmem>>, vector<128x128xf32>
    %c0_2 = arith.constant 0 : index
    %c0_3 = arith.constant 0 : index
    %4 = vector.load %arg3[%c0_2, %c0_3] : memref<128x128xbf16, #tpu.memory_space<vmem>>, vector<128x128xbf16>
    %c0_4 = arith.constant 0 : index
    %c0_5 = arith.constant 0 : index
    %5 = vector.load %arg4[%c0_4, %c0_5] : memref<128x128xbf16, #tpu.memory_space<vmem>>, vector<128x128xbf16>
    %cst = arith.constant dense<0.000000e+00> : vector<128x128xf32>
    %6 = tpu.matmul %4, %5, %cst {dimension_numbers = #tpu.dot_dimension_numbers<[1], [0], [0], [1], [0, 0, 1, 1], [], []>} : vector<128x128xbf16>, vector<128x128xbf16>, vector<128x128xf32> -> vector<128x128xf32>
    %7 = arith.addf %3, %6 : vector<128x128xf32>
    %c0_6 = arith.constant 0 : index
    %c0_7 = arith.constant 0 : index
    %8 = vector.load %arg8[%c0_6, %c0_7] : memref<128x128xf32, #tpu.memory_space<vmem>>, vector<128x128xf32>
    tpu.vector_store %arg8[%c0_6, %c0_7], %7 {strides = array<i32>} : memref<128x128xf32, #tpu.memory_space<vmem>>, vector<128x128xf32>,
    %c0_i32_8 = arith.constant 0 : i32
    %9 = arith.cmpi eq, %arg2, %c0_i32_8 : i32
    %10 = arith.extui %9 : i1 to i32
    %c0_i32_9 = arith.constant 0 : i32
    %11 = arith.cmpi ne, %10, %c0_i32_9 : i32
    scf.if %11 {
      %c0_10 = arith.constant 0 : index
      %c0_11 = arith.constant 0 : index
      %12 = vector.load %arg8[%c0_10, %c0_11] : memref<128x128xf32, #tpu.memory_space<vmem>>, vector<128x128xf32>
      %c0_12 = arith.constant 0 : index
      %c0_13 = arith.constant 0 : index
      %13 = vector.load %arg5[%c0_12, %c0_13] : memref<1x128xf32, #tpu.memory_space<vmem>>, vector<1x128xf32>
      %14 = vector.broadcast %13 : vector<1x128xf32> to vector<128x128xf32>
      %15 = arith.mulf %12, %14 : vector<128x128xf32>
      %c0_14 = arith.constant 0 : index
      %c0_15 = arith.constant 0 : index
      %16 = vector.load %arg6[%c0_14, %c0_15] : memref<1x128xf32, #tpu.memory_space<vmem>>, vector<1x128xf32>
      %17 = vector.broadcast %16 : vector<1x128xf32> to vector<128x128xf32>
      %18 = arith.addf %15, %17 : vector<128x128xf32>
      %c0_16 = arith.constant 0 : index
      %c0_17 = arith.constant 0 : index
      %19 = vector.load %arg7[%c0_16, %c0_17] : memref<128x128xf32, #tpu.memory_space<vmem>>, vector<128x128xf32>
      tpu.vector_store %arg7[%c0_16, %c0_17], %18 {strides = array<i32>} : memref<128x128xf32, #tpu.memory_space<vmem>>, vector<128x128xf32>,
    } else {
    }
    return
  }
  func.func @transform_0(%arg0: i32, %arg1: i32, %arg2: i32) -> (i32, i32) {
    %c0_i32 = arith.constant 0 : i32
    return %arg0, %arg2 : i32, i32
  }
  func.func @transform_1(%arg0: i32, %arg1: i32, %arg2: i32) -> (i32, i32) {
    %c0_i32 = arith.constant 0 : i32
    return %arg2, %arg1 : i32, i32
  }
  func.func @transform_2(%arg0: i32, %arg1: i32, %arg2: i32) -> (i32, i32) {
    %c0_i32 = arith.constant 0 : i32
    %c0_i32_0 = arith.constant 0 : i32
    return %c0_i32, %arg1 : i32, i32
  }
  func.func @transform_3(%arg0: i32, %arg1: i32, %arg2: i32) -> (i32, i32) {
    %c0_i32 = arith.constant 0 : i32
    %c0_i32_0 = arith.constant 0 : i32
    return %c0_i32, %arg1 : i32, i32
  }
  func.func @transform_4(%arg0: i32, %arg1: i32, %arg2: i32) -> (i32, i32) {
    %c0_i32 = arith.constant 0 : i32
    return %arg0, %arg1 : i32, i32
  }
}

module attributes {stable_mosaic.version = 11 : i64} {
  func.func @_gemm_fused_kernel(%arg0: i32, %arg1: i32, %arg2: i32, %arg3: memref<128x128xbf16, #tpu.memory_space<vmem>>, %arg4: memref<128x128xbf16, #tpu.memory_space<vmem>>, %arg5: memref<1x128xf32, #tpu.memory_space<vmem>>, %arg6: memref<1x128xf32, #tpu.memory_space<vmem>>, %arg7: memref<128x128xf32, #tpu.memory_space<vmem>>, %arg8: memref<128x128xf32, #tpu.memory_space<vmem>>, %arg9: memref<128x128xf32, #tpu.memory_space<vmem>>) attributes {dimension_semantics = [#tpu.dimension_semantics<parallel>, #tpu.dimension_semantics<parallel>, #tpu.dimension_semantics<arbitrary>], iteration_bounds = array<i64: 1, 1, 1>, scalar_prefetch = 0 : i64, scratch_operands = 1 : i64, tpu.core_type = #tpu.core_type<tc>, window_params = [{transform_indices = @transform_0, window_bounds = array<i64: 128, 128>}, {transform_indices = @transform_1, window_bounds = array<i64: 128, 128>}, {transform_indices = @transform_2, window_bounds = array<i64: 1, 128>}, {transform_indices = @transform_3, window_bounds = array<i64: 1, 128>}, {transform_indices = @transform_4, window_bounds = array<i64: 128, 128>}, {transform_indices = @transform_5, window_bounds = array<i64: 128, 128>}]} {
    %c0_i32 = arith.constant 0 : i32
    %0 = arith.cmpi eq, %arg2, %c0_i32 : i32
    %1 = arith.extui %0 : i1 to i32
    %c0_i32_0 = arith.constant 0 : i32
    %2 = arith.cmpi ne, %1, %c0_i32_0 : i32
    scf.if %2 {
      %cst_10 = arith.constant 0.000000e+00 : f32
      %12 = vector.broadcast %cst_10 : f32 to vector<128x128xf32>
      %c0_11 = arith.constant 0 : index
      %c0_12 = arith.constant 0 : index
      %13 = vector.load %arg9[%c0_11, %c0_12] : memref<128x128xf32, #tpu.memory_space<vmem>>, vector<128x128xf32>
      tpu.vector_store %arg9[%c0_11, %c0_12], %12 {strides = array<i32>} : memref<128x128xf32, #tpu.memory_space<vmem>>, vector<128x128xf32>,
    } else {
    }
    %c0 = arith.constant 0 : index
    %c0_1 = arith.constant 0 : index
    %3 = vector.load %arg9[%c0, %c0_1] : memref<128x128xf32, #tpu.memory_space<vmem>>, vector<128x128xf32>
    %c0_2 = arith.constant 0 : index
    %c0_3 = arith.constant 0 : index
    %4 = vector.load %arg3[%c0_2, %c0_3] : memref<128x128xbf16, #tpu.memory_space<vmem>>, vector<128x128xbf16>
    %c0_4 = arith.constant 0 : index
    %c0_5 = arith.constant 0 : index
    %5 = vector.load %arg4[%c0_4, %c0_5] : memref<128x128xbf16, #tpu.memory_space<vmem>>, vector<128x128xbf16>
    %cst = arith.constant dense<0.000000e+00> : vector<128x128xf32>
    %6 = tpu.matmul %4, %5, %cst {dimension_numbers = #tpu.dot_dimension_numbers<[1], [0], [0], [1], [0, 0, 1, 1], [], []>} : vector<128x128xbf16>, vector<128x128xbf16>, vector<128x128xf32> -> vector<128x128xf32>
    %7 = arith.addf %3, %6 : vector<128x128xf32>
    %c0_6 = arith.constant 0 : index
    %c0_7 = arith.constant 0 : index
    %8 = vector.load %arg9[%c0_6, %c0_7] : memref<128x128xf32, #tpu.memory_space<vmem>>, vector<128x128xf32>
    tpu.vector_store %arg9[%c0_6, %c0_7], %7 {strides = array<i32>} : memref<128x128xf32, #tpu.memory_space<vmem>>, vector<128x128xf32>,
    %c0_i32_8 = arith.constant 0 : i32
    %9 = arith.cmpi eq, %arg2, %c0_i32_8 : i32
    %10 = arith.extui %9 : i1 to i32
    %c0_i32_9 = arith.constant 0 : i32
    %11 = arith.cmpi ne, %10, %c0_i32_9 : i32
    scf.if %11 {
      %c0_10 = arith.constant 0 : index
      %c0_11 = arith.constant 0 : index
      %12 = vector.load %arg9[%c0_10, %c0_11] : memref<128x128xf32, #tpu.memory_space<vmem>>, vector<128x128xf32>
      %c0_12 = arith.constant 0 : index
      %c0_13 = arith.constant 0 : index
      %13 = vector.load %arg5[%c0_12, %c0_13] : memref<1x128xf32, #tpu.memory_space<vmem>>, vector<1x128xf32>
      %14 = vector.broadcast %13 : vector<1x128xf32> to vector<128x128xf32>
      %15 = arith.mulf %12, %14 : vector<128x128xf32>
      %c0_14 = arith.constant 0 : index
      %c0_15 = arith.constant 0 : index
      %16 = vector.load %arg6[%c0_14, %c0_15] : memref<1x128xf32, #tpu.memory_space<vmem>>, vector<1x128xf32>
      %17 = vector.broadcast %16 : vector<1x128xf32> to vector<128x128xf32>
      %18 = arith.addf %15, %17 : vector<128x128xf32>
      %c0_16 = arith.constant 0 : index
      %c0_17 = arith.constant 0 : index
      %19 = vector.load %arg7[%c0_16, %c0_17] : memref<128x128xf32, #tpu.memory_space<vmem>>, vector<128x128xf32>
      %20 = arith.addf %18, %19 : vector<128x128xf32>
      %cst_18 = arith.constant 0.000000e+00 : f32
      %21 = vector.broadcast %cst_18 : f32 to vector<128x128xf32>
      %22 = arith.maximumf %20, %21 : vector<128x128xf32>
      %c0_19 = arith.constant 0 : index
      %c0_20 = arith.constant 0 : index
      %23 = vector.load %arg8[%c0_19, %c0_20] : memref<128x128xf32, #tpu.memory_space<vmem>>, vector<128x128xf32>
      tpu.vector_store %arg8[%c0_19, %c0_20], %22 {strides = array<i32>} : memref<128x128xf32, #tpu.memory_space<vmem>>, vector<128x128xf32>,
    } else {
    }
    return
  }
  func.func @transform_0(%arg0: i32, %arg1: i32, %arg2: i32) -> (i32, i32) {
    %c0_i32 = arith.constant 0 : i32
    return %arg0, %arg2 : i32, i32
  }
  func.func @transform_1(%arg0: i32, %arg1: i32, %arg2: i32) -> (i32, i32) {
    %c0_i32 = arith.constant 0 : i32
    return %arg2, %arg1 : i32, i32
  }
  func.func @transform_2(%arg0: i32, %arg1: i32, %arg2: i32) -> (i32, i32) {
    %c0_i32 = arith.constant 0 : i32
    %c0_i32_0 = arith.constant 0 : i32
    return %c0_i32, %arg1 : i32, i32
  }
  func.func @transform_3(%arg0: i32, %arg1: i32, %arg2: i32) -> (i32, i32) {
    %c0_i32 = arith.constant 0 : i32
    %c0_i32_0 = arith.constant 0 : i32
    return %c0_i32, %arg1 : i32, i32
  }
  func.func @transform_4(%arg0: i32, %arg1: i32, %arg2: i32) -> (i32, i32) {
    %c0_i32 = arith.constant 0 : i32
    return %arg0, %arg1 : i32, i32
  }
  func.func @transform_5(%arg0: i32, %arg1: i32, %arg2: i32) -> (i32, i32) {
    %c0_i32 = arith.constant 0 : i32
    return %arg0, %arg1 : i32, i32
  }
}

module attributes {stable_mosaic.version = 11 : i64} {
  func.func @_gemm_fused_kernel(%arg0: i32, %arg1: i32, %arg2: i32, %arg3: memref<32x256xbf16, #tpu.memory_space<vmem>>, %arg4: memref<256x128xbf16, #tpu.memory_space<vmem>>, %arg5: memref<1x128xf32, #tpu.memory_space<vmem>>, %arg6: memref<1x128xf32, #tpu.memory_space<vmem>>, %arg7: memref<32x128xf32, #tpu.memory_space<vmem>>, %arg8: memref<32x128xf32, #tpu.memory_space<vmem>>) attributes {dimension_semantics = [#tpu.dimension_semantics<parallel>, #tpu.dimension_semantics<parallel>, #tpu.dimension_semantics<arbitrary>], iteration_bounds = array<i64: 1, 1, 1>, scalar_prefetch = 0 : i64, scratch_operands = 1 : i64, tpu.core_type = #tpu.core_type<tc>, window_params = [{transform_indices = @transform_0, window_bounds = array<i64: 32, 256>}, {transform_indices = @transform_1, window_bounds = array<i64: 256, 128>}, {transform_indices = @transform_2, window_bounds = array<i64: 1, 128>}, {transform_indices = @transform_3, window_bounds = array<i64: 1, 128>}, {transform_indices = @transform_4, window_bounds = array<i64: 32, 128>}]} {
    %c0_i32 = arith.constant 0 : i32
    %0 = arith.cmpi eq, %arg2, %c0_i32 : i32
    %1 = arith.extui %0 : i1 to i32
    %c0_i32_0 = arith.constant 0 : i32
    %2 = arith.cmpi ne, %1, %c0_i32_0 : i32
    scf.if %2 {
      %cst_10 = arith.constant 0.000000e+00 : f32
      %12 = vector.broadcast %cst_10 : f32 to vector<32x128xf32>
      %c0_11 = arith.constant 0 : index
      %c0_12 = arith.constant 0 : index
      %13 = vector.load %arg8[%c0_11, %c0_12] : memref<32x128xf32, #tpu.memory_space<vmem>>, vector<32x128xf32>
      tpu.vector_store %arg8[%c0_11, %c0_12], %12 {strides = array<i32>} : memref<32x128xf32, #tpu.memory_space<vmem>>, vector<32x128xf32>,
    } else {
    }
    %c0 = arith.constant 0 : index
    %c0_1 = arith.constant 0 : index
    %3 = vector.load %arg8[%c0, %c0_1] : memref<32x128xf32, #tpu.memory_space<vmem>>, vector<32x128xf32>
    %c0_2 = arith.constant 0 : index
    %c0_3 = arith.constant 0 : index
    %4 = vector.load %arg3[%c0_2, %c0_3] : memref<32x256xbf16, #tpu.memory_space<vmem>>, vector<32x256xbf16>
    %c0_4 = arith.constant 0 : index
    %c0_5 = arith.constant 0 : index
    %5 = vector.load %arg4[%c0_4, %c0_5] : memref<256x128xbf16, #tpu.memory_space<vmem>>, vector<256x128xbf16>
    %cst = arith.constant dense<0.000000e+00> : vector<32x128xf32>
    %6 = tpu.matmul %4, %5, %cst {dimension_numbers = #tpu.dot_dimension_numbers<[1], [0], [0], [1], [0, 0, 1, 1], [], []>} : vector<32x256xbf16>, vector<256x128xbf16>, vector<32x128xf32> -> vector<32x128xf32>
    %7 = arith.addf %3, %6 : vector<32x128xf32>
    %c0_6 = arith.constant 0 : index
    %c0_7 = arith.constant 0 : index
    %8 = vector.load %arg8[%c0_6, %c0_7] : memref<32x128xf32, #tpu.memory_space<vmem>>, vector<32x128xf32>
    tpu.vector_store %arg8[%c0_6, %c0_7], %7 {strides = array<i32>} : memref<32x128xf32, #tpu.memory_space<vmem>>, vector<32x128xf32>,
    %c0_i32_8 = arith.constant 0 : i32
    %9 = arith.cmpi eq, %arg2, %c0_i32_8 : i32
    %10 = arith.extui %9 : i1 to i32
    %c0_i32_9 = arith.constant 0 : i32
    %11 = arith.cmpi ne, %10, %c0_i32_9 : i32
    scf.if %11 {
      %c0_10 = arith.constant 0 : index
      %c0_11 = arith.constant 0 : index
      %12 = vector.load %arg8[%c0_10, %c0_11] : memref<32x128xf32, #tpu.memory_space<vmem>>, vector<32x128xf32>
      %c0_12 = arith.constant 0 : index
      %c0_13 = arith.constant 0 : index
      %13 = vector.load %arg5[%c0_12, %c0_13] : memref<1x128xf32, #tpu.memory_space<vmem>>, vector<1x128xf32>
      %14 = vector.broadcast %13 : vector<1x128xf32> to vector<32x128xf32>
      %15 = arith.mulf %12, %14 : vector<32x128xf32>
      %c0_14 = arith.constant 0 : index
      %c0_15 = arith.constant 0 : index
      %16 = vector.load %arg6[%c0_14, %c0_15] : memref<1x128xf32, #tpu.memory_space<vmem>>, vector<1x128xf32>
      %17 = vector.broadcast %16 : vector<1x128xf32> to vector<32x128xf32>
      %18 = arith.addf %15, %17 : vector<32x128xf32>
      %cst_16 = arith.constant 0.000000e+00 : f32
      %19 = vector.broadcast %cst_16 : f32 to vector<32x128xf32>
      %20 = arith.maximumf %18, %19 : vector<32x128xf32>
      %c0_17 = arith.constant 0 : index
      %c0_18 = arith.constant 0 : index
      %21 = vector.load %arg7[%c0_17, %c0_18] : memref<32x128xf32, #tpu.memory_space<vmem>>, vector<32x128xf32>
      tpu.vector_store %arg7[%c0_17, %c0_18], %20 {strides = array<i32>} : memref<32x128xf32, #tpu.memory_space<vmem>>, vector<32x128xf32>,
    } else {
    }
    return
  }
  func.func @transform_0(%arg0: i32, %arg1: i32, %arg2: i32) -> (i32, i32) {
    %c0_i32 = arith.constant 0 : i32
    return %arg0, %arg2 : i32, i32
  }
  func.func @transform_1(%arg0: i32, %arg1: i32, %arg2: i32) -> (i32, i32) {
    %c0_i32 = arith.constant 0 : i32
    return %arg2, %arg1 : i32, i32
  }
  func.func @transform_2(%arg0: i32, %arg1: i32, %arg2: i32) -> (i32, i32) {
    %c0_i32 = arith.constant 0 : i32
    %c0_i32_0 = arith.constant 0 : i32
    return %c0_i32, %arg1 : i32, i32
  }
  func.func @transform_3(%arg0: i32, %arg1: i32, %arg2: i32) -> (i32, i32) {
    %c0_i32 = arith.constant 0 : i32
    %c0_i32_0 = arith.constant 0 : i32
    return %c0_i32, %arg1 : i32, i32
  }
  func.func @transform_4(%arg0: i32, %arg1: i32, %arg2: i32) -> (i32, i32) {
    %c0_i32 = arith.constant 0 : i32
    return %arg0, %arg1 : i32, i32
  }
}

module attributes {stable_mosaic.version = 11 : i64} {
  func.func @_gemm_fused_kernel(%arg0: i32, %arg1: i32, %arg2: i32, %arg3: memref<32x128xbf16, #tpu.memory_space<vmem>>, %arg4: memref<128x128xbf16, #tpu.memory_space<vmem>>, %arg5: memref<1x128xf32, #tpu.memory_space<vmem>>, %arg6: memref<1x128xf32, #tpu.memory_space<vmem>>, %arg7: memref<32x128xf32, #tpu.memory_space<vmem>>, %arg8: memref<32x128xf32, #tpu.memory_space<vmem>>, %arg9: memref<32x128xf32, #tpu.memory_space<vmem>>) attributes {dimension_semantics = [#tpu.dimension_semantics<parallel>, #tpu.dimension_semantics<parallel>, #tpu.dimension_semantics<arbitrary>], iteration_bounds = array<i64: 1, 1, 1>, scalar_prefetch = 0 : i64, scratch_operands = 1 : i64, tpu.core_type = #tpu.core_type<tc>, window_params = [{transform_indices = @transform_0, window_bounds = array<i64: 32, 128>}, {transform_indices = @transform_1, window_bounds = array<i64: 128, 128>}, {transform_indices = @transform_2, window_bounds = array<i64: 1, 128>}, {transform_indices = @transform_3, window_bounds = array<i64: 1, 128>}, {transform_indices = @transform_4, window_bounds = array<i64: 32, 128>}, {transform_indices = @transform_5, window_bounds = array<i64: 32, 128>}]} {
    %c0_i32 = arith.constant 0 : i32
    %0 = arith.cmpi eq, %arg2, %c0_i32 : i32
    %1 = arith.extui %0 : i1 to i32
    %c0_i32_0 = arith.constant 0 : i32
    %2 = arith.cmpi ne, %1, %c0_i32_0 : i32
    scf.if %2 {
      %cst_10 = arith.constant 0.000000e+00 : f32
      %12 = vector.broadcast %cst_10 : f32 to vector<32x128xf32>
      %c0_11 = arith.constant 0 : index
      %c0_12 = arith.constant 0 : index
      %13 = vector.load %arg9[%c0_11, %c0_12] : memref<32x128xf32, #tpu.memory_space<vmem>>, vector<32x128xf32>
      tpu.vector_store %arg9[%c0_11, %c0_12], %12 {strides = array<i32>} : memref<32x128xf32, #tpu.memory_space<vmem>>, vector<32x128xf32>,
    } else {
    }
    %c0 = arith.constant 0 : index
    %c0_1 = arith.constant 0 : index
    %3 = vector.load %arg9[%c0, %c0_1] : memref<32x128xf32, #tpu.memory_space<vmem>>, vector<32x128xf32>
    %c0_2 = arith.constant 0 : index
    %c0_3 = arith.constant 0 : index
    %4 = vector.load %arg3[%c0_2, %c0_3] : memref<32x128xbf16, #tpu.memory_space<vmem>>, vector<32x128xbf16>
    %c0_4 = arith.constant 0 : index
    %c0_5 = arith.constant 0 : index
    %5 = vector.load %arg4[%c0_4, %c0_5] : memref<128x128xbf16, #tpu.memory_space<vmem>>, vector<128x128xbf16>
    %cst = arith.constant dense<0.000000e+00> : vector<32x128xf32>
    %6 = tpu.matmul %4, %5, %cst {dimension_numbers = #tpu.dot_dimension_numbers<[1], [0], [0], [1], [0, 0, 1, 1], [], []>} : vector<32x128xbf16>, vector<128x128xbf16>, vector<32x128xf32> -> vector<32x128xf32>
    %7 = arith.addf %3, %6 : vector<32x128xf32>
    %c0_6 = arith.constant 0 : index
    %c0_7 = arith.constant 0 : index
    %8 = vector.load %arg9[%c0_6, %c0_7] : memref<32x128xf32, #tpu.memory_space<vmem>>, vector<32x128xf32>
    tpu.vector_store %arg9[%c0_6, %c0_7], %7 {strides = array<i32>} : memref<32x128xf32, #tpu.memory_space<vmem>>, vector<32x128xf32>,
    %c0_i32_8 = arith.constant 0 : i32
    %9 = arith.cmpi eq, %arg2, %c0_i32_8 : i32
    %10 = arith.extui %9 : i1 to i32
    %c0_i32_9 = arith.constant 0 : i32
    %11 = arith.cmpi ne, %10, %c0_i32_9 : i32
    scf.if %11 {
      %c0_10 = arith.constant 0 : index
      %c0_11 = arith.constant 0 : index
      %12 = vector.load %arg9[%c0_10, %c0_11] : memref<32x128xf32, #tpu.memory_space<vmem>>, vector<32x128xf32>
      %c0_12 = arith.constant 0 : index
      %c0_13 = arith.constant 0 : index
      %13 = vector.load %arg5[%c0_12, %c0_13] : memref<1x128xf32, #tpu.memory_space<vmem>>, vector<1x128xf32>
      %14 = vector.broadcast %13 : vector<1x128xf32> to vector<32x128xf32>
      %15 = arith.mulf %12, %14 : vector<32x128xf32>
      %c0_14 = arith.constant 0 : index
      %c0_15 = arith.constant 0 : index
      %16 = vector.load %arg6[%c0_14, %c0_15] : memref<1x128xf32, #tpu.memory_space<vmem>>, vector<1x128xf32>
      %17 = vector.broadcast %16 : vector<1x128xf32> to vector<32x128xf32>
      %18 = arith.addf %15, %17 : vector<32x128xf32>
      %c0_16 = arith.constant 0 : index
      %c0_17 = arith.constant 0 : index
      %19 = vector.load %arg7[%c0_16, %c0_17] : memref<32x128xf32, #tpu.memory_space<vmem>>, vector<32x128xf32>
      %20 = arith.addf %18, %19 : vector<32x128xf32>
      %cst_18 = arith.constant 0.000000e+00 : f32
      %21 = vector.broadcast %cst_18 : f32 to vector<32x128xf32>
      %22 = arith.maximumf %20, %21 : vector<32x128xf32>
      %c0_19 = arith.constant 0 : index
      %c0_20 = arith.constant 0 : index
      %23 = vector.load %arg8[%c0_19, %c0_20] : memref<32x128xf32, #tpu.memory_space<vmem>>, vector<32x128xf32>
      tpu.vector_store %arg8[%c0_19, %c0_20], %22 {strides = array<i32>} : memref<32x128xf32, #tpu.memory_space<vmem>>, vector<32x128xf32>,
    } else {
    }
    return
  }
  func.func @transform_0(%arg0: i32, %arg1: i32, %arg2: i32) -> (i32, i32) {
    %c0_i32 = arith.constant 0 : i32
    return %arg0, %arg2 : i32, i32
  }
  func.func @transform_1(%arg0: i32, %arg1: i32, %arg2: i32) -> (i32, i32) {
    %c0_i32 = arith.constant 0 : i32
    return %arg2, %arg1 : i32, i32
  }
  func.func @transform_2(%arg0: i32, %arg1: i32, %arg2: i32) -> (i32, i32) {
    %c0_i32 = arith.constant 0 : i32
    %c0_i32_0 = arith.constant 0 : i32
    return %c0_i32, %arg1 : i32, i32
  }
  func.func @transform_3(%arg0: i32, %arg1: i32, %arg2: i32) -> (i32, i32) {
    %c0_i32 = arith.constant 0 : i32
    %c0_i32_0 = arith.constant 0 : i32
    return %c0_i32, %arg1 : i32, i32
  }
  func.func @transform_4(%arg0: i32, %arg1: i32, %arg2: i32) -> (i32, i32) {
    %c0_i32 = arith.constant 0 : i32
    return %arg0, %arg1 : i32, i32
  }
  func.func @transform_5(%arg0: i32, %arg1: i32, %arg2: i32) -> (i32, i32) {
    %c0_i32 = arith.constant 0 : i32
    return %arg0, %arg1 : i32, i32
  }
}

module attributes {stable_mosaic.version = 11 : i64} {
  func.func @_gemm_fused_kernel(%arg0: i32, %arg1: i32, %arg2: i32, %arg3: memref<32x128xbf16, #tpu.memory_space<vmem>>, %arg4: memref<128x128xbf16, #tpu.memory_space<vmem>>, %arg5: memref<1x128xf32, #tpu.memory_space<vmem>>, %arg6: memref<1x128xf32, #tpu.memory_space<vmem>>, %arg7: memref<32x128xf32, #tpu.memory_space<vmem>>, %arg8: memref<32x128xf32, #tpu.memory_space<vmem>>) attributes {dimension_semantics = [#tpu.dimension_semantics<parallel>, #tpu.dimension_semantics<parallel>, #tpu.dimension_semantics<arbitrary>], iteration_bounds = array<i64: 1, 1, 1>, scalar_prefetch = 0 : i64, scratch_operands = 1 : i64, tpu.core_type = #tpu.core_type<tc>, window_params = [{transform_indices = @transform_0, window_bounds = array<i64: 32, 128>}, {transform_indices = @transform_1, window_bounds = array<i64: 128, 128>}, {transform_indices = @transform_2, window_bounds = array<i64: 1, 128>}, {transform_indices = @transform_3, window_bounds = array<i64: 1, 128>}, {transform_indices = @transform_4, window_bounds = array<i64: 32, 128>}]} {
    %c0_i32 = arith.constant 0 : i32
    %0 = arith.cmpi eq, %arg2, %c0_i32 : i32
    %1 = arith.extui %0 : i1 to i32
    %c0_i32_0 = arith.constant 0 : i32
    %2 = arith.cmpi ne, %1, %c0_i32_0 : i32
    scf.if %2 {
      %cst_10 = arith.constant 0.000000e+00 : f32
      %12 = vector.broadcast %cst_10 : f32 to vector<32x128xf32>
      %c0_11 = arith.constant 0 : index
      %c0_12 = arith.constant 0 : index
      %13 = vector.load %arg8[%c0_11, %c0_12] : memref<32x128xf32, #tpu.memory_space<vmem>>, vector<32x128xf32>
      tpu.vector_store %arg8[%c0_11, %c0_12], %12 {strides = array<i32>} : memref<32x128xf32, #tpu.memory_space<vmem>>, vector<32x128xf32>,
    } else {
    }
    %c0 = arith.constant 0 : index
    %c0_1 = arith.constant 0 : index
    %3 = vector.load %arg8[%c0, %c0_1] : memref<32x128xf32, #tpu.memory_space<vmem>>, vector<32x128xf32>
    %c0_2 = arith.constant 0 : index
    %c0_3 = arith.constant 0 : index
    %4 = vector.load %arg3[%c0_2, %c0_3] : memref<32x128xbf16, #tpu.memory_space<vmem>>, vector<32x128xbf16>
    %c0_4 = arith.constant 0 : index
    %c0_5 = arith.constant 0 : index
    %5 = vector.load %arg4[%c0_4, %c0_5] : memref<128x128xbf16, #tpu.memory_space<vmem>>, vector<128x128xbf16>
    %cst = arith.constant dense<0.000000e+00> : vector<32x128xf32>
    %6 = tpu.matmul %4, %5, %cst {dimension_numbers = #tpu.dot_dimension_numbers<[1], [0], [0], [1], [0, 0, 1, 1], [], []>} : vector<32x128xbf16>, vector<128x128xbf16>, vector<32x128xf32> -> vector<32x128xf32>
    %7 = arith.addf %3, %6 : vector<32x128xf32>
    %c0_6 = arith.constant 0 : index
    %c0_7 = arith.constant 0 : index
    %8 = vector.load %arg8[%c0_6, %c0_7] : memref<32x128xf32, #tpu.memory_space<vmem>>, vector<32x128xf32>
    tpu.vector_store %arg8[%c0_6, %c0_7], %7 {strides = array<i32>} : memref<32x128xf32, #tpu.memory_space<vmem>>, vector<32x128xf32>,
    %c0_i32_8 = arith.constant 0 : i32
    %9 = arith.cmpi eq, %arg2, %c0_i32_8 : i32
    %10 = arith.extui %9 : i1 to i32
    %c0_i32_9 = arith.constant 0 : i32
    %11 = arith.cmpi ne, %10, %c0_i32_9 : i32
    scf.if %11 {
      %c0_10 = arith.constant 0 : index
      %c0_11 = arith.constant 0 : index
      %12 = vector.load %arg8[%c0_10, %c0_11] : memref<32x128xf32, #tpu.memory_space<vmem>>, vector<32x128xf32>
      %c0_12 = arith.constant 0 : index
      %c0_13 = arith.constant 0 : index
      %13 = vector.load %arg5[%c0_12, %c0_13] : memref<1x128xf32, #tpu.memory_space<vmem>>, vector<1x128xf32>
      %14 = vector.broadcast %13 : vector<1x128xf32> to vector<32x128xf32>
      %15 = arith.mulf %12, %14 : vector<32x128xf32>
      %c0_14 = arith.constant 0 : index
      %c0_15 = arith.constant 0 : index
      %16 = vector.load %arg6[%c0_14, %c0_15] : memref<1x128xf32, #tpu.memory_space<vmem>>, vector<1x128xf32>
      %17 = vector.broadcast %16 : vector<1x128xf32> to vector<32x128xf32>
      %18 = arith.addf %15, %17 : vector<32x128xf32>
      %c0_16 = arith.constant 0 : index
      %c0_17 = arith.constant 0 : index
      %19 = vector.load %arg7[%c0_16, %c0_17] : memref<32x128xf32, #tpu.memory_space<vmem>>, vector<32x128xf32>
      tpu.vector_store %arg7[%c0_16, %c0_17], %18 {strides = array<i32>} : memref<32x128xf32, #tpu.memory_space<vmem>>, vector<32x128xf32>,
    } else {
    }
    return
  }
  func.func @transform_0(%arg0: i32, %arg1: i32, %arg2: i32) -> (i32, i32) {
    %c0_i32 = arith.constant 0 : i32
    return %arg0, %arg2 : i32, i32
  }
  func.func @transform_1(%arg0: i32, %arg1: i32, %arg2: i32) -> (i32, i32) {
    %c0_i32 = arith.constant 0 : i32
    return %arg2, %arg1 : i32, i32
  }
  func.func @transform_2(%arg0: i32, %arg1: i32, %arg2: i32) -> (i32, i32) {
    %c0_i32 = arith.constant 0 : i32
    %c0_i32_0 = arith.constant 0 : i32
    return %c0_i32, %arg1 : i32, i32
  }
  func.func @transform_3(%arg0: i32, %arg1: i32, %arg2: i32) -> (i32, i32) {
    %c0_i32 = arith.constant 0 : i32
    %c0_i32_0 = arith.constant 0 : i32
    return %c0_i32, %arg1 : i32, i32
  }
  func.func @transform_4(%arg0: i32, %arg1: i32, %arg2: i32) -> (i32, i32) {
    %c0_i32 = arith.constant 0 : i32
    return %arg0, %arg1 : i32, i32
  }
}

module attributes {stable_mosaic.version = 11 : i64} {
  func.func @_gemm_fused_kernel(%arg0: i32, %arg1: i32, %arg2: i32, %arg3: memref<32x128xbf16, #tpu.memory_space<vmem>>, %arg4: memref<128x128xbf16, #tpu.memory_space<vmem>>, %arg5: memref<1x128xf32, #tpu.memory_space<vmem>>, %arg6: memref<1x128xf32, #tpu.memory_space<vmem>>, %arg7: memref<32x128xf32, #tpu.memory_space<vmem>>, %arg8: memref<32x128xf32, #tpu.memory_space<vmem>>, %arg9: memref<32x128xf32, #tpu.memory_space<vmem>>) attributes {dimension_semantics = [#tpu.dimension_semantics<parallel>, #tpu.dimension_semantics<parallel>, #tpu.dimension_semantics<arbitrary>], iteration_bounds = array<i64: 1, 1, 1>, scalar_prefetch = 0 : i64, scratch_operands = 1 : i64, tpu.core_type = #tpu.core_type<tc>, window_params = [{transform_indices = @transform_0, window_bounds = array<i64: 32, 128>}, {transform_indices = @transform_1, window_bounds = array<i64: 128, 128>}, {transform_indices = @transform_2, window_bounds = array<i64: 1, 128>}, {transform_indices = @transform_3, window_bounds = array<i64: 1, 128>}, {transform_indices = @transform_4, window_bounds = array<i64: 32, 128>}, {transform_indices = @transform_5, window_bounds = array<i64: 32, 128>}]} {
    %c0_i32 = arith.constant 0 : i32
    %0 = arith.cmpi eq, %arg2, %c0_i32 : i32
    %1 = arith.extui %0 : i1 to i32
    %c0_i32_0 = arith.constant 0 : i32
    %2 = arith.cmpi ne, %1, %c0_i32_0 : i32
    scf.if %2 {
      %cst_10 = arith.constant 0.000000e+00 : f32
      %12 = vector.broadcast %cst_10 : f32 to vector<32x128xf32>
      %c0_11 = arith.constant 0 : index
      %c0_12 = arith.constant 0 : index
      %13 = vector.load %arg9[%c0_11, %c0_12] : memref<32x128xf32, #tpu.memory_space<vmem>>, vector<32x128xf32>
      tpu.vector_store %arg9[%c0_11, %c0_12], %12 {strides = array<i32>} : memref<32x128xf32, #tpu.memory_space<vmem>>, vector<32x128xf32>,
    } else {
    }
    %c0 = arith.constant 0 : index
    %c0_1 = arith.constant 0 : index
    %3 = vector.load %arg9[%c0, %c0_1] : memref<32x128xf32, #tpu.memory_space<vmem>>, vector<32x128xf32>
    %c0_2 = arith.constant 0 : index
    %c0_3 = arith.constant 0 : index
    %4 = vector.load %arg3[%c0_2, %c0_3] : memref<32x128xbf16, #tpu.memory_space<vmem>>, vector<32x128xbf16>
    %c0_4 = arith.constant 0 : index
    %c0_5 = arith.constant 0 : index
    %5 = vector.load %arg4[%c0_4, %c0_5] : memref<128x128xbf16, #tpu.memory_space<vmem>>, vector<128x128xbf16>
    %cst = arith.constant dense<0.000000e+00> : vector<32x128xf32>
    %6 = tpu.matmul %4, %5, %cst {dimension_numbers = #tpu.dot_dimension_numbers<[1], [0], [0], [1], [0, 0, 1, 1], [], []>} : vector<32x128xbf16>, vector<128x128xbf16>, vector<32x128xf32> -> vector<32x128xf32>
    %7 = arith.addf %3, %6 : vector<32x128xf32>
    %c0_6 = arith.constant 0 : index
    %c0_7 = arith.constant 0 : index
    %8 = vector.load %arg9[%c0_6, %c0_7] : memref<32x128xf32, #tpu.memory_space<vmem>>, vector<32x128xf32>
    tpu.vector_store %arg9[%c0_6, %c0_7], %7 {strides = array<i32>} : memref<32x128xf32, #tpu.memory_space<vmem>>, vector<32x128xf32>,
    %c0_i32_8 = arith.constant 0 : i32
    %9 = arith.cmpi eq, %arg2, %c0_i32_8 : i32
    %10 = arith.extui %9 : i1 to i32
    %c0_i32_9 = arith.constant 0 : i32
    %11 = arith.cmpi ne, %10, %c0_i32_9 : i32
    scf.if %11 {
      %c0_10 = arith.constant 0 : index
      %c0_11 = arith.constant 0 : index
      %12 = vector.load %arg9[%c0_10, %c0_11] : memref<32x128xf32, #tpu.memory_space<vmem>>, vector<32x128xf32>
      %c0_12 = arith.constant 0 : index
      %c0_13 = arith.constant 0 : index
      %13 = vector.load %arg5[%c0_12, %c0_13] : memref<1x128xf32, #tpu.memory_space<vmem>>, vector<1x128xf32>
      %14 = vector.broadcast %13 : vector<1x128xf32> to vector<32x128xf32>
      %15 = arith.mulf %12, %14 : vector<32x128xf32>
      %c0_14 = arith.constant 0 : index
      %c0_15 = arith.constant 0 : index
      %16 = vector.load %arg6[%c0_14, %c0_15] : memref<1x128xf32, #tpu.memory_space<vmem>>, vector<1x128xf32>
      %17 = vector.broadcast %16 : vector<1x128xf32> to vector<32x128xf32>
      %18 = arith.addf %15, %17 : vector<32x128xf32>
      %c0_16 = arith.constant 0 : index
      %c0_17 = arith.constant 0 : index
      %19 = vector.load %arg7[%c0_16, %c0_17] : memref<32x128xf32, #tpu.memory_space<vmem>>, vector<32x128xf32>
      %20 = arith.addf %18, %19 : vector<32x128xf32>
      %cst_18 = arith.constant 0.000000e+00 : f32
      %21 = vector.broadcast %cst_18 : f32 to vector<32x128xf32>
      %22 = arith.maximumf %20, %21 : vector<32x128xf32>
      %c0_19 = arith.constant 0 : index
      %c0_20 = arith.constant 0 : index
      %23 = vector.load %arg8[%c0_19, %c0_20] : memref<32x128xf32, #tpu.memory_space<vmem>>, vector<32x128xf32>
      tpu.vector_store %arg8[%c0_19, %c0_20], %22 {strides = array<i32>} : memref<32x128xf32, #tpu.memory_space<vmem>>, vector<32x128xf32>,
    } else {
    }
    return
  }
  func.func @transform_0(%arg0: i32, %arg1: i32, %arg2: i32) -> (i32, i32) {
    %c0_i32 = arith.constant 0 : i32
    return %arg0, %arg2 : i32, i32
  }
  func.func @transform_1(%arg0: i32, %arg1: i32, %arg2: i32) -> (i32, i32) {
    %c0_i32 = arith.constant 0 : i32
    return %arg2, %arg1 : i32, i32
  }
  func.func @transform_2(%arg0: i32, %arg1: i32, %arg2: i32) -> (i32, i32) {
    %c0_i32 = arith.constant 0 : i32
    %c0_i32_0 = arith.constant 0 : i32
    return %c0_i32, %arg1 : i32, i32
  }
  func.func @transform_3(%arg0: i32, %arg1: i32, %arg2: i32) -> (i32, i32) {
    %c0_i32 = arith.constant 0 : i32
    %c0_i32_0 = arith.constant 0 : i32
    return %c0_i32, %arg1 : i32, i32
  }
  func.func @transform_4(%arg0: i32, %arg1: i32, %arg2: i32) -> (i32, i32) {
    %c0_i32 = arith.constant 0 : i32
    return %arg0, %arg1 : i32, i32
  }
  func.func @transform_5(%arg0: i32, %arg1: i32, %arg2: i32) -> (i32, i32) {
    %c0_i32 = arith.constant 0 : i32
    return %arg0, %arg1 : i32, i32
  }
}

module attributes {stable_mosaic.version = 11 : i64} {
  func.func @_gemm_fused_kernel(%arg0: i32, %arg1: i32, %arg2: i32, %arg3: memref<32x256xbf16, #tpu.memory_space<vmem>>, %arg4: memref<256x128xbf16, #tpu.memory_space<vmem>>, %arg5: memref<1x128xf32, #tpu.memory_space<vmem>>, %arg6: memref<1x128xf32, #tpu.memory_space<vmem>>, %arg7: memref<32x128xf32, #tpu.memory_space<vmem>>, %arg8: memref<32x128xf32, #tpu.memory_space<vmem>>) attributes {dimension_semantics = [#tpu.dimension_semantics<parallel>, #tpu.dimension_semantics<parallel>, #tpu.dimension_semantics<arbitrary>], iteration_bounds = array<i64: 1, 1, 1>, scalar_prefetch = 0 : i64, scratch_operands = 1 : i64, tpu.core_type = #tpu.core_type<tc>, window_params = [{transform_indices = @transform_0, window_bounds = array<i64: 32, 256>}, {transform_indices = @transform_1, window_bounds = array<i64: 256, 128>}, {transform_indices = @transform_2, window_bounds = array<i64: 1, 128>}, {transform_indices = @transform_3, window_bounds = array<i64: 1, 128>}, {transform_indices = @transform_4, window_bounds = array<i64: 32, 128>}]} {
    %c0_i32 = arith.constant 0 : i32
    %0 = arith.cmpi eq, %arg2, %c0_i32 : i32
    %1 = arith.extui %0 : i1 to i32
    %c0_i32_0 = arith.constant 0 : i32
    %2 = arith.cmpi ne, %1, %c0_i32_0 : i32
    scf.if %2 {
      %cst_10 = arith.constant 0.000000e+00 : f32
      %12 = vector.broadcast %cst_10 : f32 to vector<32x128xf32>
      %c0_11 = arith.constant 0 : index
      %c0_12 = arith.constant 0 : index
      %13 = vector.load %arg8[%c0_11, %c0_12] : memref<32x128xf32, #tpu.memory_space<vmem>>, vector<32x128xf32>
      tpu.vector_store %arg8[%c0_11, %c0_12], %12 {strides = array<i32>} : memref<32x128xf32, #tpu.memory_space<vmem>>, vector<32x128xf32>,
    } else {
    }
    %c0 = arith.constant 0 : index
    %c0_1 = arith.constant 0 : index
    %3 = vector.load %arg8[%c0, %c0_1] : memref<32x128xf32, #tpu.memory_space<vmem>>, vector<32x128xf32>
    %c0_2 = arith.constant 0 : index
    %c0_3 = arith.constant 0 : index
    %4 = vector.load %arg3[%c0_2, %c0_3] : memref<32x256xbf16, #tpu.memory_space<vmem>>, vector<32x256xbf16>
    %c0_4 = arith.constant 0 : index
    %c0_5 = arith.constant 0 : index
    %5 = vector.load %arg4[%c0_4, %c0_5] : memref<256x128xbf16, #tpu.memory_space<vmem>>, vector<256x128xbf16>
    %cst = arith.constant dense<0.000000e+00> : vector<32x128xf32>
    %6 = tpu.matmul %4, %5, %cst {dimension_numbers = #tpu.dot_dimension_numbers<[1], [0], [0], [1], [0, 0, 1, 1], [], []>} : vector<32x256xbf16>, vector<256x128xbf16>, vector<32x128xf32> -> vector<32x128xf32>
    %7 = arith.addf %3, %6 : vector<32x128xf32>
    %c0_6 = arith.constant 0 : index
    %c0_7 = arith.constant 0 : index
    %8 = vector.load %arg8[%c0_6, %c0_7] : memref<32x128xf32, #tpu.memory_space<vmem>>, vector<32x128xf32>
    tpu.vector_store %arg8[%c0_6, %c0_7], %7 {strides = array<i32>} : memref<32x128xf32, #tpu.memory_space<vmem>>, vector<32x128xf32>,
    %c0_i32_8 = arith.constant 0 : i32
    %9 = arith.cmpi eq, %arg2, %c0_i32_8 : i32
    %10 = arith.extui %9 : i1 to i32
    %c0_i32_9 = arith.constant 0 : i32
    %11 = arith.cmpi ne, %10, %c0_i32_9 : i32
    scf.if %11 {
      %c0_10 = arith.constant 0 : index
      %c0_11 = arith.constant 0 : index
      %12 = vector.load %arg8[%c0_10, %c0_11] : memref<32x128xf32, #tpu.memory_space<vmem>>, vector<32x128xf32>
      %c0_12 = arith.constant 0 : index
      %c0_13 = arith.constant 0 : index
      %13 = vector.load %arg5[%c0_12, %c0_13] : memref<1x128xf32, #tpu.memory_space<vmem>>, vector<1x128xf32>
      %14 = vector.broadcast %13 : vector<1x128xf32> to vector<32x128xf32>
      %15 = arith.mulf %12, %14 : vector<32x128xf32>
      %c0_14 = arith.constant 0 : index
      %c0_15 = arith.constant 0 : index
      %16 = vector.load %arg6[%c0_14, %c0_15] : memref<1x128xf32, #tpu.memory_space<vmem>>, vector<1x128xf32>
      %17 = vector.broadcast %16 : vector<1x128xf32> to vector<32x128xf32>
      %18 = arith.addf %15, %17 : vector<32x128xf32>
      %cst_16 = arith.constant 0.000000e+00 : f32
      %19 = vector.broadcast %cst_16 : f32 to vector<32x128xf32>
      %20 = arith.maximumf %18, %19 : vector<32x128xf32>
      %c0_17 = arith.constant 0 : index
      %c0_18 = arith.constant 0 : index
      %21 = vector.load %arg7[%c0_17, %c0_18] : memref<32x128xf32, #tpu.memory_space<vmem>>, vector<32x128xf32>
      tpu.vector_store %arg7[%c0_17, %c0_18], %20 {strides = array<i32>} : memref<32x128xf32, #tpu.memory_space<vmem>>, vector<32x128xf32>,
    } else {
    }
    return
  }
  func.func @transform_0(%arg0: i32, %arg1: i32, %arg2: i32) -> (i32, i32) {
    %c0_i32 = arith.constant 0 : i32
    return %arg0, %arg2 : i32, i32
  }
  func.func @transform_1(%arg0: i32, %arg1: i32, %arg2: i32) -> (i32, i32) {
    %c0_i32 = arith.constant 0 : i32
    return %arg2, %arg1 : i32, i32
  }
  func.func @transform_2(%arg0: i32, %arg1: i32, %arg2: i32) -> (i32, i32) {
    %c0_i32 = arith.constant 0 : i32
    %c0_i32_0 = arith.constant 0 : i32
    return %c0_i32, %arg1 : i32, i32
  }
  func.func @transform_3(%arg0: i32, %arg1: i32, %arg2: i32) -> (i32, i32) {
    %c0_i32 = arith.constant 0 : i32
    %c0_i32_0 = arith.constant 0 : i32
    return %c0_i32, %arg1 : i32, i32
  }
  func.func @transform_4(%arg0: i32, %arg1: i32, %arg2: i32) -> (i32, i32) {
    %c0_i32 = arith.constant 0 : i32
    return %arg0, %arg1 : i32, i32
  }
}

module attributes {stable_mosaic.version = 11 : i64} {
  func.func @_gemm_fused_kernel(%arg0: i32, %arg1: i32, %arg2: i32, %arg3: memref<8x384xbf16, #tpu.memory_space<vmem>>, %arg4: memref<384x128xbf16, #tpu.memory_space<vmem>>, %arg5: memref<1x128xf32, #tpu.memory_space<vmem>>, %arg6: memref<1x128xf32, #tpu.memory_space<vmem>>, %arg7: memref<8x128xf32, #tpu.memory_space<vmem>>, %arg8: memref<8x128xf32, #tpu.memory_space<vmem>>) attributes {dimension_semantics = [#tpu.dimension_semantics<parallel>, #tpu.dimension_semantics<parallel>, #tpu.dimension_semantics<arbitrary>], iteration_bounds = array<i64: 1, 1, 1>, scalar_prefetch = 0 : i64, scratch_operands = 1 : i64, tpu.core_type = #tpu.core_type<tc>, window_params = [{transform_indices = @transform_0, window_bounds = array<i64: 8, 384>}, {transform_indices = @transform_1, window_bounds = array<i64: 384, 128>}, {transform_indices = @transform_2, window_bounds = array<i64: 1, 128>}, {transform_indices = @transform_3, window_bounds = array<i64: 1, 128>}, {transform_indices = @transform_4, window_bounds = array<i64: 8, 128>}]} {
    %c0_i32 = arith.constant 0 : i32
    %0 = arith.cmpi eq, %arg2, %c0_i32 : i32
    %1 = arith.extui %0 : i1 to i32
    %c0_i32_0 = arith.constant 0 : i32
    %2 = arith.cmpi ne, %1, %c0_i32_0 : i32
    scf.if %2 {
      %cst_10 = arith.constant 0.000000e+00 : f32
      %12 = vector.broadcast %cst_10 : f32 to vector<8x128xf32>
      %c0_11 = arith.constant 0 : index
      %c0_12 = arith.constant 0 : index
      %13 = vector.load %arg8[%c0_11, %c0_12] : memref<8x128xf32, #tpu.memory_space<vmem>>, vector<8x128xf32>
      tpu.vector_store %arg8[%c0_11, %c0_12], %12 {strides = array<i32>} : memref<8x128xf32, #tpu.memory_space<vmem>>, vector<8x128xf32>,
    } else {
    }
    %c0 = arith.constant 0 : index
    %c0_1 = arith.constant 0 : index
    %3 = vector.load %arg8[%c0, %c0_1] : memref<8x128xf32, #tpu.memory_space<vmem>>, vector<8x128xf32>
    %c0_2 = arith.constant 0 : index
    %c0_3 = arith.constant 0 : index
    %4 = vector.load %arg3[%c0_2, %c0_3] : memref<8x384xbf16, #tpu.memory_space<vmem>>, vector<8x384xbf16>
    %c0_4 = arith.constant 0 : index
    %c0_5 = arith.constant 0 : index
    %5 = vector.load %arg4[%c0_4, %c0_5] : memref<384x128xbf16, #tpu.memory_space<vmem>>, vector<384x128xbf16>
    %cst = arith.constant dense<0.000000e+00> : vector<8x128xf32>
    %6 = tpu.matmul %4, %5, %cst {dimension_numbers = #tpu.dot_dimension_numbers<[1], [0], [0], [1], [0, 0, 1, 1], [], []>} : vector<8x384xbf16>, vector<384x128xbf16>, vector<8x128xf32> -> vector<8x128xf32>
    %7 = arith.addf %3, %6 : vector<8x128xf32>
    %c0_6 = arith.constant 0 : index
    %c0_7 = arith.constant 0 : index
    %8 = vector.load %arg8[%c0_6, %c0_7] : memref<8x128xf32, #tpu.memory_space<vmem>>, vector<8x128xf32>
    tpu.vector_store %arg8[%c0_6, %c0_7], %7 {strides = array<i32>} : memref<8x128xf32, #tpu.memory_space<vmem>>, vector<8x128xf32>,
    %c0_i32_8 = arith.constant 0 : i32
    %9 = arith.cmpi eq, %arg2, %c0_i32_8 : i32
    %10 = arith.extui %9 : i1 to i32
    %c0_i32_9 = arith.constant 0 : i32
    %11 = arith.cmpi ne, %10, %c0_i32_9 : i32
    scf.if %11 {
      %c0_10 = arith.constant 0 : index
      %c0_11 = arith.constant 0 : index
      %12 = vector.load %arg8[%c0_10, %c0_11] : memref<8x128xf32, #tpu.memory_space<vmem>>, vector<8x128xf32>
      %c0_12 = arith.constant 0 : index
      %c0_13 = arith.constant 0 : index
      %13 = vector.load %arg5[%c0_12, %c0_13] : memref<1x128xf32, #tpu.memory_space<vmem>>, vector<1x128xf32>
      %14 = vector.broadcast %13 : vector<1x128xf32> to vector<8x128xf32>
      %15 = arith.mulf %12, %14 : vector<8x128xf32>
      %c0_14 = arith.constant 0 : index
      %c0_15 = arith.constant 0 : index
      %16 = vector.load %arg6[%c0_14, %c0_15] : memref<1x128xf32, #tpu.memory_space<vmem>>, vector<1x128xf32>
      %17 = vector.broadcast %16 : vector<1x128xf32> to vector<8x128xf32>
      %18 = arith.addf %15, %17 : vector<8x128xf32>
      %cst_16 = arith.constant 0.000000e+00 : f32
      %19 = vector.broadcast %cst_16 : f32 to vector<8x128xf32>
      %20 = arith.maximumf %18, %19 : vector<8x128xf32>
      %c0_17 = arith.constant 0 : index
      %c0_18 = arith.constant 0 : index
      %21 = vector.load %arg7[%c0_17, %c0_18] : memref<8x128xf32, #tpu.memory_space<vmem>>, vector<8x128xf32>
      tpu.vector_store %arg7[%c0_17, %c0_18], %20 {strides = array<i32>} : memref<8x128xf32, #tpu.memory_space<vmem>>, vector<8x128xf32>,
    } else {
    }
    return
  }
  func.func @transform_0(%arg0: i32, %arg1: i32, %arg2: i32) -> (i32, i32) {
    %c0_i32 = arith.constant 0 : i32
    return %arg0, %arg2 : i32, i32
  }
  func.func @transform_1(%arg0: i32, %arg1: i32, %arg2: i32) -> (i32, i32) {
    %c0_i32 = arith.constant 0 : i32
    return %arg2, %arg1 : i32, i32
  }
  func.func @transform_2(%arg0: i32, %arg1: i32, %arg2: i32) -> (i32, i32) {
    %c0_i32 = arith.constant 0 : i32
    %c0_i32_0 = arith.constant 0 : i32
    return %c0_i32, %arg1 : i32, i32
  }
  func.func @transform_3(%arg0: i32, %arg1: i32, %arg2: i32) -> (i32, i32) {
    %c0_i32 = arith.constant 0 : i32
    %c0_i32_0 = arith.constant 0 : i32
    return %c0_i32, %arg1 : i32, i32
  }
  func.func @transform_4(%arg0: i32, %arg1: i32, %arg2: i32) -> (i32, i32) {
    %c0_i32 = arith.constant 0 : i32
    return %arg0, %arg1 : i32, i32
  }
}

module attributes {stable_mosaic.version = 11 : i64} {
  func.func @_gemm_fused_kernel(%arg0: i32, %arg1: i32, %arg2: i32, %arg3: memref<8x128xbf16, #tpu.memory_space<vmem>>, %arg4: memref<128x128xbf16, #tpu.memory_space<vmem>>, %arg5: memref<1x128xf32, #tpu.memory_space<vmem>>, %arg6: memref<1x128xf32, #tpu.memory_space<vmem>>, %arg7: memref<8x128xf32, #tpu.memory_space<vmem>>, %arg8: memref<8x128xf32, #tpu.memory_space<vmem>>) attributes {dimension_semantics = [#tpu.dimension_semantics<parallel>, #tpu.dimension_semantics<parallel>, #tpu.dimension_semantics<arbitrary>], iteration_bounds = array<i64: 1, 1, 1>, scalar_prefetch = 0 : i64, scratch_operands = 1 : i64, tpu.core_type = #tpu.core_type<tc>, window_params = [{transform_indices = @transform_0, window_bounds = array<i64: 8, 128>}, {transform_indices = @transform_1, window_bounds = array<i64: 128, 128>}, {transform_indices = @transform_2, window_bounds = array<i64: 1, 128>}, {transform_indices = @transform_3, window_bounds = array<i64: 1, 128>}, {transform_indices = @transform_4, window_bounds = array<i64: 8, 128>}]} {
    %c0_i32 = arith.constant 0 : i32
    %0 = arith.cmpi eq, %arg2, %c0_i32 : i32
    %1 = arith.extui %0 : i1 to i32
    %c0_i32_0 = arith.constant 0 : i32
    %2 = arith.cmpi ne, %1, %c0_i32_0 : i32
    scf.if %2 {
      %cst_10 = arith.constant 0.000000e+00 : f32
      %12 = vector.broadcast %cst_10 : f32 to vector<8x128xf32>
      %c0_11 = arith.constant 0 : index
      %c0_12 = arith.constant 0 : index
      %13 = vector.load %arg8[%c0_11, %c0_12] : memref<8x128xf32, #tpu.memory_space<vmem>>, vector<8x128xf32>
      tpu.vector_store %arg8[%c0_11, %c0_12], %12 {strides = array<i32>} : memref<8x128xf32, #tpu.memory_space<vmem>>, vector<8x128xf32>,
    } else {
    }
    %c0 = arith.constant 0 : index
    %c0_1 = arith.constant 0 : index
    %3 = vector.load %arg8[%c0, %c0_1] : memref<8x128xf32, #tpu.memory_space<vmem>>, vector<8x128xf32>
    %c0_2 = arith.constant 0 : index
    %c0_3 = arith.constant 0 : index
    %4 = vector.load %arg3[%c0_2, %c0_3] : memref<8x128xbf16, #tpu.memory_space<vmem>>, vector<8x128xbf16>
    %c0_4 = arith.constant 0 : index
    %c0_5 = arith.constant 0 : index
    %5 = vector.load %arg4[%c0_4, %c0_5] : memref<128x128xbf16, #tpu.memory_space<vmem>>, vector<128x128xbf16>
    %cst = arith.constant dense<0.000000e+00> : vector<8x128xf32>
    %6 = tpu.matmul %4, %5, %cst {dimension_numbers = #tpu.dot_dimension_numbers<[1], [0], [0], [1], [0, 0, 1, 1], [], []>} : vector<8x128xbf16>, vector<128x128xbf16>, vector<8x128xf32> -> vector<8x128xf32>
    %7 = arith.addf %3, %6 : vector<8x128xf32>
    %c0_6 = arith.constant 0 : index
    %c0_7 = arith.constant 0 : index
    %8 = vector.load %arg8[%c0_6, %c0_7] : memref<8x128xf32, #tpu.memory_space<vmem>>, vector<8x128xf32>
    tpu.vector_store %arg8[%c0_6, %c0_7], %7 {strides = array<i32>} : memref<8x128xf32, #tpu.memory_space<vmem>>, vector<8x128xf32>,
    %c0_i32_8 = arith.constant 0 : i32
    %9 = arith.cmpi eq, %arg2, %c0_i32_8 : i32
    %10 = arith.extui %9 : i1 to i32
    %c0_i32_9 = arith.constant 0 : i32
    %11 = arith.cmpi ne, %10, %c0_i32_9 : i32
    scf.if %11 {
      %c0_10 = arith.constant 0 : index
      %c0_11 = arith.constant 0 : index
      %12 = vector.load %arg8[%c0_10, %c0_11] : memref<8x128xf32, #tpu.memory_space<vmem>>, vector<8x128xf32>
      %c0_12 = arith.constant 0 : index
      %c0_13 = arith.constant 0 : index
      %13 = vector.load %arg5[%c0_12, %c0_13] : memref<1x128xf32, #tpu.memory_space<vmem>>, vector<1x128xf32>
      %14 = vector.broadcast %13 : vector<1x128xf32> to vector<8x128xf32>
      %15 = arith.mulf %12, %14 : vector<8x128xf32>
      %c0_14 = arith.constant 0 : index
      %c0_15 = arith.constant 0 : index
      %16 = vector.load %arg6[%c0_14, %c0_15] : memref<1x128xf32, #tpu.memory_space<vmem>>, vector<1x128xf32>
      %17 = vector.broadcast %16 : vector<1x128xf32> to vector<8x128xf32>
      %18 = arith.addf %15, %17 : vector<8x128xf32>
      %c0_16 = arith.constant 0 : index
      %c0_17 = arith.constant 0 : index
      %19 = vector.load %arg7[%c0_16, %c0_17] : memref<8x128xf32, #tpu.memory_space<vmem>>, vector<8x128xf32>
      tpu.vector_store %arg7[%c0_16, %c0_17], %18 {strides = array<i32>} : memref<8x128xf32, #tpu.memory_space<vmem>>, vector<8x128xf32>,
    } else {
    }
    return
  }
  func.func @transform_0(%arg0: i32, %arg1: i32, %arg2: i32) -> (i32, i32) {
    %c0_i32 = arith.constant 0 : i32
    return %arg0, %arg2 : i32, i32
  }
  func.func @transform_1(%arg0: i32, %arg1: i32, %arg2: i32) -> (i32, i32) {
    %c0_i32 = arith.constant 0 : i32
    return %arg2, %arg1 : i32, i32
  }
  func.func @transform_2(%arg0: i32, %arg1: i32, %arg2: i32) -> (i32, i32) {
    %c0_i32 = arith.constant 0 : i32
    %c0_i32_0 = arith.constant 0 : i32
    return %c0_i32, %arg1 : i32, i32
  }
  func.func @transform_3(%arg0: i32, %arg1: i32, %arg2: i32) -> (i32, i32) {
    %c0_i32 = arith.constant 0 : i32
    %c0_i32_0 = arith.constant 0 : i32
    return %c0_i32, %arg1 : i32, i32
  }
  func.func @transform_4(%arg0: i32, %arg1: i32, %arg2: i32) -> (i32, i32) {
    %c0_i32 = arith.constant 0 : i32
    return %arg0, %arg1 : i32, i32
  }
}

module attributes {stable_mosaic.version = 11 : i64} {
  func.func @_gemm_fused_kernel(%arg0: i32, %arg1: i32, %arg2: i32, %arg3: memref<8x128xbf16, #tpu.memory_space<vmem>>, %arg4: memref<128x128xbf16, #tpu.memory_space<vmem>>, %arg5: memref<1x128xf32, #tpu.memory_space<vmem>>, %arg6: memref<1x128xf32, #tpu.memory_space<vmem>>, %arg7: memref<8x128xf32, #tpu.memory_space<vmem>>, %arg8: memref<8x128xf32, #tpu.memory_space<vmem>>, %arg9: memref<8x128xf32, #tpu.memory_space<vmem>>) attributes {dimension_semantics = [#tpu.dimension_semantics<parallel>, #tpu.dimension_semantics<parallel>, #tpu.dimension_semantics<arbitrary>], iteration_bounds = array<i64: 1, 1, 1>, scalar_prefetch = 0 : i64, scratch_operands = 1 : i64, tpu.core_type = #tpu.core_type<tc>, window_params = [{transform_indices = @transform_0, window_bounds = array<i64: 8, 128>}, {transform_indices = @transform_1, window_bounds = array<i64: 128, 128>}, {transform_indices = @transform_2, window_bounds = array<i64: 1, 128>}, {transform_indices = @transform_3, window_bounds = array<i64: 1, 128>}, {transform_indices = @transform_4, window_bounds = array<i64: 8, 128>}, {transform_indices = @transform_5, window_bounds = array<i64: 8, 128>}]} {
    %c0_i32 = arith.constant 0 : i32
    %0 = arith.cmpi eq, %arg2, %c0_i32 : i32
    %1 = arith.extui %0 : i1 to i32
    %c0_i32_0 = arith.constant 0 : i32
    %2 = arith.cmpi ne, %1, %c0_i32_0 : i32
    scf.if %2 {
      %cst_10 = arith.constant 0.000000e+00 : f32
      %12 = vector.broadcast %cst_10 : f32 to vector<8x128xf32>
      %c0_11 = arith.constant 0 : index
      %c0_12 = arith.constant 0 : index
      %13 = vector.load %arg9[%c0_11, %c0_12] : memref<8x128xf32, #tpu.memory_space<vmem>>, vector<8x128xf32>
      tpu.vector_store %arg9[%c0_11, %c0_12], %12 {strides = array<i32>} : memref<8x128xf32, #tpu.memory_space<vmem>>, vector<8x128xf32>,
    } else {
    }
    %c0 = arith.constant 0 : index
    %c0_1 = arith.constant 0 : index
    %3 = vector.load %arg9[%c0, %c0_1] : memref<8x128xf32, #tpu.memory_space<vmem>>, vector<8x128xf32>
    %c0_2 = arith.constant 0 : index
    %c0_3 = arith.constant 0 : index
    %4 = vector.load %arg3[%c0_2, %c0_3] : memref<8x128xbf16, #tpu.memory_space<vmem>>, vector<8x128xbf16>
    %c0_4 = arith.constant 0 : index
    %c0_5 = arith.constant 0 : index
    %5 = vector.load %arg4[%c0_4, %c0_5] : memref<128x128xbf16, #tpu.memory_space<vmem>>, vector<128x128xbf16>
    %cst = arith.constant dense<0.000000e+00> : vector<8x128xf32>
    %6 = tpu.matmul %4, %5, %cst {dimension_numbers = #tpu.dot_dimension_numbers<[1], [0], [0], [1], [0, 0, 1, 1], [], []>} : vector<8x128xbf16>, vector<128x128xbf16>, vector<8x128xf32> -> vector<8x128xf32>
    %7 = arith.addf %3, %6 : vector<8x128xf32>
    %c0_6 = arith.constant 0 : index
    %c0_7 = arith.constant 0 : index
    %8 = vector.load %arg9[%c0_6, %c0_7] : memref<8x128xf32, #tpu.memory_space<vmem>>, vector<8x128xf32>
    tpu.vector_store %arg9[%c0_6, %c0_7], %7 {strides = array<i32>} : memref<8x128xf32, #tpu.memory_space<vmem>>, vector<8x128xf32>,
    %c0_i32_8 = arith.constant 0 : i32
    %9 = arith.cmpi eq, %arg2, %c0_i32_8 : i32
    %10 = arith.extui %9 : i1 to i32
    %c0_i32_9 = arith.constant 0 : i32
    %11 = arith.cmpi ne, %10, %c0_i32_9 : i32
    scf.if %11 {
      %c0_10 = arith.constant 0 : index
      %c0_11 = arith.constant 0 : index
      %12 = vector.load %arg9[%c0_10, %c0_11] : memref<8x128xf32, #tpu.memory_space<vmem>>, vector<8x128xf32>
      %c0_12 = arith.constant 0 : index
      %c0_13 = arith.constant 0 : index
      %13 = vector.load %arg5[%c0_12, %c0_13] : memref<1x128xf32, #tpu.memory_space<vmem>>, vector<1x128xf32>
      %14 = vector.broadcast %13 : vector<1x128xf32> to vector<8x128xf32>
      %15 = arith.mulf %12, %14 : vector<8x128xf32>
      %c0_14 = arith.constant 0 : index
      %c0_15 = arith.constant 0 : index
      %16 = vector.load %arg6[%c0_14, %c0_15] : memref<1x128xf32, #tpu.memory_space<vmem>>, vector<1x128xf32>
      %17 = vector.broadcast %16 : vector<1x128xf32> to vector<8x128xf32>
      %18 = arith.addf %15, %17 : vector<8x128xf32>
      %c0_16 = arith.constant 0 : index
      %c0_17 = arith.constant 0 : index
      %19 = vector.load %arg7[%c0_16, %c0_17] : memref<8x128xf32, #tpu.memory_space<vmem>>, vector<8x128xf32>
      %20 = arith.addf %18, %19 : vector<8x128xf32>
      %cst_18 = arith.constant 0.000000e+00 : f32
      %21 = vector.broadcast %cst_18 : f32 to vector<8x128xf32>
      %22 = arith.maximumf %20, %21 : vector<8x128xf32>
      %c0_19 = arith.constant 0 : index
      %c0_20 = arith.constant 0 : index
      %23 = vector.load %arg8[%c0_19, %c0_20] : memref<8x128xf32, #tpu.memory_space<vmem>>, vector<8x128xf32>
      tpu.vector_store %arg8[%c0_19, %c0_20], %22 {strides = array<i32>} : memref<8x128xf32, #tpu.memory_space<vmem>>, vector<8x128xf32>,
    } else {
    }
    return
  }
  func.func @transform_0(%arg0: i32, %arg1: i32, %arg2: i32) -> (i32, i32) {
    %c0_i32 = arith.constant 0 : i32
    return %arg0, %arg2 : i32, i32
  }
  func.func @transform_1(%arg0: i32, %arg1: i32, %arg2: i32) -> (i32, i32) {
    %c0_i32 = arith.constant 0 : i32
    return %arg2, %arg1 : i32, i32
  }
  func.func @transform_2(%arg0: i32, %arg1: i32, %arg2: i32) -> (i32, i32) {
    %c0_i32 = arith.constant 0 : i32
    %c0_i32_0 = arith.constant 0 : i32
    return %c0_i32, %arg1 : i32, i32
  }
  func.func @transform_3(%arg0: i32, %arg1: i32, %arg2: i32) -> (i32, i32) {
    %c0_i32 = arith.constant 0 : i32
    %c0_i32_0 = arith.constant 0 : i32
    return %c0_i32, %arg1 : i32, i32
  }
  func.func @transform_4(%arg0: i32, %arg1: i32, %arg2: i32) -> (i32, i32) {
    %c0_i32 = arith.constant 0 : i32
    return %arg0, %arg1 : i32, i32
  }
  func.func @transform_5(%arg0: i32, %arg1: i32, %arg2: i32) -> (i32, i32) {
    %c0_i32 = arith.constant 0 : i32
    return %arg0, %arg1 : i32, i32
  }
}

module attributes {stable_mosaic.version = 11 : i64} {
  func.func @_gemm_fused_kernel(%arg0: i32, %arg1: i32, %arg2: i32, %arg3: memref<8x384xbf16, #tpu.memory_space<vmem>>, %arg4: memref<384x128xbf16, #tpu.memory_space<vmem>>, %arg5: memref<1x128xf32, #tpu.memory_space<vmem>>, %arg6: memref<1x128xf32, #tpu.memory_space<vmem>>, %arg7: memref<8x128xf32, #tpu.memory_space<vmem>>, %arg8: memref<8x128xf32, #tpu.memory_space<vmem>>) attributes {dimension_semantics = [#tpu.dimension_semantics<parallel>, #tpu.dimension_semantics<parallel>, #tpu.dimension_semantics<arbitrary>], iteration_bounds = array<i64: 1, 1, 1>, scalar_prefetch = 0 : i64, scratch_operands = 1 : i64, tpu.core_type = #tpu.core_type<tc>, window_params = [{transform_indices = @transform_0, window_bounds = array<i64: 8, 384>}, {transform_indices = @transform_1, window_bounds = array<i64: 384, 128>}, {transform_indices = @transform_2, window_bounds = array<i64: 1, 128>}, {transform_indices = @transform_3, window_bounds = array<i64: 1, 128>}, {transform_indices = @transform_4, window_bounds = array<i64: 8, 128>}]} {
    %c0_i32 = arith.constant 0 : i32
    %0 = arith.cmpi eq, %arg2, %c0_i32 : i32
    %1 = arith.extui %0 : i1 to i32
    %c0_i32_0 = arith.constant 0 : i32
    %2 = arith.cmpi ne, %1, %c0_i32_0 : i32
    scf.if %2 {
      %cst_10 = arith.constant 0.000000e+00 : f32
      %12 = vector.broadcast %cst_10 : f32 to vector<8x128xf32>
      %c0_11 = arith.constant 0 : index
      %c0_12 = arith.constant 0 : index
      %13 = vector.load %arg8[%c0_11, %c0_12] : memref<8x128xf32, #tpu.memory_space<vmem>>, vector<8x128xf32>
      tpu.vector_store %arg8[%c0_11, %c0_12], %12 {strides = array<i32>} : memref<8x128xf32, #tpu.memory_space<vmem>>, vector<8x128xf32>,
    } else {
    }
    %c0 = arith.constant 0 : index
    %c0_1 = arith.constant 0 : index
    %3 = vector.load %arg8[%c0, %c0_1] : memref<8x128xf32, #tpu.memory_space<vmem>>, vector<8x128xf32>
    %c0_2 = arith.constant 0 : index
    %c0_3 = arith.constant 0 : index
    %4 = vector.load %arg3[%c0_2, %c0_3] : memref<8x384xbf16, #tpu.memory_space<vmem>>, vector<8x384xbf16>
    %c0_4 = arith.constant 0 : index
    %c0_5 = arith.constant 0 : index
    %5 = vector.load %arg4[%c0_4, %c0_5] : memref<384x128xbf16, #tpu.memory_space<vmem>>, vector<384x128xbf16>
    %cst = arith.constant dense<0.000000e+00> : vector<8x128xf32>
    %6 = tpu.matmul %4, %5, %cst {dimension_numbers = #tpu.dot_dimension_numbers<[1], [0], [0], [1], [0, 0, 1, 1], [], []>} : vector<8x384xbf16>, vector<384x128xbf16>, vector<8x128xf32> -> vector<8x128xf32>
    %7 = arith.addf %3, %6 : vector<8x128xf32>
    %c0_6 = arith.constant 0 : index
    %c0_7 = arith.constant 0 : index
    %8 = vector.load %arg8[%c0_6, %c0_7] : memref<8x128xf32, #tpu.memory_space<vmem>>, vector<8x128xf32>
    tpu.vector_store %arg8[%c0_6, %c0_7], %7 {strides = array<i32>} : memref<8x128xf32, #tpu.memory_space<vmem>>, vector<8x128xf32>,
    %c0_i32_8 = arith.constant 0 : i32
    %9 = arith.cmpi eq, %arg2, %c0_i32_8 : i32
    %10 = arith.extui %9 : i1 to i32
    %c0_i32_9 = arith.constant 0 : i32
    %11 = arith.cmpi ne, %10, %c0_i32_9 : i32
    scf.if %11 {
      %c0_10 = arith.constant 0 : index
      %c0_11 = arith.constant 0 : index
      %12 = vector.load %arg8[%c0_10, %c0_11] : memref<8x128xf32, #tpu.memory_space<vmem>>, vector<8x128xf32>
      %c0_12 = arith.constant 0 : index
      %c0_13 = arith.constant 0 : index
      %13 = vector.load %arg5[%c0_12, %c0_13] : memref<1x128xf32, #tpu.memory_space<vmem>>, vector<1x128xf32>
      %14 = vector.broadcast %13 : vector<1x128xf32> to vector<8x128xf32>
      %15 = arith.mulf %12, %14 : vector<8x128xf32>
      %c0_14 = arith.constant 0 : index
      %c0_15 = arith.constant 0 : index
      %16 = vector.load %arg6[%c0_14, %c0_15] : memref<1x128xf32, #tpu.memory_space<vmem>>, vector<1x128xf32>
      %17 = vector.broadcast %16 : vector<1x128xf32> to vector<8x128xf32>
      %18 = arith.addf %15, %17 : vector<8x128xf32>
      %cst_16 = arith.constant 0.000000e+00 : f32
      %19 = vector.broadcast %cst_16 : f32 to vector<8x128xf32>
      %20 = arith.maximumf %18, %19 : vector<8x128xf32>
      %c0_17 = arith.constant 0 : index
      %c0_18 = arith.constant 0 : index
      %21 = vector.load %arg7[%c0_17, %c0_18] : memref<8x128xf32, #tpu.memory_space<vmem>>, vector<8x128xf32>
      tpu.vector_store %arg7[%c0_17, %c0_18], %20 {strides = array<i32>} : memref<8x128xf32, #tpu.memory_space<vmem>>, vector<8x128xf32>,
    } else {
    }
    return
  }
  func.func @transform_0(%arg0: i32, %arg1: i32, %arg2: i32) -> (i32, i32) {
    %c0_i32 = arith.constant 0 : i32
    return %arg0, %arg2 : i32, i32
  }
  func.func @transform_1(%arg0: i32, %arg1: i32, %arg2: i32) -> (i32, i32) {
    %c0_i32 = arith.constant 0 : i32
    return %arg2, %arg1 : i32, i32
  }
  func.func @transform_2(%arg0: i32, %arg1: i32, %arg2: i32) -> (i32, i32) {
    %c0_i32 = arith.constant 0 : i32
    %c0_i32_0 = arith.constant 0 : i32
    return %c0_i32, %arg1 : i32, i32
  }
  func.func @transform_3(%arg0: i32, %arg1: i32, %arg2: i32) -> (i32, i32) {
    %c0_i32 = arith.constant 0 : i32
    %c0_i32_0 = arith.constant 0 : i32
    return %c0_i32, %arg1 : i32, i32
  }
  func.func @transform_4(%arg0: i32, %arg1: i32, %arg2: i32) -> (i32, i32) {
    %c0_i32 = arith.constant 0 : i32
    return %arg0, %arg1 : i32, i32
  }
}

module attributes {stable_mosaic.version = 11 : i64} {
  func.func @_gemm_fused_kernel(%arg0: i32, %arg1: i32, %arg2: i32, %arg3: memref<128x256xbf16, #tpu.memory_space<vmem>>, %arg4: memref<256x128xbf16, #tpu.memory_space<vmem>>, %arg5: memref<1x128xf32, #tpu.memory_space<vmem>>, %arg6: memref<1x128xf32, #tpu.memory_space<vmem>>, %arg7: memref<1x128xf32, #tpu.memory_space<vmem>>, %arg8: memref<1x128xf32, #tpu.memory_space<vmem>>, %arg9: memref<128x128xf32, #tpu.memory_space<vmem>>, %arg10: memref<128x128xf32, #tpu.memory_space<vmem>>) attributes {dimension_semantics = [#tpu.dimension_semantics<parallel>, #tpu.dimension_semantics<parallel>, #tpu.dimension_semantics<arbitrary>], iteration_bounds = array<i64: 1, 1, 1>, scalar_prefetch = 0 : i64, scratch_operands = 1 : i64, tpu.core_type = #tpu.core_type<tc>, window_params = [{transform_indices = @transform_0, window_bounds = array<i64: 128, 256>}, {transform_indices = @transform_1, window_bounds = array<i64: 256, 128>}, {transform_indices = @transform_2, window_bounds = array<i64: 1, 128>}, {transform_indices = @transform_3, window_bounds = array<i64: 1, 128>}, {transform_indices = @transform_4, window_bounds = array<i64: 1, 128>}, {transform_indices = @transform_5, window_bounds = array<i64: 1, 128>}, {transform_indices = @transform_6, window_bounds = array<i64: 128, 128>}]} {
    %c0_i32 = arith.constant 0 : i32
    %0 = arith.cmpi eq, %arg2, %c0_i32 : i32
    %1 = arith.extui %0 : i1 to i32
    %c0_i32_0 = arith.constant 0 : i32
    %2 = arith.cmpi ne, %1, %c0_i32_0 : i32
    scf.if %2 {
      %cst_10 = arith.constant 0.000000e+00 : f32
      %12 = vector.broadcast %cst_10 : f32 to vector<128x128xf32>
      %c0_11 = arith.constant 0 : index
      %c0_12 = arith.constant 0 : index
      %13 = vector.load %arg10[%c0_11, %c0_12] : memref<128x128xf32, #tpu.memory_space<vmem>>, vector<128x128xf32>
      tpu.vector_store %arg10[%c0_11, %c0_12], %12 {strides = array<i32>} : memref<128x128xf32, #tpu.memory_space<vmem>>, vector<128x128xf32>,
    } else {
    }
    %c0 = arith.constant 0 : index
    %c0_1 = arith.constant 0 : index
    %3 = vector.load %arg10[%c0, %c0_1] : memref<128x128xf32, #tpu.memory_space<vmem>>, vector<128x128xf32>
    %c0_2 = arith.constant 0 : index
    %c0_3 = arith.constant 0 : index
    %4 = vector.load %arg3[%c0_2, %c0_3] : memref<128x256xbf16, #tpu.memory_space<vmem>>, vector<128x256xbf16>
    %c0_4 = arith.constant 0 : index
    %c0_5 = arith.constant 0 : index
    %5 = vector.load %arg4[%c0_4, %c0_5] : memref<256x128xbf16, #tpu.memory_space<vmem>>, vector<256x128xbf16>
    %cst = arith.constant dense<0.000000e+00> : vector<128x128xf32>
    %6 = tpu.matmul %4, %5, %cst {dimension_numbers = #tpu.dot_dimension_numbers<[1], [0], [0], [1], [0, 0, 1, 1], [], []>} : vector<128x256xbf16>, vector<256x128xbf16>, vector<128x128xf32> -> vector<128x128xf32>
    %7 = arith.addf %3, %6 : vector<128x128xf32>
    %c0_6 = arith.constant 0 : index
    %c0_7 = arith.constant 0 : index
    %8 = vector.load %arg10[%c0_6, %c0_7] : memref<128x128xf32, #tpu.memory_space<vmem>>, vector<128x128xf32>
    tpu.vector_store %arg10[%c0_6, %c0_7], %7 {strides = array<i32>} : memref<128x128xf32, #tpu.memory_space<vmem>>, vector<128x128xf32>,
    %c0_i32_8 = arith.constant 0 : i32
    %9 = arith.cmpi eq, %arg2, %c0_i32_8 : i32
    %10 = arith.extui %9 : i1 to i32
    %c0_i32_9 = arith.constant 0 : i32
    %11 = arith.cmpi ne, %10, %c0_i32_9 : i32
    scf.if %11 {
      %c0_10 = arith.constant 0 : index
      %c0_11 = arith.constant 0 : index
      %12 = vector.load %arg10[%c0_10, %c0_11] : memref<128x128xf32, #tpu.memory_space<vmem>>, vector<128x128xf32>
      %c0_12 = arith.constant 0 : index
      %c0_13 = arith.constant 0 : index
      %13 = vector.load %arg5[%c0_12, %c0_13] : memref<1x128xf32, #tpu.memory_space<vmem>>, vector<1x128xf32>
      %14 = vector.broadcast %13 : vector<1x128xf32> to vector<128x128xf32>
      %15 = arith.mulf %12, %14 : vector<128x128xf32>
      %c0_14 = arith.constant 0 : index
      %c0_15 = arith.constant 0 : index
      %16 = vector.load %arg6[%c0_14, %c0_15] : memref<1x128xf32, #tpu.memory_space<vmem>>, vector<1x128xf32>
      %17 = vector.broadcast %16 : vector<1x128xf32> to vector<128x128xf32>
      %18 = arith.addf %15, %17 : vector<128x128xf32>
      %cst_16 = arith.constant 0.000000e+00 : f32
      %19 = vector.broadcast %cst_16 : f32 to vector<128x128xf32>
      %20 = arith.maximumf %18, %19 : vector<128x128xf32>
      %c0_17 = arith.constant 0 : index
      %c0_18 = arith.constant 0 : index
      %21 = vector.load %arg7[%c0_17, %c0_18] : memref<1x128xf32, #tpu.memory_space<vmem>>, vector<1x128xf32>
      %22 = vector.broadcast %21 : vector<1x128xf32> to vector<128x128xf32>
      %23 = arith.mulf %20, %22 : vector<128x128xf32>
      %c0_19 = arith.constant 0 : index
      %c0_20 = arith.constant 0 : index
      %24 = vector.load %arg8[%c0_19, %c0_20] : memref<1x128xf32, #tpu.memory_space<vmem>>, vector<1x128xf32>
      %25 = vector.broadcast %24 : vector<1x128xf32> to vector<128x128xf32>
      %26 = arith.addf %23, %25 : vector<128x128xf32>
      %c0_21 = arith.constant 0 : index
      %c0_22 = arith.constant 0 : index
      %27 = vector.load %arg9[%c0_21, %c0_22] : memref<128x128xf32, #tpu.memory_space<vmem>>, vector<128x128xf32>
      tpu.vector_store %arg9[%c0_21, %c0_22], %26 {strides = array<i32>} : memref<128x128xf32, #tpu.memory_space<vmem>>, vector<128x128xf32>,
    } else {
    }
    return
  }
  func.func @transform_0(%arg0: i32, %arg1: i32, %arg2: i32) -> (i32, i32) {
    %c0_i32 = arith.constant 0 : i32
    return %arg0, %arg2 : i32, i32
  }
  func.func @transform_1(%arg0: i32, %arg1: i32, %arg2: i32) -> (i32, i32) {
    %c0_i32 = arith.constant 0 : i32
    return %arg2, %arg1 : i32, i32
  }
  func.func @transform_2(%arg0: i32, %arg1: i32, %arg2: i32) -> (i32, i32) {
    %c0_i32 = arith.constant 0 : i32
    %c0_i32_0 = arith.constant 0 : i32
    return %c0_i32, %arg1 : i32, i32
  }
  func.func @transform_3(%arg0: i32, %arg1: i32, %arg2: i32) -> (i32, i32) {
    %c0_i32 = arith.constant 0 : i32
    %c0_i32_0 = arith.constant 0 : i32
    return %c0_i32, %arg1 : i32, i32
  }
  func.func @transform_4(%arg0: i32, %arg1: i32, %arg2: i32) -> (i32, i32) {
    %c0_i32 = arith.constant 0 : i32
    %c0_i32_0 = arith.constant 0 : i32
    return %c0_i32, %arg1 : i32, i32
  }
  func.func @transform_5(%arg0: i32, %arg1: i32, %arg2: i32) -> (i32, i32) {
    %c0_i32 = arith.constant 0 : i32
    %c0_i32_0 = arith.constant 0 : i32
    return %c0_i32, %arg1 : i32, i32
  }
  func.func @transform_6(%arg0: i32, %arg1: i32, %arg2: i32) -> (i32, i32) {
    %c0_i32 = arith.constant 0 : i32
    return %arg0, %arg1 : i32, i32
  }
}

module attributes {stable_mosaic.version = 11 : i64} {
  func.func @_max_windows_kernel(%arg0: memref<8x128xf32, #tpu.memory_space<vmem>>, %arg1: memref<8x128xf32, #tpu.memory_space<vmem>>, %arg2: memref<8x128xf32, #tpu.memory_space<vmem>>, %arg3: memref<8x128xf32, #tpu.memory_space<vmem>>, %arg4: memref<8x128xf32, #tpu.memory_space<vmem>>, %arg5: memref<8x128xf32, #tpu.memory_space<vmem>>, %arg6: memref<8x128xf32, #tpu.memory_space<vmem>>, %arg7: memref<8x128xf32, #tpu.memory_space<vmem>>, %arg8: memref<8x128xf32, #tpu.memory_space<vmem>>, %arg9: memref<8x128xf32, #tpu.memory_space<vmem>>) attributes {dimension_semantics = [], scalar_prefetch = 0 : i64, scratch_operands = 0 : i64, tpu.core_type = #tpu.core_type<tc>} {
    %c0 = arith.constant 0 : index
    %c0_0 = arith.constant 0 : index
    %0 = vector.load %arg0[%c0, %c0_0] : memref<8x128xf32, #tpu.memory_space<vmem>>, vector<8x128xf32>
    %c0_1 = arith.constant 0 : index
    %c0_2 = arith.constant 0 : index
    %1 = vector.load %arg1[%c0_1, %c0_2] : memref<8x128xf32, #tpu.memory_space<vmem>>, vector<8x128xf32>
    %2 = arith.maximumf %0, %1 : vector<8x128xf32>
    %c0_3 = arith.constant 0 : index
    %c0_4 = arith.constant 0 : index
    %3 = vector.load %arg2[%c0_3, %c0_4] : memref<8x128xf32, #tpu.memory_space<vmem>>, vector<8x128xf32>
    %4 = arith.maximumf %2, %3 : vector<8x128xf32>
    %c0_5 = arith.constant 0 : index
    %c0_6 = arith.constant 0 : index
    %5 = vector.load %arg3[%c0_5, %c0_6] : memref<8x128xf32, #tpu.memory_space<vmem>>, vector<8x128xf32>
    %6 = arith.maximumf %4, %5 : vector<8x128xf32>
    %c0_7 = arith.constant 0 : index
    %c0_8 = arith.constant 0 : index
    %7 = vector.load %arg4[%c0_7, %c0_8] : memref<8x128xf32, #tpu.memory_space<vmem>>, vector<8x128xf32>
    %8 = arith.maximumf %6, %7 : vector<8x128xf32>
    %c0_9 = arith.constant 0 : index
    %c0_10 = arith.constant 0 : index
    %9 = vector.load %arg5[%c0_9, %c0_10] : memref<8x128xf32, #tpu.memory_space<vmem>>, vector<8x128xf32>
    %10 = arith.maximumf %8, %9 : vector<8x128xf32>
    %c0_11 = arith.constant 0 : index
    %c0_12 = arith.constant 0 : index
    %11 = vector.load %arg6[%c0_11, %c0_12] : memref<8x128xf32, #tpu.memory_space<vmem>>, vector<8x128xf32>
    %12 = arith.maximumf %10, %11 : vector<8x128xf32>
    %c0_13 = arith.constant 0 : index
    %c0_14 = arith.constant 0 : index
    %13 = vector.load %arg7[%c0_13, %c0_14] : memref<8x128xf32, #tpu.memory_space<vmem>>, vector<8x128xf32>
    %14 = arith.maximumf %12, %13 : vector<8x128xf32>
    %c0_15 = arith.constant 0 : index
    %c0_16 = arith.constant 0 : index
    %15 = vector.load %arg8[%c0_15, %c0_16] : memref<8x128xf32, #tpu.memory_space<vmem>>, vector<8x128xf32>
    %16 = arith.maximumf %14, %15 : vector<8x128xf32>
    %c0_17 = arith.constant 0 : index
    %c0_18 = arith.constant 0 : index
    %17 = vector.load %arg9[%c0_17, %c0_18] : memref<8x128xf32, #tpu.memory_space<vmem>>, vector<8x128xf32>
    tpu.vector_store %arg9[%c0_17, %c0_18], %16 {strides = array<i32>} : memref<8x128xf32, #tpu.memory_space<vmem>>, vector<8x128xf32>,
    return
  }
}

module attributes {stable_mosaic.version = 11 : i64} {
  func.func @_gemm_fused_kernel(%arg0: i32, %arg1: i32, %arg2: i32, %arg3: memref<32x512xbf16, #tpu.memory_space<vmem>>, %arg4: memref<512x128xbf16, #tpu.memory_space<vmem>>, %arg5: memref<1x128xf32, #tpu.memory_space<vmem>>, %arg6: memref<1x128xf32, #tpu.memory_space<vmem>>, %arg7: memref<32x128xf32, #tpu.memory_space<vmem>>, %arg8: memref<32x128xf32, #tpu.memory_space<vmem>>) attributes {dimension_semantics = [#tpu.dimension_semantics<parallel>, #tpu.dimension_semantics<parallel>, #tpu.dimension_semantics<arbitrary>], iteration_bounds = array<i64: 1, 1, 2>, scalar_prefetch = 0 : i64, scratch_operands = 1 : i64, tpu.core_type = #tpu.core_type<tc>, window_params = [{transform_indices = @transform_0, window_bounds = array<i64: 32, 512>}, {transform_indices = @transform_1, window_bounds = array<i64: 512, 128>}, {transform_indices = @transform_2, window_bounds = array<i64: 1, 128>}, {transform_indices = @transform_3, window_bounds = array<i64: 1, 128>}, {transform_indices = @transform_4, window_bounds = array<i64: 32, 128>}]} {
    %c0_i32 = arith.constant 0 : i32
    %0 = arith.cmpi eq, %arg2, %c0_i32 : i32
    %1 = arith.extui %0 : i1 to i32
    %c0_i32_0 = arith.constant 0 : i32
    %2 = arith.cmpi ne, %1, %c0_i32_0 : i32
    scf.if %2 {
      %cst_9 = arith.constant 0.000000e+00 : f32
      %12 = vector.broadcast %cst_9 : f32 to vector<32x128xf32>
      %c0_10 = arith.constant 0 : index
      %c0_11 = arith.constant 0 : index
      %13 = vector.load %arg8[%c0_10, %c0_11] : memref<32x128xf32, #tpu.memory_space<vmem>>, vector<32x128xf32>
      tpu.vector_store %arg8[%c0_10, %c0_11], %12 {strides = array<i32>} : memref<32x128xf32, #tpu.memory_space<vmem>>, vector<32x128xf32>,
    } else {
    }
    %c0 = arith.constant 0 : index
    %c0_1 = arith.constant 0 : index
    %3 = vector.load %arg8[%c0, %c0_1] : memref<32x128xf32, #tpu.memory_space<vmem>>, vector<32x128xf32>
    %c0_2 = arith.constant 0 : index
    %c0_3 = arith.constant 0 : index
    %4 = vector.load %arg3[%c0_2, %c0_3] : memref<32x512xbf16, #tpu.memory_space<vmem>>, vector<32x512xbf16>
    %c0_4 = arith.constant 0 : index
    %c0_5 = arith.constant 0 : index
    %5 = vector.load %arg4[%c0_4, %c0_5] : memref<512x128xbf16, #tpu.memory_space<vmem>>, vector<512x128xbf16>
    %cst = arith.constant dense<0.000000e+00> : vector<32x128xf32>
    %6 = tpu.matmul %4, %5, %cst {dimension_numbers = #tpu.dot_dimension_numbers<[1], [0], [0], [1], [0, 0, 1, 1], [], []>} : vector<32x512xbf16>, vector<512x128xbf16>, vector<32x128xf32> -> vector<32x128xf32>
    %7 = arith.addf %3, %6 : vector<32x128xf32>
    %c0_6 = arith.constant 0 : index
    %c0_7 = arith.constant 0 : index
    %8 = vector.load %arg8[%c0_6, %c0_7] : memref<32x128xf32, #tpu.memory_space<vmem>>, vector<32x128xf32>
    tpu.vector_store %arg8[%c0_6, %c0_7], %7 {strides = array<i32>} : memref<32x128xf32, #tpu.memory_space<vmem>>, vector<32x128xf32>,
    %c1_i32 = arith.constant 1 : i32
    %9 = arith.cmpi eq, %arg2, %c1_i32 : i32
    %10 = arith.extui %9 : i1 to i32
    %c0_i32_8 = arith.constant 0 : i32
    %11 = arith.cmpi ne, %10, %c0_i32_8 : i32
    scf.if %11 {
      %c0_9 = arith.constant 0 : index
      %c0_10 = arith.constant 0 : index
      %12 = vector.load %arg8[%c0_9, %c0_10] : memref<32x128xf32, #tpu.memory_space<vmem>>, vector<32x128xf32>
      %c0_11 = arith.constant 0 : index
      %c0_12 = arith.constant 0 : index
      %13 = vector.load %arg5[%c0_11, %c0_12] : memref<1x128xf32, #tpu.memory_space<vmem>>, vector<1x128xf32>
      %14 = vector.broadcast %13 : vector<1x128xf32> to vector<32x128xf32>
      %15 = arith.mulf %12, %14 : vector<32x128xf32>
      %c0_13 = arith.constant 0 : index
      %c0_14 = arith.constant 0 : index
      %16 = vector.load %arg6[%c0_13, %c0_14] : memref<1x128xf32, #tpu.memory_space<vmem>>, vector<1x128xf32>
      %17 = vector.broadcast %16 : vector<1x128xf32> to vector<32x128xf32>
      %18 = arith.addf %15, %17 : vector<32x128xf32>
      %cst_15 = arith.constant 0.000000e+00 : f32
      %19 = vector.broadcast %cst_15 : f32 to vector<32x128xf32>
      %20 = arith.maximumf %18, %19 : vector<32x128xf32>
      %c0_16 = arith.constant 0 : index
      %c0_17 = arith.constant 0 : index
      %21 = vector.load %arg7[%c0_16, %c0_17] : memref<32x128xf32, #tpu.memory_space<vmem>>, vector<32x128xf32>
      tpu.vector_store %arg7[%c0_16, %c0_17], %20 {strides = array<i32>} : memref<32x128xf32, #tpu.memory_space<vmem>>, vector<32x128xf32>,
    } else {
    }
    return
  }
  func.func @transform_0(%arg0: i32, %arg1: i32, %arg2: i32) -> (i32, i32) {
    %c0_i32 = arith.constant 0 : i32
    return %arg0, %arg2 : i32, i32
  }
  func.func @transform_1(%arg0: i32, %arg1: i32, %arg2: i32) -> (i32, i32) {
    %c0_i32 = arith.constant 0 : i32
    return %arg2, %arg1 : i32, i32
  }
  func.func @transform_2(%arg0: i32, %arg1: i32, %arg2: i32) -> (i32, i32) {
    %c0_i32 = arith.constant 0 : i32
    %c0_i32_0 = arith.constant 0 : i32
    return %c0_i32, %arg1 : i32, i32
  }
  func.func @transform_3(%arg0: i32, %arg1: i32, %arg2: i32) -> (i32, i32) {
    %c0_i32 = arith.constant 0 : i32
    %c0_i32_0 = arith.constant 0 : i32
    return %c0_i32, %arg1 : i32, i32
  }
  func.func @transform_4(%arg0: i32, %arg1: i32, %arg2: i32) -> (i32, i32) {
    %c0_i32 = arith.constant 0 : i32
    return %arg0, %arg1 : i32, i32
  }
}

module attributes {stable_mosaic.version = 11 : i64} {
  func.func @_gemm_fused_kernel(%arg0: i32, %arg1: i32, %arg2: i32, %arg3: memref<32x384xbf16, #tpu.memory_space<vmem>>, %arg4: memref<384x128xbf16, #tpu.memory_space<vmem>>, %arg5: memref<1x128xf32, #tpu.memory_space<vmem>>, %arg6: memref<1x128xf32, #tpu.memory_space<vmem>>, %arg7: memref<32x128xf32, #tpu.memory_space<vmem>>, %arg8: memref<32x128xf32, #tpu.memory_space<vmem>>) attributes {dimension_semantics = [#tpu.dimension_semantics<parallel>, #tpu.dimension_semantics<parallel>, #tpu.dimension_semantics<arbitrary>], iteration_bounds = array<i64: 1, 1, 1>, scalar_prefetch = 0 : i64, scratch_operands = 1 : i64, tpu.core_type = #tpu.core_type<tc>, window_params = [{transform_indices = @transform_0, window_bounds = array<i64: 32, 384>}, {transform_indices = @transform_1, window_bounds = array<i64: 384, 128>}, {transform_indices = @transform_2, window_bounds = array<i64: 1, 128>}, {transform_indices = @transform_3, window_bounds = array<i64: 1, 128>}, {transform_indices = @transform_4, window_bounds = array<i64: 32, 128>}]} {
    %c0_i32 = arith.constant 0 : i32
    %0 = arith.cmpi eq, %arg2, %c0_i32 : i32
    %1 = arith.extui %0 : i1 to i32
    %c0_i32_0 = arith.constant 0 : i32
    %2 = arith.cmpi ne, %1, %c0_i32_0 : i32
    scf.if %2 {
      %cst_10 = arith.constant 0.000000e+00 : f32
      %12 = vector.broadcast %cst_10 : f32 to vector<32x128xf32>
      %c0_11 = arith.constant 0 : index
      %c0_12 = arith.constant 0 : index
      %13 = vector.load %arg8[%c0_11, %c0_12] : memref<32x128xf32, #tpu.memory_space<vmem>>, vector<32x128xf32>
      tpu.vector_store %arg8[%c0_11, %c0_12], %12 {strides = array<i32>} : memref<32x128xf32, #tpu.memory_space<vmem>>, vector<32x128xf32>,
    } else {
    }
    %c0 = arith.constant 0 : index
    %c0_1 = arith.constant 0 : index
    %3 = vector.load %arg8[%c0, %c0_1] : memref<32x128xf32, #tpu.memory_space<vmem>>, vector<32x128xf32>
    %c0_2 = arith.constant 0 : index
    %c0_3 = arith.constant 0 : index
    %4 = vector.load %arg3[%c0_2, %c0_3] : memref<32x384xbf16, #tpu.memory_space<vmem>>, vector<32x384xbf16>
    %c0_4 = arith.constant 0 : index
    %c0_5 = arith.constant 0 : index
    %5 = vector.load %arg4[%c0_4, %c0_5] : memref<384x128xbf16, #tpu.memory_space<vmem>>, vector<384x128xbf16>
    %cst = arith.constant dense<0.000000e+00> : vector<32x128xf32>
    %6 = tpu.matmul %4, %5, %cst {dimension_numbers = #tpu.dot_dimension_numbers<[1], [0], [0], [1], [0, 0, 1, 1], [], []>} : vector<32x384xbf16>, vector<384x128xbf16>, vector<32x128xf32> -> vector<32x128xf32>
    %7 = arith.addf %3, %6 : vector<32x128xf32>
    %c0_6 = arith.constant 0 : index
    %c0_7 = arith.constant 0 : index
    %8 = vector.load %arg8[%c0_6, %c0_7] : memref<32x128xf32, #tpu.memory_space<vmem>>, vector<32x128xf32>
    tpu.vector_store %arg8[%c0_6, %c0_7], %7 {strides = array<i32>} : memref<32x128xf32, #tpu.memory_space<vmem>>, vector<32x128xf32>,
    %c0_i32_8 = arith.constant 0 : i32
    %9 = arith.cmpi eq, %arg2, %c0_i32_8 : i32
    %10 = arith.extui %9 : i1 to i32
    %c0_i32_9 = arith.constant 0 : i32
    %11 = arith.cmpi ne, %10, %c0_i32_9 : i32
    scf.if %11 {
      %c0_10 = arith.constant 0 : index
      %c0_11 = arith.constant 0 : index
      %12 = vector.load %arg8[%c0_10, %c0_11] : memref<32x128xf32, #tpu.memory_space<vmem>>, vector<32x128xf32>
      %c0_12 = arith.constant 0 : index
      %c0_13 = arith.constant 0 : index
      %13 = vector.load %arg5[%c0_12, %c0_13] : memref<1x128xf32, #tpu.memory_space<vmem>>, vector<1x128xf32>
      %14 = vector.broadcast %13 : vector<1x128xf32> to vector<32x128xf32>
      %15 = arith.mulf %12, %14 : vector<32x128xf32>
      %c0_14 = arith.constant 0 : index
      %c0_15 = arith.constant 0 : index
      %16 = vector.load %arg6[%c0_14, %c0_15] : memref<1x128xf32, #tpu.memory_space<vmem>>, vector<1x128xf32>
      %17 = vector.broadcast %16 : vector<1x128xf32> to vector<32x128xf32>
      %18 = arith.addf %15, %17 : vector<32x128xf32>
      %cst_16 = arith.constant 0.000000e+00 : f32
      %19 = vector.broadcast %cst_16 : f32 to vector<32x128xf32>
      %20 = arith.maximumf %18, %19 : vector<32x128xf32>
      %c0_17 = arith.constant 0 : index
      %c0_18 = arith.constant 0 : index
      %21 = vector.load %arg7[%c0_17, %c0_18] : memref<32x128xf32, #tpu.memory_space<vmem>>, vector<32x128xf32>
      tpu.vector_store %arg7[%c0_17, %c0_18], %20 {strides = array<i32>} : memref<32x128xf32, #tpu.memory_space<vmem>>, vector<32x128xf32>,
    } else {
    }
    return
  }
  func.func @transform_0(%arg0: i32, %arg1: i32, %arg2: i32) -> (i32, i32) {
    %c0_i32 = arith.constant 0 : i32
    return %arg0, %arg2 : i32, i32
  }
  func.func @transform_1(%arg0: i32, %arg1: i32, %arg2: i32) -> (i32, i32) {
    %c0_i32 = arith.constant 0 : i32
    return %arg2, %arg1 : i32, i32
  }
  func.func @transform_2(%arg0: i32, %arg1: i32, %arg2: i32) -> (i32, i32) {
    %c0_i32 = arith.constant 0 : i32
    %c0_i32_0 = arith.constant 0 : i32
    return %c0_i32, %arg1 : i32, i32
  }
  func.func @transform_3(%arg0: i32, %arg1: i32, %arg2: i32) -> (i32, i32) {
    %c0_i32 = arith.constant 0 : i32
    %c0_i32_0 = arith.constant 0 : i32
    return %c0_i32, %arg1 : i32, i32
  }
  func.func @transform_4(%arg0: i32, %arg1: i32, %arg2: i32) -> (i32, i32) {
    %c0_i32 = arith.constant 0 : i32
    return %arg0, %arg1 : i32, i32
  }
}

module attributes {stable_mosaic.version = 11 : i64} {
  func.func @_gumbel_softmax_kernel(%arg0: i32, %arg1: memref<1x4x1xf32, #tpu.memory_space<vmem>>, %arg2: memref<1x4x64xf32, #tpu.memory_space<vmem>>, %arg3: memref<1x4x64xf32, #tpu.memory_space<vmem>>) attributes {dimension_semantics = [#tpu.dimension_semantics<arbitrary>], iteration_bounds = array<i64: 8>, scalar_prefetch = 0 : i64, scratch_operands = 0 : i64, tpu.core_type = #tpu.core_type<tc>, window_params = [{transform_indices = @transform_0, window_bounds = array<i64: 1, 4, 1>}, {transform_indices = @transform_1, window_bounds = array<i64: 1, 4, 64>}, {transform_indices = @transform_2, window_bounds = array<i64: 1, 4, 64>}]} {
    %c0 = arith.constant 0 : index
    %c0_0 = arith.constant 0 : index
    %c0_1 = arith.constant 0 : index
    %0 = vector.load %arg2[%c0, %c0_0, %c0_1] : memref<1x4x64xf32, #tpu.memory_space<vmem>>, vector<1x4x64xf32>
    %1 = vector.shape_cast %0 : vector<1x4x64xf32> to vector<4x64xf32>
    %cst = arith.constant 9.99999997E-7 : f32
    %2 = vector.broadcast %cst : f32 to vector<4x64xf32>
    %3 = arith.addf %1, %2 : vector<4x64xf32>
    %4 = math.log %3 : vector<4x64xf32>
    %cst_2 = arith.constant 0.000000e+00 : f32
    %5 = vector.broadcast %cst_2 : f32 to vector<4x64xf32>
    %6 = arith.subf %5, %4 : vector<4x64xf32>
    %cst_3 = arith.constant 9.99999997E-7 : f32
    %7 = vector.broadcast %cst_3 : f32 to vector<4x64xf32>
    %8 = arith.addf %6, %7 : vector<4x64xf32>
    %9 = math.log %8 : vector<4x64xf32>
    %c0_4 = arith.constant 0 : index
    %c0_5 = arith.constant 0 : index
    %c0_6 = arith.constant 0 : index
    %10 = vector.load %arg1[%c0_4, %c0_5, %c0_6] : memref<1x4x1xf32, #tpu.memory_space<vmem>>, vector<1x4x1xf32>
    %11 = vector.shape_cast %10 : vector<1x4x1xf32> to vector<4x1xf32>
    %12 = vector.broadcast %11 : vector<4x1xf32> to vector<4x64xf32>
    %13 = arith.subf %12, %9 : vector<4x64xf32>
    %cst_7 = arith.constant 5.000000e-01 : f32
    %14 = vector.broadcast %cst_7 : f32 to vector<4x64xf32>
    %15 = arith.mulf %13, %14 : vector<4x64xf32>
    %cst_8 = arith.constant dense<0xFF800000> : vector<64xf32>
    %16 = vector.multi_reduction <maximumf>, %15, %cst_8 [0] : vector<4x64xf32> to vector<64xf32>
    %17 = vector.shape_cast %16 : vector<64xf32> to vector<1x64xf32>
    %18 = vector.broadcast %17 : vector<1x64xf32> to vector<4x64xf32>
    %19 = arith.subf %15, %18 : vector<4x64xf32>
    %20 = math.exp %19 : vector<4x64xf32>
    %cst_9 = arith.constant dense<0.000000e+00> : vector<64xf32>
    %21 = vector.multi_reduction <add>, %20, %cst_9 [0] : vector<4x64xf32> to vector<64xf32>
    %22 = vector.shape_cast %21 : vector<64xf32> to vector<1x64xf32>
    %23 = vector.broadcast %22 : vector<1x64xf32> to vector<4x64xf32>
    %24 = arith.divf %20, %23 : vector<4x64xf32>
    %c0_10 = arith.constant 0 : index
    %c0_11 = arith.constant 0 : index
    %c0_12 = arith.constant 0 : index
    %25 = vector.load %arg3[%c0_10, %c0_11, %c0_12] : memref<1x4x64xf32, #tpu.memory_space<vmem>>, vector<1x4x64xf32>
    %26 = vector.shape_cast %25 : vector<1x4x64xf32> to vector<4x64xf32>
    %27 = vector.shape_cast %24 : vector<4x64xf32> to vector<1x4x64xf32>
    tpu.vector_store %arg3[%c0_10, %c0_11, %c0_12], %27 {strides = array<i32>} : memref<1x4x64xf32, #tpu.memory_space<vmem>>, vector<1x4x64xf32>,
    return
  }
  func.func @transform_0(%arg0: i32) -> (i32, i32, i32) {
    %c0_i32 = arith.constant 0 : i32
    %c0_i32_0 = arith.constant 0 : i32
    %c0_i32_1 = arith.constant 0 : i32
    return %arg0, %c0_i32, %c0_i32_0 : i32, i32, i32
  }
  func.func @transform_1(%arg0: i32) -> (i32, i32, i32) {
    %c0_i32 = arith.constant 0 : i32
    %c0_i32_0 = arith.constant 0 : i32
    %c0_i32_1 = arith.constant 0 : i32
    return %arg0, %c0_i32, %c0_i32_0 : i32, i32, i32
  }
  func.func @transform_2(%arg0: i32) -> (i32, i32, i32) {
    %c0_i32 = arith.constant 0 : i32
    %c0_i32_0 = arith.constant 0 : i32
    %c0_i32_1 = arith.constant 0 : i32
    return %arg0, %c0_i32, %c0_i32_0 : i32, i32, i32
  }
}

module attributes {stable_mosaic.version = 11 : i64} {
  func.func @_gemm_fused_kernel(%arg0: i32, %arg1: i32, %arg2: i32, %arg3: memref<32x384xbf16, #tpu.memory_space<vmem>>, %arg4: memref<384x128xbf16, #tpu.memory_space<vmem>>, %arg5: memref<1x128xf32, #tpu.memory_space<vmem>>, %arg6: memref<1x128xf32, #tpu.memory_space<vmem>>, %arg7: memref<1x128xf32, #tpu.memory_space<vmem>>, %arg8: memref<1x128xf32, #tpu.memory_space<vmem>>, %arg9: memref<32x128xf32, #tpu.memory_space<vmem>>, %arg10: memref<32x128xf32, #tpu.memory_space<vmem>>, %arg11: memref<32x128xf32, #tpu.memory_space<vmem>>) attributes {dimension_semantics = [#tpu.dimension_semantics<parallel>, #tpu.dimension_semantics<parallel>, #tpu.dimension_semantics<arbitrary>], iteration_bounds = array<i64: 1, 1, 1>, scalar_prefetch = 0 : i64, scratch_operands = 1 : i64, tpu.core_type = #tpu.core_type<tc>, window_params = [{transform_indices = @transform_0, window_bounds = array<i64: 32, 384>}, {transform_indices = @transform_1, window_bounds = array<i64: 384, 128>}, {transform_indices = @transform_2, window_bounds = array<i64: 1, 128>}, {transform_indices = @transform_3, window_bounds = array<i64: 1, 128>}, {transform_indices = @transform_4, window_bounds = array<i64: 1, 128>}, {transform_indices = @transform_5, window_bounds = array<i64: 1, 128>}, {transform_indices = @transform_6, window_bounds = array<i64: 32, 128>}, {transform_indices = @transform_7, window_bounds = array<i64: 32, 128>}]} {
    %c0_i32 = arith.constant 0 : i32
    %0 = arith.cmpi eq, %arg2, %c0_i32 : i32
    %1 = arith.extui %0 : i1 to i32
    %c0_i32_0 = arith.constant 0 : i32
    %2 = arith.cmpi ne, %1, %c0_i32_0 : i32
    scf.if %2 {
      %cst_10 = arith.constant 0.000000e+00 : f32
      %12 = vector.broadcast %cst_10 : f32 to vector<32x128xf32>
      %c0_11 = arith.constant 0 : index
      %c0_12 = arith.constant 0 : index
      %13 = vector.load %arg11[%c0_11, %c0_12] : memref<32x128xf32, #tpu.memory_space<vmem>>, vector<32x128xf32>
      tpu.vector_store %arg11[%c0_11, %c0_12], %12 {strides = array<i32>} : memref<32x128xf32, #tpu.memory_space<vmem>>, vector<32x128xf32>,
    } else {
    }
    %c0 = arith.constant 0 : index
    %c0_1 = arith.constant 0 : index
    %3 = vector.load %arg11[%c0, %c0_1] : memref<32x128xf32, #tpu.memory_space<vmem>>, vector<32x128xf32>
    %c0_2 = arith.constant 0 : index
    %c0_3 = arith.constant 0 : index
    %4 = vector.load %arg3[%c0_2, %c0_3] : memref<32x384xbf16, #tpu.memory_space<vmem>>, vector<32x384xbf16>
    %c0_4 = arith.constant 0 : index
    %c0_5 = arith.constant 0 : index
    %5 = vector.load %arg4[%c0_4, %c0_5] : memref<384x128xbf16, #tpu.memory_space<vmem>>, vector<384x128xbf16>
    %cst = arith.constant dense<0.000000e+00> : vector<32x128xf32>
    %6 = tpu.matmul %4, %5, %cst {dimension_numbers = #tpu.dot_dimension_numbers<[1], [0], [0], [1], [0, 0, 1, 1], [], []>} : vector<32x384xbf16>, vector<384x128xbf16>, vector<32x128xf32> -> vector<32x128xf32>
    %7 = arith.addf %3, %6 : vector<32x128xf32>
    %c0_6 = arith.constant 0 : index
    %c0_7 = arith.constant 0 : index
    %8 = vector.load %arg11[%c0_6, %c0_7] : memref<32x128xf32, #tpu.memory_space<vmem>>, vector<32x128xf32>
    tpu.vector_store %arg11[%c0_6, %c0_7], %7 {strides = array<i32>} : memref<32x128xf32, #tpu.memory_space<vmem>>, vector<32x128xf32>,
    %c0_i32_8 = arith.constant 0 : i32
    %9 = arith.cmpi eq, %arg2, %c0_i32_8 : i32
    %10 = arith.extui %9 : i1 to i32
    %c0_i32_9 = arith.constant 0 : i32
    %11 = arith.cmpi ne, %10, %c0_i32_9 : i32
    scf.if %11 {
      %c0_10 = arith.constant 0 : index
      %c0_11 = arith.constant 0 : index
      %12 = vector.load %arg11[%c0_10, %c0_11] : memref<32x128xf32, #tpu.memory_space<vmem>>, vector<32x128xf32>
      %c0_12 = arith.constant 0 : index
      %c0_13 = arith.constant 0 : index
      %13 = vector.load %arg5[%c0_12, %c0_13] : memref<1x128xf32, #tpu.memory_space<vmem>>, vector<1x128xf32>
      %14 = vector.broadcast %13 : vector<1x128xf32> to vector<32x128xf32>
      %15 = arith.mulf %12, %14 : vector<32x128xf32>
      %c0_14 = arith.constant 0 : index
      %c0_15 = arith.constant 0 : index
      %16 = vector.load %arg6[%c0_14, %c0_15] : memref<1x128xf32, #tpu.memory_space<vmem>>, vector<1x128xf32>
      %17 = vector.broadcast %16 : vector<1x128xf32> to vector<32x128xf32>
      %18 = arith.addf %15, %17 : vector<32x128xf32>
      %cst_16 = arith.constant 0.000000e+00 : f32
      %19 = vector.broadcast %cst_16 : f32 to vector<32x128xf32>
      %20 = arith.maximumf %18, %19 : vector<32x128xf32>
      %c0_17 = arith.constant 0 : index
      %c0_18 = arith.constant 0 : index
      %21 = vector.load %arg7[%c0_17, %c0_18] : memref<1x128xf32, #tpu.memory_space<vmem>>, vector<1x128xf32>
      %22 = vector.broadcast %21 : vector<1x128xf32> to vector<32x128xf32>
      %23 = arith.mulf %20, %22 : vector<32x128xf32>
      %c0_19 = arith.constant 0 : index
      %c0_20 = arith.constant 0 : index
      %24 = vector.load %arg8[%c0_19, %c0_20] : memref<1x128xf32, #tpu.memory_space<vmem>>, vector<1x128xf32>
      %25 = vector.broadcast %24 : vector<1x128xf32> to vector<32x128xf32>
      %26 = arith.addf %23, %25 : vector<32x128xf32>
      %c0_21 = arith.constant 0 : index
      %c0_22 = arith.constant 0 : index
      %27 = vector.load %arg9[%c0_21, %c0_22] : memref<32x128xf32, #tpu.memory_space<vmem>>, vector<32x128xf32>
      %28 = arith.mulf %26, %27 : vector<32x128xf32>
      %c0_23 = arith.constant 0 : index
      %c0_24 = arith.constant 0 : index
      %29 = vector.load %arg10[%c0_23, %c0_24] : memref<32x128xf32, #tpu.memory_space<vmem>>, vector<32x128xf32>
      tpu.vector_store %arg10[%c0_23, %c0_24], %28 {strides = array<i32>} : memref<32x128xf32, #tpu.memory_space<vmem>>, vector<32x128xf32>,
    } else {
    }
    return
  }
  func.func @transform_0(%arg0: i32, %arg1: i32, %arg2: i32) -> (i32, i32) {
    %c0_i32 = arith.constant 0 : i32
    return %arg0, %arg2 : i32, i32
  }
  func.func @transform_1(%arg0: i32, %arg1: i32, %arg2: i32) -> (i32, i32) {
    %c0_i32 = arith.constant 0 : i32
    return %arg2, %arg1 : i32, i32
  }
  func.func @transform_2(%arg0: i32, %arg1: i32, %arg2: i32) -> (i32, i32) {
    %c0_i32 = arith.constant 0 : i32
    %c0_i32_0 = arith.constant 0 : i32
    return %c0_i32, %arg1 : i32, i32
  }
  func.func @transform_3(%arg0: i32, %arg1: i32, %arg2: i32) -> (i32, i32) {
    %c0_i32 = arith.constant 0 : i32
    %c0_i32_0 = arith.constant 0 : i32
    return %c0_i32, %arg1 : i32, i32
  }
  func.func @transform_4(%arg0: i32, %arg1: i32, %arg2: i32) -> (i32, i32) {
    %c0_i32 = arith.constant 0 : i32
    %c0_i32_0 = arith.constant 0 : i32
    return %c0_i32, %arg1 : i32, i32
  }
  func.func @transform_5(%arg0: i32, %arg1: i32, %arg2: i32) -> (i32, i32) {
    %c0_i32 = arith.constant 0 : i32
    %c0_i32_0 = arith.constant 0 : i32
    return %c0_i32, %arg1 : i32, i32
  }
  func.func @transform_6(%arg0: i32, %arg1: i32, %arg2: i32) -> (i32, i32) {
    %c0_i32 = arith.constant 0 : i32
    return %arg0, %arg1 : i32, i32
  }
  func.func @transform_7(%arg0: i32, %arg1: i32, %arg2: i32) -> (i32, i32) {
    %c0_i32 = arith.constant 0 : i32
    return %arg0, %arg1 : i32, i32
  }
}

module attributes {stable_mosaic.version = 11 : i64} {
  func.func @_rowmean_kernel(%arg0: i32, %arg1: memref<1x4x256xf32, #tpu.memory_space<vmem>>, %arg2: memref<1x1x256xf32, #tpu.memory_space<vmem>>) attributes {dimension_semantics = [#tpu.dimension_semantics<arbitrary>], iteration_bounds = array<i64: 2>, scalar_prefetch = 0 : i64, scratch_operands = 0 : i64, tpu.core_type = #tpu.core_type<tc>, window_params = [{transform_indices = @transform_0, window_bounds = array<i64: 1, 4, 256>}, {transform_indices = @transform_1, window_bounds = array<i64: 1, 1, 256>}]} {
    %c0 = arith.constant 0 : index
    %c0_0 = arith.constant 0 : index
    %c0_1 = arith.constant 0 : index
    %0 = vector.load %arg1[%c0, %c0_0, %c0_1] : memref<1x4x256xf32, #tpu.memory_space<vmem>>, vector<1x4x256xf32>
    %1 = vector.shape_cast %0 : vector<1x4x256xf32> to vector<4x256xf32>
    %cst = arith.constant dense<0.000000e+00> : vector<256xf32>
    %2 = vector.multi_reduction <add>, %1, %cst [0] : vector<4x256xf32> to vector<256xf32>
    %3 = vector.shape_cast %2 : vector<256xf32> to vector<1x256xf32>
    %cst_2 = arith.constant 2.500000e-01 : f32
    %4 = vector.broadcast %cst_2 : f32 to vector<1x256xf32>
    %5 = arith.mulf %3, %4 : vector<1x256xf32>
    %c0_3 = arith.constant 0 : index
    %c0_4 = arith.constant 0 : index
    %c0_5 = arith.constant 0 : index
    %6 = vector.load %arg2[%c0_3, %c0_4, %c0_5] : memref<1x1x256xf32, #tpu.memory_space<vmem>>, vector<1x1x256xf32>
    %7 = vector.shape_cast %6 : vector<1x1x256xf32> to vector<1x256xf32>
    %8 = vector.shape_cast %5 : vector<1x256xf32> to vector<1x1x256xf32>
    tpu.vector_store %arg2[%c0_3, %c0_4, %c0_5], %8 {strides = array<i32>} : memref<1x1x256xf32, #tpu.memory_space<vmem>>, vector<1x1x256xf32>,
    return
  }
  func.func @transform_0(%arg0: i32) -> (i32, i32, i32) {
    %c0_i32 = arith.constant 0 : i32
    %c0_i32_0 = arith.constant 0 : i32
    %c0_i32_1 = arith.constant 0 : i32
    return %arg0, %c0_i32, %c0_i32_0 : i32, i32, i32
  }
  func.func @transform_1(%arg0: i32) -> (i32, i32, i32) {
    %c0_i32 = arith.constant 0 : i32
    %c0_i32_0 = arith.constant 0 : i32
    %c0_i32_1 = arith.constant 0 : i32
    return %arg0, %c0_i32, %c0_i32_0 : i32, i32, i32
  }
}

module attributes {stable_mosaic.version = 11 : i64} {
  func.func @_gemm_fused_kernel(%arg0: i32, %arg1: i32, %arg2: i32, %arg3: memref<8x512xbf16, #tpu.memory_space<vmem>>, %arg4: memref<512x128xbf16, #tpu.memory_space<vmem>>, %arg5: memref<1x128xf32, #tpu.memory_space<vmem>>, %arg6: memref<1x128xf32, #tpu.memory_space<vmem>>, %arg7: memref<1x128xf32, #tpu.memory_space<vmem>>, %arg8: memref<1x128xf32, #tpu.memory_space<vmem>>, %arg9: memref<8x128xf32, #tpu.memory_space<vmem>>, %arg10: memref<8x128xf32, #tpu.memory_space<vmem>>) attributes {dimension_semantics = [#tpu.dimension_semantics<parallel>, #tpu.dimension_semantics<parallel>, #tpu.dimension_semantics<arbitrary>], iteration_bounds = array<i64: 1, 1, 2>, scalar_prefetch = 0 : i64, scratch_operands = 1 : i64, tpu.core_type = #tpu.core_type<tc>, window_params = [{transform_indices = @transform_0, window_bounds = array<i64: 8, 512>}, {transform_indices = @transform_1, window_bounds = array<i64: 512, 128>}, {transform_indices = @transform_2, window_bounds = array<i64: 1, 128>}, {transform_indices = @transform_3, window_bounds = array<i64: 1, 128>}, {transform_indices = @transform_4, window_bounds = array<i64: 1, 128>}, {transform_indices = @transform_5, window_bounds = array<i64: 1, 128>}, {transform_indices = @transform_6, window_bounds = array<i64: 8, 128>}]} {
    %c0_i32 = arith.constant 0 : i32
    %0 = arith.cmpi eq, %arg2, %c0_i32 : i32
    %1 = arith.extui %0 : i1 to i32
    %c0_i32_0 = arith.constant 0 : i32
    %2 = arith.cmpi ne, %1, %c0_i32_0 : i32
    scf.if %2 {
      %cst_9 = arith.constant 0.000000e+00 : f32
      %12 = vector.broadcast %cst_9 : f32 to vector<8x128xf32>
      %c0_10 = arith.constant 0 : index
      %c0_11 = arith.constant 0 : index
      %13 = vector.load %arg10[%c0_10, %c0_11] : memref<8x128xf32, #tpu.memory_space<vmem>>, vector<8x128xf32>
      tpu.vector_store %arg10[%c0_10, %c0_11], %12 {strides = array<i32>} : memref<8x128xf32, #tpu.memory_space<vmem>>, vector<8x128xf32>,
    } else {
    }
    %c0 = arith.constant 0 : index
    %c0_1 = arith.constant 0 : index
    %3 = vector.load %arg10[%c0, %c0_1] : memref<8x128xf32, #tpu.memory_space<vmem>>, vector<8x128xf32>
    %c0_2 = arith.constant 0 : index
    %c0_3 = arith.constant 0 : index
    %4 = vector.load %arg3[%c0_2, %c0_3] : memref<8x512xbf16, #tpu.memory_space<vmem>>, vector<8x512xbf16>
    %c0_4 = arith.constant 0 : index
    %c0_5 = arith.constant 0 : index
    %5 = vector.load %arg4[%c0_4, %c0_5] : memref<512x128xbf16, #tpu.memory_space<vmem>>, vector<512x128xbf16>
    %cst = arith.constant dense<0.000000e+00> : vector<8x128xf32>
    %6 = tpu.matmul %4, %5, %cst {dimension_numbers = #tpu.dot_dimension_numbers<[1], [0], [0], [1], [0, 0, 1, 1], [], []>} : vector<8x512xbf16>, vector<512x128xbf16>, vector<8x128xf32> -> vector<8x128xf32>
    %7 = arith.addf %3, %6 : vector<8x128xf32>
    %c0_6 = arith.constant 0 : index
    %c0_7 = arith.constant 0 : index
    %8 = vector.load %arg10[%c0_6, %c0_7] : memref<8x128xf32, #tpu.memory_space<vmem>>, vector<8x128xf32>
    tpu.vector_store %arg10[%c0_6, %c0_7], %7 {strides = array<i32>} : memref<8x128xf32, #tpu.memory_space<vmem>>, vector<8x128xf32>,
    %c1_i32 = arith.constant 1 : i32
    %9 = arith.cmpi eq, %arg2, %c1_i32 : i32
    %10 = arith.extui %9 : i1 to i32
    %c0_i32_8 = arith.constant 0 : i32
    %11 = arith.cmpi ne, %10, %c0_i32_8 : i32
    scf.if %11 {
      %c0_9 = arith.constant 0 : index
      %c0_10 = arith.constant 0 : index
      %12 = vector.load %arg10[%c0_9, %c0_10] : memref<8x128xf32, #tpu.memory_space<vmem>>, vector<8x128xf32>
      %c0_11 = arith.constant 0 : index
      %c0_12 = arith.constant 0 : index
      %13 = vector.load %arg5[%c0_11, %c0_12] : memref<1x128xf32, #tpu.memory_space<vmem>>, vector<1x128xf32>
      %14 = vector.broadcast %13 : vector<1x128xf32> to vector<8x128xf32>
      %15 = arith.mulf %12, %14 : vector<8x128xf32>
      %c0_13 = arith.constant 0 : index
      %c0_14 = arith.constant 0 : index
      %16 = vector.load %arg6[%c0_13, %c0_14] : memref<1x128xf32, #tpu.memory_space<vmem>>, vector<1x128xf32>
      %17 = vector.broadcast %16 : vector<1x128xf32> to vector<8x128xf32>
      %18 = arith.addf %15, %17 : vector<8x128xf32>
      %cst_15 = arith.constant 0.000000e+00 : f32
      %19 = vector.broadcast %cst_15 : f32 to vector<8x128xf32>
      %20 = arith.maximumf %18, %19 : vector<8x128xf32>
      %c0_16 = arith.constant 0 : index
      %c0_17 = arith.constant 0 : index
      %21 = vector.load %arg7[%c0_16, %c0_17] : memref<1x128xf32, #tpu.memory_space<vmem>>, vector<1x128xf32>
      %22 = vector.broadcast %21 : vector<1x128xf32> to vector<8x128xf32>
      %23 = arith.mulf %20, %22 : vector<8x128xf32>
      %c0_18 = arith.constant 0 : index
      %c0_19 = arith.constant 0 : index
      %24 = vector.load %arg8[%c0_18, %c0_19] : memref<1x128xf32, #tpu.memory_space<vmem>>, vector<1x128xf32>
      %25 = vector.broadcast %24 : vector<1x128xf32> to vector<8x128xf32>
      %26 = arith.addf %23, %25 : vector<8x128xf32>
      %c0_20 = arith.constant 0 : index
      %c0_21 = arith.constant 0 : index
      %27 = vector.load %arg9[%c0_20, %c0_21] : memref<8x128xf32, #tpu.memory_space<vmem>>, vector<8x128xf32>
      tpu.vector_store %arg9[%c0_20, %c0_21], %26 {strides = array<i32>} : memref<8x128xf32, #tpu.memory_space<vmem>>, vector<8x128xf32>,
    } else {
    }
    return
  }
  func.func @transform_0(%arg0: i32, %arg1: i32, %arg2: i32) -> (i32, i32) {
    %c0_i32 = arith.constant 0 : i32
    return %arg0, %arg2 : i32, i32
  }
  func.func @transform_1(%arg0: i32, %arg1: i32, %arg2: i32) -> (i32, i32) {
    %c0_i32 = arith.constant 0 : i32
    return %arg2, %arg1 : i32, i32
  }
  func.func @transform_2(%arg0: i32, %arg1: i32, %arg2: i32) -> (i32, i32) {
    %c0_i32 = arith.constant 0 : i32
    %c0_i32_0 = arith.constant 0 : i32
    return %c0_i32, %arg1 : i32, i32
  }
  func.func @transform_3(%arg0: i32, %arg1: i32, %arg2: i32) -> (i32, i32) {
    %c0_i32 = arith.constant 0 : i32
    %c0_i32_0 = arith.constant 0 : i32
    return %c0_i32, %arg1 : i32, i32
  }
  func.func @transform_4(%arg0: i32, %arg1: i32, %arg2: i32) -> (i32, i32) {
    %c0_i32 = arith.constant 0 : i32
    %c0_i32_0 = arith.constant 0 : i32
    return %c0_i32, %arg1 : i32, i32
  }
  func.func @transform_5(%arg0: i32, %arg1: i32, %arg2: i32) -> (i32, i32) {
    %c0_i32 = arith.constant 0 : i32
    %c0_i32_0 = arith.constant 0 : i32
    return %c0_i32, %arg1 : i32, i32
  }
  func.func @transform_6(%arg0: i32, %arg1: i32, %arg2: i32) -> (i32, i32) {
    %c0_i32 = arith.constant 0 : i32
    return %arg0, %arg1 : i32, i32
  }
}

module attributes {stable_mosaic.version = 11 : i64} {
  func.func @_gemm_fused_kernel(%arg0: i32, %arg1: i32, %arg2: i32, %arg3: memref<8x256xbf16, #tpu.memory_space<vmem>>, %arg4: memref<256x128xbf16, #tpu.memory_space<vmem>>, %arg5: memref<1x128xf32, #tpu.memory_space<vmem>>, %arg6: memref<1x128xf32, #tpu.memory_space<vmem>>, %arg7: memref<8x128xf32, #tpu.memory_space<vmem>>, %arg8: memref<8x128xf32, #tpu.memory_space<vmem>>) attributes {dimension_semantics = [#tpu.dimension_semantics<parallel>, #tpu.dimension_semantics<parallel>, #tpu.dimension_semantics<arbitrary>], iteration_bounds = array<i64: 1, 1, 1>, scalar_prefetch = 0 : i64, scratch_operands = 1 : i64, tpu.core_type = #tpu.core_type<tc>, window_params = [{transform_indices = @transform_0, window_bounds = array<i64: 8, 256>}, {transform_indices = @transform_1, window_bounds = array<i64: 256, 128>}, {transform_indices = @transform_2, window_bounds = array<i64: 1, 128>}, {transform_indices = @transform_3, window_bounds = array<i64: 1, 128>}, {transform_indices = @transform_4, window_bounds = array<i64: 8, 128>}]} {
    %c0_i32 = arith.constant 0 : i32
    %0 = arith.cmpi eq, %arg2, %c0_i32 : i32
    %1 = arith.extui %0 : i1 to i32
    %c0_i32_0 = arith.constant 0 : i32
    %2 = arith.cmpi ne, %1, %c0_i32_0 : i32
    scf.if %2 {
      %cst_10 = arith.constant 0.000000e+00 : f32
      %12 = vector.broadcast %cst_10 : f32 to vector<8x128xf32>
      %c0_11 = arith.constant 0 : index
      %c0_12 = arith.constant 0 : index
      %13 = vector.load %arg8[%c0_11, %c0_12] : memref<8x128xf32, #tpu.memory_space<vmem>>, vector<8x128xf32>
      tpu.vector_store %arg8[%c0_11, %c0_12], %12 {strides = array<i32>} : memref<8x128xf32, #tpu.memory_space<vmem>>, vector<8x128xf32>,
    } else {
    }
    %c0 = arith.constant 0 : index
    %c0_1 = arith.constant 0 : index
    %3 = vector.load %arg8[%c0, %c0_1] : memref<8x128xf32, #tpu.memory_space<vmem>>, vector<8x128xf32>
    %c0_2 = arith.constant 0 : index
    %c0_3 = arith.constant 0 : index
    %4 = vector.load %arg3[%c0_2, %c0_3] : memref<8x256xbf16, #tpu.memory_space<vmem>>, vector<8x256xbf16>
    %c0_4 = arith.constant 0 : index
    %c0_5 = arith.constant 0 : index
    %5 = vector.load %arg4[%c0_4, %c0_5] : memref<256x128xbf16, #tpu.memory_space<vmem>>, vector<256x128xbf16>
    %cst = arith.constant dense<0.000000e+00> : vector<8x128xf32>
    %6 = tpu.matmul %4, %5, %cst {dimension_numbers = #tpu.dot_dimension_numbers<[1], [0], [0], [1], [0, 0, 1, 1], [], []>} : vector<8x256xbf16>, vector<256x128xbf16>, vector<8x128xf32> -> vector<8x128xf32>
    %7 = arith.addf %3, %6 : vector<8x128xf32>
    %c0_6 = arith.constant 0 : index
    %c0_7 = arith.constant 0 : index
    %8 = vector.load %arg8[%c0_6, %c0_7] : memref<8x128xf32, #tpu.memory_space<vmem>>, vector<8x128xf32>
    tpu.vector_store %arg8[%c0_6, %c0_7], %7 {strides = array<i32>} : memref<8x128xf32, #tpu.memory_space<vmem>>, vector<8x128xf32>,
    %c0_i32_8 = arith.constant 0 : i32
    %9 = arith.cmpi eq, %arg2, %c0_i32_8 : i32
    %10 = arith.extui %9 : i1 to i32
    %c0_i32_9 = arith.constant 0 : i32
    %11 = arith.cmpi ne, %10, %c0_i32_9 : i32
    scf.if %11 {
      %c0_10 = arith.constant 0 : index
      %c0_11 = arith.constant 0 : index
      %12 = vector.load %arg8[%c0_10, %c0_11] : memref<8x128xf32, #tpu.memory_space<vmem>>, vector<8x128xf32>
      %c0_12 = arith.constant 0 : index
      %c0_13 = arith.constant 0 : index
      %13 = vector.load %arg5[%c0_12, %c0_13] : memref<1x128xf32, #tpu.memory_space<vmem>>, vector<1x128xf32>
      %14 = vector.broadcast %13 : vector<1x128xf32> to vector<8x128xf32>
      %15 = arith.mulf %12, %14 : vector<8x128xf32>
      %c0_14 = arith.constant 0 : index
      %c0_15 = arith.constant 0 : index
      %16 = vector.load %arg6[%c0_14, %c0_15] : memref<1x128xf32, #tpu.memory_space<vmem>>, vector<1x128xf32>
      %17 = vector.broadcast %16 : vector<1x128xf32> to vector<8x128xf32>
      %18 = arith.addf %15, %17 : vector<8x128xf32>
      %c0_16 = arith.constant 0 : index
      %c0_17 = arith.constant 0 : index
      %19 = vector.load %arg7[%c0_16, %c0_17] : memref<8x128xf32, #tpu.memory_space<vmem>>, vector<8x128xf32>
      tpu.vector_store %arg7[%c0_16, %c0_17], %18 {strides = array<i32>} : memref<8x128xf32, #tpu.memory_space<vmem>>, vector<8x128xf32>,
    } else {
    }
    return
  }
  func.func @transform_0(%arg0: i32, %arg1: i32, %arg2: i32) -> (i32, i32) {
    %c0_i32 = arith.constant 0 : i32
    return %arg0, %arg2 : i32, i32
  }
  func.func @transform_1(%arg0: i32, %arg1: i32, %arg2: i32) -> (i32, i32) {
    %c0_i32 = arith.constant 0 : i32
    return %arg2, %arg1 : i32, i32
  }
  func.func @transform_2(%arg0: i32, %arg1: i32, %arg2: i32) -> (i32, i32) {
    %c0_i32 = arith.constant 0 : i32
    %c0_i32_0 = arith.constant 0 : i32
    return %c0_i32, %arg1 : i32, i32
  }
  func.func @transform_3(%arg0: i32, %arg1: i32, %arg2: i32) -> (i32, i32) {
    %c0_i32 = arith.constant 0 : i32
    %c0_i32_0 = arith.constant 0 : i32
    return %c0_i32, %arg1 : i32, i32
  }
  func.func @transform_4(%arg0: i32, %arg1: i32, %arg2: i32) -> (i32, i32) {
    %c0_i32 = arith.constant 0 : i32
    return %arg0, %arg1 : i32, i32
  }
}

module attributes {stable_mosaic.version = 11 : i64} {
  func.func @_row_softmax_kernel(%arg0: memref<8x4xf32, #tpu.memory_space<vmem>>, %arg1: memref<8x4xf32, #tpu.memory_space<vmem>>) attributes {dimension_semantics = [], scalar_prefetch = 0 : i64, scratch_operands = 0 : i64, tpu.core_type = #tpu.core_type<tc>} {
    %c0 = arith.constant 0 : index
    %c0_0 = arith.constant 0 : index
    %0 = vector.load %arg0[%c0, %c0_0] : memref<8x4xf32, #tpu.memory_space<vmem>>, vector<8x4xf32>
    %cst = arith.constant 5.000000e-01 : f32
    %1 = vector.broadcast %cst : f32 to vector<8x4xf32>
    %2 = arith.mulf %0, %1 : vector<8x4xf32>
    %cst_1 = arith.constant dense<0xFF800000> : vector<8xf32>
    %3 = vector.multi_reduction <maximumf>, %2, %cst_1 [1] : vector<8x4xf32> to vector<8xf32>
    %4 = vector.shape_cast %3 : vector<8xf32> to vector<8x1xf32>
    %5 = vector.broadcast %4 : vector<8x1xf32> to vector<8x4xf32>
    %6 = arith.subf %2, %5 : vector<8x4xf32>
    %7 = math.exp %6 : vector<8x4xf32>
    %cst_2 = arith.constant dense<0.000000e+00> : vector<8xf32>
    %8 = vector.multi_reduction <add>, %7, %cst_2 [1] : vector<8x4xf32> to vector<8xf32>
    %9 = vector.shape_cast %8 : vector<8xf32> to vector<8x1xf32>
    %10 = vector.broadcast %9 : vector<8x1xf32> to vector<8x4xf32>
    %11 = arith.divf %7, %10 : vector<8x4xf32>
    %c0_3 = arith.constant 0 : index
    %c0_4 = arith.constant 0 : index
    %12 = vector.load %arg1[%c0_3, %c0_4] : memref<8x4xf32, #tpu.memory_space<vmem>>, vector<8x4xf32>
    tpu.vector_store %arg1[%c0_3, %c0_4], %11 {strides = array<i32>} : memref<8x4xf32, #tpu.memory_space<vmem>>, vector<8x4xf32>,
    return
  }
}

</mosaic_0001>

<bundles_post_ra>
// kernel: _lambda_.69
= control target key start
LH: loop header
LB: loop body
LE: loop exit
PB: predicated region body
PF: predicated region fallthrough
CT: control target
= control target key end

     0   :  { %s1556_s15 = smov 0   ;;  %s1558_s16 = smov 0   ;;  %s1786_s0 = inlined_call_operand.vmem [shape: bf16[2048,256], index: 0, kind: input, shape index: {}]   ;;  %s1787_s1 = inlined_call_operand.vmem [shape: bf16[256,128], index: 1, kind: input, shape index: {}]   ;;  %s1788_s2 = inlined_call_operand.vmem [shape: f32[1,128], index: 2, kind: input, shape index: {}]   ;;  %s1789_s3 = inlined_call_operand.vmem [shape: f32[1,128], index: 3, kind: input, shape index: {}]   ;;  %s1790_s4 = inlined_call_operand.vmem [shape: f32[2048,128], index: 4, kind: output, shape index: {}]  }
   0x1   :  { %s1560_s17 = smov 0  }
   0x2 LB: > { %s33_s18 = sadd.s32 1, %s1525_s16  ;;  %p1232_p0 = scmp.ge.s32.totalorder %s1529_s17, 1  ;;  %s1529_s17 = sphi %s1560_s17, %s14_s17   ;;  %s1525_s16 = sphi %s1558_s16, %s1792_s16   ;;  %s1521_s15 = sphi %s1556_s15, %s1791_s15  }
   0x3   : > { %p35_p1 = scmp.ge.s32.totalorder %s33_s18, 8  ;;  %p224_p2 = scmp.lt.s32.totalorder %s1529_s17, 9 }
   0x5   : > { %s1794_s18 = smov (%p35_p1, %s33_s18), 0  ;;  %p225_p3 = pnand %p1232_p0, %p224_p2 }
   0x6   : > { %v1443_v0 = vld [vmem:[%s1787_s1 + $0x40] sm:$0xff] (!%p225_p3)   ;;  %s1233_s21 = sshll.u32 (!%p225_p3), %s1521_s15, 5  ;;  %v1445_v2 = vld [vmem:[%s1787_s1 + $0x48] sm:$0xff] (!%p225_p3)   ;;  %v1447_v4 = vld [vmem:[%s1787_s1 + $0x50] sm:$0xff] (!%p225_p3)  }
   0x7   : > { %228 = sbr.rel (%p225_p3) target bundleno = 320 (0x140), region = 36  ;;  %v1444_v1 = vld [vmem:[%s1787_s1] sm:$0xff] (!%p225_p3)   ;;  %1291 = vmatprep.subr.bf16.mxu0 (!%p225_p3), %v1443_v0  ;;  %1403 = vmatprep.subr.bf16.mxu1 (!%p225_p3), %v1443_v0  ;;  %v1446_v3 = vld [vmem:[%s1787_s1 + $0x8] sm:$0xff] (!%p225_p3)   ;;  %p274_p4 = scmp.lt.s32.totalorder (!%p225_p3), %s1233_s21, 255  ;;  %v1448_v5 = vld [vmem:[%s1787_s1 + $0x10] sm:$0xff] (!%p225_p3)  }
   0x8   : > { %1292 = vmatpush3.bf16.msra.mxu0 (!%p225_p3), %v1444_v1  ;;  %1411 = vmatpush3.bf16.msra.mxu1 (!%p225_p3), %v1444_v1  ;;  %v1449_v6 = vld [vmem:[%s1787_s1 + $0x58] sm:$0xff] (!%p225_p3)   ;;  %v1451_v8 = vld [vmem:[%s1787_s1 + $0x60] sm:$0xff] (!%p225_p3)   ;;  %v1453_v10 = vld [vmem:[%s1787_s1 + $0x68] sm:$0xff] (!%p225_p3)  }
   0x9   : > { %1293 = vmatprep.subr.bf16.mxu0 (!%p225_p3), %v1445_v2  ;;  %1404 = vmatprep.subr.bf16.mxu1 (!%p225_p3), %v1445_v2  ;;  %v1450_v7 = vld [vmem:[%s1787_s1 + $0x18] sm:$0xff] (!%p225_p3)   ;;  %v1452_v9 = vld [vmem:[%s1787_s1 + $0x20] sm:$0xff] (!%p225_p3)   ;;  %v1454_v13 = vld [vmem:[%s1787_s1 + $0x28] sm:$0xff] (!%p225_p3)  }
   0xa   : > { %v1455_v14 = vld [vmem:[%s1787_s1 + $0x70] sm:$0xff] (!%p225_p3)   ;;  %v1457_v16 = vld [vmem:[%s1787_s1 + $0x78] sm:$0xff] (!%p225_p3)   ;;  %v1667_v51 = vld [vmem:[%s1788_s2] ss:$0 sm:$0xff] (!%p225_p3) }
   0xb   : > { %v1456_v15 = vld [vmem:[%s1787_s1 + $0x30] sm:$0xff] (!%p225_p3)   ;;  %v1458_v17 = vld [vmem:[%s1787_s1 + $0x38] sm:$0xff] (!%p225_p3)   ;;  %v1672_v57 = vld [vmem:[%s1789_s3] ss:$0 sm:$0xff] (!%p225_p3) }
   0xc   : > { %1294 = vmatpush3.bf16.msra.mxu0 (!%p225_p3), %v1446_v3  ;;  %1412 = vmatpush3.bf16.msra.mxu1 (!%p225_p3), %v1446_v3 }
   0xd   : > { %1295 = vmatprep.subr.bf16.mxu0 (!%p225_p3), %v1447_v4  ;;  %1405 = vmatprep.subr.bf16.mxu1 (!%p225_p3), %v1447_v4 }
   0xe   : > { %s1796_s21 = smov (!%p274_p4, %s1233_s21), 255 }
   0xf   : > { %s1290_s10 = sshll.u32 %s1796_s21, 3 }
  0x10   : > { %1296 = vmatpush3.bf16.msra.mxu0 %v1448_v5  ;;  %1413 = vmatpush3.bf16.msra.mxu1 %v1448_v5  ;;  %s1609_s15 = scalar_lea.vmem %s1786_s0, %s1290_s10 }
  0x11   : > { %1297 = vmatprep.subr.bf16.mxu0 %v1449_v6  ;;  %1406 = vmatprep.subr.bf16.mxu1 %v1449_v6  ;;  %v1461_v11 = vld [vmem:[%s1609_s15 + $0x4] ss:$8 sps:$4 sm:$0xff]   ;;  %v1459_v18 = vld [vmem:[%s1609_s15] ss:$8 sps:$4 sm:$0xff]   ;;  %v1465_v20 = vld [vmem:[%s1609_s15 + $0x14] ss:$8 sps:$4 sm:$0xff]  }
  0x12   : > { %v1464_v12 = vld [vmem:[%s1609_s15 + $0x84] ss:$8 sps:$4 sm:$0xff]   ;;  %729 = vmatprep.mubr.bf16.mxu0 %v1461_v11  ;;  %v1462_v19 = vld [vmem:[%s1609_s15 + $0x80] ss:$8 sps:$4 sm:$0xff]   ;;  %v1467_v21 = vld [vmem:[%s1609_s15 + $0x94] ss:$8 sps:$4 sm:$0xff]  }
  0x13   : > { %793 = vmatprep.mubr.bf16.mxu1 %v1464_v12  ;;  %v1469_v22 = vld [vmem:[%s1609_s15 + $0x10] ss:$8 sps:$4 sm:$0xff]   ;;  %v1471_v24 = vld [vmem:[%s1609_s15 + $0x24] ss:$8 sps:$4 sm:$0xff]   ;;  %v1475_v26 = vld [vmem:[%s1609_s15 + $0x20] ss:$8 sps:$4 sm:$0xff]  }
  0x14   : > { %1298 = vmatpush3.bf16.msra.mxu0 %v1450_v7  ;;  %1414 = vmatpush3.bf16.msra.mxu1 %v1450_v7  ;;  %v1470_v23 = vld [vmem:[%s1609_s15 + $0x90] ss:$8 sps:$4 sm:$0xff]   ;;  %v1473_v25 = vld [vmem:[%s1609_s15 + $0xa4] ss:$8 sps:$4 sm:$0xff]   ;;  %v1476_v27 = vld [vmem:[%s1609_s15 + $0xa0] ss:$8 sps:$4 sm:$0xff]  }
  0x15   : > { %1299 = vmatprep.subr.bf16.mxu0 %v1451_v8  ;;  %1407 = vmatprep.subr.bf16.mxu1 %v1451_v8  ;;  %v1477_v28 = vld [vmem:[%s1609_s15 + $0x34] ss:$8 sps:$4 sm:$0xff]   ;;  %v1481_v30 = vld [vmem:[%s1609_s15 + $0x30] ss:$8 sps:$4 sm:$0xff]   ;;  %v1483_v32 = vld [vmem:[%s1609_s15 + $0x44] ss:$8 sps:$4 sm:$0xff]  }
  0x16   : > { %v1479_v29 = vld [vmem:[%s1609_s15 + $0xb4] ss:$8 sps:$4 sm:$0xff]   ;;  %v1482_v31 = vld [vmem:[%s1609_s15 + $0xb0] ss:$8 sps:$4 sm:$0xff]   ;;  %v1485_v33 = vld [vmem:[%s1609_s15 + $0xc4] ss:$8 sps:$4 sm:$0xff]  }
  0x17   : > { %v1487_v34 = vld [vmem:[%s1609_s15 + $0x40] ss:$8 sps:$4 sm:$0xff]   ;;  %v1489_v36 = vld [vmem:[%s1609_s15 + $0x54] ss:$8 sps:$4 sm:$0xff]   ;;  %v1493_v38 = vld [vmem:[%s1609_s15 + $0x50] ss:$8 sps:$4 sm:$0xff]  }
  0x18   : > { %1300 = vmatpush3.bf16.msra.mxu0 %v1452_v9  ;;  %1415 = vmatpush3.bf16.msra.mxu1 %v1452_v9  ;;  %v1488_v35 = vld [vmem:[%s1609_s15 + $0xc0] ss:$8 sps:$4 sm:$0xff]   ;;  %v1491_v37 = vld [vmem:[%s1609_s15 + $0xd4] ss:$8 sps:$4 sm:$0xff]   ;;  %v1494_v39 = vld [vmem:[%s1609_s15 + $0xd0] ss:$8 sps:$4 sm:$0xff]  }
  0x19   : > { %1301 = vmatprep.subr.bf16.mxu0 %v1453_v10  ;;  %1408 = vmatprep.subr.bf16.mxu1 %v1453_v10  ;;  %v1495_v40 = vld [vmem:[%s1609_s15 + $0x64] ss:$8 sps:$4 sm:$0xff]   ;;  %v1499_v42 = vld [vmem:[%s1609_s15 + $0x60] ss:$8 sps:$4 sm:$0xff]   ;;  %v1501_v44 = vld [vmem:[%s1609_s15 + $0x74] ss:$8 sps:$4 sm:$0xff]  }
  0x1a   : > { %v1497_v41 = vld [vmem:[%s1609_s15 + $0xe4] ss:$8 sps:$4 sm:$0xff]   ;;  %v1500_v43 = vld [vmem:[%s1609_s15 + $0xe0] ss:$8 sps:$4 sm:$0xff]   ;;  %v1503_v45 = vld [vmem:[%s1609_s15 + $0xf4] ss:$8 sps:$4 sm:$0xff]  }
  0x1b   : > { %v1505_v46 = vld [vmem:[%s1609_s15 + $0x70] ss:$8 sps:$4 sm:$0xff]  }
  0x1c   : > { %1302 = vmatpush3.bf16.msra.mxu0 %v1454_v13  ;;  %1416 = vmatpush3.bf16.msra.mxu1 %v1454_v13  ;;  %v1506_v47 = vld [vmem:[%s1609_s15 + $0xf0] ss:$8 sps:$4 sm:$0xff]   ;;  %s1685_s15 = scalar_lea.vmem %s1790_s4, %s1290_s10 }
  0x1d   : > { %1303 = vmatprep.subr.bf16.mxu0 %v1455_v14  ;;  %1409 = vmatprep.subr.bf16.mxu1 %v1455_v14 }
  0x20   : > { %1304 = vmatpush3.bf16.msra.mxu0 %v1456_v15  ;;  %1417 = vmatpush3.bf16.msra.mxu1 %v1456_v15 }
  0x21   : > { %1305 = vmatprep.subr.bf16.mxu0 %v1457_v16  ;;  %1410 = vmatprep.subr.bf16.mxu1 %v1457_v16 }
  0x24   : > { %1306 = vmatpush3.bf16.msra.mxu0 %v1458_v17  ;;  %1418 = vmatpush3.bf16.msra.mxu1 %v1458_v17 }
  0x27   : > { %730 = vmatmul.mubr.bf16.vlgmr.msra.gmra.mrb[0].mxu0 %v1459_v18  ;;  %794 = vmatmul.mubr.bf16.vlgmr.msra.gmra.mrb[0].mxu1 %v1462_v19 }
  0x28   : > { %737 = vmatprep.mubr.bf16.mxu0 %v1465_v20  ;;  %801 = vmatprep.mubr.bf16.mxu1 %v1467_v21 }
  0x2f   : > { %738 = vmatmul.mubr.bf16.gmra.mrb[4].mxu0 %v1469_v22  ;;  %802 = vmatmul.mubr.bf16.gmra.mrb[4].mxu1 %v1470_v23 }
  0x30   : > { %745 = vmatprep.mubr.bf16.mxu0 %v1471_v24  ;;  %809 = vmatprep.mubr.bf16.mxu1 %v1473_v25 }
  0x37   : > { %746 = vmatmul.mubr.bf16.gmra.mrb[8].mxu0 %v1475_v26  ;;  %810 = vmatmul.mubr.bf16.gmra.mrb[8].mxu1 %v1476_v27 }
  0x38   : > { %753 = vmatprep.mubr.bf16.mxu0 %v1477_v28  ;;  %817 = vmatprep.mubr.bf16.mxu1 %v1479_v29 }
  0x3f   : > { %754 = vmatmul.mubr.bf16.gmra.mrb[12].mxu0 %v1481_v30  ;;  %818 = vmatmul.mubr.bf16.gmra.mrb[12].mxu1 %v1482_v31 }
  0x40   : > { %761 = vmatprep.mubr.bf16.mxu0 %v1483_v32  ;;  %825 = vmatprep.mubr.bf16.mxu1 %v1485_v33 }
  0x47   : > { %762 = vmatmul.mubr.bf16.gmra.mrb[16].mxu0 %v1487_v34  ;;  %826 = vmatmul.mubr.bf16.gmra.mrb[16].mxu1 %v1488_v35 }
  0x48   : > { %769 = vmatprep.mubr.bf16.mxu0 %v1489_v36  ;;  %833 = vmatprep.mubr.bf16.mxu1 %v1491_v37 }
  0x4f   : > { %770 = vmatmul.mubr.bf16.gmra.mrb[20].mxu0 %v1493_v38  ;;  %834 = vmatmul.mubr.bf16.gmra.mrb[20].mxu1 %v1494_v39 }
  0x50   : > { %777 = vmatprep.mubr.bf16.mxu0 %v1495_v40  ;;  %841 = vmatprep.mubr.bf16.mxu1 %v1497_v41 }
  0x57   : > { %778 = vmatmul.mubr.bf16.gmra.mrb[24].mxu0 %v1499_v42  ;;  %842 = vmatmul.mubr.bf16.gmra.mrb[24].mxu1 %v1500_v43 }
  0x58   : > { %785 = vmatprep.mubr.bf16.mxu0 %v1501_v44  ;;  %849 = vmatprep.mubr.bf16.mxu1 %v1503_v45 }
  0x5f   : > { %786 = vmatmul.mubr.bf16.gmra.mrb[28].mxu0 %v1505_v46  ;;  %850 = vmatmul.mubr.bf16.gmra.mrb[28].mxu1 %v1506_v47 }
  0xfa   : > { %v1307_v48 = vpop.f32.mrb[0].mxu0  ;;  %v1355_v49 = vpop.f32.mrb[0].mxu1 }
  0xfb   : > { %v1308_v50 = vpop.f32.mrb[1].mxu0  ;;  %v1356_v52 = vpop.f32.mrb[1].mxu1 }
  0xfc   : > { %v1309_v53 = vadd.f32 %v1308_v50, %v1307_v48  ;;  %v1357_v54 = vadd.f32 %v1356_v52, %v1355_v49  ;;  %v1310_v55 = vpop.f32.mrb[2].mxu0  ;;  %v1358_v56 = vpop.f32.mrb[2].mxu1 }
  0xfd   : > { %v1311_v58 = vpop.f32.mrb[3].mxu0  ;;  %v1359_v59 = vpop.f32.mrb[3].mxu1 }
  0xfe   : > { %v964_v60 = vmul.f32 %v1309_v53, %v1667_v51  ;;  %v980_v61 = vmul.f32 %v1357_v54, %v1667_v51  ;;  %v1312_v62 = vadd.f32 %v1311_v58, %v1310_v55  ;;  %v1360_v63 = vadd.f32 %v1359_v59, %v1358_v56 }
 0x100   : > { %v1003_v0 = vadd.f32 %v1672_v57, %v964_v60  ;;  %v1019_v1 = vadd.f32 %v1672_v57, %v980_v61  ;;  %v965_v2 = vmul.f32 %v1312_v62, %v1667_v51  ;;  %v981_v3 = vmul.f32 %v1360_v63, %v1667_v51 }
 0x102   : > { %v1035_v4 = vmax.f32 %v1003_v0, 0.0  ;;  %v1051_v5 = vmax.f32 %v1019_v1, 0.0  ;;  %v1004_v6 = vadd.f32 %v1672_v57, %v965_v2  ;;  %v1020_v7 = vadd.f32 %v1672_v57, %v981_v3  ;;  %v1313_v8 = vpop.f32.mrb[4].mxu0  ;;  %v1361_v9 = vpop.f32.mrb[4].mxu1 }
 0x103   : > { %v1314_v10 = vpop.f32.mrb[5].mxu0  ;;  %v1362_v11 = vpop.f32.mrb[5].mxu1 }
 0x104   : > { %1067 = vst [vmem:[%s1685_s15] sm:$0xff] %v1035_v4  ;;  %1083 = vst [vmem:[%s1685_s15 + $0x80] sm:$0xff] %v1051_v5  ;;  %v1036_v12 = vmax.f32 %v1004_v6, 0.0  ;;  %v1052_v13 = vmax.f32 %v1020_v7, 0.0  ;;  %v1315_v14 = vadd.f32 %v1314_v10, %v1313_v8  ;;  %v1363_v15 = vadd.f32 %v1362_v11, %v1361_v9  ;;  %v1316_v16 = vpop.f32.mrb[6].mxu0  ;;  %v1364_v17 = vpop.f32.mrb[6].mxu1 }
 0x105   : > { %v1317_v18 = vpop.f32.mrb[7].mxu0  ;;  %v1365_v19 = vpop.f32.mrb[7].mxu1 }
 0x106   : > { %1068 = vst [vmem:[%s1685_s15 + $0x8] sm:$0xff] %v1036_v12  ;;  %1084 = vst [vmem:[%s1685_s15 + $0x88] sm:$0xff] %v1052_v13  ;;  %v966_v20 = vmul.f32 %v1315_v14, %v1667_v51  ;;  %v982_v21 = vmul.f32 %v1363_v15, %v1667_v51  ;;  %v1318_v22 = vadd.f32 %v1317_v18, %v1316_v16 }
 0x107   : > { %v1366_v23 = vadd.f32 %v1365_v19, %v1364_v17 }
 0x108   : > { %v1005_v24 = vadd.f32 %v1672_v57, %v966_v20  ;;  %v1021_v25 = vadd.f32 %v1672_v57, %v982_v21  ;;  %v967_v26 = vmul.f32 %v1318_v22, %v1667_v51 }
 0x109   : > { %v983_v27 = vmul.f32 %v1366_v23, %v1667_v51 }
 0x10a   : > { %v1037_v28 = vmax.f32 %v1005_v24, 0.0  ;;  %v1053_v29 = vmax.f32 %v1021_v25, 0.0  ;;  %v1006_v30 = vadd.f32 %v1672_v57, %v967_v26  ;;  %v1319_v32 = vpop.f32.mrb[8].mxu0  ;;  %v1367_v33 = vpop.f32.mrb[8].mxu1 }
 0x10b   : > { %v1022_v31 = vadd.f32 %v1672_v57, %v983_v27  ;;  %v1320_v34 = vpop.f32.mrb[9].mxu0  ;;  %v1368_v35 = vpop.f32.mrb[9].mxu1 }
 0x10c   : > { %1069 = vst [vmem:[%s1685_s15 + $0x10] sm:$0xff] %v1037_v28  ;;  %1085 = vst [vmem:[%s1685_s15 + $0x90] sm:$0xff] %v1053_v29  ;;  %v1038_v36 = vmax.f32 %v1006_v30, 0.0  ;;  %v1321_v38 = vadd.f32 %v1320_v34, %v1319_v32  ;;  %v1369_v39 = vadd.f32 %v1368_v35, %v1367_v33  ;;  %v1322_v40 = vpop.f32.mrb[10].mxu0  ;;  %v1370_v41 = vpop.f32.mrb[10].mxu1 }
 0x10d   : > { %v1054_v37 = vmax.f32 %v1022_v31, 0.0  ;;  %v1323_v42 = vpop.f32.mrb[11].mxu0  ;;  %v1371_v43 = vpop.f32.mrb[11].mxu1 }
 0x10e   : > { %1070 = vst [vmem:[%s1685_s15 + $0x18] sm:$0xff] %v1038_v36  ;;  %v968_v44 = vmul.f32 %v1321_v38, %v1667_v51  ;;  %v984_v45 = vmul.f32 %v1369_v39, %v1667_v51  ;;  %v1324_v46 = vadd.f32 %v1323_v42, %v1322_v40  ;;  %v1372_v47 = vadd.f32 %v1371_v43, %v1370_v41 }
 0x10f   : > { %1086 = vst [vmem:[%s1685_s15 + $0x98] sm:$0xff] %v1054_v37 }
 0x110   : > { %v1007_v48 = vadd.f32 %v1672_v57, %v968_v44  ;;  %v1023_v49 = vadd.f32 %v1672_v57, %v984_v45  ;;  %v969_v50 = vmul.f32 %v1324_v46, %v1667_v51  ;;  %v985_v52 = vmul.f32 %v1372_v47, %v1667_v51 }
 0x112   : > { %v1039_v53 = vmax.f32 %v1007_v48, 0.0  ;;  %v1055_v54 = vmax.f32 %v1023_v49, 0.0  ;;  %v1008_v55 = vadd.f32 %v1672_v57, %v969_v50  ;;  %v1024_v56 = vadd.f32 %v1672_v57, %v985_v52  ;;  %v1325_v58 = vpop.f32.mrb[12].mxu0  ;;  %v1373_v59 = vpop.f32.mrb[12].mxu1 }
 0x113   : > { %v1326_v60 = vpop.f32.mrb[13].mxu0  ;;  %v1374_v61 = vpop.f32.mrb[13].mxu1 }
 0x114   : > { %1071 = vst [vmem:[%s1685_s15 + $0x20] sm:$0xff] %v1039_v53  ;;  %1087 = vst [vmem:[%s1685_s15 + $0xa0] sm:$0xff] %v1055_v54  ;;  %v1040_v62 = vmax.f32 %v1008_v55, 0.0  ;;  %v1056_v63 = vmax.f32 %v1024_v56, 0.0  ;;  %v1327_v0 = vadd.f32 %v1326_v60, %v1325_v58  ;;  %v1375_v1 = vadd.f32 %v1374_v61, %v1373_v59  ;;  %v1328_v2 = vpop.f32.mrb[14].mxu0  ;;  %v1376_v3 = vpop.f32.mrb[14].mxu1 }
 0x115   : > { %v1329_v4 = vpop.f32.mrb[15].mxu0  ;;  %v1377_v5 = vpop.f32.mrb[15].mxu1 }
 0x116   : > { %1072 = vst [vmem:[%s1685_s15 + $0x28] sm:$0xff] %v1040_v62  ;;  %1088 = vst [vmem:[%s1685_s15 + $0xa8] sm:$0xff] %v1056_v63  ;;  %v970_v6 = vmul.f32 %v1327_v0, %v1667_v51  ;;  %v986_v7 = vmul.f32 %v1375_v1, %v1667_v51  ;;  %v1330_v8 = vadd.f32 %v1329_v4, %v1328_v2 }
 0x117   : > { %v1378_v9 = vadd.f32 %v1377_v5, %v1376_v3 }
 0x118   : > { %v1009_v10 = vadd.f32 %v1672_v57, %v970_v6  ;;  %v1025_v11 = vadd.f32 %v1672_v57, %v986_v7  ;;  %v971_v12 = vmul.f32 %v1330_v8, %v1667_v51 }
 0x119   : > { %v987_v13 = vmul.f32 %v1378_v9, %v1667_v51 }
 0x11a   : > { %v1041_v14 = vmax.f32 %v1009_v10, 0.0  ;;  %v1057_v15 = vmax.f32 %v1025_v11, 0.0  ;;  %v1010_v16 = vadd.f32 %v1672_v57, %v971_v12  ;;  %v1331_v18 = vpop.f32.mrb[16].mxu0  ;;  %v1379_v19 = vpop.f32.mrb[16].mxu1 }
 0x11b   : > { %v1026_v17 = vadd.f32 %v1672_v57, %v987_v13  ;;  %v1332_v20 = vpop.f32.mrb[17].mxu0  ;;  %v1380_v21 = vpop.f32.mrb[17].mxu1 }
 0x11c   : > { %1073 = vst [vmem:[%s1685_s15 + $0x30] sm:$0xff] %v1041_v14  ;;  %1089 = vst [vmem:[%s1685_s15 + $0xb0] sm:$0xff] %v1057_v15  ;;  %v1042_v22 = vmax.f32 %v1010_v16, 0.0  ;;  %v1333_v24 = vadd.f32 %v1332_v20, %v1331_v18  ;;  %v1381_v25 = vadd.f32 %v1380_v21, %v1379_v19  ;;  %v1334_v26 = vpop.f32.mrb[18].mxu0  ;;  %v1382_v27 = vpop.f32.mrb[18].mxu1 }
 0x11d   : > { %v1058_v23 = vmax.f32 %v1026_v17, 0.0  ;;  %v1335_v28 = vpop.f32.mrb[19].mxu0  ;;  %v1383_v29 = vpop.f32.mrb[19].mxu1 }
 0x11e   : > { %1074 = vst [vmem:[%s1685_s15 + $0x38] sm:$0xff] %v1042_v22  ;;  %v972_v30 = vmul.f32 %v1333_v24, %v1667_v51  ;;  %v988_v31 = vmul.f32 %v1381_v25, %v1667_v51  ;;  %v1336_v32 = vadd.f32 %v1335_v28, %v1334_v26  ;;  %v1384_v33 = vadd.f32 %v1383_v29, %v1382_v27 }
 0x11f   : > { %1090 = vst [vmem:[%s1685_s15 + $0xb8] sm:$0xff] %v1058_v23 }
 0x120   : > { %v1011_v34 = vadd.f32 %v1672_v57, %v972_v30  ;;  %v1027_v35 = vadd.f32 %v1672_v57, %v988_v31  ;;  %v973_v36 = vmul.f32 %v1336_v32, %v1667_v51  ;;  %v989_v37 = vmul.f32 %v1384_v33, %v1667_v51 }
 0x122   : > { %v1043_v38 = vmax.f32 %v1011_v34, 0.0  ;;  %v1059_v39 = vmax.f32 %v1027_v35, 0.0  ;;  %v1012_v40 = vadd.f32 %v1672_v57, %v973_v36  ;;  %v1028_v41 = vadd.f32 %v1672_v57, %v989_v37  ;;  %v1337_v42 = vpop.f32.mrb[20].mxu0  ;;  %v1385_v43 = vpop.f32.mrb[20].mxu1 }
 0x123   : > { %v1338_v44 = vpop.f32.mrb[21].mxu0  ;;  %v1386_v45 = vpop.f32.mrb[21].mxu1 }
 0x124   : > { %1075 = vst [vmem:[%s1685_s15 + $0x40] sm:$0xff] %v1043_v38  ;;  %1091 = vst [vmem:[%s1685_s15 + $0xc0] sm:$0xff] %v1059_v39  ;;  %v1044_v46 = vmax.f32 %v1012_v40, 0.0  ;;  %v1060_v47 = vmax.f32 %v1028_v41, 0.0  ;;  %v1339_v48 = vadd.f32 %v1338_v44, %v1337_v42  ;;  %v1387_v49 = vadd.f32 %v1386_v45, %v1385_v43  ;;  %v1340_v50 = vpop.f32.mrb[22].mxu0  ;;  %v1388_v52 = vpop.f32.mrb[22].mxu1 }
 0x125   : > { %v1341_v53 = vpop.f32.mrb[23].mxu0  ;;  %v1389_v54 = vpop.f32.mrb[23].mxu1 }
 0x126   : > { %1076 = vst [vmem:[%s1685_s15 + $0x48] sm:$0xff] %v1044_v46  ;;  %1092 = vst [vmem:[%s1685_s15 + $0xc8] sm:$0xff] %v1060_v47  ;;  %v974_v55 = vmul.f32 %v1339_v48, %v1667_v51  ;;  %v990_v56 = vmul.f32 %v1387_v49, %v1667_v51  ;;  %v1342_v58 = vadd.f32 %v1341_v53, %v1340_v50 }
 0x127   : > { %v1390_v59 = vadd.f32 %v1389_v54, %v1388_v52 }
 0x128   : > { %v1013_v60 = vadd.f32 %v1672_v57, %v974_v55  ;;  %v1029_v61 = vadd.f32 %v1672_v57, %v990_v56  ;;  %v975_v62 = vmul.f32 %v1342_v58, %v1667_v51 }
 0x129   : > { %v991_v63 = vmul.f32 %v1390_v59, %v1667_v51 }
 0x12a   : > { %v1045_v0 = vmax.f32 %v1013_v60, 0.0  ;;  %v1061_v1 = vmax.f32 %v1029_v61, 0.0  ;;  %v1014_v2 = vadd.f32 %v1672_v57, %v975_v62  ;;  %v1343_v4 = vpop.f32.mrb[24].mxu0  ;;  %v1391_v5 = vpop.f32.mrb[24].mxu1 }
 0x12b   : > { %v1030_v3 = vadd.f32 %v1672_v57, %v991_v63  ;;  %v1344_v6 = vpop.f32.mrb[25].mxu0  ;;  %v1392_v7 = vpop.f32.mrb[25].mxu1 }
 0x12c   : > { %1077 = vst [vmem:[%s1685_s15 + $0x50] sm:$0xff] %v1045_v0  ;;  %1093 = vst [vmem:[%s1685_s15 + $0xd0] sm:$0xff] %v1061_v1  ;;  %v1046_v8 = vmax.f32 %v1014_v2, 0.0  ;;  %v1345_v10 = vadd.f32 %v1344_v6, %v1343_v4  ;;  %v1393_v11 = vadd.f32 %v1392_v7, %v1391_v5  ;;  %v1346_v12 = vpop.f32.mrb[26].mxu0  ;;  %v1394_v13 = vpop.f32.mrb[26].mxu1 }
 0x12d   : > { %v1062_v9 = vmax.f32 %v1030_v3, 0.0  ;;  %v1347_v14 = vpop.f32.mrb[27].mxu0  ;;  %v1395_v15 = vpop.f32.mrb[27].mxu1 }
 0x12e   : > { %1078 = vst [vmem:[%s1685_s15 + $0x58] sm:$0xff] %v1046_v8  ;;  %v976_v16 = vmul.f32 %v1345_v10, %v1667_v51  ;;  %v992_v17 = vmul.f32 %v1393_v11, %v1667_v51  ;;  %v1348_v18 = vadd.f32 %v1347_v14, %v1346_v12  ;;  %v1396_v19 = vadd.f32 %v1395_v15, %v1394_v13 }
 0x12f   : > { %1094 = vst [vmem:[%s1685_s15 + $0xd8] sm:$0xff] %v1062_v9 }
 0x130   : > { %v1015_v20 = vadd.f32 %v1672_v57, %v976_v16  ;;  %v1031_v21 = vadd.f32 %v1672_v57, %v992_v17  ;;  %v977_v22 = vmul.f32 %v1348_v18, %v1667_v51  ;;  %v993_v23 = vmul.f32 %v1396_v19, %v1667_v51 }
 0x132   : > { %v1047_v24 = vmax.f32 %v1015_v20, 0.0  ;;  %v1063_v25 = vmax.f32 %v1031_v21, 0.0  ;;  %v1016_v26 = vadd.f32 %v1672_v57, %v977_v22  ;;  %v1032_v27 = vadd.f32 %v1672_v57, %v993_v23  ;;  %v1349_v28 = vpop.f32.mrb[28].mxu0  ;;  %v1397_v29 = vpop.f32.mrb[28].mxu1 }
 0x133   : > { %v1350_v30 = vpop.f32.mrb[29].mxu0  ;;  %v1398_v31 = vpop.f32.mrb[29].mxu1 }
 0x134   : > { %1079 = vst [vmem:[%s1685_s15 + $0x60] sm:$0xff] %v1047_v24  ;;  %1095 = vst [vmem:[%s1685_s15 + $0xe0] sm:$0xff] %v1063_v25  ;;  %v1048_v32 = vmax.f32 %v1016_v26, 0.0  ;;  %v1064_v33 = vmax.f32 %v1032_v27, 0.0  ;;  %v1351_v34 = vadd.f32 %v1350_v30, %v1349_v28  ;;  %v1399_v35 = vadd.f32 %v1398_v31, %v1397_v29  ;;  %v1352_v36 = vpop.f32.mrb[30].mxu0  ;;  %v1400_v37 = vpop.f32.mrb[30].mxu1 }
 0x135   : > { %v1353_v38 = vpop.f32.mrb[31].mxu0  ;;  %v1401_v39 = vpop.f32.mrb[31].mxu1 }
 0x136   : > { %1080 = vst [vmem:[%s1685_s15 + $0x68] sm:$0xff] %v1048_v32  ;;  %1096 = vst [vmem:[%s1685_s15 + $0xe8] sm:$0xff] %v1064_v33  ;;  %v978_v40 = vmul.f32 %v1351_v34, %v1667_v51  ;;  %v994_v41 = vmul.f32 %v1399_v35, %v1667_v51  ;;  %v1354_v42 = vadd.f32 %v1353_v38, %v1352_v36 }
 0x137   : > { %v1402_v43 = vadd.f32 %v1401_v39, %v1400_v37 }
 0x138   : > { %v1017_v44 = vadd.f32 %v1672_v57, %v978_v40  ;;  %v1033_v45 = vadd.f32 %v1672_v57, %v994_v41  ;;  %v979_v46 = vmul.f32 %v1354_v42, %v1667_v51 }
 0x139   : > { %v995_v47 = vmul.f32 %v1402_v43, %v1667_v51 }
 0x13a   : > { %v1049_v48 = vmax.f32 %v1017_v44, 0.0  ;;  %v1065_v49 = vmax.f32 %v1033_v45, 0.0  ;;  %v1018_v50 = vadd.f32 %v1672_v57, %v979_v46 }
 0x13b   : > { %v1034_v52 = vadd.f32 %v1672_v57, %v995_v47 }
 0x13c   : > { %1081 = vst [vmem:[%s1685_s15 + $0x70] sm:$0xff] %v1049_v48  ;;  %1097 = vst [vmem:[%s1685_s15 + $0xf0] sm:$0xff] %v1065_v49  ;;  %v1050_v53 = vmax.f32 %v1018_v50, 0.0 }
 0x13d   : > { %v1066_v54 = vmax.f32 %v1034_v52, 0.0 }
 0x13e   : > { %1082 = vst [vmem:[%s1685_s15 + $0x78] sm:$0xff] %v1050_v53 }
 0x13f   : > { %1098 = vst [vmem:[%s1685_s15 + $0xf8] sm:$0xff] %v1066_v54 }
 0x140 PF: > { %s14_s17 = sadd.s32 1, %s1529_s17   ;;  %s1791_s15 = smov %s1525_s16 }
 0x141   : > { %p11_p5 = scmp.ge.s32.totalorder %s14_s17, 10   ;;  %s1792_s16 = smov %s1794_s18 }
 0x143   :  { %13 = sbr.rel (!%p11_p5) target bundleno = 2 (0x2), region = 83 }

// kernel: _lambda_.70
= control target key start
LH: loop header
LB: loop body
LE: loop exit
PB: predicated region body
PF: predicated region fallthrough
CT: control target
= control target key end

     0   :  { %s182_s0 = inlined_call_operand.vmem [shape: f32[16,128], index: 0, kind: input, shape index: {}]   ;;  %s183_s1 = inlined_call_operand.vmem [shape: f32[16,128], index: 1, kind: input, shape index: {}]   ;;  %s184_s2 = inlined_call_operand.vmem [shape: f32[16,128], index: 2, kind: input, shape index: {}]   ;;  %s185_s3 = inlined_call_operand.vmem [shape: f32[16,128], index: 3, kind: input, shape index: {}]   ;;  %s186_s4 = inlined_call_operand.vmem [shape: f32[16,128], index: 4, kind: input, shape index: {}]   ;;  %s187_s5 = inlined_call_operand.vmem [shape: f32[16,128], index: 5, kind: input, shape index: {}]   ;;  %s188_s6 = inlined_call_operand.vmem [shape: f32[16,128], index: 6, kind: input, shape index: {}]   ;;  %s189_s7 = inlined_call_operand.vmem [shape: f32[16,128], index: 7, kind: input, shape index: {}]   ;;  %s190_s8 = inlined_call_operand.vmem [shape: f32[16,128], index: 8, kind: input, shape index: {}]   ;;  %s191_s9 = inlined_call_operand.vmem [shape: f32[16,128], index: 9, kind: output, shape index: {}]  }
   0x1   :  { %v32_v0 = vld [vmem:[%s182_s0] sm:$0xff]  ;;  %v33_v6 = vld [vmem:[%s182_s0 + $0x8] sm:$0xff] }
   0x2   :  { %v34_v1 = vld [vmem:[%s183_s1] sm:$0xff]  ;;  %v35_v7 = vld [vmem:[%s183_s1 + $0x8] sm:$0xff] }
   0x3   :  { %v38_v2 = vld [vmem:[%s184_s2] sm:$0xff]  ;;  %v36_v3 = vmax.f32 %v32_v0, %v34_v1  ;;  %v39_v8 = vld [vmem:[%s184_s2 + $0x8] sm:$0xff]  ;;  %v37_v10 = vmax.f32 %v33_v6, %v35_v7 }
   0x4   :  { %v42_v4 = vld [vmem:[%s185_s3] sm:$0xff]  ;;  %v43_v12 = vld [vmem:[%s185_s3 + $0x8] sm:$0xff] }
   0x5   :  { %v40_v5 = vmax.f32 %v36_v3, %v38_v2  ;;  %v46_v9 = vld [vmem:[%s186_s4] sm:$0xff]  ;;  %v41_v14 = vmax.f32 %v37_v10, %v39_v8  ;;  %v47_v16 = vld [vmem:[%s186_s4 + $0x8] sm:$0xff] }
   0x6   :  { %v50_v13 = vld [vmem:[%s187_s5] sm:$0xff]  ;;  %v51_v20 = vld [vmem:[%s187_s5 + $0x8] sm:$0xff] }
   0x7   :  { %v44_v11 = vmax.f32 %v40_v5, %v42_v4  ;;  %v54_v17 = vld [vmem:[%s188_s6] sm:$0xff]  ;;  %v45_v18 = vmax.f32 %v41_v14, %v43_v12  ;;  %v55_v24 = vld [vmem:[%s188_s6 + $0x8] sm:$0xff] }
   0x8   :  { %v58_v21 = vld [vmem:[%s189_s7] sm:$0xff]  ;;  %v59_v28 = vld [vmem:[%s189_s7 + $0x8] sm:$0xff] }
   0x9   :  { %v48_v15 = vmax.f32 %v44_v11, %v46_v9  ;;  %v49_v22 = vmax.f32 %v45_v18, %v47_v16  ;;  %v62_v25 = vld [vmem:[%s190_s8] sm:$0xff]  ;;  %v63_v31 = vld [vmem:[%s190_s8 + $0x8] sm:$0xff] }
   0xb   :  { %v52_v19 = vmax.f32 %v48_v15, %v50_v13  ;;  %v53_v26 = vmax.f32 %v49_v22, %v51_v20 }
   0xd   :  { %v56_v23 = vmax.f32 %v52_v19, %v54_v17  ;;  %v57_v29 = vmax.f32 %v53_v26, %v55_v24 }
   0xf   :  { %v60_v27 = vmax.f32 %v56_v23, %v58_v21  ;;  %v61_v32 = vmax.f32 %v57_v29, %v59_v28 }
  0x11   :  { %v64_v30 = vmax.f32 %v60_v27, %v62_v25  ;;  %v65_v33 = vmax.f32 %v61_v32, %v63_v31 }
  0x13   :  { %66 = vst [vmem:[%s191_s9] sm:$0xff] %v64_v30  ;;  %67 = vst [vmem:[%s191_s9 + $0x8] sm:$0xff] %v65_v33 }

// kernel: _lambda_.71
= control target key start
LH: loop header
LB: loop body
LE: loop exit
PB: predicated region body
PF: predicated region fallthrough
CT: control target
= control target key end

     0   :  { %s1311_s15 = smov 0   ;;  %s1313_s16 = smov 0   ;;  %s1498_s0 = inlined_call_operand.vmem [shape: bf16[512,128], index: 0, kind: input, shape index: {}]   ;;  %s1499_s1 = inlined_call_operand.vmem [shape: bf16[128,128], index: 1, kind: input, shape index: {}]   ;;  %s1500_s2 = inlined_call_operand.vmem [shape: f32[1,128], index: 2, kind: input, shape index: {}]   ;;  %s1501_s3 = inlined_call_operand.vmem [shape: f32[1,128], index: 3, kind: input, shape index: {}]   ;;  %s1502_s4 = inlined_call_operand.vmem [shape: f32[512,128], index: 4, kind: output, shape index: {}]  }
   0x1   :  { %s1315_s17 = smov 0  }
   0x2 LB: > { %s33_s18 = sadd.s32 1, %s1280_s16  ;;  %p1093_p0 = scmp.ge.s32.totalorder %s1284_s17, 1  ;;  %s1284_s17 = sphi %s1315_s17, %s14_s17   ;;  %s1280_s16 = sphi %s1313_s16, %s1504_s16   ;;  %s1276_s15 = sphi %s1311_s15, %s1503_s15  }
   0x3   : > { %p35_p1 = scmp.ge.s32.totalorder %s33_s18, 2  ;;  %p221_p2 = scmp.lt.s32.totalorder %s1284_s17, 3 }
   0x5   : > { %s1506_s18 = smov (%p35_p1, %s33_s18), 0  ;;  %p222_p3 = pnand %p1093_p0, %p221_p2 }
   0x6   : > { %v1238_v0 = vld [vmem:[%s1499_s1] sm:$0xff] (!%p222_p3)   ;;  %s1094_s21 = sshll.u32 (!%p222_p3), %s1276_s15, 5  ;;  %v1239_v1 = vld [vmem:[%s1499_s1 + $0x8] sm:$0xff] (!%p222_p3)   ;;  %v1240_v2 = vld [vmem:[%s1499_s1 + $0x10] sm:$0xff] (!%p222_p3)  }
   0x7   : > { %225 = sbr.rel (%p222_p3) target bundleno = 285 (0x11d), region = 36  ;;  %p268_p4 = scmp.lt.s32.totalorder (!%p222_p3), %s1094_s21, 63  ;;  %1150 = vmatprep.subr.bf16.mxu0 (!%p222_p3), %v1238_v0  ;;  %1198 = vmatprep.subr.bf16.mxu1 (!%p222_p3), %v1238_v0  ;;  %v1241_v3 = vld [vmem:[%s1499_s1 + $0x18] sm:$0xff] (!%p222_p3)   ;;  %v1242_v6 = vld [vmem:[%s1499_s1 + $0x20] sm:$0xff] (!%p222_p3)   ;;  %v1243_v7 = vld [vmem:[%s1499_s1 + $0x28] sm:$0xff] (!%p222_p3)  }
   0x8   : > { %1151 = vmatpush3.bf16.msra.mxu0 (!%p222_p3), %v1238_v0  ;;  %1206 = vmatpush3.bf16.msra.mxu1 (!%p222_p3), %v1238_v0  ;;  %v1244_v8 = vld [vmem:[%s1499_s1 + $0x30] sm:$0xff] (!%p222_p3)   ;;  %v1245_v9 = vld [vmem:[%s1499_s1 + $0x38] sm:$0xff] (!%p222_p3)   ;;  %v1380_v24 = vld [vmem:[%s1500_s2] ss:$0 sm:$0xff] (!%p222_p3) }
   0x9   : > { %1152 = vmatprep.subr.bf16.mxu0 (!%p222_p3), %v1239_v1  ;;  %1199 = vmatprep.subr.bf16.mxu1 (!%p222_p3), %v1239_v1  ;;  %v1385_v26 = vld [vmem:[%s1501_s3] ss:$0 sm:$0xff] (!%p222_p3) }
   0xc   : > { %1153 = vmatpush3.bf16.msra.mxu0 (!%p222_p3), %v1239_v1  ;;  %1207 = vmatpush3.bf16.msra.mxu1 (!%p222_p3), %v1239_v1 }
   0xd   : > { %1154 = vmatprep.subr.bf16.mxu0 (!%p222_p3), %v1240_v2  ;;  %1200 = vmatprep.subr.bf16.mxu1 (!%p222_p3), %v1240_v2 }
   0xe   : > { %s1508_s21 = smov (!%p268_p4, %s1094_s21), 63 }
   0xf   : > { %s1095_s26 = sshll.u32 %s1508_s21, 2  ;;  %s1097_s22 = sshll.u32 %s1508_s21, 3 }
  0x10   : > { %s1344_s29 = scalar_lea.vmem %s1498_s0, %s1095_s26  ;;  %1155 = vmatpush3.bf16.msra.mxu0 %v1240_v2  ;;  %1208 = vmatpush3.bf16.msra.mxu1 %v1240_v2  ;;  %s1399_s24 = scalar_lea.vmem %s1502_s4, %s1097_s22 }
  0x11   : > { %v1246_v4 = vld [vmem:[%s1344_s29] sm:$0xff]   ;;  %1156 = vmatprep.subr.bf16.mxu0 %v1241_v3  ;;  %1201 = vmatprep.subr.bf16.mxu1 %v1241_v3  ;;  %v1248_v10 = vld [vmem:[%s1344_s29 + $0x8] sm:$0xff]   ;;  %v1250_v12 = vld [vmem:[%s1344_s29 + $0x10] sm:$0xff]  }
  0x12   : > { %v1247_v5 = vld [vmem:[%s1344_s29 + $0x40] sm:$0xff]   ;;  %1166 = vmatprep.mubr.bf16.mxu0 %v1246_v4  ;;  %v1249_v11 = vld [vmem:[%s1344_s29 + $0x48] sm:$0xff]   ;;  %v1251_v13 = vld [vmem:[%s1344_s29 + $0x50] sm:$0xff]  }
  0x13   : > { %1182 = vmatprep.mubr.bf16.mxu1 %v1247_v5  ;;  %v1252_v14 = vld [vmem:[%s1344_s29 + $0x18] sm:$0xff]   ;;  %v1254_v16 = vld [vmem:[%s1344_s29 + $0x20] sm:$0xff]   ;;  %v1256_v18 = vld [vmem:[%s1344_s29 + $0x28] sm:$0xff]  }
  0x14   : > { %1157 = vmatpush3.bf16.msra.mxu0 %v1241_v3  ;;  %1209 = vmatpush3.bf16.msra.mxu1 %v1241_v3  ;;  %v1253_v15 = vld [vmem:[%s1344_s29 + $0x58] sm:$0xff]   ;;  %v1255_v17 = vld [vmem:[%s1344_s29 + $0x60] sm:$0xff]   ;;  %v1257_v19 = vld [vmem:[%s1344_s29 + $0x68] sm:$0xff]  }
  0x15   : > { %1158 = vmatprep.subr.bf16.mxu0 %v1242_v6  ;;  %1202 = vmatprep.subr.bf16.mxu1 %v1242_v6  ;;  %v1258_v20 = vld [vmem:[%s1344_s29 + $0x30] sm:$0xff]   ;;  %v1260_v22 = vld [vmem:[%s1344_s29 + $0x38] sm:$0xff]  }
  0x16   : > { %v1259_v21 = vld [vmem:[%s1344_s29 + $0x70] sm:$0xff]   ;;  %v1261_v23 = vld [vmem:[%s1344_s29 + $0x78] sm:$0xff]  }
  0x18   : > { %1159 = vmatpush3.bf16.msra.mxu0 %v1242_v6  ;;  %1210 = vmatpush3.bf16.msra.mxu1 %v1242_v6 }
  0x19   : > { %1160 = vmatprep.subr.bf16.mxu0 %v1243_v7  ;;  %1203 = vmatprep.subr.bf16.mxu1 %v1243_v7 }
  0x1c   : > { %1161 = vmatpush3.bf16.msra.mxu0 %v1243_v7  ;;  %1211 = vmatpush3.bf16.msra.mxu1 %v1243_v7 }
  0x1d   : > { %1162 = vmatprep.subr.bf16.mxu0 %v1244_v8  ;;  %1204 = vmatprep.subr.bf16.mxu1 %v1244_v8 }
  0x20   : > { %1163 = vmatpush3.bf16.msra.mxu0 %v1244_v8  ;;  %1212 = vmatpush3.bf16.msra.mxu1 %v1244_v8 }
  0x21   : > { %1164 = vmatprep.subr.bf16.mxu0 %v1245_v9  ;;  %1205 = vmatprep.subr.bf16.mxu1 %v1245_v9 }
  0x24   : > { %1165 = vmatpush3.bf16.msra.mxu0 %v1245_v9  ;;  %1213 = vmatpush3.bf16.msra.mxu1 %v1245_v9 }
  0x27   : > { %1167 = vmatmul.mubr.bf16.vlgmr.msra.gmra.mrb[0].mxu0 %v1248_v10  ;;  %1183 = vmatmul.mubr.bf16.vlgmr.msra.gmra.mrb[0].mxu1 %v1249_v11 }
  0x28   : > { %1170 = vmatprep.mubr.bf16.mxu0 %v1250_v12  ;;  %1186 = vmatprep.mubr.bf16.mxu1 %v1251_v13 }
  0x2f   : > { %1171 = vmatmul.mubr.bf16.gmra.mrb[4].mxu0 %v1252_v14  ;;  %1187 = vmatmul.mubr.bf16.gmra.mrb[4].mxu1 %v1253_v15 }
  0x30   : > { %1174 = vmatprep.mubr.bf16.mxu0 %v1254_v16  ;;  %1190 = vmatprep.mubr.bf16.mxu1 %v1255_v17 }
  0x37   : > { %1175 = vmatmul.mubr.bf16.gmra.mrb[8].mxu0 %v1256_v18  ;;  %1191 = vmatmul.mubr.bf16.gmra.mrb[8].mxu1 %v1257_v19 }
  0x38   : > { %1178 = vmatprep.mubr.bf16.mxu0 %v1258_v20  ;;  %1194 = vmatprep.mubr.bf16.mxu1 %v1259_v21 }
  0x3f   : > { %1179 = vmatmul.mubr.bf16.gmra.mrb[12].mxu0 %v1260_v22  ;;  %1195 = vmatmul.mubr.bf16.gmra.mrb[12].mxu1 %v1261_v23 }
  0xfa   : > { %v1168_v25 = vpop.f32.mrb[0].mxu0  ;;  %v1184_v27 = vpop.f32.mrb[0].mxu1 }
  0xfb   : > { %v830_v28 = vmul.f32 %v1168_v25, %v1380_v24  ;;  %v846_v29 = vmul.f32 %v1184_v27, %v1380_v24  ;;  %v595_v30 = vpop.f32.mrb[1].mxu0  ;;  %v659_v31 = vpop.f32.mrb[1].mxu1 }
  0xfc   : > { %v828_v32 = vmul.f32 %v1380_v24, %v595_v30  ;;  %v844_v33 = vmul.f32 %v1380_v24, %v659_v31  ;;  %v1169_v34 = vpop.f32.mrb[2].mxu0  ;;  %v1185_v35 = vpop.f32.mrb[2].mxu1 }
  0xfd   : > { %v869_v36 = vadd.f32 %v1385_v26, %v830_v28  ;;  %v885_v37 = vadd.f32 %v1385_v26, %v846_v29  ;;  %v831_v38 = vmul.f32 %v1169_v34, %v1380_v24  ;;  %v847_v39 = vmul.f32 %v1185_v35, %v1380_v24  ;;  %v598_v40 = vpop.f32.mrb[3].mxu0  ;;  %v662_v41 = vpop.f32.mrb[3].mxu1 }
  0xfe   : > { %v867_v42 = vadd.f32 %v1385_v26, %v828_v32  ;;  %v883_v43 = vadd.f32 %v1385_v26, %v844_v33  ;;  %v829_v44 = vmul.f32 %v1380_v24, %v598_v40  ;;  %v845_v45 = vmul.f32 %v1380_v24, %v662_v41 }
  0xff   : > { %v901_v46 = vmax.f32 %v869_v36, 0.0  ;;  %v917_v47 = vmax.f32 %v885_v37, 0.0  ;;  %v870_v48 = vadd.f32 %v1385_v26, %v831_v38  ;;  %v886_v49 = vadd.f32 %v1385_v26, %v847_v39 }
 0x100   : > { %v899_v50 = vmax.f32 %v867_v42, 0.0  ;;  %v915_v51 = vmax.f32 %v883_v43, 0.0  ;;  %v868_v52 = vadd.f32 %v1385_v26, %v829_v44  ;;  %v884_v53 = vadd.f32 %v1385_v26, %v845_v45 }
 0x101   : > { %933 = vst [vmem:[%s1399_s24 + $0x10] sm:$0xff] %v901_v46  ;;  %949 = vst [vmem:[%s1399_s24 + $0x90] sm:$0xff] %v917_v47  ;;  %v902_v54 = vmax.f32 %v870_v48, 0.0  ;;  %v918_v55 = vmax.f32 %v886_v49, 0.0 }
 0x102   : > { %931 = vst [vmem:[%s1399_s24] sm:$0xff] %v899_v50  ;;  %947 = vst [vmem:[%s1399_s24 + $0x80] sm:$0xff] %v915_v51  ;;  %v900_v56 = vmax.f32 %v868_v52, 0.0  ;;  %v916_v57 = vmax.f32 %v884_v53, 0.0  ;;  %v1172_v58 = vpop.f32.mrb[4].mxu0  ;;  %v1188_v59 = vpop.f32.mrb[4].mxu1 }
 0x103   : > { %934 = vst [vmem:[%s1399_s24 + $0x18] sm:$0xff] %v902_v54  ;;  %950 = vst [vmem:[%s1399_s24 + $0x98] sm:$0xff] %v918_v55  ;;  %v834_v60 = vmul.f32 %v1172_v58, %v1380_v24  ;;  %v850_v61 = vmul.f32 %v1188_v59, %v1380_v24  ;;  %v611_v62 = vpop.f32.mrb[5].mxu0  ;;  %v675_v63 = vpop.f32.mrb[5].mxu1 }
 0x104   : > { %932 = vst [vmem:[%s1399_s24 + $0x8] sm:$0xff] %v900_v56  ;;  %948 = vst [vmem:[%s1399_s24 + $0x88] sm:$0xff] %v916_v57  ;;  %v832_v0 = vmul.f32 %v1380_v24, %v611_v62  ;;  %v848_v1 = vmul.f32 %v1380_v24, %v675_v63  ;;  %v1173_v2 = vpop.f32.mrb[6].mxu0  ;;  %v1189_v3 = vpop.f32.mrb[6].mxu1 }
 0x105   : > { %v873_v4 = vadd.f32 %v1385_v26, %v834_v60  ;;  %v889_v5 = vadd.f32 %v1385_v26, %v850_v61  ;;  %v835_v6 = vmul.f32 %v1173_v2, %v1380_v24  ;;  %v851_v7 = vmul.f32 %v1189_v3, %v1380_v24  ;;  %v614_v8 = vpop.f32.mrb[7].mxu0  ;;  %v678_v9 = vpop.f32.mrb[7].mxu1 }
 0x106   : > { %v871_v10 = vadd.f32 %v1385_v26, %v832_v0  ;;  %v887_v11 = vadd.f32 %v1385_v26, %v848_v1  ;;  %v833_v12 = vmul.f32 %v1380_v24, %v614_v8  ;;  %v849_v13 = vmul.f32 %v1380_v24, %v678_v9 }
 0x107   : > { %v905_v14 = vmax.f32 %v873_v4, 0.0  ;;  %v921_v15 = vmax.f32 %v889_v5, 0.0  ;;  %v874_v16 = vadd.f32 %v1385_v26, %v835_v6  ;;  %v890_v17 = vadd.f32 %v1385_v26, %v851_v7 }
 0x108   : > { %v903_v18 = vmax.f32 %v871_v10, 0.0  ;;  %v919_v19 = vmax.f32 %v887_v11, 0.0  ;;  %v872_v20 = vadd.f32 %v1385_v26, %v833_v12  ;;  %v888_v21 = vadd.f32 %v1385_v26, %v849_v13 }
 0x109   : > { %937 = vst [vmem:[%s1399_s24 + $0x30] sm:$0xff] %v905_v14  ;;  %953 = vst [vmem:[%s1399_s24 + $0xb0] sm:$0xff] %v921_v15  ;;  %v906_v22 = vmax.f32 %v874_v16, 0.0  ;;  %v922_v23 = vmax.f32 %v890_v17, 0.0 }
 0x10a   : > { %935 = vst [vmem:[%s1399_s24 + $0x20] sm:$0xff] %v903_v18  ;;  %951 = vst [vmem:[%s1399_s24 + $0xa0] sm:$0xff] %v919_v19  ;;  %v904_v25 = vmax.f32 %v872_v20, 0.0  ;;  %v920_v27 = vmax.f32 %v888_v21, 0.0  ;;  %v1176_v28 = vpop.f32.mrb[8].mxu0  ;;  %v1192_v29 = vpop.f32.mrb[8].mxu1 }
 0x10b   : > { %938 = vst [vmem:[%s1399_s24 + $0x38] sm:$0xff] %v906_v22  ;;  %954 = vst [vmem:[%s1399_s24 + $0xb8] sm:$0xff] %v922_v23  ;;  %v838_v30 = vmul.f32 %v1176_v28, %v1380_v24  ;;  %v854_v31 = vmul.f32 %v1192_v29, %v1380_v24  ;;  %v627_v32 = vpop.f32.mrb[9].mxu0  ;;  %v691_v33 = vpop.f32.mrb[9].mxu1 }
 0x10c   : > { %936 = vst [vmem:[%s1399_s24 + $0x28] sm:$0xff] %v904_v25  ;;  %952 = vst [vmem:[%s1399_s24 + $0xa8] sm:$0xff] %v920_v27  ;;  %v836_v34 = vmul.f32 %v1380_v24, %v627_v32  ;;  %v852_v35 = vmul.f32 %v1380_v24, %v691_v33  ;;  %v1177_v36 = vpop.f32.mrb[10].mxu0  ;;  %v1193_v37 = vpop.f32.mrb[10].mxu1 }
 0x10d   : > { %v877_v38 = vadd.f32 %v1385_v26, %v838_v30  ;;  %v893_v39 = vadd.f32 %v1385_v26, %v854_v31  ;;  %v839_v40 = vmul.f32 %v1177_v36, %v1380_v24  ;;  %v855_v41 = vmul.f32 %v1193_v37, %v1380_v24  ;;  %v630_v42 = vpop.f32.mrb[11].mxu0  ;;  %v694_v43 = vpop.f32.mrb[11].mxu1 }
 0x10e   : > { %v875_v44 = vadd.f32 %v1385_v26, %v836_v34  ;;  %v891_v45 = vadd.f32 %v1385_v26, %v852_v35  ;;  %v837_v46 = vmul.f32 %v1380_v24, %v630_v42  ;;  %v853_v47 = vmul.f32 %v1380_v24, %v694_v43 }
 0x10f   : > { %v909_v48 = vmax.f32 %v877_v38, 0.0  ;;  %v925_v49 = vmax.f32 %v893_v39, 0.0  ;;  %v878_v50 = vadd.f32 %v1385_v26, %v839_v40  ;;  %v894_v51 = vadd.f32 %v1385_v26, %v855_v41 }
 0x110   : > { %v907_v52 = vmax.f32 %v875_v44, 0.0  ;;  %v923_v53 = vmax.f32 %v891_v45, 0.0  ;;  %v876_v54 = vadd.f32 %v1385_v26, %v837_v46  ;;  %v892_v55 = vadd.f32 %v1385_v26, %v853_v47 }
 0x111   : > { %941 = vst [vmem:[%s1399_s24 + $0x50] sm:$0xff] %v909_v48  ;;  %957 = vst [vmem:[%s1399_s24 + $0xd0] sm:$0xff] %v925_v49  ;;  %v910_v56 = vmax.f32 %v878_v50, 0.0  ;;  %v926_v57 = vmax.f32 %v894_v51, 0.0 }
 0x112   : > { %939 = vst [vmem:[%s1399_s24 + $0x40] sm:$0xff] %v907_v52  ;;  %955 = vst [vmem:[%s1399_s24 + $0xc0] sm:$0xff] %v923_v53  ;;  %v908_v58 = vmax.f32 %v876_v54, 0.0  ;;  %v924_v59 = vmax.f32 %v892_v55, 0.0  ;;  %v1180_v60 = vpop.f32.mrb[12].mxu0  ;;  %v1196_v61 = vpop.f32.mrb[12].mxu1 }
 0x113   : > { %942 = vst [vmem:[%s1399_s24 + $0x58] sm:$0xff] %v910_v56  ;;  %958 = vst [vmem:[%s1399_s24 + $0xd8] sm:$0xff] %v926_v57  ;;  %v842_v62 = vmul.f32 %v1180_v60, %v1380_v24  ;;  %v858_v63 = vmul.f32 %v1196_v61, %v1380_v24  ;;  %v643_v0 = vpop.f32.mrb[13].mxu0  ;;  %v707_v1 = vpop.f32.mrb[13].mxu1 }
 0x114   : > { %940 = vst [vmem:[%s1399_s24 + $0x48] sm:$0xff] %v908_v58  ;;  %956 = vst [vmem:[%s1399_s24 + $0xc8] sm:$0xff] %v924_v59  ;;  %v840_v2 = vmul.f32 %v1380_v24, %v643_v0  ;;  %v856_v3 = vmul.f32 %v1380_v24, %v707_v1  ;;  %v1181_v4 = vpop.f32.mrb[14].mxu0  ;;  %v1197_v5 = vpop.f32.mrb[14].mxu1 }
 0x115   : > { %v881_v6 = vadd.f32 %v1385_v26, %v842_v62  ;;  %v897_v7 = vadd.f32 %v1385_v26, %v858_v63  ;;  %v843_v8 = vmul.f32 %v1181_v4, %v1380_v24  ;;  %v859_v9 = vmul.f32 %v1197_v5, %v1380_v24  ;;  %v646_v10 = vpop.f32.mrb[15].mxu0  ;;  %v710_v11 = vpop.f32.mrb[15].mxu1 }
 0x116   : > { %v879_v12 = vadd.f32 %v1385_v26, %v840_v2  ;;  %v895_v13 = vadd.f32 %v1385_v26, %v856_v3  ;;  %v841_v14 = vmul.f32 %v1380_v24, %v646_v10  ;;  %v857_v15 = vmul.f32 %v1380_v24, %v710_v11 }
 0x117   : > { %v913_v16 = vmax.f32 %v881_v6, 0.0  ;;  %v929_v17 = vmax.f32 %v897_v7, 0.0  ;;  %v882_v18 = vadd.f32 %v1385_v26, %v843_v8  ;;  %v898_v19 = vadd.f32 %v1385_v26, %v859_v9 }
 0x118   : > { %v911_v20 = vmax.f32 %v879_v12, 0.0  ;;  %v927_v21 = vmax.f32 %v895_v13, 0.0  ;;  %v880_v22 = vadd.f32 %v1385_v26, %v841_v14  ;;  %v896_v23 = vadd.f32 %v1385_v26, %v857_v15 }
 0x119   : > { %945 = vst [vmem:[%s1399_s24 + $0x70] sm:$0xff] %v913_v16  ;;  %961 = vst [vmem:[%s1399_s24 + $0xf0] sm:$0xff] %v929_v17  ;;  %v914_v25 = vmax.f32 %v882_v18, 0.0  ;;  %v930_v24 = vmax.f32 %v898_v19, 0.0 }
 0x11a   : > { %943 = vst [vmem:[%s1399_s24 + $0x60] sm:$0xff] %v911_v20  ;;  %959 = vst [vmem:[%s1399_s24 + $0xe0] sm:$0xff] %v927_v21  ;;  %v912_v27 = vmax.f32 %v880_v22, 0.0  ;;  %v928_v28 = vmax.f32 %v896_v23, 0.0 }
 0x11b   : > { %946 = vst [vmem:[%s1399_s24 + $0x78] sm:$0xff] %v914_v25  ;;  %962 = vst [vmem:[%s1399_s24 + $0xf8] sm:$0xff] %v930_v24 }
 0x11c   : > { %944 = vst [vmem:[%s1399_s24 + $0x68] sm:$0xff] %v912_v27  ;;  %960 = vst [vmem:[%s1399_s24 + $0xe8] sm:$0xff] %v928_v28 }
 0x11d PF: > { %s14_s17 = sadd.s32 1, %s1284_s17   ;;  %s1503_s15 = smov %s1280_s16 }
 0x11e   : > { %p11_p5 = scmp.ge.s32.totalorder %s14_s17, 4   ;;  %s1504_s16 = smov %s1506_s18 }
 0x120   :  { %13 = sbr.rel (!%p11_p5) target bundleno = 2 (0x2), region = 83 }

// kernel: _lambda_.73
= control target key start
LH: loop header
LB: loop body
LE: loop exit
PB: predicated region body
PF: predicated region fallthrough
CT: control target
= control target key end

     0   :  { %s1279_s15 = smov 0   ;;  %s1281_s16 = smov 0   ;;  %s1466_s0 = inlined_call_operand.vmem [shape: bf16[512,128], index: 0, kind: input, shape index: {}]   ;;  %s1467_s1 = inlined_call_operand.vmem [shape: bf16[128,128], index: 1, kind: input, shape index: {}]   ;;  %s1468_s2 = inlined_call_operand.vmem [shape: f32[1,128], index: 2, kind: input, shape index: {}]   ;;  %s1469_s3 = inlined_call_operand.vmem [shape: f32[1,128], index: 3, kind: input, shape index: {}]   ;;  %s1470_s4 = inlined_call_operand.vmem [shape: f32[512,128], index: 4, kind: output, shape index: {}]  }
   0x1   :  { %s1283_s17 = smov 0  }
   0x2 LB: > { %s33_s18 = sadd.s32 1, %s1248_s16  ;;  %p1061_p0 = scmp.ge.s32.totalorder %s1252_s17, 1  ;;  %s1252_s17 = sphi %s1283_s17, %s14_s17   ;;  %s1248_s16 = sphi %s1281_s16, %s1472_s16   ;;  %s1244_s15 = sphi %s1279_s15, %s1471_s15  }
   0x3   : > { %p35_p1 = scmp.ge.s32.totalorder %s33_s18, 2  ;;  %p221_p2 = scmp.lt.s32.totalorder %s1252_s17, 3 }
   0x5   : > { %s1474_s18 = smov (%p35_p1, %s33_s18), 0  ;;  %p222_p3 = pnand %p1061_p0, %p221_p2 }
   0x6   : > { %v1206_v0 = vld [vmem:[%s1467_s1] sm:$0xff] (!%p222_p3)   ;;  %s1062_s21 = sshll.u32 (!%p222_p3), %s1244_s15, 5  ;;  %v1207_v1 = vld [vmem:[%s1467_s1 + $0x8] sm:$0xff] (!%p222_p3)   ;;  %v1208_v2 = vld [vmem:[%s1467_s1 + $0x10] sm:$0xff] (!%p222_p3)  }
   0x7   : > { %225 = sbr.rel (%p222_p3) target bundleno = 283 (0x11b), region = 36  ;;  %p268_p4 = scmp.lt.s32.totalorder (!%p222_p3), %s1062_s21, 63  ;;  %1118 = vmatprep.subr.bf16.mxu0 (!%p222_p3), %v1206_v0  ;;  %1166 = vmatprep.subr.bf16.mxu1 (!%p222_p3), %v1206_v0  ;;  %v1209_v3 = vld [vmem:[%s1467_s1 + $0x18] sm:$0xff] (!%p222_p3)   ;;  %v1210_v6 = vld [vmem:[%s1467_s1 + $0x20] sm:$0xff] (!%p222_p3)   ;;  %v1211_v7 = vld [vmem:[%s1467_s1 + $0x28] sm:$0xff] (!%p222_p3)  }
   0x8   : > { %1119 = vmatpush3.bf16.msra.mxu0 (!%p222_p3), %v1206_v0  ;;  %1174 = vmatpush3.bf16.msra.mxu1 (!%p222_p3), %v1206_v0  ;;  %v1212_v8 = vld [vmem:[%s1467_s1 + $0x30] sm:$0xff] (!%p222_p3)   ;;  %v1213_v9 = vld [vmem:[%s1467_s1 + $0x38] sm:$0xff] (!%p222_p3)   ;;  %v1348_v24 = vld [vmem:[%s1468_s2] ss:$0 sm:$0xff] (!%p222_p3) }
   0x9   : > { %1120 = vmatprep.subr.bf16.mxu0 (!%p222_p3), %v1207_v1  ;;  %1167 = vmatprep.subr.bf16.mxu1 (!%p222_p3), %v1207_v1  ;;  %v1354_v26 = vld [vmem:[%s1469_s3] ss:$0 sm:$0xff] (!%p222_p3) }
   0xc   : > { %1121 = vmatpush3.bf16.msra.mxu0 (!%p222_p3), %v1207_v1  ;;  %1175 = vmatpush3.bf16.msra.mxu1 (!%p222_p3), %v1207_v1 }
   0xd   : > { %1122 = vmatprep.subr.bf16.mxu0 (!%p222_p3), %v1208_v2  ;;  %1168 = vmatprep.subr.bf16.mxu1 (!%p222_p3), %v1208_v2 }
   0xe   : > { %s1476_s21 = smov (!%p268_p4, %s1062_s21), 63 }
   0xf   : > { %s1063_s26 = sshll.u32 %s1476_s21, 2  ;;  %s1065_s19 = sshll.u32 %s1476_s21, 3 }
  0x10   : > { %s1312_s29 = scalar_lea.vmem %s1466_s0, %s1063_s26  ;;  %1123 = vmatpush3.bf16.msra.mxu0 %v1208_v2  ;;  %1176 = vmatpush3.bf16.msra.mxu1 %v1208_v2  ;;  %s1361_s25 = scalar_lea.vmem %s1470_s4, %s1065_s19 }
  0x11   : > { %v1214_v4 = vld [vmem:[%s1312_s29] sm:$0xff]   ;;  %1124 = vmatprep.subr.bf16.mxu0 %v1209_v3  ;;  %1169 = vmatprep.subr.bf16.mxu1 %v1209_v3  ;;  %v1216_v10 = vld [vmem:[%s1312_s29 + $0x8] sm:$0xff]   ;;  %v1218_v12 = vld [vmem:[%s1312_s29 + $0x10] sm:$0xff]  }
  0x12   : > { %v1215_v5 = vld [vmem:[%s1312_s29 + $0x40] sm:$0xff]   ;;  %1134 = vmatprep.mubr.bf16.mxu0 %v1214_v4  ;;  %v1217_v11 = vld [vmem:[%s1312_s29 + $0x48] sm:$0xff]   ;;  %v1219_v13 = vld [vmem:[%s1312_s29 + $0x50] sm:$0xff]  }
  0x13   : > { %1150 = vmatprep.mubr.bf16.mxu1 %v1215_v5  ;;  %v1220_v14 = vld [vmem:[%s1312_s29 + $0x18] sm:$0xff]   ;;  %v1222_v16 = vld [vmem:[%s1312_s29 + $0x20] sm:$0xff]   ;;  %v1224_v18 = vld [vmem:[%s1312_s29 + $0x28] sm:$0xff]  }
  0x14   : > { %1125 = vmatpush3.bf16.msra.mxu0 %v1209_v3  ;;  %1177 = vmatpush3.bf16.msra.mxu1 %v1209_v3  ;;  %v1221_v15 = vld [vmem:[%s1312_s29 + $0x58] sm:$0xff]   ;;  %v1223_v17 = vld [vmem:[%s1312_s29 + $0x60] sm:$0xff]   ;;  %v1225_v19 = vld [vmem:[%s1312_s29 + $0x68] sm:$0xff]  }
  0x15   : > { %1126 = vmatprep.subr.bf16.mxu0 %v1210_v6  ;;  %1170 = vmatprep.subr.bf16.mxu1 %v1210_v6  ;;  %v1226_v20 = vld [vmem:[%s1312_s29 + $0x30] sm:$0xff]   ;;  %v1228_v22 = vld [vmem:[%s1312_s29 + $0x38] sm:$0xff]  }
  0x16   : > { %v1227_v21 = vld [vmem:[%s1312_s29 + $0x70] sm:$0xff]   ;;  %v1229_v23 = vld [vmem:[%s1312_s29 + $0x78] sm:$0xff]  }
  0x18   : > { %1127 = vmatpush3.bf16.msra.mxu0 %v1210_v6  ;;  %1178 = vmatpush3.bf16.msra.mxu1 %v1210_v6 }
  0x19   : > { %1128 = vmatprep.subr.bf16.mxu0 %v1211_v7  ;;  %1171 = vmatprep.subr.bf16.mxu1 %v1211_v7 }
  0x1c   : > { %1129 = vmatpush3.bf16.msra.mxu0 %v1211_v7  ;;  %1179 = vmatpush3.bf16.msra.mxu1 %v1211_v7 }
  0x1d   : > { %1130 = vmatprep.subr.bf16.mxu0 %v1212_v8  ;;  %1172 = vmatprep.subr.bf16.mxu1 %v1212_v8 }
  0x20   : > { %1131 = vmatpush3.bf16.msra.mxu0 %v1212_v8  ;;  %1180 = vmatpush3.bf16.msra.mxu1 %v1212_v8 }
  0x21   : > { %1132 = vmatprep.subr.bf16.mxu0 %v1213_v9  ;;  %1173 = vmatprep.subr.bf16.mxu1 %v1213_v9 }
  0x24   : > { %1133 = vmatpush3.bf16.msra.mxu0 %v1213_v9  ;;  %1181 = vmatpush3.bf16.msra.mxu1 %v1213_v9 }
  0x27   : > { %1135 = vmatmul.mubr.bf16.vlgmr.msra.gmra.mrb[0].mxu0 %v1216_v10  ;;  %1151 = vmatmul.mubr.bf16.vlgmr.msra.gmra.mrb[0].mxu1 %v1217_v11 }
  0x28   : > { %1138 = vmatprep.mubr.bf16.mxu0 %v1218_v12  ;;  %1154 = vmatprep.mubr.bf16.mxu1 %v1219_v13 }
  0x2f   : > { %1139 = vmatmul.mubr.bf16.gmra.mrb[4].mxu0 %v1220_v14  ;;  %1155 = vmatmul.mubr.bf16.gmra.mrb[4].mxu1 %v1221_v15 }
  0x30   : > { %1142 = vmatprep.mubr.bf16.mxu0 %v1222_v16  ;;  %1158 = vmatprep.mubr.bf16.mxu1 %v1223_v17 }
  0x37   : > { %1143 = vmatmul.mubr.bf16.gmra.mrb[8].mxu0 %v1224_v18  ;;  %1159 = vmatmul.mubr.bf16.gmra.mrb[8].mxu1 %v1225_v19 }
  0x38   : > { %1146 = vmatprep.mubr.bf16.mxu0 %v1226_v20  ;;  %1162 = vmatprep.mubr.bf16.mxu1 %v1227_v21 }
  0x3f   : > { %1147 = vmatmul.mubr.bf16.gmra.mrb[12].mxu0 %v1228_v22  ;;  %1163 = vmatmul.mubr.bf16.gmra.mrb[12].mxu1 %v1229_v23 }
  0xfa   : > { %v1136_v25 = vpop.f32.mrb[0].mxu0  ;;  %v1152_v27 = vpop.f32.mrb[0].mxu1 }
  0xfb   : > { %v830_v28 = vmul.f32 %v1136_v25, %v1348_v24  ;;  %v846_v29 = vmul.f32 %v1152_v27, %v1348_v24  ;;  %v595_v30 = vpop.f32.mrb[1].mxu0  ;;  %v659_v31 = vpop.f32.mrb[1].mxu1 }
  0xfc   : > { %v828_v32 = vmul.f32 %v1348_v24, %v595_v30  ;;  %v844_v33 = vmul.f32 %v1348_v24, %v659_v31  ;;  %v1137_v34 = vpop.f32.mrb[2].mxu0  ;;  %v1153_v35 = vpop.f32.mrb[2].mxu1 }
  0xfd   : > { %v869_v36 = vadd.f32 %v1354_v26, %v830_v28  ;;  %v885_v37 = vadd.f32 %v1354_v26, %v846_v29  ;;  %v831_v38 = vmul.f32 %v1137_v34, %v1348_v24  ;;  %v847_v39 = vmul.f32 %v1153_v35, %v1348_v24  ;;  %v598_v40 = vpop.f32.mrb[3].mxu0  ;;  %v662_v41 = vpop.f32.mrb[3].mxu1 }
  0xfe   : > { %v867_v42 = vadd.f32 %v1354_v26, %v828_v32  ;;  %v883_v43 = vadd.f32 %v1354_v26, %v844_v33  ;;  %v829_v44 = vmul.f32 %v1348_v24, %v598_v40  ;;  %v845_v45 = vmul.f32 %v1348_v24, %v662_v41 }
  0xff   : > { %901 = vst [vmem:[%s1361_s25 + $0x10] sm:$0xff] %v869_v36  ;;  %917 = vst [vmem:[%s1361_s25 + $0x90] sm:$0xff] %v885_v37  ;;  %v870_v46 = vadd.f32 %v1354_v26, %v831_v38  ;;  %v886_v47 = vadd.f32 %v1354_v26, %v847_v39 }
 0x100   : > { %899 = vst [vmem:[%s1361_s25] sm:$0xff] %v867_v42  ;;  %915 = vst [vmem:[%s1361_s25 + $0x80] sm:$0xff] %v883_v43  ;;  %v868_v48 = vadd.f32 %v1354_v26, %v829_v44  ;;  %v884_v49 = vadd.f32 %v1354_v26, %v845_v45 }
 0x101   : > { %902 = vst [vmem:[%s1361_s25 + $0x18] sm:$0xff] %v870_v46  ;;  %918 = vst [vmem:[%s1361_s25 + $0x98] sm:$0xff] %v886_v47 }
 0x102   : > { %900 = vst [vmem:[%s1361_s25 + $0x8] sm:$0xff] %v868_v48  ;;  %916 = vst [vmem:[%s1361_s25 + $0x88] sm:$0xff] %v884_v49  ;;  %v1140_v50 = vpop.f32.mrb[4].mxu0  ;;  %v1156_v51 = vpop.f32.mrb[4].mxu1 }
 0x103   : > { %v834_v52 = vmul.f32 %v1140_v50, %v1348_v24  ;;  %v850_v53 = vmul.f32 %v1156_v51, %v1348_v24  ;;  %v611_v54 = vpop.f32.mrb[5].mxu0  ;;  %v675_v55 = vpop.f32.mrb[5].mxu1 }
 0x104   : > { %v832_v56 = vmul.f32 %v1348_v24, %v611_v54  ;;  %v848_v57 = vmul.f32 %v1348_v24, %v675_v55  ;;  %v1141_v58 = vpop.f32.mrb[6].mxu0  ;;  %v1157_v59 = vpop.f32.mrb[6].mxu1 }
 0x105   : > { %v873_v60 = vadd.f32 %v1354_v26, %v834_v52  ;;  %v889_v61 = vadd.f32 %v1354_v26, %v850_v53  ;;  %v835_v62 = vmul.f32 %v1141_v58, %v1348_v24  ;;  %v851_v63 = vmul.f32 %v1157_v59, %v1348_v24  ;;  %v614_v0 = vpop.f32.mrb[7].mxu0  ;;  %v678_v1 = vpop.f32.mrb[7].mxu1 }
 0x106   : > { %v871_v2 = vadd.f32 %v1354_v26, %v832_v56  ;;  %v887_v3 = vadd.f32 %v1354_v26, %v848_v57  ;;  %v833_v4 = vmul.f32 %v1348_v24, %v614_v0  ;;  %v849_v5 = vmul.f32 %v1348_v24, %v678_v1 }
 0x107   : > { %905 = vst [vmem:[%s1361_s25 + $0x30] sm:$0xff] %v873_v60  ;;  %921 = vst [vmem:[%s1361_s25 + $0xb0] sm:$0xff] %v889_v61  ;;  %v874_v6 = vadd.f32 %v1354_v26, %v835_v62  ;;  %v890_v7 = vadd.f32 %v1354_v26, %v851_v63 }
 0x108   : > { %903 = vst [vmem:[%s1361_s25 + $0x20] sm:$0xff] %v871_v2  ;;  %919 = vst [vmem:[%s1361_s25 + $0xa0] sm:$0xff] %v887_v3  ;;  %v872_v8 = vadd.f32 %v1354_v26, %v833_v4  ;;  %v888_v9 = vadd.f32 %v1354_v26, %v849_v5 }
 0x109   : > { %906 = vst [vmem:[%s1361_s25 + $0x38] sm:$0xff] %v874_v6  ;;  %922 = vst [vmem:[%s1361_s25 + $0xb8] sm:$0xff] %v890_v7 }
 0x10a   : > { %904 = vst [vmem:[%s1361_s25 + $0x28] sm:$0xff] %v872_v8  ;;  %920 = vst [vmem:[%s1361_s25 + $0xa8] sm:$0xff] %v888_v9  ;;  %v1144_v10 = vpop.f32.mrb[8].mxu0  ;;  %v1160_v11 = vpop.f32.mrb[8].mxu1 }
 0x10b   : > { %v838_v12 = vmul.f32 %v1144_v10, %v1348_v24  ;;  %v854_v13 = vmul.f32 %v1160_v11, %v1348_v24  ;;  %v627_v14 = vpop.f32.mrb[9].mxu0  ;;  %v691_v15 = vpop.f32.mrb[9].mxu1 }
 0x10c   : > { %v836_v16 = vmul.f32 %v1348_v24, %v627_v14  ;;  %v852_v17 = vmul.f32 %v1348_v24, %v691_v15  ;;  %v1145_v18 = vpop.f32.mrb[10].mxu0  ;;  %v1161_v19 = vpop.f32.mrb[10].mxu1 }
 0x10d   : > { %v877_v20 = vadd.f32 %v1354_v26, %v838_v12  ;;  %v893_v21 = vadd.f32 %v1354_v26, %v854_v13  ;;  %v839_v22 = vmul.f32 %v1145_v18, %v1348_v24  ;;  %v855_v23 = vmul.f32 %v1161_v19, %v1348_v24  ;;  %v630_v25 = vpop.f32.mrb[11].mxu0  ;;  %v694_v27 = vpop.f32.mrb[11].mxu1 }
 0x10e   : > { %v875_v28 = vadd.f32 %v1354_v26, %v836_v16  ;;  %v891_v29 = vadd.f32 %v1354_v26, %v852_v17  ;;  %v837_v30 = vmul.f32 %v1348_v24, %v630_v25  ;;  %v853_v31 = vmul.f32 %v1348_v24, %v694_v27 }
 0x10f   : > { %909 = vst [vmem:[%s1361_s25 + $0x50] sm:$0xff] %v877_v20  ;;  %925 = vst [vmem:[%s1361_s25 + $0xd0] sm:$0xff] %v893_v21  ;;  %v878_v32 = vadd.f32 %v1354_v26, %v839_v22  ;;  %v894_v33 = vadd.f32 %v1354_v26, %v855_v23 }
 0x110   : > { %907 = vst [vmem:[%s1361_s25 + $0x40] sm:$0xff] %v875_v28  ;;  %923 = vst [vmem:[%s1361_s25 + $0xc0] sm:$0xff] %v891_v29  ;;  %v876_v34 = vadd.f32 %v1354_v26, %v837_v30  ;;  %v892_v35 = vadd.f32 %v1354_v26, %v853_v31 }
 0x111   : > { %910 = vst [vmem:[%s1361_s25 + $0x58] sm:$0xff] %v878_v32  ;;  %926 = vst [vmem:[%s1361_s25 + $0xd8] sm:$0xff] %v894_v33 }
 0x112   : > { %908 = vst [vmem:[%s1361_s25 + $0x48] sm:$0xff] %v876_v34  ;;  %924 = vst [vmem:[%s1361_s25 + $0xc8] sm:$0xff] %v892_v35  ;;  %v1148_v36 = vpop.f32.mrb[12].mxu0  ;;  %v1164_v37 = vpop.f32.mrb[12].mxu1 }
 0x113   : > { %v842_v38 = vmul.f32 %v1148_v36, %v1348_v24  ;;  %v858_v39 = vmul.f32 %v1164_v37, %v1348_v24  ;;  %v643_v40 = vpop.f32.mrb[13].mxu0  ;;  %v707_v41 = vpop.f32.mrb[13].mxu1 }
 0x114   : > { %v840_v42 = vmul.f32 %v1348_v24, %v643_v40  ;;  %v856_v43 = vmul.f32 %v1348_v24, %v707_v41  ;;  %v1149_v44 = vpop.f32.mrb[14].mxu0  ;;  %v1165_v45 = vpop.f32.mrb[14].mxu1 }
 0x115   : > { %v881_v46 = vadd.f32 %v1354_v26, %v842_v38  ;;  %v897_v47 = vadd.f32 %v1354_v26, %v858_v39  ;;  %v843_v48 = vmul.f32 %v1149_v44, %v1348_v24  ;;  %v859_v49 = vmul.f32 %v1165_v45, %v1348_v24  ;;  %v646_v50 = vpop.f32.mrb[15].mxu0  ;;  %v710_v51 = vpop.f32.mrb[15].mxu1 }
 0x116   : > { %v879_v52 = vadd.f32 %v1354_v26, %v840_v42  ;;  %v895_v53 = vadd.f32 %v1354_v26, %v856_v43  ;;  %v841_v54 = vmul.f32 %v1348_v24, %v646_v50  ;;  %v857_v55 = vmul.f32 %v1348_v24, %v710_v51 }
 0x117   : > { %913 = vst [vmem:[%s1361_s25 + $0x70] sm:$0xff] %v881_v46  ;;  %929 = vst [vmem:[%s1361_s25 + $0xf0] sm:$0xff] %v897_v47  ;;  %v882_v56 = vadd.f32 %v1354_v26, %v843_v48  ;;  %v898_v57 = vadd.f32 %v1354_v26, %v859_v49 }
 0x118   : > { %911 = vst [vmem:[%s1361_s25 + $0x60] sm:$0xff] %v879_v52  ;;  %927 = vst [vmem:[%s1361_s25 + $0xe0] sm:$0xff] %v895_v53  ;;  %v880_v58 = vadd.f32 %v1354_v26, %v841_v54  ;;  %v896_v59 = vadd.f32 %v1354_v26, %v857_v55 }
 0x119   : > { %914 = vst [vmem:[%s1361_s25 + $0x78] sm:$0xff] %v882_v56  ;;  %930 = vst [vmem:[%s1361_s25 + $0xf8] sm:$0xff] %v898_v57 }
 0x11a   : > { %912 = vst [vmem:[%s1361_s25 + $0x68] sm:$0xff] %v880_v58  ;;  %928 = vst [vmem:[%s1361_s25 + $0xe8] sm:$0xff] %v896_v59 }
 0x11b PF: > { %s14_s17 = sadd.s32 1, %s1252_s17   ;;  %s1471_s15 = smov %s1248_s16 }
 0x11c   : > { %p11_p5 = scmp.ge.s32.totalorder %s14_s17, 4   ;;  %s1472_s16 = smov %s1474_s18 }
 0x11e   :  { %13 = sbr.rel (!%p11_p5) target bundleno = 2 (0x2), region = 83 }

// kernel: _lambda_.74
= control target key start
LH: loop header
LB: loop body
LE: loop exit
PB: predicated region body
PF: predicated region fallthrough
CT: control target
= control target key end

     0   :  { %s1457_s18 = smov 0   ;;  %s1459_s19 = smov 0   ;;  %s1685_s0 = inlined_call_operand.vmem [shape: bf16[512,128], index: 0, kind: input, shape index: {}]   ;;  %s1686_s1 = inlined_call_operand.vmem [shape: bf16[128,128], index: 1, kind: input, shape index: {}]   ;;  %s1687_s2 = inlined_call_operand.vmem [shape: f32[1,128], index: 2, kind: input, shape index: {}]   ;;  %s1688_s3 = inlined_call_operand.vmem [shape: f32[1,128], index: 3, kind: input, shape index: {}]   ;;  %s1689_s4 = inlined_call_operand.vmem [shape: f32[512,128], index: 4, kind: input, shape index: {}]   ;;  %s1690_s5 = inlined_call_operand.vmem [shape: f32[512,128], index: 5, kind: output, shape index: {}]  }
   0x1   :  { %s1461_s20 = smov 0  }
   0x2 LB: > { %s34_s21 = sadd.s32 1, %s1421_s19  ;;  %p1232_p0 = scmp.ge.s32.totalorder %s1425_s20, 1  ;;  %s1425_s20 = sphi %s1461_s20, %s15_s20   ;;  %s1421_s19 = sphi %s1459_s19, %s1692_s19   ;;  %s1417_s18 = sphi %s1457_s18, %s1691_s18  }
   0x3   : > { %p36_p1 = scmp.ge.s32.totalorder %s34_s21, 2  ;;  %p262_p2 = scmp.lt.s32.totalorder %s1425_s20, 3 }
   0x5   : > { %s1694_s21 = smov (%p36_p1, %s34_s21), 0  ;;  %p263_p3 = pnand %p1232_p0, %p262_p2 }
   0x6   : > { %v1379_v0 = vld [vmem:[%s1686_s1] sm:$0xff] (!%p263_p3)   ;;  %s1233_s24 = sshll.u32 (!%p263_p3), %s1417_s18, 5  ;;  %v1380_v1 = vld [vmem:[%s1686_s1 + $0x8] sm:$0xff] (!%p263_p3)   ;;  %v1381_v2 = vld [vmem:[%s1686_s1 + $0x10] sm:$0xff] (!%p263_p3)  }
   0x7   : > { %266 = sbr.rel (%p263_p3) target bundleno = 289 (0x121), region = 40  ;;  %p319_p4 = scmp.lt.s32.totalorder (!%p263_p3), %s1233_s24, 63  ;;  %1291 = vmatprep.subr.bf16.mxu0 (!%p263_p3), %v1379_v0  ;;  %1339 = vmatprep.subr.bf16.mxu1 (!%p263_p3), %v1379_v0  ;;  %v1382_v3 = vld [vmem:[%s1686_s1 + $0x18] sm:$0xff] (!%p263_p3)   ;;  %v1383_v6 = vld [vmem:[%s1686_s1 + $0x20] sm:$0xff] (!%p263_p3)   ;;  %v1384_v7 = vld [vmem:[%s1686_s1 + $0x28] sm:$0xff] (!%p263_p3)  }
   0x8   : > { %1292 = vmatpush3.bf16.msra.mxu0 (!%p263_p3), %v1379_v0  ;;  %1347 = vmatpush3.bf16.msra.mxu1 (!%p263_p3), %v1379_v0  ;;  %v1385_v8 = vld [vmem:[%s1686_s1 + $0x30] sm:$0xff] (!%p263_p3)   ;;  %v1386_v9 = vld [vmem:[%s1686_s1 + $0x38] sm:$0xff] (!%p263_p3)   ;;  %v1527_v24 = vld [vmem:[%s1687_s2] ss:$0 sm:$0xff] (!%p263_p3) }
   0x9   : > { %1293 = vmatprep.subr.bf16.mxu0 (!%p263_p3), %v1380_v1  ;;  %1340 = vmatprep.subr.bf16.mxu1 (!%p263_p3), %v1380_v1  ;;  %v1539_v26 = vld [vmem:[%s1688_s3] ss:$0 sm:$0xff] (!%p263_p3) }
   0xc   : > { %1294 = vmatpush3.bf16.msra.mxu0 (!%p263_p3), %v1380_v1  ;;  %1348 = vmatpush3.bf16.msra.mxu1 (!%p263_p3), %v1380_v1 }
   0xd   : > { %1295 = vmatprep.subr.bf16.mxu0 (!%p263_p3), %v1381_v2  ;;  %1341 = vmatprep.subr.bf16.mxu1 (!%p263_p3), %v1381_v2 }
   0xe   : > { %s1696_s24 = smov (!%p319_p4, %s1233_s24), 63 }
   0xf   : > { %s1234_s29 = sshll.u32 %s1696_s24, 2  ;;  %s1236_s18 = sshll.u32 %s1696_s24, 3 }
  0x10   : > { %s1490_s7 = scalar_lea.vmem %s1685_s0, %s1234_s29  ;;  %1296 = vmatpush3.bf16.msra.mxu0 %v1381_v2  ;;  %1349 = vmatpush3.bf16.msra.mxu1 %v1381_v2  ;;  %s1534_s27 = scalar_lea.vmem %s1689_s4, %s1236_s18 }
  0x11   : > { %v1387_v4 = vld [vmem:[%s1490_s7] sm:$0xff]   ;;  %1297 = vmatprep.subr.bf16.mxu0 %v1382_v3  ;;  %1342 = vmatprep.subr.bf16.mxu1 %v1382_v3  ;;  %v1389_v10 = vld [vmem:[%s1490_s7 + $0x8] sm:$0xff]   ;;  %v1391_v12 = vld [vmem:[%s1490_s7 + $0x10] sm:$0xff]  }
  0x12   : > { %v1388_v5 = vld [vmem:[%s1490_s7 + $0x40] sm:$0xff]   ;;  %1307 = vmatprep.mubr.bf16.mxu0 %v1387_v4  ;;  %v1390_v11 = vld [vmem:[%s1490_s7 + $0x48] sm:$0xff]   ;;  %v1392_v13 = vld [vmem:[%s1490_s7 + $0x50] sm:$0xff]  }
  0x13   : > { %1323 = vmatprep.mubr.bf16.mxu1 %v1388_v5  ;;  %v1393_v14 = vld [vmem:[%s1490_s7 + $0x18] sm:$0xff]   ;;  %v1395_v16 = vld [vmem:[%s1490_s7 + $0x20] sm:$0xff]   ;;  %v1397_v18 = vld [vmem:[%s1490_s7 + $0x28] sm:$0xff]  }
  0x14   : > { %1298 = vmatpush3.bf16.msra.mxu0 %v1382_v3  ;;  %1350 = vmatpush3.bf16.msra.mxu1 %v1382_v3  ;;  %v1394_v15 = vld [vmem:[%s1490_s7 + $0x58] sm:$0xff]   ;;  %v1396_v17 = vld [vmem:[%s1490_s7 + $0x60] sm:$0xff]   ;;  %v1398_v19 = vld [vmem:[%s1490_s7 + $0x68] sm:$0xff]  }
  0x15   : > { %1299 = vmatprep.subr.bf16.mxu0 %v1383_v6  ;;  %1343 = vmatprep.subr.bf16.mxu1 %v1383_v6  ;;  %v1399_v20 = vld [vmem:[%s1490_s7 + $0x30] sm:$0xff]   ;;  %v1401_v22 = vld [vmem:[%s1490_s7 + $0x38] sm:$0xff]   ;;  %v959_v40 = vld [vmem:[%s1534_s27] sm:$0xff] }
  0x16   : > { %v1400_v21 = vld [vmem:[%s1490_s7 + $0x70] sm:$0xff]   ;;  %v1402_v23 = vld [vmem:[%s1490_s7 + $0x78] sm:$0xff]   ;;  %v975_v41 = vld [vmem:[%s1534_s27 + $0x80] sm:$0xff]  ;;  %s1568_s7 = scalar_lea.vmem %s1690_s5, %s1236_s18 }
  0x17   : > { %v961_v32 = vld [vmem:[%s1534_s27 + $0x10] sm:$0xff]  ;;  %v962_v48 = vld [vmem:[%s1534_s27 + $0x18] sm:$0xff]  ;;  %v960_v56 = vld [vmem:[%s1534_s27 + $0x8] sm:$0xff] }
  0x18   : > { %1300 = vmatpush3.bf16.msra.mxu0 %v1383_v6  ;;  %1351 = vmatpush3.bf16.msra.mxu1 %v1383_v6  ;;  %v977_v33 = vld [vmem:[%s1534_s27 + $0x90] sm:$0xff]  ;;  %v978_v49 = vld [vmem:[%s1534_s27 + $0x98] sm:$0xff]  ;;  %v976_v57 = vld [vmem:[%s1534_s27 + $0x88] sm:$0xff] }
  0x19   : > { %1301 = vmatprep.subr.bf16.mxu0 %v1384_v7  ;;  %1344 = vmatprep.subr.bf16.mxu1 %v1384_v7 }
  0x1c   : > { %1302 = vmatpush3.bf16.msra.mxu0 %v1384_v7  ;;  %1352 = vmatpush3.bf16.msra.mxu1 %v1384_v7 }
  0x1d   : > { %1303 = vmatprep.subr.bf16.mxu0 %v1385_v8  ;;  %1345 = vmatprep.subr.bf16.mxu1 %v1385_v8 }
  0x20   : > { %1304 = vmatpush3.bf16.msra.mxu0 %v1385_v8  ;;  %1353 = vmatpush3.bf16.msra.mxu1 %v1385_v8 }
  0x21   : > { %1305 = vmatprep.subr.bf16.mxu0 %v1386_v9  ;;  %1346 = vmatprep.subr.bf16.mxu1 %v1386_v9 }
  0x24   : > { %1306 = vmatpush3.bf16.msra.mxu0 %v1386_v9  ;;  %1354 = vmatpush3.bf16.msra.mxu1 %v1386_v9 }
  0x27   : > { %1308 = vmatmul.mubr.bf16.vlgmr.msra.gmra.mrb[0].mxu0 %v1389_v10  ;;  %1324 = vmatmul.mubr.bf16.vlgmr.msra.gmra.mrb[0].mxu1 %v1390_v11 }
  0x28   : > { %1311 = vmatprep.mubr.bf16.mxu0 %v1391_v12  ;;  %1327 = vmatprep.mubr.bf16.mxu1 %v1392_v13 }
  0x2f   : > { %1312 = vmatmul.mubr.bf16.gmra.mrb[4].mxu0 %v1393_v14  ;;  %1328 = vmatmul.mubr.bf16.gmra.mrb[4].mxu1 %v1394_v15 }
  0x30   : > { %1315 = vmatprep.mubr.bf16.mxu0 %v1395_v16  ;;  %1331 = vmatprep.mubr.bf16.mxu1 %v1396_v17  ;;  %v965_v16 = vld [vmem:[%s1534_s27 + $0x30] sm:$0xff] }
  0x31   : > { %v981_v17 = vld [vmem:[%s1534_s27 + $0xb0] sm:$0xff] }
  0x37   : > { %1316 = vmatmul.mubr.bf16.gmra.mrb[8].mxu0 %v1397_v18  ;;  %1332 = vmatmul.mubr.bf16.gmra.mrb[8].mxu1 %v1398_v19 }
  0x38   : > { %1319 = vmatprep.mubr.bf16.mxu0 %v1399_v20  ;;  %1335 = vmatprep.mubr.bf16.mxu1 %v1400_v21 }
  0x3f   : > { %1320 = vmatmul.mubr.bf16.gmra.mrb[12].mxu0 %v1401_v22  ;;  %1336 = vmatmul.mubr.bf16.gmra.mrb[12].mxu1 %v1402_v23 }
  0xfa   : > { %v1309_v25 = vpop.f32.mrb[0].mxu0  ;;  %v1325_v27 = vpop.f32.mrb[0].mxu1 }
  0xfb   : > { %v890_v28 = vmul.f32 %v1309_v25, %v1527_v24  ;;  %v906_v29 = vmul.f32 %v1325_v27, %v1527_v24  ;;  %v655_v30 = vpop.f32.mrb[1].mxu0  ;;  %v719_v31 = vpop.f32.mrb[1].mxu1  ;;  %v963_v25 = vld [vmem:[%s1534_s27 + $0x20] sm:$0xff] }
  0xfc   : > { %v888_v34 = vmul.f32 %v1527_v24, %v655_v30  ;;  %v904_v35 = vmul.f32 %v1527_v24, %v719_v31  ;;  %v1310_v36 = vpop.f32.mrb[2].mxu0  ;;  %v1326_v37 = vpop.f32.mrb[2].mxu1  ;;  %v979_v27 = vld [vmem:[%s1534_s27 + $0xa0] sm:$0xff] }
  0xfd   : > { %v929_v38 = vadd.f32 %v1539_v26, %v890_v28  ;;  %v945_v39 = vadd.f32 %v1539_v26, %v906_v29  ;;  %v891_v42 = vmul.f32 %v1310_v36, %v1527_v24  ;;  %v907_v43 = vmul.f32 %v1326_v37, %v1527_v24  ;;  %v658_v44 = vpop.f32.mrb[3].mxu0  ;;  %v722_v45 = vpop.f32.mrb[3].mxu1 }
  0xfe   : > { %v927_v46 = vadd.f32 %v1539_v26, %v888_v34  ;;  %v943_v47 = vadd.f32 %v1539_v26, %v904_v35  ;;  %v889_v50 = vmul.f32 %v1527_v24, %v658_v44  ;;  %v905_v51 = vmul.f32 %v1527_v24, %v722_v45  ;;  %v966_v34 = vld [vmem:[%s1534_s27 + $0x38] sm:$0xff] }
  0xff   : > { %v993_v52 = vadd.f32 %v961_v32, %v929_v38  ;;  %v1009_v53 = vadd.f32 %v977_v33, %v945_v39  ;;  %v930_v54 = vadd.f32 %v1539_v26, %v891_v42  ;;  %v946_v55 = vadd.f32 %v1539_v26, %v907_v43  ;;  %v982_v35 = vld [vmem:[%s1534_s27 + $0xb8] sm:$0xff]  ;;  %v964_v42 = vld [vmem:[%s1534_s27 + $0x28] sm:$0xff] }
 0x100   : > { %v991_v58 = vadd.f32 %v959_v40, %v927_v46  ;;  %v1007_v59 = vadd.f32 %v975_v41, %v943_v47  ;;  %v928_v60 = vadd.f32 %v1539_v26, %v889_v50  ;;  %v944_v61 = vadd.f32 %v1539_v26, %v905_v51  ;;  %v980_v43 = vld [vmem:[%s1534_s27 + $0xa8] sm:$0xff] }
 0x101   : > { %v1025_v62 = vmax.f32 %v993_v52, 0.0  ;;  %v1041_v63 = vmax.f32 %v1009_v53, 0.0  ;;  %v994_v0 = vadd.f32 %v962_v48, %v930_v54  ;;  %v1010_v1 = vadd.f32 %v978_v49, %v946_v55 }
 0x102   : > { %v1023_v2 = vmax.f32 %v991_v58, 0.0  ;;  %v1039_v3 = vmax.f32 %v1007_v59, 0.0  ;;  %v992_v4 = vadd.f32 %v960_v56, %v928_v60  ;;  %v1008_v5 = vadd.f32 %v976_v57, %v944_v61  ;;  %v1313_v6 = vpop.f32.mrb[4].mxu0  ;;  %v1329_v7 = vpop.f32.mrb[4].mxu1 }
 0x103   : > { %1057 = vst [vmem:[%s1568_s7 + $0x10] sm:$0xff] %v1025_v62  ;;  %1073 = vst [vmem:[%s1568_s7 + $0x90] sm:$0xff] %v1041_v63  ;;  %v1026_v8 = vmax.f32 %v994_v0, 0.0  ;;  %v1042_v9 = vmax.f32 %v1010_v1, 0.0  ;;  %v894_v10 = vmul.f32 %v1313_v6, %v1527_v24  ;;  %v910_v11 = vmul.f32 %v1329_v7, %v1527_v24  ;;  %v671_v12 = vpop.f32.mrb[5].mxu0  ;;  %v735_v13 = vpop.f32.mrb[5].mxu1 }
 0x104   : > { %1055 = vst [vmem:[%s1568_s7] sm:$0xff] %v1023_v2  ;;  %1071 = vst [vmem:[%s1568_s7 + $0x80] sm:$0xff] %v1039_v3  ;;  %v1024_v14 = vmax.f32 %v992_v4, 0.0  ;;  %v1040_v15 = vmax.f32 %v1008_v5, 0.0  ;;  %v892_v18 = vmul.f32 %v1527_v24, %v671_v12  ;;  %v908_v19 = vmul.f32 %v1527_v24, %v735_v13  ;;  %v1314_v20 = vpop.f32.mrb[6].mxu0  ;;  %v1330_v21 = vpop.f32.mrb[6].mxu1  ;;  %v969_v2 = vld [vmem:[%s1534_s27 + $0x50] sm:$0xff] }
 0x105   : > { %1058 = vst [vmem:[%s1568_s7 + $0x18] sm:$0xff] %v1026_v8  ;;  %1074 = vst [vmem:[%s1568_s7 + $0x98] sm:$0xff] %v1042_v9  ;;  %v933_v22 = vadd.f32 %v1539_v26, %v894_v10  ;;  %v949_v23 = vadd.f32 %v1539_v26, %v910_v11  ;;  %v895_v28 = vmul.f32 %v1314_v20, %v1527_v24  ;;  %v674_v30 = vpop.f32.mrb[7].mxu0  ;;  %v738_v31 = vpop.f32.mrb[7].mxu1  ;;  %v985_v3 = vld [vmem:[%s1534_s27 + $0xd0] sm:$0xff]  ;;  %v967_v10 = vld [vmem:[%s1534_s27 + $0x40] sm:$0xff] }
 0x106   : > { %v911_v29 = vmul.f32 %v1330_v21, %v1527_v24  ;;  %1056 = vst [vmem:[%s1568_s7 + $0x8] sm:$0xff] %v1024_v14  ;;  %1072 = vst [vmem:[%s1568_s7 + $0x88] sm:$0xff] %v1040_v15  ;;  %v931_v32 = vadd.f32 %v1539_v26, %v892_v18  ;;  %v947_v33 = vadd.f32 %v1539_v26, %v908_v19  ;;  %v983_v11 = vld [vmem:[%s1534_s27 + $0xc0] sm:$0xff]  ;;  %v970_v18 = vld [vmem:[%s1534_s27 + $0x58] sm:$0xff] }
 0x107   : > { %v893_v36 = vmul.f32 %v1527_v24, %v674_v30  ;;  %v909_v37 = vmul.f32 %v1527_v24, %v738_v31  ;;  %v997_v38 = vadd.f32 %v965_v16, %v933_v22  ;;  %v1013_v39 = vadd.f32 %v981_v17, %v949_v23  ;;  %v986_v19 = vld [vmem:[%s1534_s27 + $0xd8] sm:$0xff] }
 0x108   : > { %v934_v40 = vadd.f32 %v1539_v26, %v895_v28  ;;  %v950_v41 = vadd.f32 %v1539_v26, %v911_v29  ;;  %v995_v44 = vadd.f32 %v963_v25, %v931_v32  ;;  %v1011_v45 = vadd.f32 %v979_v27, %v947_v33  ;;  %v968_v28 = vld [vmem:[%s1534_s27 + $0x48] sm:$0xff] }
 0x109   : > { %v932_v46 = vadd.f32 %v1539_v26, %v893_v36  ;;  %v948_v47 = vadd.f32 %v1539_v26, %v909_v37  ;;  %v1029_v48 = vmax.f32 %v997_v38, 0.0  ;;  %v1045_v49 = vmax.f32 %v1013_v39, 0.0  ;;  %v984_v29 = vld [vmem:[%s1534_s27 + $0xc8] sm:$0xff] }
 0x10a   : > { %v998_v50 = vadd.f32 %v966_v34, %v934_v40  ;;  %v1014_v51 = vadd.f32 %v982_v35, %v950_v41  ;;  %v1027_v52 = vmax.f32 %v995_v44, 0.0  ;;  %v1043_v53 = vmax.f32 %v1011_v45, 0.0  ;;  %v1317_v56 = vpop.f32.mrb[8].mxu0  ;;  %v1333_v57 = vpop.f32.mrb[8].mxu1 }
 0x10b   : > { %v996_v54 = vadd.f32 %v964_v42, %v932_v46  ;;  %v1012_v55 = vadd.f32 %v980_v43, %v948_v47  ;;  %1061 = vst [vmem:[%s1568_s7 + $0x30] sm:$0xff] %v1029_v48  ;;  %1077 = vst [vmem:[%s1568_s7 + $0xb0] sm:$0xff] %v1045_v49  ;;  %v898_v60 = vmul.f32 %v1317_v56, %v1527_v24  ;;  %v687_v62 = vpop.f32.mrb[9].mxu0  ;;  %v751_v63 = vpop.f32.mrb[9].mxu1 }
 0x10c   : > { %v1030_v58 = vmax.f32 %v998_v50, 0.0  ;;  %v1046_v59 = vmax.f32 %v1014_v51, 0.0  ;;  %v914_v61 = vmul.f32 %v1333_v57, %v1527_v24  ;;  %1059 = vst [vmem:[%s1568_s7 + $0x20] sm:$0xff] %v1027_v52  ;;  %1075 = vst [vmem:[%s1568_s7 + $0xa0] sm:$0xff] %v1043_v53  ;;  %v896_v4 = vmul.f32 %v1527_v24, %v687_v62  ;;  %v1318_v6 = vpop.f32.mrb[10].mxu0  ;;  %v1334_v7 = vpop.f32.mrb[10].mxu1 }
 0x10d   : > { %v1028_v0 = vmax.f32 %v996_v54, 0.0  ;;  %v1044_v1 = vmax.f32 %v1012_v55, 0.0  ;;  %v912_v5 = vmul.f32 %v1527_v24, %v751_v63  ;;  %v937_v8 = vadd.f32 %v1539_v26, %v898_v60  ;;  %v690_v14 = vpop.f32.mrb[11].mxu0  ;;  %v754_v15 = vpop.f32.mrb[11].mxu1  ;;  %v973_v52 = vld [vmem:[%s1534_s27 + $0x70] sm:$0xff]  ;;  %v971_v60 = vld [vmem:[%s1534_s27 + $0x60] sm:$0xff] }
 0x10e   : > { %1062 = vst [vmem:[%s1568_s7 + $0x38] sm:$0xff] %v1030_v58  ;;  %1078 = vst [vmem:[%s1568_s7 + $0xb8] sm:$0xff] %v1046_v59  ;;  %v953_v9 = vadd.f32 %v1539_v26, %v914_v61  ;;  %v899_v12 = vmul.f32 %v1318_v6, %v1527_v24  ;;  %v915_v13 = vmul.f32 %v1334_v7, %v1527_v24  ;;  %v989_v53 = vld [vmem:[%s1534_s27 + $0xf0] sm:$0xff]  ;;  %v987_v61 = vld [vmem:[%s1534_s27 + $0xe0] sm:$0xff] }
 0x10f   : > { %1060 = vst [vmem:[%s1568_s7 + $0x28] sm:$0xff] %v1028_v0  ;;  %1076 = vst [vmem:[%s1568_s7 + $0xa8] sm:$0xff] %v1044_v1  ;;  %v935_v16 = vadd.f32 %v1539_v26, %v896_v4  ;;  %v951_v17 = vadd.f32 %v1539_v26, %v912_v5  ;;  %v897_v20 = vmul.f32 %v1527_v24, %v690_v14  ;;  %v974_v4 = vld [vmem:[%s1534_s27 + $0x78] sm:$0xff] }
 0x110   : > { %v913_v21 = vmul.f32 %v1527_v24, %v754_v15  ;;  %v1001_v22 = vadd.f32 %v969_v2, %v937_v8  ;;  %v1017_v23 = vadd.f32 %v985_v3, %v953_v9  ;;  %v938_v25 = vadd.f32 %v1539_v26, %v899_v12  ;;  %v990_v5 = vld [vmem:[%s1534_s27 + $0xf8] sm:$0xff]  ;;  %v972_v12 = vld [vmem:[%s1534_s27 + $0x68] sm:$0xff] }
 0x111   : > { %v954_v27 = vadd.f32 %v1539_v26, %v915_v13  ;;  %v999_v30 = vadd.f32 %v967_v10, %v935_v16  ;;  %v1015_v31 = vadd.f32 %v983_v11, %v951_v17  ;;  %v936_v32 = vadd.f32 %v1539_v26, %v897_v20  ;;  %v988_v13 = vld [vmem:[%s1534_s27 + $0xe8] sm:$0xff] }
 0x112   : > { %v952_v33 = vadd.f32 %v1539_v26, %v913_v21  ;;  %v1033_v34 = vmax.f32 %v1001_v22, 0.0  ;;  %v1049_v35 = vmax.f32 %v1017_v23, 0.0  ;;  %v1002_v36 = vadd.f32 %v970_v18, %v938_v25  ;;  %v1321_v42 = vpop.f32.mrb[12].mxu0  ;;  %v1337_v43 = vpop.f32.mrb[12].mxu1 }
 0x113   : > { %v1018_v37 = vadd.f32 %v986_v19, %v954_v27  ;;  %v1031_v38 = vmax.f32 %v999_v30, 0.0  ;;  %v1047_v39 = vmax.f32 %v1015_v31, 0.0  ;;  %v1000_v40 = vadd.f32 %v968_v28, %v936_v32  ;;  %v703_v48 = vpop.f32.mrb[13].mxu0  ;;  %v767_v49 = vpop.f32.mrb[13].mxu1 }
 0x114   : > { %v1016_v41 = vadd.f32 %v984_v29, %v952_v33  ;;  %1065 = vst [vmem:[%s1568_s7 + $0x50] sm:$0xff] %v1033_v34  ;;  %1081 = vst [vmem:[%s1568_s7 + $0xd0] sm:$0xff] %v1049_v35  ;;  %v1034_v44 = vmax.f32 %v1002_v36, 0.0  ;;  %v902_v46 = vmul.f32 %v1321_v42, %v1527_v24  ;;  %v918_v47 = vmul.f32 %v1337_v43, %v1527_v24  ;;  %v1322_v56 = vpop.f32.mrb[14].mxu0  ;;  %v1338_v57 = vpop.f32.mrb[14].mxu1 }
 0x115   : > { %v1050_v45 = vmax.f32 %v1018_v37, 0.0  ;;  %1063 = vst [vmem:[%s1568_s7 + $0x40] sm:$0xff] %v1031_v38  ;;  %1079 = vst [vmem:[%s1568_s7 + $0xc0] sm:$0xff] %v1047_v39  ;;  %v1032_v50 = vmax.f32 %v1000_v40, 0.0  ;;  %v900_v54 = vmul.f32 %v1527_v24, %v703_v48  ;;  %v916_v55 = vmul.f32 %v1527_v24, %v767_v49  ;;  %v706_v0 = vpop.f32.mrb[15].mxu0  ;;  %v770_v1 = vpop.f32.mrb[15].mxu1 }
 0x116   : > { %v1048_v51 = vmax.f32 %v1016_v41, 0.0  ;;  %1066 = vst [vmem:[%s1568_s7 + $0x58] sm:$0xff] %v1034_v44  ;;  %v941_v58 = vadd.f32 %v1539_v26, %v902_v46  ;;  %v957_v59 = vadd.f32 %v1539_v26, %v918_v47  ;;  %v903_v62 = vmul.f32 %v1322_v56, %v1527_v24 }
 0x117   : > { %1082 = vst [vmem:[%s1568_s7 + $0xd8] sm:$0xff] %v1050_v45  ;;  %v919_v63 = vmul.f32 %v1338_v57, %v1527_v24  ;;  %1064 = vst [vmem:[%s1568_s7 + $0x48] sm:$0xff] %v1032_v50  ;;  %v939_v2 = vadd.f32 %v1539_v26, %v900_v54  ;;  %v955_v3 = vadd.f32 %v1539_v26, %v916_v55 }
 0x118   : > { %1080 = vst [vmem:[%s1568_s7 + $0xc8] sm:$0xff] %v1048_v51  ;;  %v901_v6 = vmul.f32 %v1527_v24, %v706_v0  ;;  %v917_v7 = vmul.f32 %v1527_v24, %v770_v1  ;;  %v1005_v8 = vadd.f32 %v973_v52, %v941_v58  ;;  %v1021_v9 = vadd.f32 %v989_v53, %v957_v59 }
 0x119   : > { %v942_v10 = vadd.f32 %v1539_v26, %v903_v62  ;;  %v958_v11 = vadd.f32 %v1539_v26, %v919_v63  ;;  %v1003_v14 = vadd.f32 %v971_v60, %v939_v2  ;;  %v1019_v15 = vadd.f32 %v987_v61, %v955_v3 }
 0x11a   : > { %v940_v16 = vadd.f32 %v1539_v26, %v901_v6  ;;  %v956_v17 = vadd.f32 %v1539_v26, %v917_v7  ;;  %v1037_v18 = vmax.f32 %v1005_v8, 0.0  ;;  %v1053_v24 = vmax.f32 %v1021_v9, 0.0 }
 0x11b   : > { %v1006_v19 = vadd.f32 %v974_v4, %v942_v10  ;;  %v1022_v20 = vadd.f32 %v990_v5, %v958_v11  ;;  %v1035_v21 = vmax.f32 %v1003_v14, 0.0  ;;  %v1051_v22 = vmax.f32 %v1019_v15, 0.0 }
 0x11c   : > { %v1004_v23 = vadd.f32 %v972_v12, %v940_v16  ;;  %v1020_v25 = vadd.f32 %v988_v13, %v956_v17  ;;  %1069 = vst [vmem:[%s1568_s7 + $0x70] sm:$0xff] %v1037_v18  ;;  %1085 = vst [vmem:[%s1568_s7 + $0xf0] sm:$0xff] %v1053_v24 }
 0x11d   : > { %v1038_v27 = vmax.f32 %v1006_v19, 0.0  ;;  %v1054_v28 = vmax.f32 %v1022_v20, 0.0  ;;  %1067 = vst [vmem:[%s1568_s7 + $0x60] sm:$0xff] %v1035_v21  ;;  %1083 = vst [vmem:[%s1568_s7 + $0xe0] sm:$0xff] %v1051_v22 }
 0x11e   : > { %v1036_v29 = vmax.f32 %v1004_v23, 0.0  ;;  %v1052_v26 = vmax.f32 %v1020_v25, 0.0 }
 0x11f   : > { %1070 = vst [vmem:[%s1568_s7 + $0x78] sm:$0xff] %v1038_v27  ;;  %1086 = vst [vmem:[%s1568_s7 + $0xf8] sm:$0xff] %v1054_v28 }
 0x120   : > { %1068 = vst [vmem:[%s1568_s7 + $0x68] sm:$0xff] %v1036_v29  ;;  %1084 = vst [vmem:[%s1568_s7 + $0xe8] sm:$0xff] %v1052_v26 }
 0x121 PF: > { %s15_s20 = sadd.s32 1, %s1425_s20   ;;  %s1691_s18 = smov %s1421_s19 }
 0x122   : > { %p12_p5 = scmp.ge.s32.totalorder %s15_s20, 4   ;;  %s1692_s19 = smov %s1694_s21 }
 0x124   :  { %14 = sbr.rel (!%p12_p5) target bundleno = 2 (0x2), region = 90 }

// kernel: _lambda_.82
= control target key start
LH: loop header
LB: loop body
LE: loop exit
PB: predicated region body
PF: predicated region fallthrough
CT: control target
= control target key end

     0   :  { %s655_s1 = inlined_call_operand.vmem [shape: bf16[128,128], index: 1, kind: input, shape index: {}]   ;;  %s656_s0 = inlined_call_operand.vmem [shape: bf16[128,128], index: 0, kind: input, shape index: {}]   ;;  %s657_s2 = inlined_call_operand.vmem [shape: f32[1,128], index: 2, kind: input, shape index: {}]   ;;  %s658_s3 = inlined_call_operand.vmem [shape: f32[1,128], index: 3, kind: input, shape index: {}]   ;;  %s659_s4 = inlined_call_operand.vmem [shape: f32[128,128], index: 4, kind: output, shape index: {}]  }
   0x1   :  { %v494_v0 = vld [vmem:[%s655_s1] sm:$0xff]   ;;  %v495_v1 = vld [vmem:[%s655_s1 + $0x8] sm:$0xff]   ;;  %v496_v2 = vld [vmem:[%s655_s1 + $0x10] sm:$0xff]  }
   0x2   :  { %446 = vmatprep.subr.bf16.mxu0 %v494_v0  ;;  %478 = vmatprep.subr.bf16.mxu1 %v494_v0  ;;  %v497_v3 = vld [vmem:[%s655_s1 + $0x18] sm:$0xff]   ;;  %v502_v4 = vld [vmem:[%s656_s0] sm:$0xff]   ;;  %v499_v7 = vld [vmem:[%s655_s1 + $0x28] sm:$0xff]  }
   0x3   :  { %447 = vmatpush3.bf16.msra.mxu0 %v494_v0  ;;  %486 = vmatpush3.bf16.msra.mxu1 %v494_v0  ;;  %v503_v5 = vld [vmem:[%s656_s0 + $0x20] sm:$0xff]   ;;  %v500_v8 = vld [vmem:[%s655_s1 + $0x30] sm:$0xff]   ;;  %v501_v9 = vld [vmem:[%s655_s1 + $0x38] sm:$0xff]  }
   0x4   :  { %448 = vmatprep.subr.bf16.mxu0 %v495_v1  ;;  %479 = vmatprep.subr.bf16.mxu1 %v495_v1  ;;  %v498_v6 = vld [vmem:[%s655_s1 + $0x20] sm:$0xff]   ;;  %v504_v10 = vld [vmem:[%s656_s0 + $0x8] sm:$0xff]   ;;  %v506_v12 = vld [vmem:[%s656_s0 + $0x10] sm:$0xff]  }
   0x5   :  { %462 = vmatprep.mubr.bf16.mxu0 %v502_v4  ;;  %470 = vmatprep.mubr.bf16.mxu1 %v503_v5  ;;  %v505_v11 = vld [vmem:[%s656_s0 + $0x28] sm:$0xff]   ;;  %v507_v13 = vld [vmem:[%s656_s0 + $0x30] sm:$0xff]   ;;  %v508_v14 = vld [vmem:[%s656_s0 + $0x18] sm:$0xff]  }
   0x6   :  { %v509_v15 = vld [vmem:[%s656_s0 + $0x38] sm:$0xff]   ;;  %v428_v16 = vld [vmem:[%s657_s2] ss:$0 sm:$0xff] }
   0x7   :  { %449 = vmatpush3.bf16.msra.mxu0 %v495_v1  ;;  %487 = vmatpush3.bf16.msra.mxu1 %v495_v1  ;;  %v589_v18 = vld [vmem:[%s658_s3] ss:$0 sm:$0xff] }
   0x8   :  { %450 = vmatprep.subr.bf16.mxu0 %v496_v2  ;;  %480 = vmatprep.subr.bf16.mxu1 %v496_v2 }
   0xb   :  { %451 = vmatpush3.bf16.msra.mxu0 %v496_v2  ;;  %488 = vmatpush3.bf16.msra.mxu1 %v496_v2 }
   0xc   :  { %452 = vmatprep.subr.bf16.mxu0 %v497_v3  ;;  %481 = vmatprep.subr.bf16.mxu1 %v497_v3 }
   0xf   :  { %453 = vmatpush3.bf16.msra.mxu0 %v497_v3  ;;  %489 = vmatpush3.bf16.msra.mxu1 %v497_v3 }
  0x10   :  { %454 = vmatprep.subr.bf16.mxu0 %v498_v6  ;;  %482 = vmatprep.subr.bf16.mxu1 %v498_v6 }
  0x13   :  { %455 = vmatpush3.bf16.msra.mxu0 %v498_v6  ;;  %490 = vmatpush3.bf16.msra.mxu1 %v498_v6 }
  0x14   :  { %456 = vmatprep.subr.bf16.mxu0 %v499_v7  ;;  %483 = vmatprep.subr.bf16.mxu1 %v499_v7 }
  0x17   :  { %457 = vmatpush3.bf16.msra.mxu0 %v499_v7  ;;  %491 = vmatpush3.bf16.msra.mxu1 %v499_v7 }
  0x18   :  { %458 = vmatprep.subr.bf16.mxu0 %v500_v8  ;;  %484 = vmatprep.subr.bf16.mxu1 %v500_v8 }
  0x1b   :  { %459 = vmatpush3.bf16.msra.mxu0 %v500_v8  ;;  %492 = vmatpush3.bf16.msra.mxu1 %v500_v8 }
  0x1c   :  { %460 = vmatprep.subr.bf16.mxu0 %v501_v9  ;;  %485 = vmatprep.subr.bf16.mxu1 %v501_v9 }
  0x1f   :  { %461 = vmatpush3.bf16.msra.mxu0 %v501_v9  ;;  %493 = vmatpush3.bf16.msra.mxu1 %v501_v9 }
  0x22   :  { %463 = vmatmul.mubr.bf16.vlgmr.msra.gmra.mrb[0].mxu0 %v504_v10  ;;  %471 = vmatmul.mubr.bf16.vlgmr.msra.gmra.mrb[0].mxu1 %v505_v11 }
  0x23   :  { %466 = vmatprep.mubr.bf16.mxu0 %v506_v12  ;;  %474 = vmatprep.mubr.bf16.mxu1 %v507_v13 }
  0x2a   :  { %467 = vmatmul.mubr.bf16.gmra.mrb[4].mxu0 %v508_v14  ;;  %475 = vmatmul.mubr.bf16.gmra.mrb[4].mxu1 %v509_v15 }
  0xf5   :  { %v464_v17 = vpop.f32.mrb[0].mxu0  ;;  %v472_v19 = vpop.f32.mrb[0].mxu1 }
  0xf6   :  { %v339_v20 = vmul.f32 %v464_v17, %v428_v16  ;;  %v347_v21 = vmul.f32 %v472_v19, %v428_v16  ;;  %v216_v22 = vpop.f32.mrb[1].mxu0  ;;  %v248_v23 = vpop.f32.mrb[1].mxu1 }
  0xf7   :  { %v337_v24 = vmul.f32 %v428_v16, %v216_v22  ;;  %v345_v25 = vmul.f32 %v428_v16, %v248_v23  ;;  %v465_v26 = vpop.f32.mrb[2].mxu0  ;;  %v473_v27 = vpop.f32.mrb[2].mxu1 }
  0xf8   :  { %v362_v28 = vadd.f32 %v589_v18, %v339_v20  ;;  %v370_v29 = vadd.f32 %v589_v18, %v347_v21  ;;  %v340_v30 = vmul.f32 %v465_v26, %v428_v16  ;;  %v348_v31 = vmul.f32 %v473_v27, %v428_v16  ;;  %v219_v32 = vpop.f32.mrb[3].mxu0  ;;  %v251_v33 = vpop.f32.mrb[3].mxu1 }
  0xf9   :  { %v360_v34 = vadd.f32 %v589_v18, %v337_v24  ;;  %v368_v35 = vadd.f32 %v589_v18, %v345_v25  ;;  %v338_v36 = vmul.f32 %v428_v16, %v219_v32  ;;  %v346_v37 = vmul.f32 %v428_v16, %v251_v33 }
  0xfa   :  { %v378_v38 = vmax.f32 %v362_v28, 0.0  ;;  %v386_v39 = vmax.f32 %v370_v29, 0.0  ;;  %v363_v40 = vadd.f32 %v589_v18, %v340_v30  ;;  %v371_v41 = vadd.f32 %v589_v18, %v348_v31 }
  0xfb   :  { %v376_v42 = vmax.f32 %v360_v34, 0.0  ;;  %v384_v43 = vmax.f32 %v368_v35, 0.0  ;;  %v361_v44 = vadd.f32 %v589_v18, %v338_v36  ;;  %v369_v45 = vadd.f32 %v589_v18, %v346_v37 }
  0xfc   :  { %394 = vst [vmem:[%s659_s4 + $0x10] sm:$0xff] %v378_v38  ;;  %402 = vst [vmem:[%s659_s4 + $0x50] sm:$0xff] %v386_v39  ;;  %v379_v46 = vmax.f32 %v363_v40, 0.0  ;;  %v387_v47 = vmax.f32 %v371_v41, 0.0 }
  0xfd   :  { %392 = vst [vmem:[%s659_s4] sm:$0xff] %v376_v42  ;;  %400 = vst [vmem:[%s659_s4 + $0x40] sm:$0xff] %v384_v43  ;;  %v377_v48 = vmax.f32 %v361_v44, 0.0  ;;  %v385_v49 = vmax.f32 %v369_v45, 0.0  ;;  %v468_v50 = vpop.f32.mrb[4].mxu0  ;;  %v476_v51 = vpop.f32.mrb[4].mxu1 }
  0xfe   :  { %395 = vst [vmem:[%s659_s4 + $0x18] sm:$0xff] %v379_v46  ;;  %403 = vst [vmem:[%s659_s4 + $0x58] sm:$0xff] %v387_v47  ;;  %v343_v52 = vmul.f32 %v468_v50, %v428_v16  ;;  %v351_v53 = vmul.f32 %v476_v51, %v428_v16  ;;  %v232_v54 = vpop.f32.mrb[5].mxu0  ;;  %v264_v55 = vpop.f32.mrb[5].mxu1 }
  0xff   :  { %393 = vst [vmem:[%s659_s4 + $0x8] sm:$0xff] %v377_v48  ;;  %401 = vst [vmem:[%s659_s4 + $0x48] sm:$0xff] %v385_v49  ;;  %v341_v56 = vmul.f32 %v428_v16, %v232_v54  ;;  %v349_v57 = vmul.f32 %v428_v16, %v264_v55  ;;  %v469_v58 = vpop.f32.mrb[6].mxu0  ;;  %v477_v59 = vpop.f32.mrb[6].mxu1 }
 0x100   :  { %v366_v60 = vadd.f32 %v589_v18, %v343_v52  ;;  %v374_v61 = vadd.f32 %v589_v18, %v351_v53  ;;  %v344_v62 = vmul.f32 %v469_v58, %v428_v16  ;;  %v352_v63 = vmul.f32 %v477_v59, %v428_v16  ;;  %v235_v0 = vpop.f32.mrb[7].mxu0  ;;  %v267_v1 = vpop.f32.mrb[7].mxu1 }
 0x101   :  { %v364_v2 = vadd.f32 %v589_v18, %v341_v56  ;;  %v372_v3 = vadd.f32 %v589_v18, %v349_v57  ;;  %v342_v4 = vmul.f32 %v428_v16, %v235_v0  ;;  %v350_v5 = vmul.f32 %v428_v16, %v267_v1 }
 0x102   :  { %v382_v6 = vmax.f32 %v366_v60, 0.0  ;;  %v390_v7 = vmax.f32 %v374_v61, 0.0  ;;  %v367_v8 = vadd.f32 %v589_v18, %v344_v62  ;;  %v375_v9 = vadd.f32 %v589_v18, %v352_v63 }
 0x103   :  { %v380_v10 = vmax.f32 %v364_v2, 0.0  ;;  %v388_v11 = vmax.f32 %v372_v3, 0.0  ;;  %v365_v12 = vadd.f32 %v589_v18, %v342_v4  ;;  %v373_v13 = vadd.f32 %v589_v18, %v350_v5 }
 0x104   :  { %398 = vst [vmem:[%s659_s4 + $0x30] sm:$0xff] %v382_v6  ;;  %406 = vst [vmem:[%s659_s4 + $0x70] sm:$0xff] %v390_v7  ;;  %v383_v14 = vmax.f32 %v367_v8, 0.0  ;;  %v391_v15 = vmax.f32 %v375_v9, 0.0 }
 0x105   :  { %396 = vst [vmem:[%s659_s4 + $0x20] sm:$0xff] %v380_v10  ;;  %404 = vst [vmem:[%s659_s4 + $0x60] sm:$0xff] %v388_v11  ;;  %v381_v16 = vmax.f32 %v365_v12, 0.0  ;;  %v389_v17 = vmax.f32 %v373_v13, 0.0 }
 0x106   :  { %399 = vst [vmem:[%s659_s4 + $0x38] sm:$0xff] %v383_v14  ;;  %407 = vst [vmem:[%s659_s4 + $0x78] sm:$0xff] %v391_v15 }
 0x107   :  { %397 = vst [vmem:[%s659_s4 + $0x28] sm:$0xff] %v381_v16  ;;  %405 = vst [vmem:[%s659_s4 + $0x68] sm:$0xff] %v389_v17 }

// kernel: _lambda_.83
= control target key start
LH: loop header
LB: loop body
LE: loop exit
PB: predicated region body
PF: predicated region fallthrough
CT: control target
= control target key end

     0   :  { %s621_s1 = inlined_call_operand.vmem [shape: bf16[128,128], index: 1, kind: input, shape index: {}]   ;;  %s622_s0 = inlined_call_operand.vmem [shape: bf16[128,128], index: 0, kind: input, shape index: {}]   ;;  %s623_s2 = inlined_call_operand.vmem [shape: f32[1,128], index: 2, kind: input, shape index: {}]   ;;  %s624_s3 = inlined_call_operand.vmem [shape: f32[1,128], index: 3, kind: input, shape index: {}]   ;;  %s625_s4 = inlined_call_operand.vmem [shape: f32[128,128], index: 4, kind: output, shape index: {}]  }
   0x1   :  { %v478_v0 = vld [vmem:[%s621_s1] sm:$0xff]   ;;  %v479_v1 = vld [vmem:[%s621_s1 + $0x8] sm:$0xff]   ;;  %v480_v2 = vld [vmem:[%s621_s1 + $0x10] sm:$0xff]  }
   0x2   :  { %430 = vmatprep.subr.bf16.mxu0 %v478_v0  ;;  %462 = vmatprep.subr.bf16.mxu1 %v478_v0  ;;  %v481_v3 = vld [vmem:[%s621_s1 + $0x18] sm:$0xff]   ;;  %v486_v4 = vld [vmem:[%s622_s0] sm:$0xff]   ;;  %v483_v7 = vld [vmem:[%s621_s1 + $0x28] sm:$0xff]  }
   0x3   :  { %431 = vmatpush3.bf16.msra.mxu0 %v478_v0  ;;  %470 = vmatpush3.bf16.msra.mxu1 %v478_v0  ;;  %v487_v5 = vld [vmem:[%s622_s0 + $0x20] sm:$0xff]   ;;  %v484_v8 = vld [vmem:[%s621_s1 + $0x30] sm:$0xff]   ;;  %v485_v9 = vld [vmem:[%s621_s1 + $0x38] sm:$0xff]  }
   0x4   :  { %432 = vmatprep.subr.bf16.mxu0 %v479_v1  ;;  %463 = vmatprep.subr.bf16.mxu1 %v479_v1  ;;  %v482_v6 = vld [vmem:[%s621_s1 + $0x20] sm:$0xff]   ;;  %v488_v10 = vld [vmem:[%s622_s0 + $0x8] sm:$0xff]   ;;  %v490_v12 = vld [vmem:[%s622_s0 + $0x10] sm:$0xff]  }
   0x5   :  { %446 = vmatprep.mubr.bf16.mxu0 %v486_v4  ;;  %454 = vmatprep.mubr.bf16.mxu1 %v487_v5  ;;  %v489_v11 = vld [vmem:[%s622_s0 + $0x28] sm:$0xff]   ;;  %v491_v13 = vld [vmem:[%s622_s0 + $0x30] sm:$0xff]   ;;  %v492_v14 = vld [vmem:[%s622_s0 + $0x18] sm:$0xff]  }
   0x6   :  { %v493_v15 = vld [vmem:[%s622_s0 + $0x38] sm:$0xff]   ;;  %v412_v16 = vld [vmem:[%s623_s2] ss:$0 sm:$0xff] }
   0x7   :  { %433 = vmatpush3.bf16.msra.mxu0 %v479_v1  ;;  %471 = vmatpush3.bf16.msra.mxu1 %v479_v1  ;;  %v413_v18 = vld [vmem:[%s624_s3] ss:$0 sm:$0xff] }
   0x8   :  { %434 = vmatprep.subr.bf16.mxu0 %v480_v2  ;;  %464 = vmatprep.subr.bf16.mxu1 %v480_v2 }
   0xb   :  { %435 = vmatpush3.bf16.msra.mxu0 %v480_v2  ;;  %472 = vmatpush3.bf16.msra.mxu1 %v480_v2 }
   0xc   :  { %436 = vmatprep.subr.bf16.mxu0 %v481_v3  ;;  %465 = vmatprep.subr.bf16.mxu1 %v481_v3 }
   0xf   :  { %437 = vmatpush3.bf16.msra.mxu0 %v481_v3  ;;  %473 = vmatpush3.bf16.msra.mxu1 %v481_v3 }
  0x10   :  { %438 = vmatprep.subr.bf16.mxu0 %v482_v6  ;;  %466 = vmatprep.subr.bf16.mxu1 %v482_v6 }
  0x13   :  { %439 = vmatpush3.bf16.msra.mxu0 %v482_v6  ;;  %474 = vmatpush3.bf16.msra.mxu1 %v482_v6 }
  0x14   :  { %440 = vmatprep.subr.bf16.mxu0 %v483_v7  ;;  %467 = vmatprep.subr.bf16.mxu1 %v483_v7 }
  0x17   :  { %441 = vmatpush3.bf16.msra.mxu0 %v483_v7  ;;  %475 = vmatpush3.bf16.msra.mxu1 %v483_v7 }
  0x18   :  { %442 = vmatprep.subr.bf16.mxu0 %v484_v8  ;;  %468 = vmatprep.subr.bf16.mxu1 %v484_v8 }
  0x1b   :  { %443 = vmatpush3.bf16.msra.mxu0 %v484_v8  ;;  %476 = vmatpush3.bf16.msra.mxu1 %v484_v8 }
  0x1c   :  { %444 = vmatprep.subr.bf16.mxu0 %v485_v9  ;;  %469 = vmatprep.subr.bf16.mxu1 %v485_v9 }
  0x1f   :  { %445 = vmatpush3.bf16.msra.mxu0 %v485_v9  ;;  %477 = vmatpush3.bf16.msra.mxu1 %v485_v9 }
  0x22   :  { %447 = vmatmul.mubr.bf16.vlgmr.msra.gmra.mrb[0].mxu0 %v488_v10  ;;  %455 = vmatmul.mubr.bf16.vlgmr.msra.gmra.mrb[0].mxu1 %v489_v11 }
  0x23   :  { %450 = vmatprep.mubr.bf16.mxu0 %v490_v12  ;;  %458 = vmatprep.mubr.bf16.mxu1 %v491_v13 }
  0x2a   :  { %451 = vmatmul.mubr.bf16.gmra.mrb[4].mxu0 %v492_v14  ;;  %459 = vmatmul.mubr.bf16.gmra.mrb[4].mxu1 %v493_v15 }
  0xf5   :  { %v448_v17 = vpop.f32.mrb[0].mxu0  ;;  %v456_v19 = vpop.f32.mrb[0].mxu1 }
  0xf6   :  { %v339_v20 = vmul.f32 %v448_v17, %v412_v16  ;;  %v347_v21 = vmul.f32 %v456_v19, %v412_v16  ;;  %v216_v22 = vpop.f32.mrb[1].mxu0  ;;  %v248_v23 = vpop.f32.mrb[1].mxu1 }
  0xf7   :  { %v337_v24 = vmul.f32 %v412_v16, %v216_v22  ;;  %v345_v25 = vmul.f32 %v412_v16, %v248_v23  ;;  %v449_v26 = vpop.f32.mrb[2].mxu0  ;;  %v457_v27 = vpop.f32.mrb[2].mxu1 }
  0xf8   :  { %v362_v28 = vadd.f32 %v413_v18, %v339_v20  ;;  %v370_v29 = vadd.f32 %v413_v18, %v347_v21  ;;  %v340_v30 = vmul.f32 %v449_v26, %v412_v16  ;;  %v348_v31 = vmul.f32 %v457_v27, %v412_v16  ;;  %v219_v32 = vpop.f32.mrb[3].mxu0  ;;  %v251_v33 = vpop.f32.mrb[3].mxu1 }
  0xf9   :  { %v360_v34 = vadd.f32 %v413_v18, %v337_v24  ;;  %v368_v35 = vadd.f32 %v413_v18, %v345_v25  ;;  %v338_v36 = vmul.f32 %v412_v16, %v219_v32  ;;  %v346_v37 = vmul.f32 %v412_v16, %v251_v33 }
  0xfa   :  { %378 = vst [vmem:[%s625_s4 + $0x10] sm:$0xff] %v362_v28  ;;  %386 = vst [vmem:[%s625_s4 + $0x50] sm:$0xff] %v370_v29  ;;  %v363_v38 = vadd.f32 %v413_v18, %v340_v30  ;;  %v371_v39 = vadd.f32 %v413_v18, %v348_v31 }
  0xfb   :  { %376 = vst [vmem:[%s625_s4] sm:$0xff] %v360_v34  ;;  %384 = vst [vmem:[%s625_s4 + $0x40] sm:$0xff] %v368_v35  ;;  %v361_v40 = vadd.f32 %v413_v18, %v338_v36  ;;  %v369_v41 = vadd.f32 %v413_v18, %v346_v37 }
  0xfc   :  { %379 = vst [vmem:[%s625_s4 + $0x18] sm:$0xff] %v363_v38  ;;  %387 = vst [vmem:[%s625_s4 + $0x58] sm:$0xff] %v371_v39 }
  0xfd   :  { %377 = vst [vmem:[%s625_s4 + $0x8] sm:$0xff] %v361_v40  ;;  %385 = vst [vmem:[%s625_s4 + $0x48] sm:$0xff] %v369_v41  ;;  %v452_v42 = vpop.f32.mrb[4].mxu0  ;;  %v460_v43 = vpop.f32.mrb[4].mxu1 }
  0xfe   :  { %v343_v44 = vmul.f32 %v452_v42, %v412_v16  ;;  %v351_v45 = vmul.f32 %v460_v43, %v412_v16  ;;  %v232_v46 = vpop.f32.mrb[5].mxu0  ;;  %v264_v47 = vpop.f32.mrb[5].mxu1 }
  0xff   :  { %v341_v48 = vmul.f32 %v412_v16, %v232_v46  ;;  %v349_v49 = vmul.f32 %v412_v16, %v264_v47  ;;  %v453_v50 = vpop.f32.mrb[6].mxu0  ;;  %v461_v51 = vpop.f32.mrb[6].mxu1 }
 0x100   :  { %v366_v52 = vadd.f32 %v413_v18, %v343_v44  ;;  %v374_v53 = vadd.f32 %v413_v18, %v351_v45  ;;  %v344_v54 = vmul.f32 %v453_v50, %v412_v16  ;;  %v352_v55 = vmul.f32 %v461_v51, %v412_v16  ;;  %v235_v56 = vpop.f32.mrb[7].mxu0  ;;  %v267_v57 = vpop.f32.mrb[7].mxu1 }
 0x101   :  { %v364_v58 = vadd.f32 %v413_v18, %v341_v48  ;;  %v372_v59 = vadd.f32 %v413_v18, %v349_v49  ;;  %v342_v60 = vmul.f32 %v412_v16, %v235_v56  ;;  %v350_v61 = vmul.f32 %v412_v16, %v267_v57 }
 0x102   :  { %382 = vst [vmem:[%s625_s4 + $0x30] sm:$0xff] %v366_v52  ;;  %390 = vst [vmem:[%s625_s4 + $0x70] sm:$0xff] %v374_v53  ;;  %v367_v62 = vadd.f32 %v413_v18, %v344_v54  ;;  %v375_v63 = vadd.f32 %v413_v18, %v352_v55 }
 0x103   :  { %380 = vst [vmem:[%s625_s4 + $0x20] sm:$0xff] %v364_v58  ;;  %388 = vst [vmem:[%s625_s4 + $0x60] sm:$0xff] %v372_v59  ;;  %v365_v0 = vadd.f32 %v413_v18, %v342_v60  ;;  %v373_v1 = vadd.f32 %v413_v18, %v350_v61 }
 0x104   :  { %383 = vst [vmem:[%s625_s4 + $0x38] sm:$0xff] %v367_v62  ;;  %391 = vst [vmem:[%s625_s4 + $0x78] sm:$0xff] %v375_v63 }
 0x105   :  { %381 = vst [vmem:[%s625_s4 + $0x28] sm:$0xff] %v365_v0  ;;  %389 = vst [vmem:[%s625_s4 + $0x68] sm:$0xff] %v373_v1 }

// kernel: _lambda_.84
= control target key start
LH: loop header
LB: loop body
LE: loop exit
PB: predicated region body
PF: predicated region fallthrough
CT: control target
= control target key end

     0   :  { %s761_s1 = inlined_call_operand.vmem [shape: bf16[128,128], index: 1, kind: input, shape index: {}]   ;;  %s762_s0 = inlined_call_operand.vmem [shape: bf16[128,128], index: 0, kind: input, shape index: {}]   ;;  %s763_s2 = inlined_call_operand.vmem [shape: f32[1,128], index: 2, kind: input, shape index: {}]   ;;  %s764_s3 = inlined_call_operand.vmem [shape: f32[1,128], index: 3, kind: input, shape index: {}]   ;;  %s765_s4 = inlined_call_operand.vmem [shape: f32[128,128], index: 4, kind: input, shape index: {}]   ;;  %s766_s5 = inlined_call_operand.vmem [shape: f32[128,128], index: 5, kind: output, shape index: {}]  }
   0x1   :  { %v529_v0 = vld [vmem:[%s761_s1] sm:$0xff]   ;;  %v530_v1 = vld [vmem:[%s761_s1 + $0x8] sm:$0xff]   ;;  %v531_v2 = vld [vmem:[%s761_s1 + $0x10] sm:$0xff]  }
   0x2   :  { %481 = vmatprep.subr.bf16.mxu0 %v529_v0  ;;  %513 = vmatprep.subr.bf16.mxu1 %v529_v0  ;;  %v532_v3 = vld [vmem:[%s761_s1 + $0x18] sm:$0xff]   ;;  %v537_v4 = vld [vmem:[%s762_s0] sm:$0xff]   ;;  %v534_v7 = vld [vmem:[%s761_s1 + $0x28] sm:$0xff]  }
   0x3   :  { %482 = vmatpush3.bf16.msra.mxu0 %v529_v0  ;;  %521 = vmatpush3.bf16.msra.mxu1 %v529_v0  ;;  %v538_v5 = vld [vmem:[%s762_s0 + $0x20] sm:$0xff]   ;;  %v535_v8 = vld [vmem:[%s761_s1 + $0x30] sm:$0xff]   ;;  %v536_v9 = vld [vmem:[%s761_s1 + $0x38] sm:$0xff]  }
   0x4   :  { %483 = vmatprep.subr.bf16.mxu0 %v530_v1  ;;  %514 = vmatprep.subr.bf16.mxu1 %v530_v1  ;;  %v533_v6 = vld [vmem:[%s761_s1 + $0x20] sm:$0xff]   ;;  %v539_v10 = vld [vmem:[%s762_s0 + $0x8] sm:$0xff]   ;;  %v541_v12 = vld [vmem:[%s762_s0 + $0x10] sm:$0xff]  }
   0x5   :  { %497 = vmatprep.mubr.bf16.mxu0 %v537_v4  ;;  %505 = vmatprep.mubr.bf16.mxu1 %v538_v5  ;;  %v540_v11 = vld [vmem:[%s762_s0 + $0x28] sm:$0xff]   ;;  %v542_v13 = vld [vmem:[%s762_s0 + $0x30] sm:$0xff]   ;;  %v543_v14 = vld [vmem:[%s762_s0 + $0x18] sm:$0xff]  }
   0x6   :  { %v544_v15 = vld [vmem:[%s762_s0 + $0x38] sm:$0xff]   ;;  %v626_v16 = vld [vmem:[%s763_s2] ss:$0 sm:$0xff]  ;;  %v381_v24 = vld [vmem:[%s765_s4 + $0x10] sm:$0xff] }
   0x7   :  { %484 = vmatpush3.bf16.msra.mxu0 %v530_v1  ;;  %522 = vmatpush3.bf16.msra.mxu1 %v530_v1  ;;  %v631_v18 = vld [vmem:[%s764_s3] ss:$0 sm:$0xff]  ;;  %v389_v25 = vld [vmem:[%s765_s4 + $0x50] sm:$0xff]  ;;  %v382_v40 = vld [vmem:[%s765_s4 + $0x18] sm:$0xff] }
   0x8   :  { %485 = vmatprep.subr.bf16.mxu0 %v531_v2  ;;  %515 = vmatprep.subr.bf16.mxu1 %v531_v2  ;;  %v379_v32 = vld [vmem:[%s765_s4] sm:$0xff]  ;;  %v390_v41 = vld [vmem:[%s765_s4 + $0x58] sm:$0xff]  ;;  %v380_v48 = vld [vmem:[%s765_s4 + $0x8] sm:$0xff] }
   0x9   :  { %v387_v33 = vld [vmem:[%s765_s4 + $0x40] sm:$0xff]  ;;  %v388_v49 = vld [vmem:[%s765_s4 + $0x48] sm:$0xff] }
   0xb   :  { %486 = vmatpush3.bf16.msra.mxu0 %v531_v2  ;;  %523 = vmatpush3.bf16.msra.mxu1 %v531_v2 }
   0xc   :  { %487 = vmatprep.subr.bf16.mxu0 %v532_v3  ;;  %516 = vmatprep.subr.bf16.mxu1 %v532_v3 }
   0xf   :  { %488 = vmatpush3.bf16.msra.mxu0 %v532_v3  ;;  %524 = vmatpush3.bf16.msra.mxu1 %v532_v3 }
  0x10   :  { %489 = vmatprep.subr.bf16.mxu0 %v533_v6  ;;  %517 = vmatprep.subr.bf16.mxu1 %v533_v6 }
  0x13   :  { %490 = vmatpush3.bf16.msra.mxu0 %v533_v6  ;;  %525 = vmatpush3.bf16.msra.mxu1 %v533_v6 }
  0x14   :  { %491 = vmatprep.subr.bf16.mxu0 %v534_v7  ;;  %518 = vmatprep.subr.bf16.mxu1 %v534_v7 }
  0x17   :  { %492 = vmatpush3.bf16.msra.mxu0 %v534_v7  ;;  %526 = vmatpush3.bf16.msra.mxu1 %v534_v7 }
  0x18   :  { %493 = vmatprep.subr.bf16.mxu0 %v535_v8  ;;  %519 = vmatprep.subr.bf16.mxu1 %v535_v8 }
  0x1b   :  { %494 = vmatpush3.bf16.msra.mxu0 %v535_v8  ;;  %527 = vmatpush3.bf16.msra.mxu1 %v535_v8  ;;  %v385_v8 = vld [vmem:[%s765_s4 + $0x30] sm:$0xff] }
  0x1c   :  { %495 = vmatprep.subr.bf16.mxu0 %v536_v9  ;;  %520 = vmatprep.subr.bf16.mxu1 %v536_v9 }
  0x1f   :  { %496 = vmatpush3.bf16.msra.mxu0 %v536_v9  ;;  %528 = vmatpush3.bf16.msra.mxu1 %v536_v9  ;;  %v393_v9 = vld [vmem:[%s765_s4 + $0x70] sm:$0xff] }
  0x22   :  { %498 = vmatmul.mubr.bf16.vlgmr.msra.gmra.mrb[0].mxu0 %v539_v10  ;;  %506 = vmatmul.mubr.bf16.vlgmr.msra.gmra.mrb[0].mxu1 %v540_v11 }
  0x23   :  { %501 = vmatprep.mubr.bf16.mxu0 %v541_v12  ;;  %509 = vmatprep.mubr.bf16.mxu1 %v542_v13 }
  0x2a   :  { %502 = vmatmul.mubr.bf16.gmra.mrb[4].mxu0 %v543_v14  ;;  %510 = vmatmul.mubr.bf16.gmra.mrb[4].mxu1 %v544_v15 }
  0xf5   :  { %v499_v17 = vpop.f32.mrb[0].mxu0  ;;  %v507_v19 = vpop.f32.mrb[0].mxu1 }
  0xf6   :  { %v342_v20 = vmul.f32 %v499_v17, %v626_v16  ;;  %v350_v21 = vmul.f32 %v507_v19, %v626_v16  ;;  %v219_v22 = vpop.f32.mrb[1].mxu0  ;;  %v251_v23 = vpop.f32.mrb[1].mxu1  ;;  %v383_v17 = vld [vmem:[%s765_s4 + $0x20] sm:$0xff] }
  0xf7   :  { %v340_v26 = vmul.f32 %v626_v16, %v219_v22  ;;  %v348_v27 = vmul.f32 %v626_v16, %v251_v23  ;;  %v500_v28 = vpop.f32.mrb[2].mxu0  ;;  %v508_v29 = vpop.f32.mrb[2].mxu1  ;;  %v391_v19 = vld [vmem:[%s765_s4 + $0x60] sm:$0xff] }
  0xf8   :  { %v365_v30 = vadd.f32 %v631_v18, %v342_v20  ;;  %v373_v31 = vadd.f32 %v631_v18, %v350_v21  ;;  %v343_v34 = vmul.f32 %v500_v28, %v626_v16  ;;  %v351_v35 = vmul.f32 %v508_v29, %v626_v16  ;;  %v222_v36 = vpop.f32.mrb[3].mxu0  ;;  %v254_v37 = vpop.f32.mrb[3].mxu1 }
  0xf9   :  { %v363_v38 = vadd.f32 %v631_v18, %v340_v26  ;;  %v371_v39 = vadd.f32 %v631_v18, %v348_v27  ;;  %v341_v42 = vmul.f32 %v626_v16, %v222_v36  ;;  %v349_v43 = vmul.f32 %v626_v16, %v254_v37  ;;  %v386_v26 = vld [vmem:[%s765_s4 + $0x38] sm:$0xff] }
  0xfa   :  { %v397_v44 = vadd.f32 %v381_v24, %v365_v30  ;;  %v405_v45 = vadd.f32 %v389_v25, %v373_v31  ;;  %v366_v46 = vadd.f32 %v631_v18, %v343_v34  ;;  %v374_v47 = vadd.f32 %v631_v18, %v351_v35  ;;  %v394_v27 = vld [vmem:[%s765_s4 + $0x78] sm:$0xff]  ;;  %v384_v34 = vld [vmem:[%s765_s4 + $0x28] sm:$0xff] }
  0xfb   :  { %v395_v50 = vadd.f32 %v379_v32, %v363_v38  ;;  %v403_v51 = vadd.f32 %v387_v33, %v371_v39  ;;  %v364_v52 = vadd.f32 %v631_v18, %v341_v42  ;;  %v372_v53 = vadd.f32 %v631_v18, %v349_v43  ;;  %v392_v35 = vld [vmem:[%s765_s4 + $0x68] sm:$0xff] }
  0xfc   :  { %v413_v54 = vmax.f32 %v397_v44, 0.0  ;;  %v421_v55 = vmax.f32 %v405_v45, 0.0  ;;  %v398_v56 = vadd.f32 %v382_v40, %v366_v46  ;;  %v406_v57 = vadd.f32 %v390_v41, %v374_v47 }
  0xfd   :  { %v411_v58 = vmax.f32 %v395_v50, 0.0  ;;  %v419_v59 = vmax.f32 %v403_v51, 0.0  ;;  %v396_v60 = vadd.f32 %v380_v48, %v364_v52  ;;  %v404_v61 = vadd.f32 %v388_v49, %v372_v53  ;;  %v503_v62 = vpop.f32.mrb[4].mxu0  ;;  %v511_v63 = vpop.f32.mrb[4].mxu1 }
  0xfe   :  { %429 = vst [vmem:[%s766_s5 + $0x10] sm:$0xff] %v413_v54  ;;  %437 = vst [vmem:[%s766_s5 + $0x50] sm:$0xff] %v421_v55  ;;  %v414_v0 = vmax.f32 %v398_v56, 0.0  ;;  %v422_v1 = vmax.f32 %v406_v57, 0.0  ;;  %v346_v2 = vmul.f32 %v503_v62, %v626_v16  ;;  %v354_v3 = vmul.f32 %v511_v63, %v626_v16  ;;  %v235_v4 = vpop.f32.mrb[5].mxu0  ;;  %v267_v5 = vpop.f32.mrb[5].mxu1 }
  0xff   :  { %427 = vst [vmem:[%s766_s5] sm:$0xff] %v411_v58  ;;  %435 = vst [vmem:[%s766_s5 + $0x40] sm:$0xff] %v419_v59  ;;  %v412_v6 = vmax.f32 %v396_v60, 0.0  ;;  %v420_v7 = vmax.f32 %v404_v61, 0.0  ;;  %v344_v10 = vmul.f32 %v626_v16, %v235_v4  ;;  %v352_v11 = vmul.f32 %v626_v16, %v267_v5  ;;  %v504_v12 = vpop.f32.mrb[6].mxu0  ;;  %v512_v13 = vpop.f32.mrb[6].mxu1 }
 0x100   :  { %430 = vst [vmem:[%s766_s5 + $0x18] sm:$0xff] %v414_v0  ;;  %438 = vst [vmem:[%s766_s5 + $0x58] sm:$0xff] %v422_v1  ;;  %v369_v14 = vadd.f32 %v631_v18, %v346_v2  ;;  %v377_v15 = vadd.f32 %v631_v18, %v354_v3  ;;  %v347_v20 = vmul.f32 %v504_v12, %v626_v16  ;;  %v238_v22 = vpop.f32.mrb[7].mxu0  ;;  %v270_v23 = vpop.f32.mrb[7].mxu1 }
 0x101   :  { %v355_v21 = vmul.f32 %v512_v13, %v626_v16  ;;  %428 = vst [vmem:[%s766_s5 + $0x8] sm:$0xff] %v412_v6  ;;  %436 = vst [vmem:[%s766_s5 + $0x48] sm:$0xff] %v420_v7  ;;  %v367_v24 = vadd.f32 %v631_v18, %v344_v10  ;;  %v375_v25 = vadd.f32 %v631_v18, %v352_v11 }
 0x102   :  { %v345_v28 = vmul.f32 %v626_v16, %v238_v22  ;;  %v353_v29 = vmul.f32 %v626_v16, %v270_v23  ;;  %v401_v30 = vadd.f32 %v385_v8, %v369_v14  ;;  %v409_v31 = vadd.f32 %v393_v9, %v377_v15 }
 0x103   :  { %v370_v32 = vadd.f32 %v631_v18, %v347_v20  ;;  %v378_v33 = vadd.f32 %v631_v18, %v355_v21  ;;  %v399_v36 = vadd.f32 %v383_v17, %v367_v24  ;;  %v407_v37 = vadd.f32 %v391_v19, %v375_v25 }
 0x104   :  { %v368_v38 = vadd.f32 %v631_v18, %v345_v28  ;;  %v376_v16 = vadd.f32 %v631_v18, %v353_v29  ;;  %v417_v39 = vmax.f32 %v401_v30, 0.0  ;;  %v425_v40 = vmax.f32 %v409_v31, 0.0 }
 0x105   :  { %v402_v41 = vadd.f32 %v386_v26, %v370_v32  ;;  %v410_v42 = vadd.f32 %v394_v27, %v378_v33  ;;  %v415_v43 = vmax.f32 %v399_v36, 0.0  ;;  %v423_v44 = vmax.f32 %v407_v37, 0.0 }
 0x106   :  { %v400_v45 = vadd.f32 %v384_v34, %v368_v38  ;;  %v408_v46 = vadd.f32 %v392_v35, %v376_v16  ;;  %433 = vst [vmem:[%s766_s5 + $0x30] sm:$0xff] %v417_v39  ;;  %441 = vst [vmem:[%s766_s5 + $0x70] sm:$0xff] %v425_v40 }
 0x107   :  { %v418_v47 = vmax.f32 %v402_v41, 0.0  ;;  %v426_v48 = vmax.f32 %v410_v42, 0.0  ;;  %431 = vst [vmem:[%s766_s5 + $0x20] sm:$0xff] %v415_v43  ;;  %439 = vst [vmem:[%s766_s5 + $0x60] sm:$0xff] %v423_v44 }
 0x108   :  { %v416_v18 = vmax.f32 %v400_v45, 0.0  ;;  %v424_v49 = vmax.f32 %v408_v46, 0.0 }
 0x109   :  { %434 = vst [vmem:[%s766_s5 + $0x38] sm:$0xff] %v418_v47  ;;  %442 = vst [vmem:[%s766_s5 + $0x78] sm:$0xff] %v426_v48 }
 0x10a   :  { %432 = vst [vmem:[%s766_s5 + $0x28] sm:$0xff] %v416_v18  ;;  %440 = vst [vmem:[%s766_s5 + $0x68] sm:$0xff] %v424_v49 }

// kernel: _lambda_.95
= control target key start
LH: loop header
LB: loop body
LE: loop exit
PB: predicated region body
PF: predicated region fallthrough
CT: control target
= control target key end

     0   :  { %s471_s1 = inlined_call_operand.vmem [shape: bf16[256,128], index: 1, kind: input, shape index: {}]   ;;  %s472_s0 = inlined_call_operand.vmem [shape: bf16[32,256], index: 0, kind: input, shape index: {}]   ;;  %s473_s2 = inlined_call_operand.vmem [shape: f32[1,128], index: 2, kind: input, shape index: {}]   ;;  %s474_s3 = inlined_call_operand.vmem [shape: f32[1,128], index: 3, kind: input, shape index: {}]   ;;  %s475_s4 = inlined_call_operand.vmem [shape: f32[32,128], index: 4, kind: output, shape index: {}]  }
   0x1   :  { %v346_v0 = vld [vmem:[%s471_s1 + $0x40] sm:$0xff]   ;;  %v348_v2 = vld [vmem:[%s471_s1 + $0x48] sm:$0xff]   ;;  %v350_v4 = vld [vmem:[%s471_s1 + $0x50] sm:$0xff]  }
   0x2   :  { %v347_v1 = vld [vmem:[%s471_s1] sm:$0xff]   ;;  %302 = vmatprep.subr.bf16.mxu0 %v346_v0  ;;  %330 = vmatprep.subr.bf16.mxu1 %v346_v0  ;;  %v349_v3 = vld [vmem:[%s471_s1 + $0x8] sm:$0xff]   ;;  %v351_v5 = vld [vmem:[%s471_s1 + $0x10] sm:$0xff]  }
   0x3   :  { %303 = vmatpush3.bf16.msra.mxu0 %v347_v1  ;;  %338 = vmatpush3.bf16.msra.mxu1 %v347_v1  ;;  %v352_v6 = vld [vmem:[%s471_s1 + $0x58] sm:$0xff]   ;;  %v354_v8 = vld [vmem:[%s471_s1 + $0x60] sm:$0xff]   ;;  %v356_v10 = vld [vmem:[%s471_s1 + $0x68] sm:$0xff]  }
   0x4   :  { %304 = vmatprep.subr.bf16.mxu0 %v348_v2  ;;  %331 = vmatprep.subr.bf16.mxu1 %v348_v2  ;;  %v353_v7 = vld [vmem:[%s471_s1 + $0x18] sm:$0xff]   ;;  %v355_v9 = vld [vmem:[%s471_s1 + $0x20] sm:$0xff]   ;;  %v357_v13 = vld [vmem:[%s471_s1 + $0x28] sm:$0xff]  }
   0x5   :  { %v364_v11 = vld [vmem:[%s472_s0 + $0x4] ss:$8 sps:$4 sm:$0xff]   ;;  %v367_v12 = vld [vmem:[%s472_s0 + $0x14] ss:$8 sps:$4 sm:$0xff]   ;;  %v362_v18 = vld [vmem:[%s472_s0] ss:$8 sps:$4 sm:$0xff]  }
   0x6   :  { %v358_v14 = vld [vmem:[%s471_s1 + $0x70] sm:$0xff]   ;;  %214 = vmatprep.mubr.bf16.mxu0 %v364_v11  ;;  %222 = vmatprep.mubr.bf16.mxu1 %v367_v12  ;;  %v360_v16 = vld [vmem:[%s471_s1 + $0x78] sm:$0xff]   ;;  %v300_v23 = vld [vmem:[%s473_s2] ss:$0 sm:$0xff] }
   0x7   :  { %305 = vmatpush3.bf16.msra.mxu0 %v349_v3  ;;  %339 = vmatpush3.bf16.msra.mxu1 %v349_v3  ;;  %v359_v15 = vld [vmem:[%s471_s1 + $0x30] sm:$0xff]   ;;  %v361_v17 = vld [vmem:[%s471_s1 + $0x38] sm:$0xff]   ;;  %v301_v29 = vld [vmem:[%s474_s3] ss:$0 sm:$0xff] }
   0x8   :  { %306 = vmatprep.subr.bf16.mxu0 %v350_v4  ;;  %332 = vmatprep.subr.bf16.mxu1 %v350_v4  ;;  %v365_v19 = vld [vmem:[%s472_s0 + $0x10] ss:$8 sps:$4 sm:$0xff]  }
   0xb   :  { %307 = vmatpush3.bf16.msra.mxu0 %v351_v5  ;;  %340 = vmatpush3.bf16.msra.mxu1 %v351_v5 }
   0xc   :  { %308 = vmatprep.subr.bf16.mxu0 %v352_v6  ;;  %333 = vmatprep.subr.bf16.mxu1 %v352_v6 }
   0xf   :  { %309 = vmatpush3.bf16.msra.mxu0 %v353_v7  ;;  %341 = vmatpush3.bf16.msra.mxu1 %v353_v7 }
  0x10   :  { %310 = vmatprep.subr.bf16.mxu0 %v354_v8  ;;  %334 = vmatprep.subr.bf16.mxu1 %v354_v8 }
  0x13   :  { %311 = vmatpush3.bf16.msra.mxu0 %v355_v9  ;;  %342 = vmatpush3.bf16.msra.mxu1 %v355_v9 }
  0x14   :  { %312 = vmatprep.subr.bf16.mxu0 %v356_v10  ;;  %335 = vmatprep.subr.bf16.mxu1 %v356_v10 }
  0x17   :  { %313 = vmatpush3.bf16.msra.mxu0 %v357_v13  ;;  %343 = vmatpush3.bf16.msra.mxu1 %v357_v13 }
  0x18   :  { %314 = vmatprep.subr.bf16.mxu0 %v358_v14  ;;  %336 = vmatprep.subr.bf16.mxu1 %v358_v14 }
  0x1b   :  { %315 = vmatpush3.bf16.msra.mxu0 %v359_v15  ;;  %344 = vmatpush3.bf16.msra.mxu1 %v359_v15 }
  0x1c   :  { %316 = vmatprep.subr.bf16.mxu0 %v360_v16  ;;  %337 = vmatprep.subr.bf16.mxu1 %v360_v16 }
  0x1f   :  { %317 = vmatpush3.bf16.msra.mxu0 %v361_v17  ;;  %345 = vmatpush3.bf16.msra.mxu1 %v361_v17 }
  0x22   :  { %215 = vmatmul.mubr.bf16.vlgmr.msra.gmra.mrb[0].mxu0 %v362_v18  ;;  %223 = vmatmul.mubr.bf16.vlgmr.msra.gmra.mrb[0].mxu1 %v365_v19 }
  0xf5   :  { %v318_v20 = vpop.f32.mrb[0].mxu0  ;;  %v324_v21 = vpop.f32.mrb[0].mxu1 }
  0xf6   :  { %v319_v22 = vpop.f32.mrb[1].mxu0  ;;  %v325_v24 = vpop.f32.mrb[1].mxu1 }
  0xf7   :  { %v320_v25 = vadd.f32 %v319_v22, %v318_v20  ;;  %v326_v26 = vadd.f32 %v325_v24, %v324_v21  ;;  %v321_v27 = vpop.f32.mrb[2].mxu0  ;;  %v327_v28 = vpop.f32.mrb[2].mxu1 }
  0xf8   :  { %v322_v30 = vpop.f32.mrb[3].mxu0  ;;  %v328_v31 = vpop.f32.mrb[3].mxu1 }
  0xf9   :  { %v253_v32 = vmul.f32 %v320_v25, %v300_v23  ;;  %v255_v33 = vmul.f32 %v326_v26, %v300_v23  ;;  %v323_v34 = vadd.f32 %v322_v30, %v321_v27  ;;  %v329_v35 = vadd.f32 %v328_v31, %v327_v28 }
  0xfb   :  { %v264_v36 = vadd.f32 %v301_v29, %v253_v32  ;;  %v266_v37 = vadd.f32 %v301_v29, %v255_v33  ;;  %v254_v38 = vmul.f32 %v323_v34, %v300_v23  ;;  %v256_v39 = vmul.f32 %v329_v35, %v300_v23 }
  0xfd   :  { %v268_v40 = vmax.f32 %v264_v36, 0.0  ;;  %v270_v41 = vmax.f32 %v266_v37, 0.0  ;;  %v265_v42 = vadd.f32 %v301_v29, %v254_v38  ;;  %v267_v43 = vadd.f32 %v301_v29, %v256_v39 }
  0xff   :  { %272 = vst [vmem:[%s475_s4] sm:$0xff] %v268_v40  ;;  %274 = vst [vmem:[%s475_s4 + $0x10] sm:$0xff] %v270_v41  ;;  %v269_v44 = vmax.f32 %v265_v42, 0.0  ;;  %v271_v45 = vmax.f32 %v267_v43, 0.0 }
 0x101   :  { %273 = vst [vmem:[%s475_s4 + $0x8] sm:$0xff] %v269_v44  ;;  %275 = vst [vmem:[%s475_s4 + $0x18] sm:$0xff] %v271_v45 }

// kernel: _lambda_.97
= control target key start
LH: loop header
LB: loop body
LE: loop exit
PB: predicated region body
PF: predicated region fallthrough
CT: control target
= control target key end

     0   :  { %s361_s1 = inlined_call_operand.vmem [shape: bf16[128,128], index: 1, kind: input, shape index: {}]   ;;  %s362_s0 = inlined_call_operand.vmem [shape: bf16[32,128], index: 0, kind: input, shape index: {}]   ;;  %s363_s2 = inlined_call_operand.vmem [shape: f32[1,128], index: 2, kind: input, shape index: {}]   ;;  %s364_s3 = inlined_call_operand.vmem [shape: f32[1,128], index: 3, kind: input, shape index: {}]   ;;  %s365_s4 = inlined_call_operand.vmem [shape: f32[32,128], index: 4, kind: input, shape index: {}]   ;;  %s366_s5 = inlined_call_operand.vmem [shape: f32[32,128], index: 5, kind: output, shape index: {}]  }
   0x1   :  { %v261_v0 = vld [vmem:[%s361_s1] sm:$0xff]   ;;  %v262_v1 = vld [vmem:[%s361_s1 + $0x8] sm:$0xff]   ;;  %v263_v2 = vld [vmem:[%s361_s1 + $0x10] sm:$0xff]  }
   0x2   :  { %241 = vmatprep.subr.bf16.mxu0 %v261_v0  ;;  %v264_v3 = vld [vmem:[%s361_s1 + $0x18] sm:$0xff]   ;;  %v269_v4 = vld [vmem:[%s362_s0] sm:$0xff]   ;;  %v266_v6 = vld [vmem:[%s361_s1 + $0x28] sm:$0xff]  }
   0x3   :  { %242 = vmatpush3.bf16.msra.mxu0 %v261_v0  ;;  %257 = vmatprep.mubr.bf16.mxu0 %v269_v4  ;;  %v265_v5 = vld [vmem:[%s361_s1 + $0x20] sm:$0xff]   ;;  %v267_v7 = vld [vmem:[%s361_s1 + $0x30] sm:$0xff]   ;;  %v268_v8 = vld [vmem:[%s361_s1 + $0x38] sm:$0xff]  }
   0x4   :  { %243 = vmatprep.subr.bf16.mxu0 %v262_v1  ;;  %v270_v9 = vld [vmem:[%s362_s0 + $0x8] sm:$0xff]   ;;  %v229_v10 = vld [vmem:[%s363_s2] ss:$0 sm:$0xff]  ;;  %v201_v15 = vld [vmem:[%s365_s4 + $0x10] sm:$0xff] }
   0x5   :  { %v230_v12 = vld [vmem:[%s364_s3] ss:$0 sm:$0xff]  ;;  %v202_v23 = vld [vmem:[%s365_s4 + $0x18] sm:$0xff]  ;;  %v200_v27 = vld [vmem:[%s365_s4 + $0x8] sm:$0xff] }
   0x6   :  { %v199_v19 = vld [vmem:[%s365_s4] sm:$0xff] }
   0x7   :  { %244 = vmatpush3.bf16.msra.mxu0 %v262_v1 }
   0x8   :  { %245 = vmatprep.subr.bf16.mxu0 %v263_v2 }
   0xb   :  { %246 = vmatpush3.bf16.msra.mxu0 %v263_v2 }
   0xc   :  { %247 = vmatprep.subr.bf16.mxu0 %v264_v3 }
   0xf   :  { %248 = vmatpush3.bf16.msra.mxu0 %v264_v3 }
  0x10   :  { %249 = vmatprep.subr.bf16.mxu0 %v265_v5 }
  0x13   :  { %250 = vmatpush3.bf16.msra.mxu0 %v265_v5 }
  0x14   :  { %251 = vmatprep.subr.bf16.mxu0 %v266_v6 }
  0x17   :  { %252 = vmatpush3.bf16.msra.mxu0 %v266_v6 }
  0x18   :  { %253 = vmatprep.subr.bf16.mxu0 %v267_v7 }
  0x1b   :  { %254 = vmatpush3.bf16.msra.mxu0 %v267_v7 }
  0x1c   :  { %255 = vmatprep.subr.bf16.mxu0 %v268_v8 }
  0x1f   :  { %256 = vmatpush3.bf16.msra.mxu0 %v268_v8 }
  0x22   :  { %258 = vmatmul.mubr.bf16.vlgmr.msra.gmra.mrb[0].mxu0 %v270_v9 }
  0xf5   :  { %v259_v11 = vpop.f32.mrb[0].mxu0 }
  0xf6   :  { %v186_v13 = vmul.f32 %v259_v11, %v229_v10  ;;  %v147_v14 = vpop.f32.mrb[1].mxu0 }
  0xf7   :  { %v184_v16 = vmul.f32 %v229_v10, %v147_v14  ;;  %v260_v17 = vpop.f32.mrb[2].mxu0 }
  0xf8   :  { %v197_v18 = vadd.f32 %v230_v12, %v186_v13  ;;  %v187_v20 = vmul.f32 %v260_v17, %v229_v10  ;;  %v150_v21 = vpop.f32.mrb[3].mxu0 }
  0xf9   :  { %v195_v22 = vadd.f32 %v230_v12, %v184_v16  ;;  %v185_v24 = vmul.f32 %v229_v10, %v150_v21 }
  0xfa   :  { %v205_v25 = vadd.f32 %v201_v15, %v197_v18  ;;  %v198_v26 = vadd.f32 %v230_v12, %v187_v20 }
  0xfb   :  { %v203_v28 = vadd.f32 %v199_v19, %v195_v22  ;;  %v196_v29 = vadd.f32 %v230_v12, %v185_v24 }
  0xfc   :  { %v209_v30 = vmax.f32 %v205_v25, 0.0  ;;  %v206_v31 = vadd.f32 %v202_v23, %v198_v26 }
  0xfd   :  { %v207_v32 = vmax.f32 %v203_v28, 0.0  ;;  %v204_v33 = vadd.f32 %v200_v27, %v196_v29 }
  0xfe   :  { %213 = vst [vmem:[%s366_s5 + $0x10] sm:$0xff] %v209_v30  ;;  %v210_v34 = vmax.f32 %v206_v31, 0.0 }
  0xff   :  { %211 = vst [vmem:[%s366_s5] sm:$0xff] %v207_v32  ;;  %v208_v35 = vmax.f32 %v204_v33, 0.0 }
 0x100   :  { %214 = vst [vmem:[%s366_s5 + $0x18] sm:$0xff] %v210_v34 }
 0x101   :  { %212 = vst [vmem:[%s366_s5 + $0x8] sm:$0xff] %v208_v35 }

// kernel: _lambda_.96
= control target key start
LH: loop header
LB: loop body
LE: loop exit
PB: predicated region body
PF: predicated region fallthrough
CT: control target
= control target key end

     0   :  { %s329_s1 = inlined_call_operand.vmem [shape: bf16[128,128], index: 1, kind: input, shape index: {}]   ;;  %s330_s0 = inlined_call_operand.vmem [shape: bf16[32,128], index: 0, kind: input, shape index: {}]   ;;  %s331_s2 = inlined_call_operand.vmem [shape: f32[1,128], index: 2, kind: input, shape index: {}]   ;;  %s332_s3 = inlined_call_operand.vmem [shape: f32[1,128], index: 3, kind: input, shape index: {}]   ;;  %s333_s4 = inlined_call_operand.vmem [shape: f32[32,128], index: 4, kind: output, shape index: {}]  }
   0x1   :  { %v246_v0 = vld [vmem:[%s329_s1] sm:$0xff]   ;;  %v247_v1 = vld [vmem:[%s329_s1 + $0x8] sm:$0xff]   ;;  %v248_v2 = vld [vmem:[%s329_s1 + $0x10] sm:$0xff]  }
   0x2   :  { %226 = vmatprep.subr.bf16.mxu0 %v246_v0  ;;  %v249_v3 = vld [vmem:[%s329_s1 + $0x18] sm:$0xff]   ;;  %v254_v4 = vld [vmem:[%s330_s0] sm:$0xff]   ;;  %v251_v6 = vld [vmem:[%s329_s1 + $0x28] sm:$0xff]  }
   0x3   :  { %227 = vmatpush3.bf16.msra.mxu0 %v246_v0  ;;  %242 = vmatprep.mubr.bf16.mxu0 %v254_v4  ;;  %v250_v5 = vld [vmem:[%s329_s1 + $0x20] sm:$0xff]   ;;  %v252_v7 = vld [vmem:[%s329_s1 + $0x30] sm:$0xff]   ;;  %v253_v8 = vld [vmem:[%s329_s1 + $0x38] sm:$0xff]  }
   0x4   :  { %228 = vmatprep.subr.bf16.mxu0 %v247_v1  ;;  %v255_v9 = vld [vmem:[%s330_s0 + $0x8] sm:$0xff]   ;;  %v214_v10 = vld [vmem:[%s331_s2] ss:$0 sm:$0xff] }
   0x5   :  { %v215_v12 = vld [vmem:[%s332_s3] ss:$0 sm:$0xff] }
   0x7   :  { %229 = vmatpush3.bf16.msra.mxu0 %v247_v1 }
   0x8   :  { %230 = vmatprep.subr.bf16.mxu0 %v248_v2 }
   0xb   :  { %231 = vmatpush3.bf16.msra.mxu0 %v248_v2 }
   0xc   :  { %232 = vmatprep.subr.bf16.mxu0 %v249_v3 }
   0xf   :  { %233 = vmatpush3.bf16.msra.mxu0 %v249_v3 }
  0x10   :  { %234 = vmatprep.subr.bf16.mxu0 %v250_v5 }
  0x13   :  { %235 = vmatpush3.bf16.msra.mxu0 %v250_v5 }
  0x14   :  { %236 = vmatprep.subr.bf16.mxu0 %v251_v6 }
  0x17   :  { %237 = vmatpush3.bf16.msra.mxu0 %v251_v6 }
  0x18   :  { %238 = vmatprep.subr.bf16.mxu0 %v252_v7 }
  0x1b   :  { %239 = vmatpush3.bf16.msra.mxu0 %v252_v7 }
  0x1c   :  { %240 = vmatprep.subr.bf16.mxu0 %v253_v8 }
  0x1f   :  { %241 = vmatpush3.bf16.msra.mxu0 %v253_v8 }
  0x22   :  { %243 = vmatmul.mubr.bf16.vlgmr.msra.gmra.mrb[0].mxu0 %v255_v9 }
  0xf5   :  { %v244_v11 = vpop.f32.mrb[0].mxu0 }
  0xf6   :  { %v183_v13 = vmul.f32 %v244_v11, %v214_v10  ;;  %v144_v14 = vpop.f32.mrb[1].mxu0 }
  0xf7   :  { %v181_v15 = vmul.f32 %v214_v10, %v144_v14  ;;  %v245_v16 = vpop.f32.mrb[2].mxu0 }
  0xf8   :  { %v194_v17 = vadd.f32 %v215_v12, %v183_v13  ;;  %v184_v18 = vmul.f32 %v245_v16, %v214_v10  ;;  %v147_v19 = vpop.f32.mrb[3].mxu0 }
  0xf9   :  { %v192_v20 = vadd.f32 %v215_v12, %v181_v15  ;;  %v182_v21 = vmul.f32 %v214_v10, %v147_v19 }
  0xfa   :  { %198 = vst [vmem:[%s333_s4 + $0x10] sm:$0xff] %v194_v17  ;;  %v195_v22 = vadd.f32 %v215_v12, %v184_v18 }
  0xfb   :  { %196 = vst [vmem:[%s333_s4] sm:$0xff] %v192_v20  ;;  %v193_v23 = vadd.f32 %v215_v12, %v182_v21 }
  0xfc   :  { %199 = vst [vmem:[%s333_s4 + $0x18] sm:$0xff] %v195_v22 }
  0xfd   :  { %197 = vst [vmem:[%s333_s4 + $0x8] sm:$0xff] %v193_v23 }

// kernel: _lambda_.103
= control target key start
LH: loop header
LB: loop body
LE: loop exit
PB: predicated region body
PF: predicated region fallthrough
CT: control target
= control target key end

     0   :  { %10 = vsyncpa [#allocation4], 0  ;;  %s457_s0 = inlined_call_operand.vmem [shape: bf16[32,128], index: 0, kind: input, shape index: {}]   ;;  %s458_s1 = inlined_call_operand.vmem [shape: bf16[128,128], index: 1, kind: input, shape index: {}]   ;;  %s459_s2 = inlined_call_operand.hbm [shape: f32[1,128], index: 2, kind: input, shape index: {}]   ;;  %s460_s3 = inlined_call_operand.hbm [shape: f32[1,128], index: 3, kind: input, shape index: {}]   ;;  %s461_s4 = inlined_call_operand.vmem [shape: f32[32,128], index: 4, kind: input, shape index: {}]   ;;  %s462_s5 = inlined_call_operand.vmem [shape: f32[32,128], index: 5, kind: output, shape index: {}]  }
   0x1   :  { %11 = vsyncpa [#allocation6], 0  ;;  %s347_s18 = smov [#allocation3]   ;;  %s348_s20 = smov [#allocation5]  }
   0x2   :  { %s22_s19 = sshll.u32 %s347_s18, 4  ;;  %s32_s21 = sshll.u32 %s348_s20, 4  ;;  %s23_s19 = int_to_ptr.vmem [resolvable:$true] %s22_s19  ;;  %s33_s21 = int_to_ptr.vmem [resolvable:$true] %s32_s21 }
   0x3   :  { %s299_s24 = scalar_lea.hbm %s459_s2, 16 }
   0x4   :  { %p300_p0 = scmp.ne.s32.totalorder %s459_s2, %s299_s24  ;;  %p303_p1 = scmp.lt.u32.totalorder %s299_s24, %s459_s2 }
   0x6   :  { %p305_p2 = pnand %p303_p1, %p300_p0 }
   0x8   :  { %308 = shalt.err (!%p305_p2)
}
   0x9   :  { %s309_s29 = scalar_lea.vmem %s23_s19, 16  ;;  %s313_s30 = scalar_lea.vmem %s23_s19, 32 }
   0xa   :  { %p310_p3 = scmp.ne.s32.totalorder %s23_s19, %s309_s29  ;;  %p314_p4 = scmp.lt.s32.totalorder %s23_s19, %s23_s19 }
   0xb   :  { %p315_p5 = scmp.lt.s32.totalorder %s313_s30, %s309_s29 }
   0xd   :  { %p316_p6 = por %p315_p5, %p314_p4 }
   0xf   :  { %p317_p7 = pnand %p316_p6, %p310_p3 }
  0x11   :  { %320 = shalt.err (!%p317_p7)
}
  0x12   :  { %25 = dma.hbm_to_vmem [thread:$0]  %s459_s2, 16, %s23_s19, [#allocation4]  }
  0x13   :  { %s321_s10 = scalar_lea.hbm %s460_s3, 16 }
  0x14   :  { %p322_p8 = scmp.ne.s32.totalorder %s460_s3, %s321_s10  ;;  %p325_p9 = scmp.lt.u32.totalorder %s321_s10, %s460_s3 }
  0x16   :  { %p327_p10 = pnand %p325_p9, %p322_p8 }
  0x18   :  { %330 = shalt.err (!%p327_p10)
}
  0x19   :  { %s331_s15 = scalar_lea.vmem %s33_s21, 16  ;;  %s335_s16 = scalar_lea.vmem %s33_s21, 32 }
  0x1a   :  { %p332_p11 = scmp.ne.s32.totalorder %s33_s21, %s331_s15  ;;  %p336_p12 = scmp.lt.s32.totalorder %s33_s21, %s33_s21 }
  0x1b   :  { %p337_p13 = scmp.lt.s32.totalorder %s335_s16, %s331_s15 }
  0x1d   :  { %p338_p0 = por %p337_p13, %p336_p12 }
  0x1f   :  { %p339_p1 = pnand %p338_p0, %p332_p11 }
  0x21   :  { %342 = shalt.err (!%p339_p1)
}
  0x22   :  { %35 = dma.hbm_to_vmem [thread:$0]  %s460_s3, 16, %s33_s21, [#allocation6]  }
  0x23   :  { %343 = dma.done.wait [#allocation4], 16  }
  0x24   :  { %344 = vsyncadd [#allocation4], 4294967280 }
  0x25   :  { %345 = dma.done.wait [#allocation6], 16  }
  0x26   :  { %346 = vsyncadd [#allocation6], 4294967280  ;;  %v289_v0 = vld [vmem:[%s458_s1] sm:$0xff]   ;;  %v290_v1 = vld [vmem:[%s458_s1 + $0x8] sm:$0xff]  }
  0x27   :  { %267 = vmatprep.subr.bf16.mxu0 %v289_v0  ;;  %v291_v2 = vld [vmem:[%s458_s1 + $0x10] sm:$0xff]   ;;  %v292_v3 = vld [vmem:[%s458_s1 + $0x18] sm:$0xff]   ;;  %v297_v4 = vld [vmem:[%s457_s0] sm:$0xff]  }
  0x28   :  { %268 = vmatpush3.bf16.msra.mxu0 %v289_v0  ;;  %283 = vmatprep.mubr.bf16.mxu0 %v297_v4  ;;  %v293_v5 = vld [vmem:[%s458_s1 + $0x20] sm:$0xff]   ;;  %v294_v6 = vld [vmem:[%s458_s1 + $0x28] sm:$0xff]   ;;  %v295_v7 = vld [vmem:[%s458_s1 + $0x30] sm:$0xff]  }
  0x29   :  { %269 = vmatprep.subr.bf16.mxu0 %v290_v1  ;;  %v296_v8 = vld [vmem:[%s458_s1 + $0x38] sm:$0xff]   ;;  %v298_v9 = vld [vmem:[%s457_s0 + $0x8] sm:$0xff]   ;;  %v255_v10 = vld [vmem:[#allocation3] ss:$0 sm:$0xff] }
  0x2a   :  { %v256_v12 = vld [vmem:[#allocation5] ss:$0 sm:$0xff]  ;;  %v225_v15 = vld [vmem:[%s461_s4 + $0x10] sm:$0xff]  ;;  %v226_v23 = vld [vmem:[%s461_s4 + $0x18] sm:$0xff] }
  0x2b   :  { %v223_v19 = vld [vmem:[%s461_s4] sm:$0xff]  ;;  %v224_v27 = vld [vmem:[%s461_s4 + $0x8] sm:$0xff] }
  0x2c   :  { %270 = vmatpush3.bf16.msra.mxu0 %v290_v1 }
  0x2d   :  { %271 = vmatprep.subr.bf16.mxu0 %v291_v2 }
  0x30   :  { %272 = vmatpush3.bf16.msra.mxu0 %v291_v2 }
  0x31   :  { %273 = vmatprep.subr.bf16.mxu0 %v292_v3 }
  0x34   :  { %274 = vmatpush3.bf16.msra.mxu0 %v292_v3 }
  0x35   :  { %275 = vmatprep.subr.bf16.mxu0 %v293_v5 }
  0x38   :  { %276 = vmatpush3.bf16.msra.mxu0 %v293_v5 }
  0x39   :  { %277 = vmatprep.subr.bf16.mxu0 %v294_v6 }
  0x3c   :  { %278 = vmatpush3.bf16.msra.mxu0 %v294_v6 }
  0x3d   :  { %279 = vmatprep.subr.bf16.mxu0 %v295_v7 }
  0x40   :  { %280 = vmatpush3.bf16.msra.mxu0 %v295_v7 }
  0x41   :  { %281 = vmatprep.subr.bf16.mxu0 %v296_v8 }
  0x44   :  { %282 = vmatpush3.bf16.msra.mxu0 %v296_v8 }
  0x47   :  { %284 = vmatmul.mubr.bf16.vlgmr.msra.gmra.mrb[0].mxu0 %v298_v9 }
 0x11a   :  { %v285_v11 = vpop.f32.mrb[0].mxu0 }
 0x11b   :  { %v210_v13 = vmul.f32 %v285_v11, %v255_v10  ;;  %v171_v14 = vpop.f32.mrb[1].mxu0 }
 0x11c   :  { %v208_v16 = vmul.f32 %v255_v10, %v171_v14  ;;  %v286_v17 = vpop.f32.mrb[2].mxu0 }
 0x11d   :  { %v221_v18 = vadd.f32 %v256_v12, %v210_v13  ;;  %v211_v20 = vmul.f32 %v286_v17, %v255_v10  ;;  %v174_v21 = vpop.f32.mrb[3].mxu0 }
 0x11e   :  { %v219_v22 = vadd.f32 %v256_v12, %v208_v16  ;;  %v209_v24 = vmul.f32 %v255_v10, %v174_v21 }
 0x11f   :  { %v229_v25 = vadd.f32 %v225_v15, %v221_v18  ;;  %v222_v26 = vadd.f32 %v256_v12, %v211_v20 }
 0x120   :  { %v227_v28 = vadd.f32 %v223_v19, %v219_v22  ;;  %v220_v29 = vadd.f32 %v256_v12, %v209_v24 }
 0x121   :  { %v233_v30 = vmax.f32 %v229_v25, 0.0  ;;  %v230_v31 = vadd.f32 %v226_v23, %v222_v26 }
 0x122   :  { %v231_v32 = vmax.f32 %v227_v28, 0.0  ;;  %v228_v33 = vadd.f32 %v224_v27, %v220_v29 }
 0x123   :  { %237 = vst [vmem:[%s462_s5 + $0x10] sm:$0xff] %v233_v30  ;;  %v234_v34 = vmax.f32 %v230_v31, 0.0 }
 0x124   :  { %235 = vst [vmem:[%s462_s5] sm:$0xff] %v231_v32  ;;  %v232_v35 = vmax.f32 %v228_v33, 0.0 }
 0x125   :  { %238 = vst [vmem:[%s462_s5 + $0x18] sm:$0xff] %v234_v34 }
 0x126   :  { %236 = vst [vmem:[%s462_s5 + $0x8] sm:$0xff] %v232_v35 }
 0x127   :  { %243 = vsyncpa [#allocation4], 1 }
 0x128   :  { %244 = vsyncpa [#allocation6], 1 }

// kernel: _lambda_.101
= control target key start
LH: loop header
LB: loop body
LE: loop exit
PB: predicated region body
PF: predicated region fallthrough
CT: control target
= control target key end

     0   :  { %9 = vsyncpa [#allocation4], 0  ;;  %s567_s0 = inlined_call_operand.vmem [shape: bf16[32,256], index: 0, kind: input, shape index: {}]   ;;  %s568_s1 = inlined_call_operand.vmem [shape: bf16[256,128], index: 1, kind: input, shape index: {}]   ;;  %s569_s2 = inlined_call_operand.hbm [shape: f32[1,128], index: 2, kind: input, shape index: {}]   ;;  %s570_s3 = inlined_call_operand.hbm [shape: f32[1,128], index: 3, kind: input, shape index: {}]   ;;  %s571_s4 = inlined_call_operand.vmem [shape: f32[32,128], index: 4, kind: output, shape index: {}]  }
   0x1   :  { %10 = vsyncpa [#allocation6], 0  ;;  %s444_s15 = smov [#allocation3]   ;;  %s445_s17 = smov [#allocation5]  }
   0x2   :  { %s21_s16 = sshll.u32 %s444_s15, 4  ;;  %s31_s18 = sshll.u32 %s445_s17, 4  ;;  %s22_s16 = int_to_ptr.vmem [resolvable:$true] %s21_s16  ;;  %s32_s18 = int_to_ptr.vmem [resolvable:$true] %s31_s18 }
   0x3   :  { %s396_s21 = scalar_lea.hbm %s569_s2, 16 }
   0x4   :  { %p397_p0 = scmp.ne.s32.totalorder %s569_s2, %s396_s21  ;;  %p400_p1 = scmp.lt.u32.totalorder %s396_s21, %s569_s2 }
   0x6   :  { %p402_p2 = pnand %p400_p1, %p397_p0 }
   0x8   :  { %405 = shalt.err (!%p402_p2)
}
   0x9   :  { %s406_s26 = scalar_lea.vmem %s22_s16, 16  ;;  %s410_s27 = scalar_lea.vmem %s22_s16, 32 }
   0xa   :  { %p407_p3 = scmp.ne.s32.totalorder %s22_s16, %s406_s26  ;;  %p411_p4 = scmp.lt.s32.totalorder %s22_s16, %s22_s16 }
   0xb   :  { %p412_p5 = scmp.lt.s32.totalorder %s410_s27, %s406_s26 }
   0xd   :  { %p413_p6 = por %p412_p5, %p411_p4 }
   0xf   :  { %p414_p7 = pnand %p413_p6, %p407_p3 }
  0x11   :  { %417 = shalt.err (!%p414_p7)
}
  0x12   :  { %24 = dma.hbm_to_vmem [thread:$0]  %s569_s2, 16, %s22_s16, [#allocation4]  }
  0x13   :  { %s418_s6 = scalar_lea.hbm %s570_s3, 16 }
  0x14   :  { %p419_p8 = scmp.ne.s32.totalorder %s570_s3, %s418_s6  ;;  %p422_p9 = scmp.lt.u32.totalorder %s418_s6, %s570_s3 }
  0x16   :  { %p424_p10 = pnand %p422_p9, %p419_p8 }
  0x18   :  { %427 = shalt.err (!%p424_p10)
}
  0x19   :  { %s428_s11 = scalar_lea.vmem %s32_s18, 16  ;;  %s432_s12 = scalar_lea.vmem %s32_s18, 32 }
  0x1a   :  { %p429_p11 = scmp.ne.s32.totalorder %s32_s18, %s428_s11  ;;  %p433_p12 = scmp.lt.s32.totalorder %s32_s18, %s32_s18 }
  0x1b   :  { %p434_p13 = scmp.lt.s32.totalorder %s432_s12, %s428_s11 }
  0x1d   :  { %p435_p0 = por %p434_p13, %p433_p12 }
  0x1f   :  { %p436_p1 = pnand %p435_p0, %p429_p11 }
  0x21   :  { %439 = shalt.err (!%p436_p1)
}
  0x22   :  { %34 = dma.hbm_to_vmem [thread:$0]  %s570_s3, 16, %s32_s18, [#allocation6]  }
  0x23   :  { %440 = dma.done.wait [#allocation4], 16  }
  0x24   :  { %441 = vsyncadd [#allocation4], 4294967280 }
  0x25   :  { %442 = dma.done.wait [#allocation6], 16  }
  0x26   :  { %443 = vsyncadd [#allocation6], 4294967280  ;;  %v374_v0 = vld [vmem:[%s568_s1 + $0x40] sm:$0xff]   ;;  %v376_v2 = vld [vmem:[%s568_s1 + $0x48] sm:$0xff]  }
  0x27   :  { %v375_v1 = vld [vmem:[%s568_s1] sm:$0xff]   ;;  %328 = vmatprep.subr.bf16.mxu0 %v374_v0  ;;  %356 = vmatprep.subr.bf16.mxu1 %v374_v0  ;;  %v377_v3 = vld [vmem:[%s568_s1 + $0x8] sm:$0xff]   ;;  %v378_v4 = vld [vmem:[%s568_s1 + $0x50] sm:$0xff]  }
  0x28   :  { %329 = vmatpush3.bf16.msra.mxu0 %v375_v1  ;;  %364 = vmatpush3.bf16.msra.mxu1 %v375_v1  ;;  %v379_v5 = vld [vmem:[%s568_s1 + $0x10] sm:$0xff]   ;;  %v380_v6 = vld [vmem:[%s568_s1 + $0x58] sm:$0xff]   ;;  %v382_v8 = vld [vmem:[%s568_s1 + $0x60] sm:$0xff]  }
  0x29   :  { %330 = vmatprep.subr.bf16.mxu0 %v376_v2  ;;  %357 = vmatprep.subr.bf16.mxu1 %v376_v2  ;;  %v381_v7 = vld [vmem:[%s568_s1 + $0x18] sm:$0xff]   ;;  %v383_v9 = vld [vmem:[%s568_s1 + $0x20] sm:$0xff]   ;;  %v384_v10 = vld [vmem:[%s568_s1 + $0x68] sm:$0xff]  }
  0x2a   :  { %v392_v11 = vld [vmem:[%s567_s0 + $0x4] ss:$8 sps:$4 sm:$0xff]   ;;  %v395_v12 = vld [vmem:[%s567_s0 + $0x14] ss:$8 sps:$4 sm:$0xff]   ;;  %v390_v18 = vld [vmem:[%s567_s0] ss:$8 sps:$4 sm:$0xff]  }
  0x2b   :  { %v385_v13 = vld [vmem:[%s568_s1 + $0x28] sm:$0xff]   ;;  %v386_v14 = vld [vmem:[%s568_s1 + $0x70] sm:$0xff]   ;;  %238 = vmatprep.mubr.bf16.mxu0 %v392_v11  ;;  %246 = vmatprep.mubr.bf16.mxu1 %v395_v12  ;;  %v388_v16 = vld [vmem:[%s568_s1 + $0x78] sm:$0xff]  }
  0x2c   :  { %331 = vmatpush3.bf16.msra.mxu0 %v377_v3  ;;  %365 = vmatpush3.bf16.msra.mxu1 %v377_v3  ;;  %v387_v15 = vld [vmem:[%s568_s1 + $0x30] sm:$0xff]   ;;  %v389_v17 = vld [vmem:[%s568_s1 + $0x38] sm:$0xff]   ;;  %v326_v23 = vld [vmem:[#allocation3] ss:$0 sm:$0xff] }
  0x2d   :  { %332 = vmatprep.subr.bf16.mxu0 %v378_v4  ;;  %358 = vmatprep.subr.bf16.mxu1 %v378_v4  ;;  %v393_v19 = vld [vmem:[%s567_s0 + $0x10] ss:$8 sps:$4 sm:$0xff]   ;;  %v327_v29 = vld [vmem:[#allocation5] ss:$0 sm:$0xff] }
  0x30   :  { %333 = vmatpush3.bf16.msra.mxu0 %v379_v5  ;;  %366 = vmatpush3.bf16.msra.mxu1 %v379_v5 }
  0x31   :  { %334 = vmatprep.subr.bf16.mxu0 %v380_v6  ;;  %359 = vmatprep.subr.bf16.mxu1 %v380_v6 }
  0x34   :  { %335 = vmatpush3.bf16.msra.mxu0 %v381_v7  ;;  %367 = vmatpush3.bf16.msra.mxu1 %v381_v7 }
  0x35   :  { %336 = vmatprep.subr.bf16.mxu0 %v382_v8  ;;  %360 = vmatprep.subr.bf16.mxu1 %v382_v8 }
  0x38   :  { %337 = vmatpush3.bf16.msra.mxu0 %v383_v9  ;;  %368 = vmatpush3.bf16.msra.mxu1 %v383_v9 }
  0x39   :  { %338 = vmatprep.subr.bf16.mxu0 %v384_v10  ;;  %361 = vmatprep.subr.bf16.mxu1 %v384_v10 }
  0x3c   :  { %339 = vmatpush3.bf16.msra.mxu0 %v385_v13  ;;  %369 = vmatpush3.bf16.msra.mxu1 %v385_v13 }
  0x3d   :  { %340 = vmatprep.subr.bf16.mxu0 %v386_v14  ;;  %362 = vmatprep.subr.bf16.mxu1 %v386_v14 }
  0x40   :  { %341 = vmatpush3.bf16.msra.mxu0 %v387_v15  ;;  %370 = vmatpush3.bf16.msra.mxu1 %v387_v15 }
  0x41   :  { %342 = vmatprep.subr.bf16.mxu0 %v388_v16  ;;  %363 = vmatprep.subr.bf16.mxu1 %v388_v16 }
  0x44   :  { %343 = vmatpush3.bf16.msra.mxu0 %v389_v17  ;;  %371 = vmatpush3.bf16.msra.mxu1 %v389_v17 }
  0x47   :  { %239 = vmatmul.mubr.bf16.vlgmr.msra.gmra.mrb[0].mxu0 %v390_v18  ;;  %247 = vmatmul.mubr.bf16.vlgmr.msra.gmra.mrb[0].mxu1 %v393_v19 }
 0x11a   :  { %v344_v20 = vpop.f32.mrb[0].mxu0  ;;  %v350_v21 = vpop.f32.mrb[0].mxu1 }
 0x11b   :  { %v345_v22 = vpop.f32.mrb[1].mxu0  ;;  %v351_v24 = vpop.f32.mrb[1].mxu1 }
 0x11c   :  { %v346_v25 = vadd.f32 %v345_v22, %v344_v20  ;;  %v352_v26 = vadd.f32 %v351_v24, %v350_v21  ;;  %v347_v27 = vpop.f32.mrb[2].mxu0  ;;  %v353_v28 = vpop.f32.mrb[2].mxu1 }
 0x11d   :  { %v348_v30 = vpop.f32.mrb[3].mxu0  ;;  %v354_v31 = vpop.f32.mrb[3].mxu1 }
 0x11e   :  { %v277_v32 = vmul.f32 %v346_v25, %v326_v23  ;;  %v279_v33 = vmul.f32 %v352_v26, %v326_v23  ;;  %v349_v34 = vadd.f32 %v348_v30, %v347_v27  ;;  %v355_v35 = vadd.f32 %v354_v31, %v353_v28 }
 0x120   :  { %v288_v36 = vadd.f32 %v327_v29, %v277_v32  ;;  %v290_v37 = vadd.f32 %v327_v29, %v279_v33  ;;  %v278_v38 = vmul.f32 %v349_v34, %v326_v23  ;;  %v280_v39 = vmul.f32 %v355_v35, %v326_v23 }
 0x122   :  { %v292_v40 = vmax.f32 %v288_v36, 0.0  ;;  %v294_v41 = vmax.f32 %v290_v37, 0.0  ;;  %v289_v42 = vadd.f32 %v327_v29, %v278_v38  ;;  %v291_v43 = vadd.f32 %v327_v29, %v280_v39 }
 0x124   :  { %296 = vst [vmem:[%s571_s4] sm:$0xff] %v292_v40  ;;  %298 = vst [vmem:[%s571_s4 + $0x10] sm:$0xff] %v294_v41  ;;  %v293_v44 = vmax.f32 %v289_v42, 0.0  ;;  %v295_v45 = vmax.f32 %v291_v43, 0.0 }
 0x126   :  { %297 = vst [vmem:[%s571_s4 + $0x8] sm:$0xff] %v293_v44  ;;  %299 = vst [vmem:[%s571_s4 + $0x18] sm:$0xff] %v295_v45 }
 0x127   :  { %304 = vsyncpa [#allocation4], 1 }
 0x128   :  { %305 = vsyncpa [#allocation6], 1 }

// kernel: _lambda_.114
= control target key start
LH: loop header
LB: loop body
LE: loop exit
PB: predicated region body
PF: predicated region fallthrough
CT: control target
= control target key end

     0   :  { %9 = vsyncpa [#allocation4], 0  ;;  %s656_s0 = inlined_call_operand.vmem [shape: bf16[8,384], index: 0, kind: input, shape index: {}]   ;;  %s657_s1 = inlined_call_operand.vmem [shape: bf16[384,128], index: 1, kind: input, shape index: {}]   ;;  %s658_s2 = inlined_call_operand.hbm [shape: f32[1,128], index: 2, kind: input, shape index: {}]   ;;  %s659_s3 = inlined_call_operand.hbm [shape: f32[1,128], index: 3, kind: input, shape index: {}]   ;;  %s660_s4 = inlined_call_operand.vmem [shape: f32[8,128], index: 4, kind: output, shape index: {}]  }
   0x1   :  { %10 = vsyncpa [#allocation6], 0  ;;  %s522_s15 = smov [#allocation3]   ;;  %s523_s17 = smov [#allocation5]  }
   0x2   :  { %s21_s16 = sshll.u32 %s522_s15, 4  ;;  %s31_s18 = sshll.u32 %s523_s17, 4  ;;  %s22_s16 = int_to_ptr.vmem [resolvable:$true] %s21_s16  ;;  %s32_s18 = int_to_ptr.vmem [resolvable:$true] %s31_s18 }
   0x3   :  { %s474_s21 = scalar_lea.hbm %s658_s2, 16 }
   0x4   :  { %p475_p0 = scmp.ne.s32.totalorder %s658_s2, %s474_s21  ;;  %p478_p1 = scmp.lt.u32.totalorder %s474_s21, %s658_s2 }
   0x6   :  { %p480_p2 = pnand %p478_p1, %p475_p0 }
   0x8   :  { %483 = shalt.err (!%p480_p2)
}
   0x9   :  { %s484_s26 = scalar_lea.vmem %s22_s16, 16  ;;  %s488_s27 = scalar_lea.vmem %s22_s16, 32 }
   0xa   :  { %p485_p3 = scmp.ne.s32.totalorder %s22_s16, %s484_s26  ;;  %p489_p4 = scmp.lt.s32.totalorder %s22_s16, %s22_s16 }
   0xb   :  { %p490_p5 = scmp.lt.s32.totalorder %s488_s27, %s484_s26 }
   0xd   :  { %p491_p6 = por %p490_p5, %p489_p4 }
   0xf   :  { %p492_p7 = pnand %p491_p6, %p485_p3 }
  0x11   :  { %495 = shalt.err (!%p492_p7)
}
  0x12   :  { %24 = dma.hbm_to_vmem [thread:$0]  %s658_s2, 16, %s22_s16, [#allocation4]  }
  0x13   :  { %s496_s6 = scalar_lea.hbm %s659_s3, 16 }
  0x14   :  { %p497_p8 = scmp.ne.s32.totalorder %s659_s3, %s496_s6  ;;  %p500_p9 = scmp.lt.u32.totalorder %s496_s6, %s659_s3 }
  0x16   :  { %p502_p10 = pnand %p500_p9, %p497_p8 }
  0x18   :  { %505 = shalt.err (!%p502_p10)
}
  0x19   :  { %s506_s11 = scalar_lea.vmem %s32_s18, 16  ;;  %s510_s12 = scalar_lea.vmem %s32_s18, 32 }
  0x1a   :  { %p507_p11 = scmp.ne.s32.totalorder %s32_s18, %s506_s11  ;;  %p511_p12 = scmp.lt.s32.totalorder %s32_s18, %s32_s18 }
  0x1b   :  { %p512_p13 = scmp.lt.s32.totalorder %s510_s12, %s506_s11 }
  0x1d   :  { %p513_p0 = por %p512_p13, %p511_p12 }
  0x1f   :  { %p514_p1 = pnand %p513_p0, %p507_p11 }
  0x21   :  { %517 = shalt.err (!%p514_p1)
}
  0x22   :  { %34 = dma.hbm_to_vmem [thread:$0]  %s659_s3, 16, %s32_s18, [#allocation6]  }
  0x23   :  { %518 = dma.done.wait [#allocation4], 16  }
  0x24   :  { %519 = vsyncadd [#allocation4], 4294967280 }
  0x25   :  { %520 = dma.done.wait [#allocation6], 16  }
  0x26   :  { %521 = vsyncadd [#allocation6], 4294967280  ;;  %v524_v0 = vmov 0.0   ;;  %vm525_vm0 = vmmov 0   ;;  %v447_v1 = vld [vmem:[%s657_s1 + $0x40] sm:$0xff]   ;;  %v450_v4 = vld [vmem:[%s657_s1 + $0x48] sm:$0xff]  }
  0x27   :  { %423 = vmatprep.subr.bf16.mxu1 %v524_v0  ;;  %439 = vmatprep.mubr.msk.bf16.mxu1 %vm525_vm0, %v524_v0  ;;  %v448_v2 = vld [vmem:[%s657_s1] sm:$0xff]   ;;  %v451_v5 = vld [vmem:[%s657_s1 + $0x8] sm:$0xff]   ;;  %v453_v7 = vld [vmem:[%s657_s1 + $0x50] sm:$0xff]  }
  0x28   :  { %392 = vmatprep.subr.bf16.mxu0 %v447_v1  ;;  %v449_v3 = vld [vmem:[%s657_s1 + $0x80] sm:$0xff]   ;;  %v452_v6 = vld [vmem:[%s657_s1 + $0x88] sm:$0xff]   ;;  %v454_v8 = vld [vmem:[%s657_s1 + $0x10] sm:$0xff]  }
  0x29   :  { %393 = vmatpush3.bf16.msra.mxu0 %v448_v2  ;;  %424 = vmatpush3.bf16.msra.mxu1 %v449_v3  ;;  %v455_v9 = vld [vmem:[%s657_s1 + $0x90] sm:$0xff]   ;;  %v456_v10 = vld [vmem:[%s657_s1 + $0x58] sm:$0xff]   ;;  %v459_v13 = vld [vmem:[%s657_s1 + $0x60] sm:$0xff]  }
  0x2a   :  { %394 = vmatprep.subr.bf16.mxu0 %v450_v4  ;;  %425 = vmatprep.subr.bf16.mxu1 %v524_v0  ;;  %v457_v11 = vld [vmem:[%s657_s1 + $0x18] sm:$0xff]   ;;  %v460_v14 = vld [vmem:[%s657_s1 + $0x20] sm:$0xff]   ;;  %v462_v16 = vld [vmem:[%s657_s1 + $0x68] sm:$0xff]  }
  0x2b   :  { %v458_v12 = vld [vmem:[%s657_s1 + $0x98] sm:$0xff]   ;;  %v461_v15 = vld [vmem:[%s657_s1 + $0xa0] sm:$0xff]   ;;  %v463_v17 = vld [vmem:[%s657_s1 + $0x28] sm:$0xff]  }
  0x2c   :  { %v464_v18 = vld [vmem:[%s657_s1 + $0xa8] sm:$0xff]   ;;  %v465_v19 = vld [vmem:[%s657_s1 + $0x70] sm:$0xff]   ;;  %v468_v22 = vld [vmem:[%s657_s1 + $0x78] sm:$0xff]  }
  0x2d   :  { %395 = vmatpush3.bf16.msra.mxu0 %v451_v5  ;;  %426 = vmatpush3.bf16.msra.mxu1 %v452_v6  ;;  %v466_v20 = vld [vmem:[%s657_s1 + $0x30] sm:$0xff]   ;;  %v48_v23 = vld [vmem:[%s656_s0] sm:$0xff]  ;;  %v469_v25 = vld [vmem:[%s657_s1 + $0x38] sm:$0xff]  }
  0x2e   :  { %396 = vmatprep.subr.bf16.mxu0 %v453_v7  ;;  %427 = vmatprep.subr.bf16.mxu1 %v524_v0  ;;  %v467_v21 = vld [vmem:[%s657_s1 + $0xb0] sm:$0xff]   ;;  %v364_v24 = vcombine.high %v48_v23, %v48_v23  ;;  %v470_v26 = vld [vmem:[%s657_s1 + $0xb8] sm:$0xff]   ;;  %v363_v27 = vcombine.low %v48_v23, %v48_v23  ;;  %v473_v28 = vld [vmem:[%s656_s0 + $0x8] ss:$0 sps:$4 sm:$0xff]  }
  0x2f   :  { %v390_v35 = vld [vmem:[#allocation3] ss:$0 sm:$0xff]  ;;  %v391_v40 = vld [vmem:[#allocation5] ss:$0 sm:$0xff] }
  0x30   :  { %285 = vmatprep.mubr.bf16.mxu0 %v364_v24 }
  0x31   :  { %397 = vmatpush3.bf16.msra.mxu0 %v454_v8  ;;  %428 = vmatpush3.bf16.msra.mxu1 %v455_v9 }
  0x32   :  { %398 = vmatprep.subr.bf16.mxu0 %v456_v10  ;;  %429 = vmatprep.subr.bf16.mxu1 %v524_v0 }
  0x35   :  { %399 = vmatpush3.bf16.msra.mxu0 %v457_v11  ;;  %430 = vmatpush3.bf16.msra.mxu1 %v458_v12 }
  0x36   :  { %400 = vmatprep.subr.bf16.mxu0 %v459_v13  ;;  %431 = vmatprep.subr.bf16.mxu1 %v524_v0 }
  0x39   :  { %401 = vmatpush3.bf16.msra.mxu0 %v460_v14  ;;  %432 = vmatpush3.bf16.msra.mxu1 %v461_v15 }
  0x3a   :  { %402 = vmatprep.subr.bf16.mxu0 %v462_v16  ;;  %433 = vmatprep.subr.bf16.mxu1 %v524_v0 }
  0x3d   :  { %403 = vmatpush3.bf16.msra.mxu0 %v463_v17  ;;  %434 = vmatpush3.bf16.msra.mxu1 %v464_v18 }
  0x3e   :  { %404 = vmatprep.subr.bf16.mxu0 %v465_v19  ;;  %435 = vmatprep.subr.bf16.mxu1 %v524_v0 }
  0x41   :  { %405 = vmatpush3.bf16.msra.mxu0 %v466_v20  ;;  %436 = vmatpush3.bf16.msra.mxu1 %v467_v21 }
  0x42   :  { %406 = vmatprep.subr.bf16.mxu0 %v468_v22  ;;  %437 = vmatprep.subr.bf16.mxu1 %v524_v0 }
  0x45   :  { %407 = vmatpush3.bf16.msra.mxu0 %v469_v25  ;;  %438 = vmatpush3.bf16.msra.mxu1 %v470_v26 }
  0x48   :  { %286 = vmatmul.mubr.bf16.vlgmr.msra.gmra.mrb[0].mxu0 %v363_v27  ;;  %440 = vmatmul.mubr.bf16.vlgmr.msra.gmra.mrb[0].mxu1 %v473_v28 }
 0x11b   :  { %v408_v29 = vpop.f32.mrb[0].mxu0  ;;  %v327_v30 = vpop.f32.mrb[0].mxu1 }
 0x11c   :  { %v409_v31 = vpop.f32.mrb[1].mxu0  ;;  %v441_v33 = vpop.f32.mrb[1].mxu1 }
 0x11d   :  { %v410_v32 = vadd.f32 %v409_v31, %v408_v29  ;;  %v411_v34 = vpop.f32.mrb[2].mxu0  ;;  %v330_v36 = vpop.f32.mrb[2].mxu1 }
 0x11e   :  { %v412_v37 = vpop.f32.mrb[3].mxu0  ;;  %v442_v39 = vpop.f32.mrb[3].mxu1 }
 0x11f   :  { %v328_v38 = vadd.f32 %v410_v32, %v327_v30 }
 0x121   :  { %v346_v41 = vmul.f32 %v390_v35, %v328_v38 }
 0x123   :  { %v354_v42 = vadd.f32 %v391_v40, %v346_v41 }
 0x125   :  { %v355_v43 = vmax.f32 %v354_v42, 0.0 }
 0x127   :  { %356 = vst [vmem:[%s660_s4] sm:$0xff] %v355_v43 }
 0x128   :  { %361 = vsyncpa [#allocation4], 1 }
 0x129   :  { %362 = vsyncpa [#allocation6], 1 }

// kernel: _lambda_.115
= control target key start
LH: loop header
LB: loop body
LE: loop exit
PB: predicated region body
PF: predicated region fallthrough
CT: control target
= control target key end

     0   :  { %v205_v0 = vmov 0.0   ;;  %vm206_vm0 = vmmov 0   ;;  %s268_s1 = inlined_call_operand.vmem [shape: bf16[128,128], index: 1, kind: input, shape index: {}]   ;;  %s269_s0 = inlined_call_operand.vmem [shape: bf16[8,128], index: 0, kind: input, shape index: {}]   ;;  %s270_s2 = inlined_call_operand.vmem [shape: f32[1,128], index: 2, kind: input, shape index: {}]   ;;  %s271_s3 = inlined_call_operand.vmem [shape: f32[1,128], index: 3, kind: input, shape index: {}]   ;;  %s272_s4 = inlined_call_operand.vmem [shape: f32[8,128], index: 4, kind: output, shape index: {}]  }
   0x1   :  { %175 = vmatprep.subr.bf16.mxu0 %v205_v0  ;;  %v197_v1 = vld [vmem:[%s268_s1] sm:$0xff]   ;;  %191 = vmatprep.mubr.msk.bf16.mxu0 %vm206_vm0, %v205_v0  ;;  %v198_v2 = vld [vmem:[%s268_s1 + $0x8] sm:$0xff]   ;;  %v199_v3 = vld [vmem:[%s268_s1 + $0x10] sm:$0xff]  }
   0x2   :  { %176 = vmatpush3.bf16.msra.mxu0 %v197_v1  ;;  %v200_v4 = vld [vmem:[%s268_s1 + $0x18] sm:$0xff]   ;;  %v201_v5 = vld [vmem:[%s268_s1 + $0x20] sm:$0xff]   ;;  %v202_v6 = vld [vmem:[%s268_s1 + $0x28] sm:$0xff]  }
   0x3   :  { %177 = vmatprep.subr.bf16.mxu0 %v205_v0  ;;  %v203_v7 = vld [vmem:[%s268_s1 + $0x30] sm:$0xff]   ;;  %v204_v8 = vld [vmem:[%s268_s1 + $0x38] sm:$0xff]   ;;  %v24_v9 = vld [vmem:[%s269_s0] sm:$0xf] }
   0x4   :  { %v164_v10 = vld [vmem:[%s270_s2] ss:$0 sm:$0xff] }
   0x5   :  { %v165_v12 = vld [vmem:[%s271_s3] ss:$0 sm:$0xff] }
   0x6   :  { %178 = vmatpush3.bf16.msra.mxu0 %v198_v2 }
   0x7   :  { %179 = vmatprep.subr.bf16.mxu0 %v205_v0 }
   0xa   :  { %180 = vmatpush3.bf16.msra.mxu0 %v199_v3 }
   0xb   :  { %181 = vmatprep.subr.bf16.mxu0 %v205_v0 }
   0xe   :  { %182 = vmatpush3.bf16.msra.mxu0 %v200_v4 }
   0xf   :  { %183 = vmatprep.subr.bf16.mxu0 %v205_v0 }
  0x12   :  { %184 = vmatpush3.bf16.msra.mxu0 %v201_v5 }
  0x13   :  { %185 = vmatprep.subr.bf16.mxu0 %v205_v0 }
  0x16   :  { %186 = vmatpush3.bf16.msra.mxu0 %v202_v6 }
  0x17   :  { %187 = vmatprep.subr.bf16.mxu0 %v205_v0 }
  0x1a   :  { %188 = vmatpush3.bf16.msra.mxu0 %v203_v7 }
  0x1b   :  { %189 = vmatprep.subr.bf16.mxu0 %v205_v0 }
  0x1e   :  { %190 = vmatpush3.bf16.msra.mxu0 %v204_v8 }
  0x21   :  { %192 = vmatmul.mubr.bf16.vlgmr.msra.gmra.mrb[0].mxu0 %v24_v9 }
  0xf4   :  { %v123_v11 = vpop.f32.mrb[0].mxu0 }
  0xf5   :  { %v142_v13 = vmul.f32 %v164_v10, %v123_v11  ;;  %v193_v14 = vpop.f32.mrb[1].mxu0 }
  0xf6   :  { %v126_v15 = vpop.f32.mrb[2].mxu0 }
  0xf7   :  { %v150_v16 = vadd.f32 %v165_v12, %v142_v13  ;;  %v194_v17 = vpop.f32.mrb[3].mxu0 }
  0xf9   :  { %151 = vst [vmem:[%s272_s4] sm:$0xff] %v150_v16 }

// kernel: _lambda_.116
= control target key start
LH: loop header
LB: loop body
LE: loop exit
PB: predicated region body
PF: predicated region fallthrough
CT: control target
= control target key end

     0   :  { %v211_v0 = vmov 0.0   ;;  %vm212_vm0 = vmmov 0   ;;  %s282_s1 = inlined_call_operand.vmem [shape: bf16[128,128], index: 1, kind: input, shape index: {}]   ;;  %s283_s0 = inlined_call_operand.vmem [shape: bf16[8,128], index: 0, kind: input, shape index: {}]   ;;  %s284_s2 = inlined_call_operand.vmem [shape: f32[1,128], index: 2, kind: input, shape index: {}]   ;;  %s285_s3 = inlined_call_operand.vmem [shape: f32[1,128], index: 3, kind: input, shape index: {}]   ;;  %s286_s4 = inlined_call_operand.vmem [shape: f32[8,128], index: 4, kind: input, shape index: {}]   ;;  %s287_s5 = inlined_call_operand.vmem [shape: f32[8,128], index: 5, kind: output, shape index: {}]  }
   0x1   :  { %181 = vmatprep.subr.bf16.mxu0 %v211_v0  ;;  %v203_v1 = vld [vmem:[%s282_s1] sm:$0xff]   ;;  %197 = vmatprep.mubr.msk.bf16.mxu0 %vm212_vm0, %v211_v0  ;;  %v204_v2 = vld [vmem:[%s282_s1 + $0x8] sm:$0xff]   ;;  %v205_v3 = vld [vmem:[%s282_s1 + $0x10] sm:$0xff]  }
   0x2   :  { %182 = vmatpush3.bf16.msra.mxu0 %v203_v1  ;;  %v206_v4 = vld [vmem:[%s282_s1 + $0x18] sm:$0xff]   ;;  %v207_v5 = vld [vmem:[%s282_s1 + $0x20] sm:$0xff]   ;;  %v208_v6 = vld [vmem:[%s282_s1 + $0x28] sm:$0xff]  }
   0x3   :  { %183 = vmatprep.subr.bf16.mxu0 %v211_v0  ;;  %v209_v7 = vld [vmem:[%s282_s1 + $0x30] sm:$0xff]   ;;  %v210_v8 = vld [vmem:[%s282_s1 + $0x38] sm:$0xff]   ;;  %v27_v9 = vld [vmem:[%s283_s0] sm:$0xf] }
   0x4   :  { %v170_v10 = vld [vmem:[%s284_s2] ss:$0 sm:$0xff] }
   0x5   :  { %v171_v12 = vld [vmem:[%s285_s3] ss:$0 sm:$0xff] }
   0x6   :  { %184 = vmatpush3.bf16.msra.mxu0 %v204_v2  ;;  %v154_v15 = vld [vmem:[%s286_s4] sm:$0xff] }
   0x7   :  { %185 = vmatprep.subr.bf16.mxu0 %v211_v0 }
   0xa   :  { %186 = vmatpush3.bf16.msra.mxu0 %v205_v3 }
   0xb   :  { %187 = vmatprep.subr.bf16.mxu0 %v211_v0 }
   0xe   :  { %188 = vmatpush3.bf16.msra.mxu0 %v206_v4 }
   0xf   :  { %189 = vmatprep.subr.bf16.mxu0 %v211_v0 }
  0x12   :  { %190 = vmatpush3.bf16.msra.mxu0 %v207_v5 }
  0x13   :  { %191 = vmatprep.subr.bf16.mxu0 %v211_v0 }
  0x16   :  { %192 = vmatpush3.bf16.msra.mxu0 %v208_v6 }
  0x17   :  { %193 = vmatprep.subr.bf16.mxu0 %v211_v0 }
  0x1a   :  { %194 = vmatpush3.bf16.msra.mxu0 %v209_v7 }
  0x1b   :  { %195 = vmatprep.subr.bf16.mxu0 %v211_v0 }
  0x1e   :  { %196 = vmatpush3.bf16.msra.mxu0 %v210_v8 }
  0x21   :  { %198 = vmatmul.mubr.bf16.vlgmr.msra.gmra.mrb[0].mxu0 %v27_v9 }
  0xf4   :  { %v126_v11 = vpop.f32.mrb[0].mxu0 }
  0xf5   :  { %v145_v13 = vmul.f32 %v170_v10, %v126_v11  ;;  %v199_v14 = vpop.f32.mrb[1].mxu0 }
  0xf6   :  { %v129_v16 = vpop.f32.mrb[2].mxu0 }
  0xf7   :  { %v153_v17 = vadd.f32 %v171_v12, %v145_v13  ;;  %v200_v18 = vpop.f32.mrb[3].mxu0 }
  0xf9   :  { %v155_v19 = vadd.f32 %v154_v15, %v153_v17 }
  0xfb   :  { %v156_v20 = vmax.f32 %v155_v19, 0.0 }
  0xfd   :  { %157 = vst [vmem:[%s287_s5] sm:$0xff] %v156_v20 }

// kernel: _lambda_.117
= control target key start
LH: loop header
LB: loop body
LE: loop exit
PB: predicated region body
PF: predicated region fallthrough
CT: control target
= control target key end

     0   :  { %v446_v1 = vmov 0.0   ;;  %vm447_vm0 = vmmov 0   ;;  %s560_s1 = inlined_call_operand.vmem [shape: bf16[384,128], index: 1, kind: input, shape index: {}]   ;;  %s561_s0 = inlined_call_operand.vmem [shape: bf16[8,384], index: 0, kind: input, shape index: {}]   ;;  %s562_s2 = inlined_call_operand.vmem [shape: f32[1,128], index: 2, kind: input, shape index: {}]   ;;  %s563_s3 = inlined_call_operand.vmem [shape: f32[1,128], index: 3, kind: input, shape index: {}]   ;;  %s564_s4 = inlined_call_operand.vmem [shape: f32[8,128], index: 4, kind: output, shape index: {}]  }
   0x1   :  { %v419_v0 = vld [vmem:[%s560_s1 + $0x40] sm:$0xff]   ;;  %397 = vmatprep.subr.bf16.mxu1 %v446_v1  ;;  %413 = vmatprep.mubr.msk.bf16.mxu1 %vm447_vm0, %v446_v1  ;;  %v422_v4 = vld [vmem:[%s560_s1 + $0x48] sm:$0xff]   ;;  %v425_v7 = vld [vmem:[%s560_s1 + $0x50] sm:$0xff]  }
   0x2   :  { %v420_v2 = vld [vmem:[%s560_s1] sm:$0xff]   ;;  %366 = vmatprep.subr.bf16.mxu0 %v419_v0  ;;  %v423_v5 = vld [vmem:[%s560_s1 + $0x8] sm:$0xff]   ;;  %v426_v8 = vld [vmem:[%s560_s1 + $0x10] sm:$0xff]  }
   0x3   :  { %v421_v3 = vld [vmem:[%s560_s1 + $0x80] sm:$0xff]   ;;  %367 = vmatpush3.bf16.msra.mxu0 %v420_v2  ;;  %v424_v6 = vld [vmem:[%s560_s1 + $0x88] sm:$0xff]   ;;  %v427_v9 = vld [vmem:[%s560_s1 + $0x90] sm:$0xff]  }
   0x4   :  { %398 = vmatpush3.bf16.msra.mxu1 %v421_v3  ;;  %368 = vmatprep.subr.bf16.mxu0 %v422_v4  ;;  %v428_v10 = vld [vmem:[%s560_s1 + $0x58] sm:$0xff]   ;;  %v431_v13 = vld [vmem:[%s560_s1 + $0x60] sm:$0xff]   ;;  %v434_v16 = vld [vmem:[%s560_s1 + $0x68] sm:$0xff]  }
   0x5   :  { %399 = vmatprep.subr.bf16.mxu1 %v446_v1  ;;  %v429_v11 = vld [vmem:[%s560_s1 + $0x18] sm:$0xff]   ;;  %v432_v14 = vld [vmem:[%s560_s1 + $0x20] sm:$0xff]   ;;  %v435_v17 = vld [vmem:[%s560_s1 + $0x28] sm:$0xff]  }
   0x6   :  { %v430_v12 = vld [vmem:[%s560_s1 + $0x98] sm:$0xff]   ;;  %v433_v15 = vld [vmem:[%s560_s1 + $0xa0] sm:$0xff]   ;;  %v436_v18 = vld [vmem:[%s560_s1 + $0xa8] sm:$0xff]  }
   0x7   :  { %369 = vmatpush3.bf16.msra.mxu0 %v423_v5  ;;  %v437_v19 = vld [vmem:[%s560_s1 + $0x70] sm:$0xff]   ;;  %v440_v22 = vld [vmem:[%s560_s1 + $0x78] sm:$0xff]   ;;  %v24_v23 = vld [vmem:[%s561_s0] sm:$0xff] }
   0x8   :  { %400 = vmatpush3.bf16.msra.mxu1 %v424_v6  ;;  %370 = vmatprep.subr.bf16.mxu0 %v425_v7  ;;  %v438_v20 = vld [vmem:[%s560_s1 + $0x30] sm:$0xff]   ;;  %v338_v24 = vcombine.high %v24_v23, %v24_v23  ;;  %v441_v25 = vld [vmem:[%s560_s1 + $0x38] sm:$0xff]   ;;  %v337_v27 = vcombine.low %v24_v23, %v24_v23  ;;  %v445_v28 = vld [vmem:[%s561_s0 + $0x8] ss:$0 sps:$4 sm:$0xff]  }
   0x9   :  { %401 = vmatprep.subr.bf16.mxu1 %v446_v1  ;;  %v439_v21 = vld [vmem:[%s560_s1 + $0xb0] sm:$0xff]   ;;  %v442_v26 = vld [vmem:[%s560_s1 + $0xb8] sm:$0xff]   ;;  %v364_v35 = vld [vmem:[%s562_s2] ss:$0 sm:$0xff] }
   0xa   :  { %261 = vmatprep.mubr.bf16.mxu0 %v338_v24  ;;  %v365_v40 = vld [vmem:[%s563_s3] ss:$0 sm:$0xff] }
   0xb   :  { %371 = vmatpush3.bf16.msra.mxu0 %v426_v8 }
   0xc   :  { %402 = vmatpush3.bf16.msra.mxu1 %v427_v9  ;;  %372 = vmatprep.subr.bf16.mxu0 %v428_v10 }
   0xd   :  { %403 = vmatprep.subr.bf16.mxu1 %v446_v1 }
   0xf   :  { %373 = vmatpush3.bf16.msra.mxu0 %v429_v11 }
  0x10   :  { %404 = vmatpush3.bf16.msra.mxu1 %v430_v12  ;;  %374 = vmatprep.subr.bf16.mxu0 %v431_v13 }
  0x11   :  { %405 = vmatprep.subr.bf16.mxu1 %v446_v1 }
  0x13   :  { %375 = vmatpush3.bf16.msra.mxu0 %v432_v14 }
  0x14   :  { %406 = vmatpush3.bf16.msra.mxu1 %v433_v15  ;;  %376 = vmatprep.subr.bf16.mxu0 %v434_v16 }
  0x15   :  { %407 = vmatprep.subr.bf16.mxu1 %v446_v1 }
  0x17   :  { %377 = vmatpush3.bf16.msra.mxu0 %v435_v17 }
  0x18   :  { %408 = vmatpush3.bf16.msra.mxu1 %v436_v18  ;;  %378 = vmatprep.subr.bf16.mxu0 %v437_v19 }
  0x19   :  { %409 = vmatprep.subr.bf16.mxu1 %v446_v1 }
  0x1b   :  { %379 = vmatpush3.bf16.msra.mxu0 %v438_v20 }
  0x1c   :  { %410 = vmatpush3.bf16.msra.mxu1 %v439_v21  ;;  %380 = vmatprep.subr.bf16.mxu0 %v440_v22 }
  0x1d   :  { %411 = vmatprep.subr.bf16.mxu1 %v446_v1 }
  0x1f   :  { %381 = vmatpush3.bf16.msra.mxu0 %v441_v25 }
  0x20   :  { %412 = vmatpush3.bf16.msra.mxu1 %v442_v26 }
  0x22   :  { %262 = vmatmul.mubr.bf16.vlgmr.msra.gmra.mrb[0].mxu0 %v337_v27 }
  0x23   :  { %414 = vmatmul.mubr.bf16.vlgmr.msra.gmra.mrb[0].mxu1 %v445_v28 }
  0xf5   :  { %v382_v29 = vpop.f32.mrb[0].mxu0 }
  0xf6   :  { %v303_v30 = vpop.f32.mrb[0].mxu1  ;;  %v383_v31 = vpop.f32.mrb[1].mxu0 }
  0xf7   :  { %v384_v32 = vadd.f32 %v383_v31, %v382_v29  ;;  %v415_v33 = vpop.f32.mrb[1].mxu1  ;;  %v385_v34 = vpop.f32.mrb[2].mxu0 }
  0xf8   :  { %v306_v36 = vpop.f32.mrb[2].mxu1  ;;  %v386_v37 = vpop.f32.mrb[3].mxu0 }
  0xf9   :  { %v304_v38 = vadd.f32 %v384_v32, %v303_v30  ;;  %v416_v39 = vpop.f32.mrb[3].mxu1 }
  0xfb   :  { %v322_v41 = vmul.f32 %v364_v35, %v304_v38 }
  0xfd   :  { %v330_v42 = vadd.f32 %v365_v40, %v322_v41 }
  0xff   :  { %v331_v43 = vmax.f32 %v330_v42, 0.0 }
 0x101   :  { %332 = vst [vmem:[%s564_s4] sm:$0xff] %v331_v43 }

// kernel: _lambda_.123
= control target key start
LH: loop header
LB: loop body
LE: loop exit
PB: predicated region body
PF: predicated region fallthrough
CT: control target
= control target key end

     0   :  { %s979_s1 = inlined_call_operand.vmem [shape: bf16[256,128], index: 1, kind: input, shape index: {}]   ;;  %s980_s0 = inlined_call_operand.vmem [shape: bf16[128,256], index: 0, kind: input, shape index: {}]   ;;  %s981_s2 = inlined_call_operand.vmem [shape: f32[1,128], index: 2, kind: input, shape index: {}]   ;;  %s982_s3 = inlined_call_operand.vmem [shape: f32[1,128], index: 3, kind: input, shape index: {}]   ;;  %s983_s4 = inlined_call_operand.vmem [shape: f32[1,128], index: 4, kind: input, shape index: {}]   ;;  %s984_s5 = inlined_call_operand.vmem [shape: f32[1,128], index: 5, kind: input, shape index: {}]   ;;  %s985_s6 = inlined_call_operand.vmem [shape: f32[128,128], index: 6, kind: output, shape index: {}]  }
   0x1   :  { %v676_v0 = vld [vmem:[%s979_s1 + $0x40] sm:$0xff]   ;;  %v678_v2 = vld [vmem:[%s979_s1 + $0x48] sm:$0xff]   ;;  %v680_v4 = vld [vmem:[%s979_s1 + $0x50] sm:$0xff]  }
   0x2   :  { %v677_v1 = vld [vmem:[%s979_s1] sm:$0xff]   ;;  %596 = vmatprep.subr.bf16.mxu0 %v676_v0  ;;  %660 = vmatprep.subr.bf16.mxu1 %v676_v0  ;;  %v679_v3 = vld [vmem:[%s979_s1 + $0x8] sm:$0xff]   ;;  %v681_v5 = vld [vmem:[%s979_s1 + $0x10] sm:$0xff]  }
   0x3   :  { %597 = vmatpush3.bf16.msra.mxu0 %v677_v1  ;;  %668 = vmatpush3.bf16.msra.mxu1 %v677_v1  ;;  %v682_v6 = vld [vmem:[%s979_s1 + $0x58] sm:$0xff]   ;;  %v684_v8 = vld [vmem:[%s979_s1 + $0x60] sm:$0xff]   ;;  %v686_v10 = vld [vmem:[%s979_s1 + $0x68] sm:$0xff]  }
   0x4   :  { %598 = vmatprep.subr.bf16.mxu0 %v678_v2  ;;  %661 = vmatprep.subr.bf16.mxu1 %v678_v2  ;;  %v683_v7 = vld [vmem:[%s979_s1 + $0x18] sm:$0xff]   ;;  %v685_v9 = vld [vmem:[%s979_s1 + $0x20] sm:$0xff]   ;;  %v687_v13 = vld [vmem:[%s979_s1 + $0x28] sm:$0xff]  }
   0x5   :  { %v694_v11 = vld [vmem:[%s980_s0 + $0x4] ss:$8 sps:$4 sm:$0xff]   ;;  %v688_v14 = vld [vmem:[%s979_s1 + $0x70] sm:$0xff]   ;;  %v690_v16 = vld [vmem:[%s979_s1 + $0x78] sm:$0xff]  }
   0x6   :  { %v697_v12 = vld [vmem:[%s980_s0 + $0x44] ss:$8 sps:$4 sm:$0xff]   ;;  %316 = vmatprep.mubr.bf16.mxu0 %v694_v11  ;;  %v689_v15 = vld [vmem:[%s979_s1 + $0x30] sm:$0xff]   ;;  %v691_v17 = vld [vmem:[%s979_s1 + $0x38] sm:$0xff]  }
   0x7   :  { %599 = vmatpush3.bf16.msra.mxu0 %v679_v3  ;;  %669 = vmatpush3.bf16.msra.mxu1 %v679_v3  ;;  %v692_v18 = vld [vmem:[%s980_s0] ss:$8 sps:$4 sm:$0xff]   ;;  %v698_v20 = vld [vmem:[%s980_s0 + $0x14] ss:$8 sps:$4 sm:$0xff]   ;;  %v702_v22 = vld [vmem:[%s980_s0 + $0x10] ss:$8 sps:$4 sm:$0xff]  }
   0x8   :  { %600 = vmatprep.subr.bf16.mxu0 %v680_v4  ;;  %662 = vmatprep.subr.bf16.mxu1 %v680_v4  ;;  %v695_v19 = vld [vmem:[%s980_s0 + $0x40] ss:$8 sps:$4 sm:$0xff]   ;;  %v700_v21 = vld [vmem:[%s980_s0 + $0x54] ss:$8 sps:$4 sm:$0xff]   ;;  %v703_v23 = vld [vmem:[%s980_s0 + $0x50] ss:$8 sps:$4 sm:$0xff]  }
   0x9   :  { %348 = vmatprep.mubr.bf16.mxu1 %v697_v12  ;;  %v704_v24 = vld [vmem:[%s980_s0 + $0x24] ss:$8 sps:$4 sm:$0xff]   ;;  %v708_v26 = vld [vmem:[%s980_s0 + $0x20] ss:$8 sps:$4 sm:$0xff]   ;;  %v710_v28 = vld [vmem:[%s980_s0 + $0x34] ss:$8 sps:$4 sm:$0xff]  }
   0xa   :  { %v706_v25 = vld [vmem:[%s980_s0 + $0x64] ss:$8 sps:$4 sm:$0xff]   ;;  %v709_v27 = vld [vmem:[%s980_s0 + $0x60] ss:$8 sps:$4 sm:$0xff]   ;;  %v712_v29 = vld [vmem:[%s980_s0 + $0x74] ss:$8 sps:$4 sm:$0xff]  }
   0xb   :  { %601 = vmatpush3.bf16.msra.mxu0 %v681_v5  ;;  %670 = vmatpush3.bf16.msra.mxu1 %v681_v5  ;;  %v714_v30 = vld [vmem:[%s980_s0 + $0x30] ss:$8 sps:$4 sm:$0xff]   ;;  %v850_v35 = vld [vmem:[%s981_s2] ss:$0 sm:$0xff] }
   0xc   :  { %602 = vmatprep.subr.bf16.mxu0 %v682_v6  ;;  %663 = vmatprep.subr.bf16.mxu1 %v682_v6  ;;  %v715_v31 = vld [vmem:[%s980_s0 + $0x70] ss:$8 sps:$4 sm:$0xff]   ;;  %v855_v41 = vld [vmem:[%s982_s3] ss:$0 sm:$0xff] }
   0xd   :  { %v866_v52 = vld [vmem:[%s983_s4] ss:$0 sm:$0xff] }
   0xe   :  { %v873_v59 = vld [vmem:[%s984_s5] ss:$0 sm:$0xff] }
   0xf   :  { %603 = vmatpush3.bf16.msra.mxu0 %v683_v7  ;;  %671 = vmatpush3.bf16.msra.mxu1 %v683_v7 }
  0x10   :  { %604 = vmatprep.subr.bf16.mxu0 %v684_v8  ;;  %664 = vmatprep.subr.bf16.mxu1 %v684_v8 }
  0x13   :  { %605 = vmatpush3.bf16.msra.mxu0 %v685_v9  ;;  %672 = vmatpush3.bf16.msra.mxu1 %v685_v9 }
  0x14   :  { %606 = vmatprep.subr.bf16.mxu0 %v686_v10  ;;  %665 = vmatprep.subr.bf16.mxu1 %v686_v10 }
  0x17   :  { %607 = vmatpush3.bf16.msra.mxu0 %v687_v13  ;;  %673 = vmatpush3.bf16.msra.mxu1 %v687_v13 }
  0x18   :  { %608 = vmatprep.subr.bf16.mxu0 %v688_v14  ;;  %666 = vmatprep.subr.bf16.mxu1 %v688_v14 }
  0x1b   :  { %609 = vmatpush3.bf16.msra.mxu0 %v689_v15  ;;  %674 = vmatpush3.bf16.msra.mxu1 %v689_v15 }
  0x1c   :  { %610 = vmatprep.subr.bf16.mxu0 %v690_v16  ;;  %667 = vmatprep.subr.bf16.mxu1 %v690_v16 }
  0x1f   :  { %611 = vmatpush3.bf16.msra.mxu0 %v691_v17  ;;  %675 = vmatpush3.bf16.msra.mxu1 %v691_v17 }
  0x22   :  { %317 = vmatmul.mubr.bf16.vlgmr.msra.gmra.mrb[0].mxu0 %v692_v18  ;;  %349 = vmatmul.mubr.bf16.vlgmr.msra.gmra.mrb[0].mxu1 %v695_v19 }
  0x23   :  { %324 = vmatprep.mubr.bf16.mxu0 %v698_v20  ;;  %356 = vmatprep.mubr.bf16.mxu1 %v700_v21 }
  0x2a   :  { %325 = vmatmul.mubr.bf16.gmra.mrb[4].mxu0 %v702_v22  ;;  %357 = vmatmul.mubr.bf16.gmra.mrb[4].mxu1 %v703_v23 }
  0x2b   :  { %332 = vmatprep.mubr.bf16.mxu0 %v704_v24  ;;  %364 = vmatprep.mubr.bf16.mxu1 %v706_v25 }
  0x32   :  { %333 = vmatmul.mubr.bf16.gmra.mrb[8].mxu0 %v708_v26  ;;  %365 = vmatmul.mubr.bf16.gmra.mrb[8].mxu1 %v709_v27 }
  0x33   :  { %340 = vmatprep.mubr.bf16.mxu0 %v710_v28  ;;  %372 = vmatprep.mubr.bf16.mxu1 %v712_v29 }
  0x3a   :  { %341 = vmatmul.mubr.bf16.gmra.mrb[12].mxu0 %v714_v30  ;;  %373 = vmatmul.mubr.bf16.gmra.mrb[12].mxu1 %v715_v31 }
  0xf5   :  { %v612_v32 = vpop.f32.mrb[0].mxu0  ;;  %v636_v33 = vpop.f32.mrb[0].mxu1 }
  0xf6   :  { %v613_v34 = vpop.f32.mrb[1].mxu0  ;;  %v637_v36 = vpop.f32.mrb[1].mxu1 }
  0xf7   :  { %v614_v37 = vadd.f32 %v613_v34, %v612_v32  ;;  %v638_v38 = vadd.f32 %v637_v36, %v636_v33  ;;  %v615_v39 = vpop.f32.mrb[2].mxu0  ;;  %v639_v40 = vpop.f32.mrb[2].mxu1 }
  0xf8   :  { %v616_v42 = vpop.f32.mrb[3].mxu0  ;;  %v640_v43 = vpop.f32.mrb[3].mxu1 }
  0xf9   :  { %v439_v44 = vmul.f32 %v614_v37, %v850_v35  ;;  %v447_v45 = vmul.f32 %v638_v38, %v850_v35  ;;  %v617_v46 = vadd.f32 %v616_v42, %v615_v39  ;;  %v641_v47 = vadd.f32 %v640_v43, %v639_v40 }
  0xfb   :  { %v462_v48 = vadd.f32 %v855_v41, %v439_v44  ;;  %v470_v49 = vadd.f32 %v855_v41, %v447_v45  ;;  %v440_v50 = vmul.f32 %v617_v46, %v850_v35  ;;  %v448_v51 = vmul.f32 %v641_v47, %v850_v35 }
  0xfd   :  { %v478_v53 = vmax.f32 %v462_v48, 0.0  ;;  %v486_v54 = vmax.f32 %v470_v49, 0.0  ;;  %v463_v55 = vadd.f32 %v855_v41, %v440_v50  ;;  %v471_v56 = vadd.f32 %v855_v41, %v448_v51  ;;  %v618_v57 = vpop.f32.mrb[4].mxu0  ;;  %v642_v58 = vpop.f32.mrb[4].mxu1 }
  0xfe   :  { %v619_v60 = vpop.f32.mrb[5].mxu0  ;;  %v643_v61 = vpop.f32.mrb[5].mxu1 }
  0xff   :  { %v501_v62 = vmul.f32 %v866_v52, %v478_v53  ;;  %v509_v63 = vmul.f32 %v866_v52, %v486_v54  ;;  %v479_v0 = vmax.f32 %v463_v55, 0.0  ;;  %v487_v1 = vmax.f32 %v471_v56, 0.0  ;;  %v621_v2 = vpop.f32.mrb[6].mxu0  ;;  %v645_v3 = vpop.f32.mrb[6].mxu1 }
 0x100   :  { %v620_v4 = vadd.f32 %v619_v60, %v618_v57  ;;  %v644_v5 = vadd.f32 %v643_v61, %v642_v58  ;;  %v622_v6 = vpop.f32.mrb[7].mxu0  ;;  %v646_v7 = vpop.f32.mrb[7].mxu1 }
 0x101   :  { %v524_v8 = vadd.f32 %v873_v59, %v501_v62  ;;  %v532_v9 = vadd.f32 %v873_v59, %v509_v63  ;;  %v502_v10 = vmul.f32 %v866_v52, %v479_v0  ;;  %v510_v11 = vmul.f32 %v866_v52, %v487_v1 }
 0x102   :  { %v441_v12 = vmul.f32 %v620_v4, %v850_v35  ;;  %v449_v13 = vmul.f32 %v644_v5, %v850_v35  ;;  %v623_v14 = vadd.f32 %v622_v6, %v621_v2  ;;  %v647_v15 = vadd.f32 %v646_v7, %v645_v3 }
 0x103   :  { %540 = vst [vmem:[%s985_s6] sm:$0xff] %v524_v8  ;;  %548 = vst [vmem:[%s985_s6 + $0x40] sm:$0xff] %v532_v9  ;;  %v525_v16 = vadd.f32 %v873_v59, %v502_v10  ;;  %v533_v17 = vadd.f32 %v873_v59, %v510_v11 }
 0x104   :  { %v464_v18 = vadd.f32 %v855_v41, %v441_v12  ;;  %v472_v19 = vadd.f32 %v855_v41, %v449_v13  ;;  %v442_v20 = vmul.f32 %v623_v14, %v850_v35  ;;  %v450_v21 = vmul.f32 %v647_v15, %v850_v35 }
 0x105   :  { %541 = vst [vmem:[%s985_s6 + $0x8] sm:$0xff] %v525_v16  ;;  %549 = vst [vmem:[%s985_s6 + $0x48] sm:$0xff] %v533_v17  ;;  %v624_v22 = vpop.f32.mrb[8].mxu0  ;;  %v648_v23 = vpop.f32.mrb[8].mxu1 }
 0x106   :  { %v480_v24 = vmax.f32 %v464_v18, 0.0  ;;  %v488_v25 = vmax.f32 %v472_v19, 0.0  ;;  %v465_v26 = vadd.f32 %v855_v41, %v442_v20  ;;  %v473_v27 = vadd.f32 %v855_v41, %v450_v21  ;;  %v625_v28 = vpop.f32.mrb[9].mxu0  ;;  %v649_v29 = vpop.f32.mrb[9].mxu1 }
 0x107   :  { %v626_v30 = vadd.f32 %v625_v28, %v624_v22  ;;  %v650_v31 = vadd.f32 %v649_v29, %v648_v23  ;;  %v627_v32 = vpop.f32.mrb[10].mxu0  ;;  %v651_v33 = vpop.f32.mrb[10].mxu1 }
 0x108   :  { %v503_v34 = vmul.f32 %v866_v52, %v480_v24  ;;  %v511_v36 = vmul.f32 %v866_v52, %v488_v25  ;;  %v481_v37 = vmax.f32 %v465_v26, 0.0  ;;  %v489_v38 = vmax.f32 %v473_v27, 0.0  ;;  %v628_v39 = vpop.f32.mrb[11].mxu0  ;;  %v652_v40 = vpop.f32.mrb[11].mxu1 }
 0x109   :  { %v443_v42 = vmul.f32 %v626_v30, %v850_v35  ;;  %v451_v43 = vmul.f32 %v650_v31, %v850_v35  ;;  %v629_v44 = vadd.f32 %v628_v39, %v627_v32  ;;  %v653_v45 = vadd.f32 %v652_v40, %v651_v33 }
 0x10a   :  { %v526_v46 = vadd.f32 %v873_v59, %v503_v34  ;;  %v534_v47 = vadd.f32 %v873_v59, %v511_v36  ;;  %v504_v48 = vmul.f32 %v866_v52, %v481_v37  ;;  %v512_v49 = vmul.f32 %v866_v52, %v489_v38 }
 0x10b   :  { %v466_v50 = vadd.f32 %v855_v41, %v443_v42  ;;  %v474_v51 = vadd.f32 %v855_v41, %v451_v43  ;;  %v444_v53 = vmul.f32 %v629_v44, %v850_v35  ;;  %v452_v54 = vmul.f32 %v653_v45, %v850_v35 }
 0x10c   :  { %542 = vst [vmem:[%s985_s6 + $0x10] sm:$0xff] %v526_v46  ;;  %550 = vst [vmem:[%s985_s6 + $0x50] sm:$0xff] %v534_v47  ;;  %v527_v55 = vadd.f32 %v873_v59, %v504_v48  ;;  %v535_v56 = vadd.f32 %v873_v59, %v512_v49 }
 0x10d   :  { %v482_v57 = vmax.f32 %v466_v50, 0.0  ;;  %v490_v58 = vmax.f32 %v474_v51, 0.0  ;;  %v467_v60 = vadd.f32 %v855_v41, %v444_v53  ;;  %v475_v61 = vadd.f32 %v855_v41, %v452_v54  ;;  %v630_v62 = vpop.f32.mrb[12].mxu0  ;;  %v654_v63 = vpop.f32.mrb[12].mxu1 }
 0x10e   :  { %543 = vst [vmem:[%s985_s6 + $0x18] sm:$0xff] %v527_v55  ;;  %551 = vst [vmem:[%s985_s6 + $0x58] sm:$0xff] %v535_v56  ;;  %v631_v0 = vpop.f32.mrb[13].mxu0  ;;  %v655_v1 = vpop.f32.mrb[13].mxu1 }
 0x10f   :  { %v505_v2 = vmul.f32 %v866_v52, %v482_v57  ;;  %v513_v3 = vmul.f32 %v866_v52, %v490_v58  ;;  %v483_v4 = vmax.f32 %v467_v60, 0.0  ;;  %v491_v5 = vmax.f32 %v475_v61, 0.0  ;;  %v633_v6 = vpop.f32.mrb[14].mxu0  ;;  %v657_v7 = vpop.f32.mrb[14].mxu1 }
 0x110   :  { %v632_v8 = vadd.f32 %v631_v0, %v630_v62  ;;  %v656_v9 = vadd.f32 %v655_v1, %v654_v63  ;;  %v634_v10 = vpop.f32.mrb[15].mxu0  ;;  %v658_v11 = vpop.f32.mrb[15].mxu1 }
 0x111   :  { %v528_v12 = vadd.f32 %v873_v59, %v505_v2  ;;  %v536_v13 = vadd.f32 %v873_v59, %v513_v3  ;;  %v506_v14 = vmul.f32 %v866_v52, %v483_v4  ;;  %v514_v15 = vmul.f32 %v866_v52, %v491_v5 }
 0x112   :  { %v445_v16 = vmul.f32 %v632_v8, %v850_v35  ;;  %v453_v17 = vmul.f32 %v656_v9, %v850_v35  ;;  %v635_v18 = vadd.f32 %v634_v10, %v633_v6  ;;  %v659_v19 = vadd.f32 %v658_v11, %v657_v7 }
 0x113   :  { %544 = vst [vmem:[%s985_s6 + $0x20] sm:$0xff] %v528_v12  ;;  %552 = vst [vmem:[%s985_s6 + $0x60] sm:$0xff] %v536_v13  ;;  %v529_v20 = vadd.f32 %v873_v59, %v506_v14  ;;  %v537_v21 = vadd.f32 %v873_v59, %v514_v15 }
 0x114   :  { %v468_v22 = vadd.f32 %v855_v41, %v445_v16  ;;  %v476_v23 = vadd.f32 %v855_v41, %v453_v17  ;;  %v446_v24 = vmul.f32 %v635_v18, %v850_v35  ;;  %v454_v25 = vmul.f32 %v659_v19, %v850_v35 }
 0x115   :  { %545 = vst [vmem:[%s985_s6 + $0x28] sm:$0xff] %v529_v20  ;;  %553 = vst [vmem:[%s985_s6 + $0x68] sm:$0xff] %v537_v21 }
 0x116   :  { %v484_v26 = vmax.f32 %v468_v22, 0.0  ;;  %v492_v27 = vmax.f32 %v476_v23, 0.0  ;;  %v469_v28 = vadd.f32 %v855_v41, %v446_v24  ;;  %v477_v29 = vadd.f32 %v855_v41, %v454_v25 }
 0x118   :  { %v507_v30 = vmul.f32 %v866_v52, %v484_v26  ;;  %v515_v31 = vmul.f32 %v866_v52, %v492_v27  ;;  %v485_v32 = vmax.f32 %v469_v28, 0.0  ;;  %v493_v35 = vmax.f32 %v477_v29, 0.0 }
 0x11a   :  { %v530_v33 = vadd.f32 %v873_v59, %v507_v30  ;;  %v538_v34 = vadd.f32 %v873_v59, %v515_v31  ;;  %v508_v36 = vmul.f32 %v866_v52, %v485_v32  ;;  %v516_v37 = vmul.f32 %v866_v52, %v493_v35 }
 0x11c   :  { %546 = vst [vmem:[%s985_s6 + $0x30] sm:$0xff] %v530_v33  ;;  %554 = vst [vmem:[%s985_s6 + $0x70] sm:$0xff] %v538_v34  ;;  %v531_v41 = vadd.f32 %v873_v59, %v508_v36  ;;  %v539_v38 = vadd.f32 %v873_v59, %v516_v37 }
 0x11e   :  { %547 = vst [vmem:[%s985_s6 + $0x38] sm:$0xff] %v531_v41  ;;  %555 = vst [vmem:[%s985_s6 + $0x78] sm:$0xff] %v539_v38 }

// kernel: _lambda_.124
= control target key start
LH: loop header
LB: loop body
LE: loop exit
PB: predicated region body
PF: predicated region fallthrough
CT: control target
= control target key end

     0   :  { %s134_s0 = inlined_call_operand.vmem [shape: f32[8,128], index: 0, kind: input, shape index: {}]   ;;  %s135_s1 = inlined_call_operand.vmem [shape: f32[8,128], index: 1, kind: input, shape index: {}]   ;;  %s136_s2 = inlined_call_operand.vmem [shape: f32[8,128], index: 2, kind: input, shape index: {}]   ;;  %s137_s3 = inlined_call_operand.vmem [shape: f32[8,128], index: 3, kind: input, shape index: {}]   ;;  %s138_s4 = inlined_call_operand.vmem [shape: f32[8,128], index: 4, kind: input, shape index: {}]   ;;  %s139_s5 = inlined_call_operand.vmem [shape: f32[8,128], index: 5, kind: input, shape index: {}]   ;;  %s140_s6 = inlined_call_operand.vmem [shape: f32[8,128], index: 6, kind: input, shape index: {}]   ;;  %s141_s7 = inlined_call_operand.vmem [shape: f32[8,128], index: 7, kind: input, shape index: {}]   ;;  %s142_s8 = inlined_call_operand.vmem [shape: f32[8,128], index: 8, kind: input, shape index: {}]   ;;  %s143_s9 = inlined_call_operand.vmem [shape: f32[8,128], index: 9, kind: output, shape index: {}]  }
   0x1   :  { %v32_v0 = vld [vmem:[%s134_s0] sm:$0xff] }
   0x2   :  { %v33_v1 = vld [vmem:[%s135_s1] sm:$0xff] }
   0x3   :  { %v35_v2 = vld [vmem:[%s136_s2] sm:$0xff]  ;;  %v34_v3 = vmax.f32 %v32_v0, %v33_v1 }
   0x4   :  { %v37_v4 = vld [vmem:[%s137_s3] sm:$0xff] }
   0x5   :  { %v36_v5 = vmax.f32 %v34_v3, %v35_v2  ;;  %v39_v6 = vld [vmem:[%s138_s4] sm:$0xff] }
   0x6   :  { %v41_v8 = vld [vmem:[%s139_s5] sm:$0xff] }
   0x7   :  { %v38_v7 = vmax.f32 %v36_v5, %v37_v4  ;;  %v43_v10 = vld [vmem:[%s140_s6] sm:$0xff] }
   0x8   :  { %v45_v12 = vld [vmem:[%s141_s7] sm:$0xff] }
   0x9   :  { %v40_v9 = vmax.f32 %v38_v7, %v39_v6  ;;  %v47_v14 = vld [vmem:[%s142_s8] sm:$0xff] }
   0xb   :  { %v42_v11 = vmax.f32 %v40_v9, %v41_v8 }
   0xd   :  { %v44_v13 = vmax.f32 %v42_v11, %v43_v10 }
   0xf   :  { %v46_v15 = vmax.f32 %v44_v13, %v45_v12 }
  0x11   :  { %v48_v16 = vmax.f32 %v46_v15, %v47_v14 }
  0x13   :  { %49 = vst [vmem:[%s143_s9] sm:$0xff] %v48_v16 }

// kernel: _lambda_.126
= control target key start
LH: loop header
LB: loop body
LE: loop exit
PB: predicated region body
PF: predicated region fallthrough
CT: control target
= control target key end

     0   :  { %s1180_s15 = smov 0   ;;  %s1182_s16 = smov 0   ;;  %s1309_s0 = inlined_call_operand.vmem [shape: bf16[32,1024], index: 0, kind: input, shape index: {}]   ;;  %s1310_s1 = inlined_call_operand.vmem [shape: bf16[1024,128], index: 1, kind: input, shape index: {}]   ;;  %s1311_s2 = inlined_call_operand.vmem [shape: f32[1,128], index: 2, kind: input, shape index: {}]   ;;  %s1312_s3 = inlined_call_operand.vmem [shape: f32[1,128], index: 3, kind: input, shape index: {}]   ;;  %s1313_s4 = inlined_call_operand.vmem [shape: f32[32,128], index: 4, kind: output, shape index: {}]  }
   0x1   :  { %s1184_s17 = smov 0   ;;  %s1186_s18 = smov 0  }
   0x2   :  { %s1188_s19 = smov 0  }
   0x3 LB: > { %s26_s20 = sadd.s32 1, %s1148_s18  ;;  %p49_p1 = scmp.ne.s32.totalorder %s1140_s16, %s1136_s15  ;;  %s1152_s19 = sphi %s1188_s19, %s14_s19   ;;  %s1148_s18 = sphi %s1186_s18, %s1317_s18   ;;  %s1144_s17 = sphi %s1184_s17, %s1316_s17   ;;  %s1140_s16 = sphi %s1182_s16, %s1315_s16   ;;  %s1136_s15 = sphi %s1180_s15, %s1314_s15  }
   0x4   : > { %p27_p0 = scmp.ge.s32.totalorder %s26_s20, 2  ;;  %p50_p2 = scmp.eq.s32.totalorder %s1152_s19, 0 }
   0x5   : > { %s42_s22 = sadd.s32 1, %s1140_s16  ;;  %p916_p5 = scmp.ge.s32.totalorder %s1152_s19, 2 }
   0x6   : > { %s1319_s20 = smov (%p27_p0, %s26_s20), 0  ;;  %p51_p3 = por %p50_p2, %p49_p1 }
   0x7   : > { %s38_s21 = ssub.s32 %s1148_s18, %s1319_s20  ;;  %195 = sbr.rel (%p916_p5) target bundleno = 22 (0x16), region = 24 }
   0x8   : > { %p40_p4 = scmp.eq.s32.totalorder %s38_s21, 0 }
   0xa   : > { %s1215_s23 = scalar_select %p40_p4, %s1140_s16, %s42_s22  }
   0xe   : > { %198 = sbr.rel (!%p51_p3) target bundleno = 22 (0x16), region = 28  ;;  %s200_s24 = sand.u32 (%p51_p3), 1, %s1140_s16  }
   0xf   : > { %s972_s25 = sshll.u32 (%p51_p3), %s1148_s18, 4  ;;  %s917_s26 = sshll.u32 (%p51_p3), %s200_s24, 6 }
  0x10   : > { %s208_s29 = scalar_lea.vmem (%p51_p3), %s1309_s0, %s972_s25  ;;  %s202_s30 = scalar_lea.vmem (%p51_p3), [#allocation3], %s917_s26 }
  0x11   : > { %v221_v0 = vld [vmem:[%s208_s29] sm:$0xff] (%p51_p3)  ;;  %v223_v1 = vld [vmem:[%s208_s29 + $0x8] sm:$0xff] (%p51_p3) }
  0x12   : > { %v225_v2 = vld [vmem:[%s208_s29 + $0x20] sm:$0xff] (%p51_p3)  ;;  %222 = vst [vmem:[%s202_s30] sm:$0xff] (%p51_p3), %v221_v0  ;;  %224 = vst [vmem:[%s202_s30 + $0x8] sm:$0xff] (%p51_p3), %v223_v1  ;;  %v227_v3 = vld [vmem:[%s208_s29 + $0x28] sm:$0xff] (%p51_p3) }
  0x13   : > { %226 = vst [vmem:[%s202_s30 + $0x10] sm:$0xff] (%p51_p3), %v225_v2  ;;  %v229_v4 = vld [vmem:[%s208_s29 + $0x40] sm:$0xff] (%p51_p3)  ;;  %v231_v5 = vld [vmem:[%s208_s29 + $0x48] sm:$0xff] (%p51_p3)  ;;  %228 = vst [vmem:[%s202_s30 + $0x18] sm:$0xff] (%p51_p3), %v227_v3 }
  0x14   : > { %230 = vst [vmem:[%s202_s30 + $0x20] sm:$0xff] (%p51_p3), %v229_v4  ;;  %232 = vst [vmem:[%s202_s30 + $0x28] sm:$0xff] (%p51_p3), %v231_v5  ;;  %v233_v6 = vld [vmem:[%s208_s29 + $0x60] sm:$0xff] (%p51_p3)  ;;  %v235_v7 = vld [vmem:[%s208_s29 + $0x68] sm:$0xff] (%p51_p3) }
  0x15   : > { %234 = vst [vmem:[%s202_s30 + $0x30] sm:$0xff] %v233_v6  ;;  %236 = vst [vmem:[%s202_s30 + $0x38] sm:$0xff] %v235_v7 }
  0x16 PF: > { %p920_p6 = scmp.ge.s32.totalorder %s1152_s19, 1  ;;  %p253_p7 = scmp.lt.s32.totalorder %s1152_s19, 3 }
  0x18   : > { %p254_p8 = pnand %p920_p6, %p253_p7 }
  0x19   : > { %s260_s5 = sand.u32 (!%p254_p8), 1, %s1136_s15   ;;  %s922_s6 = sshll.u32 (!%p254_p8), %s1144_s17, 6 }
  0x1a   : > { %257 = sbr.rel (%p254_p8) target bundleno = 319 (0x13f), region = 55  ;;  %s921_s7 = sshll.u32 (!%p254_p8), %s260_s5, 6 }
  0x1b   : > { %p305_p9 = scmp.lt.s32.totalorder (!%p254_p8), %s922_s6, 127  ;;  %s1232_s12 = scalar_lea.vmem (!%p254_p8), [#allocation3], %s921_s7 }
  0x1c   : > { %p924_p10 = scmp.ne.s32.totalorder (!%p254_p8), %s1144_s17, 0 }
  0x21   : > { %s1321_s6 = smov (!%p305_p9, %s922_s6), 127  ;;  %332 = sbr.rel (%p924_p10) target bundleno = 40 (0x28), region = 63 }
  0x22   : > { %s923_s8 = sshll.u32 %s1321_s6, 2  ;;  %v1154_v8 = vmov (!%p924_p10), 0.0  }
  0x23   : > { %s1230_s11 = scalar_lea.vmem %s1310_s1, %s923_s8  ;;  %333 = vst [vmem:[#allocation2] sm:$0xff] (!%p924_p10), %v1154_v8  ;;  %334 = vst [vmem:[#allocation2 + $0x8] sm:$0xff] (!%p924_p10), %v1154_v8 }
  0x24   : > { %335 = vst [vmem:[#allocation2 + $0x10] sm:$0xff] (!%p924_p10), %v1154_v8  ;;  %336 = vst [vmem:[#allocation2 + $0x18] sm:$0xff] (!%p924_p10), %v1154_v8 }
  0x28 PF: > { %v1070_v9 = vld [vmem:[%s1230_s11 + $0x40] sm:$0xff]   ;;  %v1074_v13 = vld [vmem:[%s1230_s11 + $0x48] sm:$0xff]   ;;  %v1078_v17 = vld [vmem:[%s1230_s11 + $0x50] sm:$0xff]   ;;  %p965_p11 = scmp.ne.s32.totalorder %s1144_s17, 1 }
  0x29   : > { %v1071_v10 = vld [vmem:[%s1230_s11 + $0xc0] sm:$0xff]   ;;  %973 = vmatprep.subr.bf16.mxu0 %v1070_v9  ;;  %v1075_v14 = vld [vmem:[%s1230_s11 + $0xc8] sm:$0xff]   ;;  %v1079_v18 = vld [vmem:[%s1230_s11 + $0xd0] sm:$0xff]  }
  0x2a   : > { %v1072_v11 = vld [vmem:[%s1230_s11] sm:$0xff]   ;;  %1001 = vmatprep.subr.bf16.mxu1 %v1071_v10  ;;  %v1076_v15 = vld [vmem:[%s1230_s11 + $0x8] sm:$0xff]   ;;  %v1080_v19 = vld [vmem:[%s1230_s11 + $0x10] sm:$0xff]  }
  0x2b   : > { %v1073_v12 = vld [vmem:[%s1230_s11 + $0x80] sm:$0xff]   ;;  %974 = vmatpush3.bf16.msra.mxu0 %v1072_v11  ;;  %v1077_v16 = vld [vmem:[%s1230_s11 + $0x88] sm:$0xff]   ;;  %v1081_v20 = vld [vmem:[%s1230_s11 + $0x90] sm:$0xff]  }
  0x2c   : > { %1002 = vmatpush3.bf16.msra.mxu1 %v1073_v12  ;;  %975 = vmatprep.subr.bf16.mxu0 %v1074_v13  ;;  %v1082_v21 = vld [vmem:[%s1230_s11 + $0x58] sm:$0xff]   ;;  %v1086_v25 = vld [vmem:[%s1230_s11 + $0x60] sm:$0xff]   ;;  %v1090_v29 = vld [vmem:[%s1230_s11 + $0x68] sm:$0xff]  }
  0x2d   : > { %1003 = vmatprep.subr.bf16.mxu1 %v1075_v14  ;;  %v1083_v22 = vld [vmem:[%s1230_s11 + $0xd8] sm:$0xff]   ;;  %v1087_v26 = vld [vmem:[%s1230_s11 + $0xe0] sm:$0xff]   ;;  %v1091_v30 = vld [vmem:[%s1230_s11 + $0xe8] sm:$0xff]  }
  0x2e   : > { %v1084_v23 = vld [vmem:[%s1230_s11 + $0x18] sm:$0xff]   ;;  %v1088_v27 = vld [vmem:[%s1230_s11 + $0x20] sm:$0xff]   ;;  %v1092_v31 = vld [vmem:[%s1230_s11 + $0x28] sm:$0xff]  }
  0x2f   : > { %976 = vmatpush3.bf16.msra.mxu0 %v1076_v15  ;;  %v1085_v24 = vld [vmem:[%s1230_s11 + $0x98] sm:$0xff]   ;;  %v1089_v28 = vld [vmem:[%s1230_s11 + $0xa0] sm:$0xff]   ;;  %v1093_v32 = vld [vmem:[%s1230_s11 + $0xa8] sm:$0xff]  }
  0x30   : > { %1004 = vmatpush3.bf16.msra.mxu1 %v1077_v16  ;;  %977 = vmatprep.subr.bf16.mxu0 %v1078_v17  ;;  %v1094_v33 = vld [vmem:[%s1230_s11 + $0x70] sm:$0xff]   ;;  %v1098_v37 = vld [vmem:[%s1230_s11 + $0x78] sm:$0xff]   ;;  %v337_v58 = vld [vmem:[#allocation2] sm:$0xff] }
  0x31   : > { %1005 = vmatprep.subr.bf16.mxu1 %v1079_v18  ;;  %v1095_v34 = vld [vmem:[%s1230_s11 + $0xf0] sm:$0xff]   ;;  %v1099_v38 = vld [vmem:[%s1230_s11 + $0xf8] sm:$0xff]   ;;  %v338_v63 = vld [vmem:[#allocation2 + $0x8] sm:$0xff] }
  0x32   : > { %v1096_v35 = vld [vmem:[%s1230_s11 + $0x30] sm:$0xff]   ;;  %v1100_v39 = vld [vmem:[%s1230_s11 + $0x38] sm:$0xff]  }
  0x33   : > { %978 = vmatpush3.bf16.msra.mxu0 %v1080_v19  ;;  %v1097_v36 = vld [vmem:[%s1230_s11 + $0xb0] sm:$0xff]   ;;  %v1101_v40 = vld [vmem:[%s1230_s11 + $0xb8] sm:$0xff]  }
  0x34   : > { %1006 = vmatpush3.bf16.msra.mxu1 %v1081_v20  ;;  %979 = vmatprep.subr.bf16.mxu0 %v1082_v21  ;;  %v1102_v41 = vld [vmem:[%s1232_s12] ss:$16 sps:$4 sm:$0xff]   ;;  %v1104_v42 = vld [vmem:[%s1232_s12 + $0x4] ss:$16 sps:$4 sm:$0xff]   ;;  %v1105_v43 = vld [vmem:[%s1232_s12 + $0x8] ss:$16 sps:$4 sm:$0xff]  }
  0x35   : > { %1007 = vmatprep.subr.bf16.mxu1 %v1083_v22  ;;  %v1107_v44 = vld [vmem:[%s1232_s12 + $0xc] ss:$16 sps:$4 sm:$0xff]   ;;  %677 = vmatprep.mubr.bf16.mxu0 %v1104_v42  ;;  %v1108_v45 = vld [vmem:[%s1232_s12 + $0x24] ss:$16 sps:$4 sm:$0xff]   ;;  %v1112_v47 = vld [vmem:[%s1232_s12 + $0x20] ss:$16 sps:$4 sm:$0xff]  }
  0x36   : > { %726 = vmatprep.mubr.bf16.mxu1 %v1107_v44  ;;  %v1110_v46 = vld [vmem:[%s1232_s12 + $0x2c] ss:$16 sps:$4 sm:$0xff]   ;;  %v1113_v48 = vld [vmem:[%s1232_s12 + $0x28] ss:$16 sps:$4 sm:$0xff]   ;;  %v339_v12 = vld [vmem:[#allocation2 + $0x10] sm:$0xff] }
  0x37   : > { %980 = vmatpush3.bf16.msra.mxu0 %v1084_v23  ;;  %v340_v17 = vld [vmem:[#allocation2 + $0x18] sm:$0xff]  ;;  %v966_v22 = vld [vmem:[%s1311_s2] ss:$0 sm:$0xff] (!%p965_p11) }
  0x38   : > { %1008 = vmatpush3.bf16.msra.mxu1 %v1085_v24  ;;  %981 = vmatprep.subr.bf16.mxu0 %v1086_v25  ;;  %v967_v23 = vld [vmem:[%s1312_s3] ss:$0 sm:$0xff] (!%p965_p11) }
  0x39   : > { %1009 = vmatprep.subr.bf16.mxu1 %v1087_v26 }
  0x3b   : > { %982 = vmatpush3.bf16.msra.mxu0 %v1088_v27 }
  0x3c   : > { %1010 = vmatpush3.bf16.msra.mxu1 %v1089_v28  ;;  %983 = vmatprep.subr.bf16.mxu0 %v1090_v29 }
  0x3d   : > { %1011 = vmatprep.subr.bf16.mxu1 %v1091_v30 }
  0x3f   : > { %984 = vmatpush3.bf16.msra.mxu0 %v1092_v31 }
  0x40   : > { %1012 = vmatpush3.bf16.msra.mxu1 %v1093_v32  ;;  %985 = vmatprep.subr.bf16.mxu0 %v1094_v33 }
  0x41   : > { %1013 = vmatprep.subr.bf16.mxu1 %v1095_v34 }
  0x43   : > { %986 = vmatpush3.bf16.msra.mxu0 %v1096_v35 }
  0x44   : > { %1014 = vmatpush3.bf16.msra.mxu1 %v1097_v36  ;;  %987 = vmatprep.subr.bf16.mxu0 %v1098_v37 }
  0x45   : > { %1015 = vmatprep.subr.bf16.mxu1 %v1099_v38 }
  0x47   : > { %988 = vmatpush3.bf16.msra.mxu0 %v1100_v39 }
  0x48   : > { %1016 = vmatpush3.bf16.msra.mxu1 %v1101_v40 }
  0x4a   : > { %678 = vmatmul.mubr.bf16.vlgmr.msra.gmra.mrb[0].mxu0 %v1102_v41 }
  0x4b   : > { %727 = vmatmul.mubr.bf16.vlgmr.msra.gmra.mrb[0].mxu1 %v1105_v43  ;;  %685 = vmatprep.mubr.bf16.mxu0 %v1108_v45 }
  0x4c   : > { %734 = vmatprep.mubr.bf16.mxu1 %v1110_v46 }
  0x52   : > { %686 = vmatmul.mubr.bf16.gmra.mrb[4].mxu0 %v1112_v47 }
  0x53   : > { %735 = vmatmul.mubr.bf16.gmra.mrb[4].mxu1 %v1113_v48 }
 0x11d   : > { %v989_v49 = vpop.f32.mrb[0].mxu0 }
 0x11e   : > { %v1017_v50 = vpop.f32.mrb[0].mxu1  ;;  %v990_v51 = vpop.f32.mrb[1].mxu0 }
 0x11f   : > { %v991_v52 = vadd.f32 %v990_v51, %v989_v49  ;;  %v1018_v53 = vpop.f32.mrb[1].mxu1  ;;  %v992_v54 = vpop.f32.mrb[2].mxu0 }
 0x120   : > { %v1019_v55 = vadd.f32 %v1018_v53, %v1017_v50  ;;  %v1020_v56 = vpop.f32.mrb[2].mxu1  ;;  %v993_v57 = vpop.f32.mrb[3].mxu0 }
 0x121   : > { %v994_v59 = vadd.f32 %v993_v57, %v992_v54  ;;  %v1021_v60 = vpop.f32.mrb[3].mxu1 }
 0x122   : > { %v729_v61 = vadd.f32 %v1019_v55, %v991_v52  ;;  %v1022_v62 = vadd.f32 %v1021_v60, %v1020_v56 }
 0x124   : > { %v743_v0 = vadd.f32 %v729_v61, %v337_v58  ;;  %v732_v1 = vadd.f32 %v1022_v62, %v994_v59 }
 0x125   : > { %v995_v2 = vpop.f32.mrb[4].mxu0 }
 0x126   : > { %747 = vst [vmem:[#allocation2] sm:$0xff] %v743_v0  ;;  %v744_v3 = vadd.f32 %v732_v1, %v338_v63  ;;  %v1023_v4 = vpop.f32.mrb[4].mxu1  ;;  %v996_v5 = vpop.f32.mrb[5].mxu0 }
 0x127   : > { %v997_v6 = vadd.f32 %v996_v5, %v995_v2  ;;  %v1024_v7 = vpop.f32.mrb[5].mxu1  ;;  %v998_v8 = vpop.f32.mrb[6].mxu0 }
 0x128   : > { %748 = vst [vmem:[#allocation2 + $0x8] sm:$0xff] %v744_v3  ;;  %v1025_v9 = vadd.f32 %v1024_v7, %v1023_v4  ;;  %v1026_v10 = vpop.f32.mrb[6].mxu1  ;;  %v999_v11 = vpop.f32.mrb[7].mxu0 }
 0x129   : > { %v1000_v13 = vadd.f32 %v999_v11, %v998_v8  ;;  %v1027_v14 = vpop.f32.mrb[7].mxu1 }
 0x12a   : > { %v737_v15 = vadd.f32 %v1025_v9, %v997_v6  ;;  %v1028_v16 = vadd.f32 %v1027_v14, %v1026_v10  ;;  %754 = sbr.rel (%p965_p11) target bundleno = 319 (0x13f), region = 67 }
 0x12c   : > { %v745_v18 = vadd.f32 %v737_v15, %v339_v12  ;;  %v740_v19 = vadd.f32 %v1028_v16, %v1000_v13 }
 0x12d   : > { %v755_v21 = vld [vmem:[#allocation2] sm:$0xff] (!%p965_p11) }
 0x12e   : > { %749 = vst [vmem:[#allocation2 + $0x10] sm:$0xff] %v745_v18  ;;  %v746_v20 = vadd.f32 %v740_v19, %v340_v17  ;;  %v766_v24 = vmul.f32 (!%p965_p11), %v966_v22, %v755_v21 }
 0x12f   : > { %v756_v25 = vld [vmem:[#allocation2 + $0x8] sm:$0xff] (!%p965_p11) }
 0x130   : > { %750 = vst [vmem:[#allocation2 + $0x18] sm:$0xff] %v746_v20  ;;  %v767_v28 = vmul.f32 (!%p965_p11), %v966_v22, %v756_v25  ;;  %v777_v31 = vadd.f32 (!%p965_p11), %v967_v23, %v766_v24 }
 0x132   : > { %v778_v32 = vadd.f32 %v967_v23, %v767_v28  ;;  %v781_v35 = vmax.f32 %v777_v31, 0.0 }
 0x134   : > { %v782_v36 = vmax.f32 %v778_v32, 0.0  ;;  %785 = vst [vmem:[%s1313_s4] sm:$0xff] %v781_v35 }
 0x135   : > { %v757_v26 = vld [vmem:[#allocation2 + $0x10] sm:$0xff] }
 0x136   : > { %v768_v29 = vmul.f32 %v966_v22, %v757_v26  ;;  %786 = vst [vmem:[%s1313_s4 + $0x8] sm:$0xff] %v782_v36 }
 0x137   : > { %v758_v27 = vld [vmem:[#allocation2 + $0x18] sm:$0xff] }
 0x138   : > { %v769_v30 = vmul.f32 %v966_v22, %v758_v27  ;;  %v779_v33 = vadd.f32 %v967_v23, %v768_v29 }
 0x13a   : > { %v780_v34 = vadd.f32 %v967_v23, %v769_v30  ;;  %v783_v37 = vmax.f32 %v779_v33, 0.0 }
 0x13c   : > { %v784_v38 = vmax.f32 %v780_v34, 0.0  ;;  %787 = vst [vmem:[%s1313_s4 + $0x10] sm:$0xff] %v783_v37 }
 0x13e   : > { %788 = vst [vmem:[%s1313_s4 + $0x18] sm:$0xff] %v784_v38 }
 0x13f PF: > { %s14_s19 = sadd.s32 1, %s1152_s19   ;;  %s1314_s15 = smov %s1140_s16 }
 0x140   : > { %p11_p12 = scmp.ge.s32.totalorder %s14_s19, 4   ;;  %s1315_s16 = smov %s1215_s23 }
 0x141   : > { %s1316_s17 = smov %s1148_s18  ;;  %s1317_s18 = smov %s1319_s20 }
 0x142   :  { %13 = sbr.rel (!%p11_p12) target bundleno = 3 (0x3), region = 111 }

// kernel: _lambda_.127
= control target key start
LH: loop header
LB: loop body
LE: loop exit
PB: predicated region body
PF: predicated region fallthrough
CT: control target
= control target key end

     0   :  { %s664_s1 = inlined_call_operand.vmem [shape: bf16[384,128], index: 1, kind: input, shape index: {}]   ;;  %s665_s0 = inlined_call_operand.vmem [shape: bf16[32,384], index: 0, kind: input, shape index: {}]   ;;  %s666_s2 = inlined_call_operand.vmem [shape: f32[1,128], index: 2, kind: input, shape index: {}]   ;;  %s667_s3 = inlined_call_operand.vmem [shape: f32[1,128], index: 3, kind: input, shape index: {}]   ;;  %s668_s4 = inlined_call_operand.vmem [shape: f32[32,128], index: 4, kind: output, shape index: {}]  }
   0x1   :  { %v499_v0 = vld [vmem:[%s664_s1 + $0x40] sm:$0xff]   ;;  %v502_v3 = vld [vmem:[%s664_s1 + $0x48] sm:$0xff]   ;;  %v505_v6 = vld [vmem:[%s664_s1 + $0x50] sm:$0xff]  }
   0x2   :  { %v500_v1 = vld [vmem:[%s664_s1] sm:$0xff]   ;;  %441 = vmatprep.subr.bf16.mxu0 %v499_v0  ;;  %v503_v4 = vld [vmem:[%s664_s1 + $0x8] sm:$0xff]   ;;  %v506_v7 = vld [vmem:[%s664_s1 + $0x10] sm:$0xff]  }
   0x3   :  { %v501_v2 = vld [vmem:[%s664_s1 + $0x80] sm:$0xff]   ;;  %442 = vmatpush3.bf16.msra.mxu0 %v500_v1  ;;  %v504_v5 = vld [vmem:[%s664_s1 + $0x88] sm:$0xff]   ;;  %v507_v8 = vld [vmem:[%s664_s1 + $0x90] sm:$0xff]  }
   0x4   :  { %479 = vmatprep.subr.bf16.mxu1 %v501_v2  ;;  %443 = vmatprep.subr.bf16.mxu0 %v502_v3  ;;  %v508_v9 = vld [vmem:[%s664_s1 + $0x58] sm:$0xff]   ;;  %v511_v12 = vld [vmem:[%s664_s1 + $0x60] sm:$0xff]   ;;  %v514_v15 = vld [vmem:[%s664_s1 + $0x68] sm:$0xff]  }
   0x5   :  { %480 = vmatpush3.bf16.msra.mxu1 %v501_v2  ;;  %v509_v10 = vld [vmem:[%s664_s1 + $0x18] sm:$0xff]   ;;  %v513_v13 = vld [vmem:[%s664_s1 + $0xa0] sm:$0xff]   ;;  %v516_v16 = vld [vmem:[%s664_s1 + $0xa8] sm:$0xff]  }
   0x6   :  { %481 = vmatprep.subr.bf16.mxu1 %v504_v5  ;;  %v510_v11 = vld [vmem:[%s664_s1 + $0x98] sm:$0xff]   ;;  %v512_v14 = vld [vmem:[%s664_s1 + $0x20] sm:$0xff]   ;;  %v515_v17 = vld [vmem:[%s664_s1 + $0x28] sm:$0xff]  }
   0x7   :  { %444 = vmatpush3.bf16.msra.mxu0 %v503_v4  ;;  %v517_v18 = vld [vmem:[%s664_s1 + $0x70] sm:$0xff]   ;;  %v520_v21 = vld [vmem:[%s664_s1 + $0x78] sm:$0xff]   ;;  %v523_v26 = vld [vmem:[%s665_s0] ss:$12 sps:$4 sm:$0xff]  }
   0x8   :  { %445 = vmatprep.subr.bf16.mxu0 %v505_v6  ;;  %v518_v19 = vld [vmem:[%s664_s1 + $0x30] sm:$0xff]   ;;  %v522_v22 = vld [vmem:[%s664_s1 + $0xb8] sm:$0xff]   ;;  %v527_v28 = vld [vmem:[%s665_s0 + $0x20] ss:$12 sps:$4 sm:$0xff]  }
   0x9   :  { %482 = vmatpush3.bf16.msra.mxu1 %v504_v5  ;;  %v519_v20 = vld [vmem:[%s664_s1 + $0xb0] sm:$0xff]   ;;  %v521_v25 = vld [vmem:[%s664_s1 + $0x38] sm:$0xff]   ;;  %v439_v37 = vld [vmem:[%s666_s2] ss:$0 sm:$0xff] }
   0xa   :  { %483 = vmatprep.subr.bf16.mxu1 %v507_v8  ;;  %v525_v23 = vld [vmem:[%s665_s0 + $0x4] ss:$12 sps:$4 sm:$0xff]   ;;  %v526_v24 = vld [vmem:[%s665_s0 + $0x8] ss:$12 sps:$4 sm:$0xff]   ;;  %v440_v41 = vld [vmem:[%s667_s3] ss:$0 sm:$0xff] }
   0xb   :  { %446 = vmatpush3.bf16.msra.mxu0 %v506_v7  ;;  %294 = vmatprep.mubr.bf16.mxu0 %v525_v23  ;;  %v528_v27 = vld [vmem:[%s665_s0 + $0x1c] ss:$12 sps:$4 sm:$0xff]   ;;  %v530_v29 = vld [vmem:[%s665_s0 + $0x18] ss:$12 sps:$4 sm:$0xff]  }
   0xc   :  { %447 = vmatprep.subr.bf16.mxu0 %v508_v9  ;;  %495 = vmatprep.mubr.bf16.mxu1 %v526_v24 }
   0xd   :  { %484 = vmatpush3.bf16.msra.mxu1 %v507_v8 }
   0xe   :  { %485 = vmatprep.subr.bf16.mxu1 %v510_v11 }
   0xf   :  { %448 = vmatpush3.bf16.msra.mxu0 %v509_v10 }
  0x10   :  { %449 = vmatprep.subr.bf16.mxu0 %v511_v12 }
  0x11   :  { %486 = vmatpush3.bf16.msra.mxu1 %v510_v11 }
  0x12   :  { %487 = vmatprep.subr.bf16.mxu1 %v513_v13 }
  0x13   :  { %450 = vmatpush3.bf16.msra.mxu0 %v512_v14 }
  0x14   :  { %451 = vmatprep.subr.bf16.mxu0 %v514_v15 }
  0x15   :  { %488 = vmatpush3.bf16.msra.mxu1 %v513_v13 }
  0x16   :  { %489 = vmatprep.subr.bf16.mxu1 %v516_v16 }
  0x17   :  { %452 = vmatpush3.bf16.msra.mxu0 %v515_v17 }
  0x18   :  { %453 = vmatprep.subr.bf16.mxu0 %v517_v18 }
  0x19   :  { %490 = vmatpush3.bf16.msra.mxu1 %v516_v16 }
  0x1a   :  { %491 = vmatprep.subr.bf16.mxu1 %v519_v20 }
  0x1b   :  { %454 = vmatpush3.bf16.msra.mxu0 %v518_v19 }
  0x1c   :  { %455 = vmatprep.subr.bf16.mxu0 %v520_v21 }
  0x1d   :  { %492 = vmatpush3.bf16.msra.mxu1 %v519_v20 }
  0x1e   :  { %493 = vmatprep.subr.bf16.mxu1 %v522_v22 }
  0x1f   :  { %456 = vmatpush3.bf16.msra.mxu0 %v521_v25 }
  0x21   :  { %494 = vmatpush3.bf16.msra.mxu1 %v522_v22 }
  0x22   :  { %295 = vmatmul.mubr.bf16.vlgmr.msra.gmra.mrb[0].mxu0 %v523_v26 }
  0x23   :  { %302 = vmatprep.mubr.bf16.mxu0 %v528_v27 }
  0x24   :  { %496 = vmatmul.mubr.bf16.vlgmr.msra.gmra.mrb[0].mxu1 %v527_v28 }
  0x2a   :  { %303 = vmatmul.mubr.bf16.gmra.mrb[4].mxu0 %v530_v29 }
  0xf5   :  { %v457_v30 = vpop.f32.mrb[0].mxu0 }
  0xf6   :  { %v458_v31 = vpop.f32.mrb[1].mxu0 }
  0xf7   :  { %v459_v32 = vadd.f32 %v458_v31, %v457_v30  ;;  %v460_v33 = vpop.f32.mrb[2].mxu0  ;;  %v497_v34 = vpop.f32.mrb[0].mxu1 }
  0xf8   :  { %v461_v35 = vpop.f32.mrb[3].mxu0  ;;  %v345_v36 = vpop.f32.mrb[1].mxu1 }
  0xf9   :  { %v462_v38 = vadd.f32 %v461_v35, %v460_v33  ;;  %v346_v39 = vadd.f32 %v459_v32, %v345_v36  ;;  %v498_v40 = vpop.f32.mrb[2].mxu1 }
  0xfa   :  { %v348_v42 = vpop.f32.mrb[3].mxu1 }
  0xfb   :  { %v382_v43 = vmul.f32 %v439_v37, %v346_v39  ;;  %v349_v44 = vadd.f32 %v462_v38, %v348_v42 }
  0xfd   :  { %v393_v45 = vadd.f32 %v440_v41, %v382_v43  ;;  %v383_v46 = vmul.f32 %v439_v37, %v349_v44  ;;  %v463_v47 = vpop.f32.mrb[4].mxu0 }
  0xfe   :  { %v464_v48 = vpop.f32.mrb[5].mxu0 }
  0xff   :  { %v397_v49 = vmax.f32 %v393_v45, 0.0  ;;  %v394_v50 = vadd.f32 %v440_v41, %v383_v46  ;;  %v465_v51 = vadd.f32 %v464_v48, %v463_v47  ;;  %v466_v52 = vpop.f32.mrb[6].mxu0 }
 0x100   :  { %v467_v53 = vpop.f32.mrb[7].mxu0 }
 0x101   :  { %401 = vst [vmem:[%s668_s4] sm:$0xff] %v397_v49  ;;  %v398_v54 = vmax.f32 %v394_v50, 0.0  ;;  %v354_v55 = vadd.f32 %v497_v34, %v465_v51  ;;  %v468_v56 = vadd.f32 %v467_v53, %v466_v52 }
 0x103   :  { %402 = vst [vmem:[%s668_s4 + $0x8] sm:$0xff] %v398_v54  ;;  %v384_v57 = vmul.f32 %v439_v37, %v354_v55  ;;  %v357_v58 = vadd.f32 %v498_v40, %v468_v56 }
 0x105   :  { %v395_v59 = vadd.f32 %v440_v41, %v384_v57  ;;  %v385_v60 = vmul.f32 %v439_v37, %v357_v58 }
 0x107   :  { %v399_v61 = vmax.f32 %v395_v59, 0.0  ;;  %v396_v62 = vadd.f32 %v440_v41, %v385_v60 }
 0x109   :  { %403 = vst [vmem:[%s668_s4 + $0x10] sm:$0xff] %v399_v61  ;;  %v400_v63 = vmax.f32 %v396_v62, 0.0 }
 0x10b   :  { %404 = vst [vmem:[%s668_s4 + $0x18] sm:$0xff] %v400_v63 }

// kernel: _lambda_.128
= control target key start
LH: loop header
LB: loop body
LE: loop exit
PB: predicated region body
PF: predicated region fallthrough
CT: control target
= control target key end

     0   :  { %s310_s9 = smov 0   ;;  %s338_s0 = inlined_call_operand.vmem [shape: f32[8,4,1], index: 0, kind: input, shape index: {}]   ;;  %s339_s1 = inlined_call_operand.vmem [shape: f32[8,4,64], index: 1, kind: input, shape index: {}]   ;;  %s340_s2 = inlined_call_operand.vmem [shape: f32[8,4,64], index: 2, kind: output, shape index: {}]  }
   0x1 LB: > { %s258_s10 = sadd.s32 4294967295, %s292_s9   ;;  %p262_p0 = scmp.ge.s32.totalorder %s292_s9, 1  ;;  %s292_s9 = sphi %s310_s9, %s12_s9  }
   0x2   : > { %p120_p1 = scmp.lt.s32.totalorder %s292_s9, 9 }
   0x4   : > { %p121_p2 = pnand %p262_p0, %p120_p1 }
   0x5   : > { %p144_p3 = scmp.lt.s32.totalorder (!%p121_p2), %s258_s10, 7  ;;  %v294_v0 = vmov (!%p121_p2), 0   ;;  %vm172_vm0 = vcmask (!%p121_p2), 519168  }
   0x6   : > { %124 = sbr.rel (%p121_p2) target bundleno = 204 (0xcc), region = 28  ;;  %277 = vset.pattern.permute.xlu0 (!%p121_p2), %v294_v0 }
   0xd   : > { %s342_s10 = smov (!%p144_p3, %s258_s10), 7 }
   0xe   : > { %s318_s11 = sshll.u32 %s342_s10, 2 }
   0xf   : > { %s147_s14 = scalar_lea.vmem %s338_s0, %s318_s11  ;;  %s151_s17 = scalar_lea.vmem %s339_s1, %s318_s11 }
  0x10   : > { %v164_v1 = vld [vmem:[%s147_s14] sm:$0xf]  ;;  %s155_s20 = scalar_lea.vmem %s340_s2, %s318_s11 }
  0x11   : > { %167 = vperm.xlu0 %277, %v164_v1   ;;  %v156_v2 = vld [vmem:[%s151_s17] sm:$0xf] }
  0x12   : > { %v157_v3 = vadd.f32 1e-06, %v156_v2 }
  0x14   : > { %278 = vlog2.f32 %v157_v3 }
  0x1e   : > { %v279_v4 = vpop.eup %278 }
  0x1f   : > { %v159_v5 = vmul.f32 0.6931472, %v279_v4 }
  0x21   : > { %v160_v6 = vsub.f32 0.0, %v159_v5 }
  0x23   : > { %v161_v7 = vadd.f32 1e-06, %v160_v6 }
  0x25   : > { %280 = vlog2.f32 %v161_v7 }
  0x2f   : > { %v281_v8 = vpop.eup %280 }
  0x30   : > { %v163_v9 = vmul.f32 0.6931472, %v281_v8 }
  0x90   : > { %v168_v10 = vpop.permute.xlu0 %167 }
  0x91   : > { %v170_v11 = vsub.f32 %v168_v10, %v163_v9 }
  0x93   : > { %v171_v12 = vmul.f32 0.5, %v170_v11 }
  0x95   : > { %v173_v13 = vsel %vm172_vm0, %v171_v12, -inf }
  0x96   : > { %v174_v14 = vrot.slane %v173_v13, 4 }
  0x98   : > { %v175_v15 = vmax.f32 %v173_v13, %v174_v14 }
  0x9a   : > { %v176_v16 = vrot.slane %v175_v15, 2 }
  0x9c   : > { %v177_v17 = vmax.f32 %v175_v15, %v176_v16 }
  0x9e   : > { %v178_v18 = vrot.slane %v177_v17, 1 }
  0xa0   : > { %v179_v19 = vmax.f32 %v177_v17, %v178_v18 }
  0xa2   : > { %v180_v20 = vsub.f32 %v171_v12, %v179_v19 }
  0xa4   : > { %v181_v21 = vmul.f32 1.442695, %v180_v20 }
  0xa6   : > { %282 = vpow2.f32 %v181_v21 }
  0xb0   : > { %v283_v22 = vpop.eup %282 }
  0xb1   : > { %v183_v23 = vsel %vm172_vm0, %v283_v22, 0.0 }
  0xb2   : > { %v184_v24 = vrot.slane %v183_v23, 4 }
  0xb4   : > { %v185_v25 = vadd.f32 %v184_v24, %v183_v23 }
  0xb6   : > { %v186_v26 = vrot.slane %v185_v25, 2 }
  0xb8   : > { %v187_v27 = vadd.f32 %v186_v26, %v185_v25 }
  0xba   : > { %v188_v28 = vrot.slane %v187_v27, 1 }
  0xbc   : > { %v189_v29 = vadd.f32 %v188_v28, %v187_v27 }
  0xbe   : > { %284 = vrcp.f32 %v189_v29 }
  0xc8   : > { %v285_v30 = vpop.eup %284 }
  0xc9   : > { %v191_v31 = vmul.f32 %v285_v30, %v283_v22 }
  0xcb   : > { %192 = vst.msk [vmem:[%s155_s20] sm:$0xf] %vm172_vm0, %v191_v31 }
  0xcc PF: > { %s12_s9 = sadd.s32 1, %s292_s9  }
  0xcd   : > { %p9_p4 = scmp.ge.s32.totalorder %s12_s9, 10  }
  0xcf   :  { %11 = sbr.rel (!%p9_p4) target bundleno = 1 (0x1), region = 61 }

// kernel: _lambda_.129
= control target key start
LH: loop header
LB: loop body
LE: loop exit
PB: predicated region body
PF: predicated region fallthrough
CT: control target
= control target key end

     0   :  { %s738_s1 = inlined_call_operand.vmem [shape: bf16[384,128], index: 1, kind: input, shape index: {}]   ;;  %s739_s0 = inlined_call_operand.vmem [shape: bf16[32,384], index: 0, kind: input, shape index: {}]   ;;  %s740_s2 = inlined_call_operand.vmem [shape: f32[1,128], index: 2, kind: input, shape index: {}]   ;;  %s741_s3 = inlined_call_operand.vmem [shape: f32[1,128], index: 3, kind: input, shape index: {}]   ;;  %s742_s4 = inlined_call_operand.vmem [shape: f32[1,128], index: 4, kind: input, shape index: {}]   ;;  %s743_s5 = inlined_call_operand.vmem [shape: f32[1,128], index: 5, kind: input, shape index: {}]   ;;  %s744_s6 = inlined_call_operand.vmem [shape: f32[32,128], index: 6, kind: input, shape index: {}]   ;;  %s745_s7 = inlined_call_operand.vmem [shape: f32[32,128], index: 7, kind: output, shape index: {}]  }
   0x1   :  { %v540_v0 = vld [vmem:[%s738_s1 + $0x40] sm:$0xff]   ;;  %v543_v3 = vld [vmem:[%s738_s1 + $0x48] sm:$0xff]   ;;  %v546_v6 = vld [vmem:[%s738_s1 + $0x50] sm:$0xff]  }
   0x2   :  { %v541_v1 = vld [vmem:[%s738_s1] sm:$0xff]   ;;  %482 = vmatprep.subr.bf16.mxu0 %v540_v0  ;;  %v544_v4 = vld [vmem:[%s738_s1 + $0x8] sm:$0xff]   ;;  %v547_v7 = vld [vmem:[%s738_s1 + $0x10] sm:$0xff]  }
   0x3   :  { %v542_v2 = vld [vmem:[%s738_s1 + $0x80] sm:$0xff]   ;;  %483 = vmatpush3.bf16.msra.mxu0 %v541_v1  ;;  %v545_v5 = vld [vmem:[%s738_s1 + $0x88] sm:$0xff]   ;;  %v548_v8 = vld [vmem:[%s738_s1 + $0x90] sm:$0xff]  }
   0x4   :  { %520 = vmatprep.subr.bf16.mxu1 %v542_v2  ;;  %484 = vmatprep.subr.bf16.mxu0 %v543_v3  ;;  %v549_v9 = vld [vmem:[%s738_s1 + $0x58] sm:$0xff]   ;;  %v552_v12 = vld [vmem:[%s738_s1 + $0x60] sm:$0xff]   ;;  %v555_v15 = vld [vmem:[%s738_s1 + $0x68] sm:$0xff]  }
   0x5   :  { %521 = vmatpush3.bf16.msra.mxu1 %v542_v2  ;;  %v550_v10 = vld [vmem:[%s738_s1 + $0x18] sm:$0xff]   ;;  %v554_v13 = vld [vmem:[%s738_s1 + $0xa0] sm:$0xff]   ;;  %v557_v16 = vld [vmem:[%s738_s1 + $0xa8] sm:$0xff]  }
   0x6   :  { %522 = vmatprep.subr.bf16.mxu1 %v545_v5  ;;  %v551_v11 = vld [vmem:[%s738_s1 + $0x98] sm:$0xff]   ;;  %v553_v14 = vld [vmem:[%s738_s1 + $0x20] sm:$0xff]   ;;  %v556_v17 = vld [vmem:[%s738_s1 + $0x28] sm:$0xff]  }
   0x7   :  { %485 = vmatpush3.bf16.msra.mxu0 %v544_v4  ;;  %v558_v18 = vld [vmem:[%s738_s1 + $0x70] sm:$0xff]   ;;  %v561_v21 = vld [vmem:[%s738_s1 + $0x78] sm:$0xff]   ;;  %v564_v26 = vld [vmem:[%s739_s0] ss:$12 sps:$4 sm:$0xff]  }
   0x8   :  { %486 = vmatprep.subr.bf16.mxu0 %v546_v6  ;;  %v559_v19 = vld [vmem:[%s738_s1 + $0x30] sm:$0xff]   ;;  %v563_v22 = vld [vmem:[%s738_s1 + $0xb8] sm:$0xff]   ;;  %v568_v28 = vld [vmem:[%s739_s0 + $0x20] ss:$12 sps:$4 sm:$0xff]  }
   0x9   :  { %523 = vmatpush3.bf16.msra.mxu1 %v545_v5  ;;  %v560_v20 = vld [vmem:[%s738_s1 + $0xb0] sm:$0xff]   ;;  %v562_v25 = vld [vmem:[%s738_s1 + $0x38] sm:$0xff]   ;;  %v478_v37 = vld [vmem:[%s740_s2] ss:$0 sm:$0xff] }
   0xa   :  { %524 = vmatprep.subr.bf16.mxu1 %v548_v8  ;;  %v566_v23 = vld [vmem:[%s739_s0 + $0x4] ss:$12 sps:$4 sm:$0xff]   ;;  %v567_v24 = vld [vmem:[%s739_s0 + $0x8] ss:$12 sps:$4 sm:$0xff]   ;;  %v479_v41 = vld [vmem:[%s741_s3] ss:$0 sm:$0xff] }
   0xb   :  { %487 = vmatpush3.bf16.msra.mxu0 %v547_v7  ;;  %303 = vmatprep.mubr.bf16.mxu0 %v566_v23  ;;  %v569_v27 = vld [vmem:[%s739_s0 + $0x1c] ss:$12 sps:$4 sm:$0xff]   ;;  %v571_v29 = vld [vmem:[%s739_s0 + $0x18] ss:$12 sps:$4 sm:$0xff]   ;;  %v480_v48 = vld [vmem:[%s742_s4] ss:$0 sm:$0xff] }
   0xc   :  { %488 = vmatprep.subr.bf16.mxu0 %v549_v9  ;;  %536 = vmatprep.mubr.bf16.mxu1 %v567_v24  ;;  %v481_v54 = vld [vmem:[%s743_s5] ss:$0 sm:$0xff]  ;;  %v433_v1 = vld [vmem:[%s744_s6 + $0x8] sm:$0xff] }
   0xd   :  { %525 = vmatpush3.bf16.msra.mxu1 %v548_v8  ;;  %v432_v60 = vld [vmem:[%s744_s6] sm:$0xff] }
   0xe   :  { %526 = vmatprep.subr.bf16.mxu1 %v551_v11 }
   0xf   :  { %489 = vmatpush3.bf16.msra.mxu0 %v550_v10 }
  0x10   :  { %490 = vmatprep.subr.bf16.mxu0 %v552_v12 }
  0x11   :  { %527 = vmatpush3.bf16.msra.mxu1 %v551_v11  ;;  %v434_v11 = vld [vmem:[%s744_s6 + $0x10] sm:$0xff] }
  0x12   :  { %528 = vmatprep.subr.bf16.mxu1 %v554_v13 }
  0x13   :  { %491 = vmatpush3.bf16.msra.mxu0 %v553_v14  ;;  %v435_v14 = vld [vmem:[%s744_s6 + $0x18] sm:$0xff] }
  0x14   :  { %492 = vmatprep.subr.bf16.mxu0 %v555_v15 }
  0x15   :  { %529 = vmatpush3.bf16.msra.mxu1 %v554_v13 }
  0x16   :  { %530 = vmatprep.subr.bf16.mxu1 %v557_v16 }
  0x17   :  { %493 = vmatpush3.bf16.msra.mxu0 %v556_v17 }
  0x18   :  { %494 = vmatprep.subr.bf16.mxu0 %v558_v18 }
  0x19   :  { %531 = vmatpush3.bf16.msra.mxu1 %v557_v16 }
  0x1a   :  { %532 = vmatprep.subr.bf16.mxu1 %v560_v20 }
  0x1b   :  { %495 = vmatpush3.bf16.msra.mxu0 %v559_v19 }
  0x1c   :  { %496 = vmatprep.subr.bf16.mxu0 %v561_v21 }
  0x1d   :  { %533 = vmatpush3.bf16.msra.mxu1 %v560_v20 }
  0x1e   :  { %534 = vmatprep.subr.bf16.mxu1 %v563_v22 }
  0x1f   :  { %497 = vmatpush3.bf16.msra.mxu0 %v562_v25 }
  0x21   :  { %535 = vmatpush3.bf16.msra.mxu1 %v563_v22 }
  0x22   :  { %304 = vmatmul.mubr.bf16.vlgmr.msra.gmra.mrb[0].mxu0 %v564_v26 }
  0x23   :  { %311 = vmatprep.mubr.bf16.mxu0 %v569_v27 }
  0x24   :  { %537 = vmatmul.mubr.bf16.vlgmr.msra.gmra.mrb[0].mxu1 %v568_v28 }
  0x2a   :  { %312 = vmatmul.mubr.bf16.gmra.mrb[4].mxu0 %v571_v29 }
  0xf5   :  { %v498_v30 = vpop.f32.mrb[0].mxu0 }
  0xf6   :  { %v499_v31 = vpop.f32.mrb[1].mxu0 }
  0xf7   :  { %v500_v32 = vadd.f32 %v499_v31, %v498_v30  ;;  %v501_v33 = vpop.f32.mrb[2].mxu0  ;;  %v538_v34 = vpop.f32.mrb[0].mxu1 }
  0xf8   :  { %v502_v35 = vpop.f32.mrb[3].mxu0  ;;  %v354_v36 = vpop.f32.mrb[1].mxu1 }
  0xf9   :  { %v503_v38 = vadd.f32 %v502_v35, %v501_v33  ;;  %v355_v39 = vadd.f32 %v500_v32, %v354_v36  ;;  %v539_v40 = vpop.f32.mrb[2].mxu1 }
  0xfa   :  { %v357_v42 = vpop.f32.mrb[3].mxu1 }
  0xfb   :  { %v391_v43 = vmul.f32 %v478_v37, %v355_v39  ;;  %v358_v44 = vadd.f32 %v503_v38, %v357_v42 }
  0xfd   :  { %v402_v45 = vadd.f32 %v479_v41, %v391_v43  ;;  %v392_v46 = vmul.f32 %v478_v37, %v358_v44  ;;  %v504_v47 = vpop.f32.mrb[4].mxu0 }
  0xfe   :  { %v505_v49 = vpop.f32.mrb[5].mxu0 }
  0xff   :  { %v406_v50 = vmax.f32 %v402_v45, 0.0  ;;  %v403_v51 = vadd.f32 %v479_v41, %v392_v46  ;;  %v506_v52 = vadd.f32 %v505_v49, %v504_v47  ;;  %v507_v53 = vpop.f32.mrb[6].mxu0 }
 0x100   :  { %v508_v55 = vpop.f32.mrb[7].mxu0 }
 0x101   :  { %v417_v56 = vmul.f32 %v480_v48, %v406_v50  ;;  %v407_v57 = vmax.f32 %v403_v51, 0.0  ;;  %v363_v58 = vadd.f32 %v538_v34, %v506_v52  ;;  %v509_v59 = vadd.f32 %v508_v55, %v507_v53 }
 0x103   :  { %v428_v61 = vadd.f32 %v481_v54, %v417_v56  ;;  %v418_v62 = vmul.f32 %v480_v48, %v407_v57  ;;  %v393_v63 = vmul.f32 %v478_v37, %v363_v58  ;;  %v366_v0 = vadd.f32 %v539_v40, %v509_v59 }
 0x105   :  { %v436_v2 = vmul.f32 %v432_v60, %v428_v61  ;;  %v429_v3 = vadd.f32 %v481_v54, %v418_v62  ;;  %v404_v4 = vadd.f32 %v479_v41, %v393_v63  ;;  %v394_v5 = vmul.f32 %v478_v37, %v366_v0 }
 0x107   :  { %440 = vst [vmem:[%s745_s7] sm:$0xff] %v436_v2  ;;  %v437_v6 = vmul.f32 %v433_v1, %v429_v3  ;;  %v408_v7 = vmax.f32 %v404_v4, 0.0  ;;  %v405_v8 = vadd.f32 %v479_v41, %v394_v5 }
 0x109   :  { %441 = vst [vmem:[%s745_s7 + $0x8] sm:$0xff] %v437_v6  ;;  %v419_v9 = vmul.f32 %v480_v48, %v408_v7  ;;  %v409_v10 = vmax.f32 %v405_v8, 0.0 }
 0x10b   :  { %v430_v12 = vadd.f32 %v481_v54, %v419_v9  ;;  %v420_v13 = vmul.f32 %v480_v48, %v409_v10 }
 0x10d   :  { %v438_v15 = vmul.f32 %v434_v11, %v430_v12  ;;  %v431_v16 = vadd.f32 %v481_v54, %v420_v13 }
 0x10f   :  { %442 = vst [vmem:[%s745_s7 + $0x10] sm:$0xff] %v438_v15  ;;  %v439_v17 = vmul.f32 %v435_v14, %v431_v16 }
 0x111   :  { %443 = vst [vmem:[%s745_s7 + $0x18] sm:$0xff] %v439_v17 }

// kernel: _lambda_.135
= control target key start
LH: loop header
LB: loop body
LE: loop exit
PB: predicated region body
PF: predicated region fallthrough
CT: control target
= control target key end

     0   :  { %s252_s6 = smov 0   ;;  %s273_s0 = inlined_call_operand.vmem [shape: f32[2,4,256], index: 0, kind: input, shape index: {}]   ;;  %s274_s1 = inlined_call_operand.vmem [shape: f32[2,1,256], index: 1, kind: output, shape index: {}]  }
   0x1 LB: > { %s212_s7 = sadd.s32 4294967295, %s239_s6   ;;  %p216_p0 = scmp.ge.s32.totalorder %s239_s6, 1  ;;  %s239_s6 = sphi %s252_s6, %s11_s6  }
   0x2   : > { %p87_p1 = scmp.lt.s32.totalorder %s239_s6, 3 }
   0x4   : > { %p88_p2 = pnand %p216_p0, %p87_p1 }
   0x5   : > { %p106_p3 = scmp.lt.s32.totalorder (!%p88_p2), %s212_s7, 1  ;;  %vm119_vm0 = vcmask (!%p88_p2), 1043456   ;;  %v241_v11 = vmov (!%p88_p2), 1966171168   ;;  %v142_v13 = vlaneseq (!%p88_p2) }
   0x6   : > { %91 = sbr.rel (%p88_p2) target bundleno = 41 (0x29), region = 24  ;;  %v140_v12 = vunpack.c.l.s4 (!%p88_p2), %v241_v11 }
   0x7   : > { %v143_v19 = vshrl.u32 (!%p88_p2), %v142_v13, 7  ;;  %vm156_vm1 = vcmp.lt.s32.totalorder (!%p88_p2), %v142_v13, 256 }
   0x8   : > { %v141_v18 = vunpack.c.0.s8 (!%p88_p2), %v140_v12 }
   0xa   : > { %v144_v23 = vsub.s32 (!%p88_p2), %v141_v18, %v143_v19 }
   0xd   : > { %s276_s7 = smov (!%p106_p3, %s212_s7), 1 }
   0xe   : > { %s222_s8 = sshll.u32 %s276_s7, 3  ;;  %s219_s12 = sshll.u32 %s276_s7, 1 }
   0xf   : > { %s110_s11 = scalar_lea.vmem %s273_s0, %s222_s8  ;;  %s114_s15 = scalar_lea.vmem %s274_s1, %s219_s12 }
  0x10   : > { %v115_v0 = vld [vmem:[%s110_s11] sm:$0xff] }
  0x11   : > { %v117_v1 = vcombine.high %v115_v0, %v115_v0  ;;  %v120_v2 = vsel %vm119_vm0, %v115_v0, 0.0 }
  0x12   : > { %v121_v3 = vrot.slane %v120_v2, 4 }
  0x13   : > { %v127_v4 = vsel %vm119_vm0, %v117_v1, 0.0 }
  0x14   : > { %v122_v5 = vadd.f32 %v121_v3, %v120_v2  ;;  %v128_v6 = vrot.slane %v127_v4, 4 }
  0x16   : > { %v123_v7 = vrot.slane %v122_v5, 2  ;;  %v129_v8 = vadd.f32 %v128_v6, %v127_v4 }
  0x18   : > { %v124_v9 = vadd.f32 %v123_v7, %v122_v5  ;;  %v130_v10 = vrot.slane %v129_v8, 2 }
  0x1a   : > { %v125_v14 = vrot.slane %v124_v9, 1  ;;  %v131_v15 = vadd.f32 %v130_v10, %v129_v8 }
  0x1c   : > { %v126_v16 = vadd.f32 %v125_v14, %v124_v9  ;;  %v132_v17 = vrot.slane %v131_v15, 1 }
  0x1e   : > { %v133_v20 = vadd.f32 %v132_v17, %v131_v15  ;;  %v134_v21 = vmul.f32 0.25, %v126_v16 }
  0x20   : > { %v135_v22 = vmul.f32 0.25, %v133_v20 }
  0x22   : > { %v138_v24 = vcombine.low %v134_v21, %v135_v22 }
  0x24   : > { %v145_v25 = vrot.slane %v138_v24, %v144_v23 }
  0x26   : > { %v152_v26 = vrot.slane %v145_v25, %v144_v23 }
  0x28   : > { %158 = vst.msk [vmem:[%s114_s15] sm:$0x3] %vm156_vm1, %v152_v26 }
  0x29 PF: > { %s11_s6 = sadd.s32 1, %s239_s6  }
  0x2a   : > { %p8_p4 = scmp.ge.s32.totalorder %s11_s6, 4  }
  0x2c   :  { %10 = sbr.rel (!%p8_p4) target bundleno = 1 (0x1), region = 54 }

// kernel: _lambda_.137
= control target key start
LH: loop header
LB: loop body
LE: loop exit
PB: predicated region body
PF: predicated region fallthrough
CT: control target
= control target key end

     0   :  { %vm10_vm0 = vcmask 31744   ;;  %s50_s0 = inlined_call_operand.vmem [shape: f32[8,4], index: 0, kind: input, shape index: {}]   ;;  %s51_s1 = inlined_call_operand.vmem [shape: f32[8,4], index: 1, kind: output, shape index: {}]  }
   0x1   :  { %v8_v0 = vld [vmem:[%s50_s0] sm:$0xff] }
   0x2   :  { %v9_v1 = vmul.f32 0.5, %v8_v0 }
   0x4   :  { %v11_v2 = vsel %vm10_vm0, %v9_v1, -inf }
   0x5   :  { %12 = vmax.xlane.f32.xlu0 %v11_v2 }
  0x92   :  { %v13_v3 = vpop.xlane.xlu0 %12 }
  0x93   :  { %v14_v4 = vsub.f32 %v9_v1, %v13_v3 }
  0x95   :  { %v15_v5 = vmul.f32 1.442695, %v14_v4 }
  0x97   :  { %27 = vpow2.f32 %v15_v5 }
  0xa1   :  { %v28_v6 = vpop.eup %27 }
  0xa2   :  { %v17_v7 = vsel %vm10_vm0, %v28_v6, 0.0 }
  0xa3   :  { %18 = vadd.xlane.f32.xlu0 %v17_v7 }
 0x130   :  { %v19_v8 = vpop.xlane.xlu0 %18 }
 0x131   :  { %29 = vrcp.f32 %v19_v8 }
 0x13b   :  { %v30_v9 = vpop.eup %29 }
 0x13c   :  { %v21_v10 = vmul.f32 %v30_v9, %v28_v6 }
 0x13e   :  { %22 = vst.msk [vmem:[%s51_s1] sm:$0xff] %vm10_vm0, %v21_v10 }

// kernel: _lambda_.130
= control target key start
LH: loop header
LB: loop body
LE: loop exit
PB: predicated region body
PF: predicated region fallthrough
CT: control target
= control target key end

     0   :  { %s1145_s21 = smov 0   ;;  %s1147_s22 = smov 0   ;;  %s1237_s0 = inlined_call_operand.vmem [shape: bf16[8,1024], index: 0, kind: input, shape index: {}]   ;;  %s1238_s1 = inlined_call_operand.vmem [shape: bf16[1024,128], index: 1, kind: input, shape index: {}]   ;;  %s1239_s2 = inlined_call_operand.vmem [shape: f32[1,128], index: 2, kind: input, shape index: {}]   ;;  %s1240_s3 = inlined_call_operand.vmem [shape: f32[1,128], index: 3, kind: input, shape index: {}]   ;;  %s1241_s4 = inlined_call_operand.vmem [shape: f32[1,128], index: 4, kind: input, shape index: {}]   ;;  %s1242_s5 = inlined_call_operand.vmem [shape: f32[1,128], index: 5, kind: input, shape index: {}]   ;;  %s1243_s6 = inlined_call_operand.vmem [shape: f32[8,128], index: 6, kind: output, shape index: {}]  }
   0x1   :  { %s1149_s23 = smov 0  }
   0x2 LB: > { %s28_s24 = sadd.s32 1, %s1103_s22  ;;  %p930_p0 = scmp.ge.s32.totalorder %s1107_s23, 1  ;;  %s1107_s23 = sphi %s1149_s23, %s16_s23   ;;  %s1103_s22 = sphi %s1147_s22, %s1245_s22   ;;  %s1099_s21 = sphi %s1145_s21, %s1244_s21  }
   0x3   : > { %p29_p1 = scmp.ge.s32.totalorder %s28_s24, 2  ;;  %p288_p2 = scmp.lt.s32.totalorder %s1107_s23, 3 }
   0x5   : > { %s1247_s24 = smov (%p29_p1, %s28_s24), 0  ;;  %p289_p3 = pnand %p930_p0, %p288_p2 }
   0x6   : > { %s931_s25 = sshll.u32 (!%p289_p3), %s1099_s21, 2  ;;  %s933_s26 = sshll.u32 (!%p289_p3), %s1099_s21, 6 }
   0x7   : > { %292 = sbr.rel (%p289_p3) target bundleno = 297 (0x129), region = 44  ;;  %p347_p4 = scmp.lt.s32.totalorder (!%p289_p3), %s931_s25, 7 }
   0x8   : > { %p355_p5 = scmp.lt.s32.totalorder (!%p289_p3), %s933_s26, 127  ;;  %p935_p6 = scmp.ne.s32.totalorder (!%p289_p3), %s1099_s21, 0 }
   0xe   : > { %s1249_s25 = smov (!%p347_p4, %s931_s25), 7  ;;  %s1251_s26 = smov (!%p355_p5, %s933_s26), 127 }
   0xf   : > { %s932_s27 = sshll.u32 %s1249_s25, 2  ;;  %s934_s7 = sshll.u32 %s1251_s26, 2  ;;  %v1109_v0 = vmov (!%p935_p6), 0.0  }
  0x10   : > { %s1170_s30 = scalar_lea.vmem %s1237_s0, %s932_s27  ;;  %s1175_s10 = scalar_lea.vmem %s1238_s1, %s934_s7  ;;  %387 = vst [vmem:[#allocation2] sm:$0xff] (!%p935_p6), %v1109_v0 }
  0x11   : > { %386 = sbr.rel (%p935_p6) target bundleno = 24 (0x18), region = 48 }
  0x18 PF: > { %v1049_v1 = vld [vmem:[%s1175_s10 + $0x40] sm:$0xff]   ;;  %v1053_v5 = vld [vmem:[%s1175_s10 + $0x48] sm:$0xff]   ;;  %v1057_v9 = vld [vmem:[%s1175_s10 + $0x50] sm:$0xff]   ;;  %p972_p7 = scmp.ne.s32.totalorder %s1099_s21, 1 }
  0x19   : > { %v1050_v2 = vld [vmem:[%s1175_s10 + $0xc0] sm:$0xff]   ;;  %980 = vmatprep.subr.bf16.mxu0 %v1049_v1  ;;  %v1054_v6 = vld [vmem:[%s1175_s10 + $0xc8] sm:$0xff]   ;;  %v1058_v10 = vld [vmem:[%s1175_s10 + $0xd0] sm:$0xff]  }
  0x1a   : > { %v1051_v3 = vld [vmem:[%s1175_s10] sm:$0xff]   ;;  %1002 = vmatprep.subr.bf16.mxu1 %v1050_v2  ;;  %v1055_v7 = vld [vmem:[%s1175_s10 + $0x8] sm:$0xff]   ;;  %v1059_v11 = vld [vmem:[%s1175_s10 + $0x10] sm:$0xff]  }
  0x1b   : > { %v1052_v4 = vld [vmem:[%s1175_s10 + $0x80] sm:$0xff]   ;;  %981 = vmatpush3.bf16.msra.mxu0 %v1051_v3  ;;  %v1056_v8 = vld [vmem:[%s1175_s10 + $0x88] sm:$0xff]   ;;  %v1060_v12 = vld [vmem:[%s1175_s10 + $0x90] sm:$0xff]  }
  0x1c   : > { %1003 = vmatpush3.bf16.msra.mxu1 %v1052_v4  ;;  %982 = vmatprep.subr.bf16.mxu0 %v1053_v5  ;;  %v1061_v13 = vld [vmem:[%s1175_s10 + $0x58] sm:$0xff]   ;;  %v1065_v17 = vld [vmem:[%s1175_s10 + $0x60] sm:$0xff]   ;;  %v1069_v21 = vld [vmem:[%s1175_s10 + $0x68] sm:$0xff]  }
  0x1d   : > { %1004 = vmatprep.subr.bf16.mxu1 %v1054_v6  ;;  %v1062_v14 = vld [vmem:[%s1175_s10 + $0xd8] sm:$0xff]   ;;  %v1066_v18 = vld [vmem:[%s1175_s10 + $0xe0] sm:$0xff]   ;;  %v1070_v22 = vld [vmem:[%s1175_s10 + $0xe8] sm:$0xff]  }
  0x1e   : > { %v1063_v15 = vld [vmem:[%s1175_s10 + $0x18] sm:$0xff]   ;;  %v1067_v19 = vld [vmem:[%s1175_s10 + $0x20] sm:$0xff]   ;;  %v1071_v23 = vld [vmem:[%s1175_s10 + $0x28] sm:$0xff]  }
  0x1f   : > { %983 = vmatpush3.bf16.msra.mxu0 %v1055_v7  ;;  %v1064_v16 = vld [vmem:[%s1175_s10 + $0x98] sm:$0xff]   ;;  %v1068_v20 = vld [vmem:[%s1175_s10 + $0xa0] sm:$0xff]   ;;  %v1072_v24 = vld [vmem:[%s1175_s10 + $0xa8] sm:$0xff]  }
  0x20   : > { %1005 = vmatpush3.bf16.msra.mxu1 %v1056_v8  ;;  %984 = vmatprep.subr.bf16.mxu0 %v1057_v9  ;;  %v1073_v25 = vld [vmem:[%s1175_s10 + $0x70] sm:$0xff]   ;;  %v1077_v29 = vld [vmem:[%s1175_s10 + $0x78] sm:$0xff]   ;;  %v389_v33 = vld [vmem:[%s1170_s30] sm:$0xff] }
  0x21   : > { %1006 = vmatprep.subr.bf16.mxu1 %v1058_v10  ;;  %v1074_v26 = vld [vmem:[%s1175_s10 + $0xf0] sm:$0xff]   ;;  %v1078_v30 = vld [vmem:[%s1175_s10 + $0xf8] sm:$0xff]   ;;  %v390_v34 = vld [vmem:[%s1170_s30 + $0x8] sm:$0xff]  ;;  %v936_v35 = vcombine.low %v389_v33, %v389_v33  ;;  %v937_v36 = vcombine.high %v389_v33, %v389_v33 }
  0x22   : > { %v1075_v27 = vld [vmem:[%s1175_s10 + $0x30] sm:$0xff]   ;;  %v1079_v31 = vld [vmem:[%s1175_s10 + $0x38] sm:$0xff]   ;;  %v938_v37 = vcombine.low %v390_v34, %v390_v34  ;;  %v939_v38 = vcombine.high %v390_v34, %v390_v34  ;;  %v388_v47 = vld [vmem:[#allocation2] sm:$0xff] }
  0x23   : > { %985 = vmatpush3.bf16.msra.mxu0 %v1059_v11  ;;  %v1076_v28 = vld [vmem:[%s1175_s10 + $0xb0] sm:$0xff]   ;;  %v1080_v32 = vld [vmem:[%s1175_s10 + $0xb8] sm:$0xff]   ;;  %693 = vmatprep.mubr.bf16.mxu0 %v937_v36  ;;  %v973_v53 = vld [vmem:[%s1239_s2] ss:$0 sm:$0xff] (!%p972_p7) }
  0x24   : > { %1007 = vmatpush3.bf16.msra.mxu1 %v1060_v12  ;;  %986 = vmatprep.subr.bf16.mxu0 %v1061_v13  ;;  %v974_v54 = vld [vmem:[%s1240_s3] ss:$0 sm:$0xff] (!%p972_p7) }
  0x25   : > { %1008 = vmatprep.subr.bf16.mxu1 %v1062_v14  ;;  %733 = vmatprep.mubr.bf16.mxu1 %v939_v38  ;;  %v975_v57 = vld [vmem:[%s1241_s4] ss:$0 sm:$0xff] (!%p972_p7) }
  0x26   : > { %v976_v59 = vld [vmem:[%s1242_s5] ss:$0 sm:$0xff] (!%p972_p7) }
  0x27   : > { %987 = vmatpush3.bf16.msra.mxu0 %v1063_v15 }
  0x28   : > { %1009 = vmatpush3.bf16.msra.mxu1 %v1064_v16  ;;  %988 = vmatprep.subr.bf16.mxu0 %v1065_v17 }
  0x29   : > { %1010 = vmatprep.subr.bf16.mxu1 %v1066_v18 }
  0x2b   : > { %989 = vmatpush3.bf16.msra.mxu0 %v1067_v19 }
  0x2c   : > { %1011 = vmatpush3.bf16.msra.mxu1 %v1068_v20  ;;  %990 = vmatprep.subr.bf16.mxu0 %v1069_v21 }
  0x2d   : > { %1012 = vmatprep.subr.bf16.mxu1 %v1070_v22 }
  0x2f   : > { %991 = vmatpush3.bf16.msra.mxu0 %v1071_v23 }
  0x30   : > { %1013 = vmatpush3.bf16.msra.mxu1 %v1072_v24  ;;  %992 = vmatprep.subr.bf16.mxu0 %v1073_v25 }
  0x31   : > { %1014 = vmatprep.subr.bf16.mxu1 %v1074_v26 }
  0x33   : > { %993 = vmatpush3.bf16.msra.mxu0 %v1075_v27 }
  0x34   : > { %1015 = vmatpush3.bf16.msra.mxu1 %v1076_v28  ;;  %994 = vmatprep.subr.bf16.mxu0 %v1077_v29 }
  0x35   : > { %1016 = vmatprep.subr.bf16.mxu1 %v1078_v30 }
  0x37   : > { %995 = vmatpush3.bf16.msra.mxu0 %v1079_v31 }
  0x38   : > { %1017 = vmatpush3.bf16.msra.mxu1 %v1080_v32 }
  0x3a   : > { %694 = vmatmul.mubr.bf16.vlgmr.msra.gmra.mrb[0].mxu0 %v936_v35 }
  0x3b   : > { %734 = vmatmul.mubr.bf16.vlgmr.msra.gmra.mrb[0].mxu1 %v938_v37 }
 0x10d   : > { %v996_v39 = vpop.f32.mrb[0].mxu0 }
 0x10e   : > { %v1018_v40 = vpop.f32.mrb[0].mxu1  ;;  %v997_v41 = vpop.f32.mrb[1].mxu0 }
 0x10f   : > { %v1019_v42 = vpop.f32.mrb[1].mxu1  ;;  %v998_v43 = vadd.f32 %v997_v41, %v996_v39  ;;  %v999_v45 = vpop.f32.mrb[2].mxu0 }
 0x110   : > { %v1020_v44 = vadd.f32 %v1019_v42, %v1018_v40  ;;  %v1021_v46 = vpop.f32.mrb[2].mxu1  ;;  %v1000_v48 = vpop.f32.mrb[3].mxu0  ;;  %746 = sbr.rel (%p972_p7) target bundleno = 297 (0x129), region = 52 }
 0x111   : > { %v1022_v49 = vpop.f32.mrb[3].mxu1 }
 0x112   : > { %v736_v50 = vadd.f32 %v1020_v44, %v998_v43 }
 0x114   : > { %v741_v51 = vadd.f32 %v736_v50, %v388_v47 }
 0x116   : > { %742 = vst [vmem:[#allocation2] sm:$0xff] %v741_v51 }
 0x11d   : > { %v747_v52 = vld [vmem:[#allocation2] sm:$0xff] }
 0x11e   : > { %v755_v55 = vmul.f32 %v973_v53, %v747_v52 }
 0x120   : > { %v763_v56 = vadd.f32 %v974_v54, %v755_v55 }
 0x122   : > { %v764_v58 = vmax.f32 %v763_v56, 0.0 }
 0x124   : > { %v772_v60 = vmul.f32 %v975_v57, %v764_v58 }
 0x126   : > { %v780_v61 = vadd.f32 %v976_v59, %v772_v60 }
 0x128   : > { %781 = vst [vmem:[%s1243_s6] sm:$0xff] %v780_v61 }
 0x129 PF: > { %s16_s23 = sadd.s32 1, %s1107_s23   ;;  %s1244_s21 = smov %s1103_s22 }
 0x12a   : > { %p13_p8 = scmp.ge.s32.totalorder %s16_s23, 4   ;;  %s1245_s22 = smov %s1247_s24 }
 0x12c   :  { %15 = sbr.rel (!%p13_p8) target bundleno = 2 (0x2), region = 97 }

// kernel: _lambda_.136
= control target key start
LH: loop header
LB: loop body
LE: loop exit
PB: predicated region body
PF: predicated region fallthrough
CT: control target
= control target key end

     0   :  { %s372_s1 = inlined_call_operand.vmem [shape: bf16[256,128], index: 1, kind: input, shape index: {}]   ;;  %s373_s0 = inlined_call_operand.vmem [shape: bf16[8,256], index: 0, kind: input, shape index: {}]   ;;  %s374_s2 = inlined_call_operand.vmem [shape: f32[1,128], index: 2, kind: input, shape index: {}]   ;;  %s375_s3 = inlined_call_operand.vmem [shape: f32[1,128], index: 3, kind: input, shape index: {}]   ;;  %s376_s4 = inlined_call_operand.vmem [shape: f32[8,128], index: 4, kind: output, shape index: {}]  }
   0x1   :  { %v269_v0 = vld [vmem:[%s372_s1 + $0x40] sm:$0xff]   ;;  %v271_v2 = vld [vmem:[%s372_s1 + $0x48] sm:$0xff]   ;;  %v273_v4 = vld [vmem:[%s372_s1 + $0x50] sm:$0xff]  }
   0x2   :  { %v270_v1 = vld [vmem:[%s372_s1] sm:$0xff]   ;;  %247 = vmatprep.subr.bf16.mxu0 %v269_v0  ;;  %v272_v3 = vld [vmem:[%s372_s1 + $0x8] sm:$0xff]   ;;  %v274_v5 = vld [vmem:[%s372_s1 + $0x10] sm:$0xff]  }
   0x3   :  { %248 = vmatpush3.bf16.msra.mxu0 %v270_v1  ;;  %v275_v6 = vld [vmem:[%s372_s1 + $0x58] sm:$0xff]   ;;  %v277_v8 = vld [vmem:[%s372_s1 + $0x60] sm:$0xff]   ;;  %v279_v10 = vld [vmem:[%s372_s1 + $0x68] sm:$0xff]  }
   0x4   :  { %249 = vmatprep.subr.bf16.mxu0 %v271_v2  ;;  %v276_v7 = vld [vmem:[%s372_s1 + $0x18] sm:$0xff]   ;;  %v278_v9 = vld [vmem:[%s372_s1 + $0x20] sm:$0xff]   ;;  %v280_v13 = vld [vmem:[%s372_s1 + $0x28] sm:$0xff]  }
   0x5   :  { %v24_v11 = vld [vmem:[%s373_s0] sm:$0xff]  ;;  %v281_v14 = vld [vmem:[%s372_s1 + $0x70] sm:$0xff]   ;;  %v283_v16 = vld [vmem:[%s372_s1 + $0x78] sm:$0xff]  }
   0x6   :  { %v228_v12 = vcombine.high %v24_v11, %v24_v11  ;;  %v282_v15 = vld [vmem:[%s372_s1 + $0x30] sm:$0xff]   ;;  %v284_v17 = vld [vmem:[%s372_s1 + $0x38] sm:$0xff]   ;;  %v227_v18 = vcombine.low %v24_v11, %v24_v11  ;;  %v245_v21 = vld [vmem:[%s374_s2] ss:$0 sm:$0xff] }
   0x7   :  { %250 = vmatpush3.bf16.msra.mxu0 %v272_v3  ;;  %v246_v24 = vld [vmem:[%s375_s3] ss:$0 sm:$0xff] }
   0x8   :  { %251 = vmatprep.subr.bf16.mxu0 %v273_v4  ;;  %192 = vmatprep.mubr.bf16.mxu0 %v228_v12 }
   0xb   :  { %252 = vmatpush3.bf16.msra.mxu0 %v274_v5 }
   0xc   :  { %253 = vmatprep.subr.bf16.mxu0 %v275_v6 }
   0xf   :  { %254 = vmatpush3.bf16.msra.mxu0 %v276_v7 }
  0x10   :  { %255 = vmatprep.subr.bf16.mxu0 %v277_v8 }
  0x13   :  { %256 = vmatpush3.bf16.msra.mxu0 %v278_v9 }
  0x14   :  { %257 = vmatprep.subr.bf16.mxu0 %v279_v10 }
  0x17   :  { %258 = vmatpush3.bf16.msra.mxu0 %v280_v13 }
  0x18   :  { %259 = vmatprep.subr.bf16.mxu0 %v281_v14 }
  0x1b   :  { %260 = vmatpush3.bf16.msra.mxu0 %v282_v15 }
  0x1c   :  { %261 = vmatprep.subr.bf16.mxu0 %v283_v16 }
  0x1f   :  { %262 = vmatpush3.bf16.msra.mxu0 %v284_v17 }
  0x22   :  { %193 = vmatmul.mubr.bf16.vlgmr.msra.gmra.mrb[0].mxu0 %v227_v18 }
  0xf5   :  { %v263_v19 = vpop.f32.mrb[0].mxu0 }
  0xf6   :  { %v264_v20 = vpop.f32.mrb[1].mxu0 }
  0xf7   :  { %v265_v22 = vadd.f32 %v264_v20, %v263_v19  ;;  %v266_v23 = vpop.f32.mrb[2].mxu0 }
  0xf8   :  { %v267_v25 = vpop.f32.mrb[3].mxu0 }
  0xf9   :  { %v213_v26 = vmul.f32 %v265_v22, %v245_v21 }
  0xfb   :  { %v221_v27 = vadd.f32 %v246_v24, %v213_v26 }
  0xfd   :  { %222 = vst [vmem:[%s376_s4] sm:$0xff] %v221_v27 }

</bundles_post_ra>
